<compile_context>
chip_gen: v7x
topology: tpu7x:2x2x1
jax: 0.10.0
libtpu: 0.0.40
codegen_flags: <defaults>
</compile_context>

<pallas_src>
import functools

import jax
import jax.numpy as jnp
from jax import lax
from jax.experimental import pallas as pl
from jax.experimental.pallas import tpu as pltpu


# ---------------------------------------------------------------------------
# In-kernel conv helpers (all data already in VMEM)
# ---------------------------------------------------------------------------
def _pad_rows(x, n):
    """Append n zero rows so the shifted-tap slices below stay in bounds."""
    return jnp.concatenate([x, jnp.zeros((n, x.shape[1]), x.dtype)], axis=0)


def _conv3x3(x, w_ref, b_ref, *, row_stride, n_out, cin):
    """3x3 stride-1 conv as 9 shifted VMEM matmuls on a flattened layout.

    x         : (R, cin) activation; pixel (r, c) lives at row r*row_stride+c.
                Columns >= the valid width hold junk that is never read when
                producing a valid output pixel.  R >= 2*row_stride + 2 + n_out.
    w_ref     : (9*cin, cout) bf16 ref, rows grouped per tap (kh*3 + kw).
    b_ref     : (1, cout) f32 ref.
    Returns (n_out, cout) f32 conv + bias, same flattened layout.
    """
    xb = x.astype(jnp.bfloat16)
    cout = w_ref.shape[-1]
    acc = jnp.zeros((n_out, cout), jnp.float32)
    for i in range(3):
        for j in range(3):
            d = i * row_stride + j
            r0 = (i * 3 + j) * cin
            acc = acc + jnp.dot(xb[d:d + n_out, :], w_ref[r0:r0 + cin, :],
                                preferred_element_type=jnp.float32)
    return acc + b_ref[...]


# ---------------------------------------------------------------------------
# Fused CNN encoder (+ encoder.fc + layer-0 LSTM input projection) kernel
# ---------------------------------------------------------------------------
def _encoder_kernel(p1_ref, w1_ref, b1_ref,
                    w01_ref, b01_ref, w02_ref, b02_ref,
                    w11_ref, b11_ref, w12_ref, b12_ref,
                    wfc_ref, bfc_ref, wih_ref, bih_ref,
                    out_ref, *, s0):
    # --- encoder.conv1 (3x3, stride 2) from pre-built patches; NO activation ---
    a = jnp.dot(p1_ref[0], w1_ref[...],
                preferred_element_type=jnp.float32) + b1_ref[...]     # (s0*s0, 64)

    # --- ConvBlock 0: conv -> relu -> conv -> relu -> MaxPool2d(2) ---
    a = _conv3x3(_pad_rows(a, 8), w01_ref, b01_ref,
                 row_stride=s0, n_out=(s0 - 2) * s0, cin=64)
    a = jnp.maximum(a, 0.0)
    a = _conv3x3(_pad_rows(a, 8), w02_ref, b02_ref,
                 row_stride=s0, n_out=(s0 - 4) * s0, cin=64)
    a = jnp.maximum(a, 0.0)
    s1 = (s0 - 4) // 2                                    # MaxPool2d(2), floor
    nm = (s1 - 1) * (2 * s0 + 2) + 1
    m = jnp.maximum(jnp.maximum(a[0:nm], a[1:nm + 1]),
                    jnp.maximum(a[s0:s0 + nm], a[s0 + 1:s0 + 1 + nm]))
    a = jnp.concatenate(
        [m[2 * ph * s0 + 2 * pw:2 * ph * s0 + 2 * pw + 1, :]
         for ph in range(s1) for pw in range(s1)], axis=0)            # (s1*s1, 64)

    # --- ConvBlock 1 (encoder.conv2): conv -> relu -> conv -> relu -> adap pool ---
    a = _conv3x3(_pad_rows(a, 8), w11_ref, b11_ref,
                 row_stride=s1, n_out=(s1 - 2) * s1, cin=64)
    a = jnp.maximum(a, 0.0)
    s2 = s1 - 4
    a = _conv3x3(_pad_rows(a, 8), w12_ref, b12_ref,
                 row_stride=s1, n_out=(s2 - 1) * (s1 + 1) + 1, cin=128)
    a = jnp.maximum(a, 0.0)
    # AdaptiveAvgPool2d(1) + flatten(1): mean over the s2*s2 valid pixels
    feat = a[0:1, :]
    if s2 > 1:
        for r in range(s2):
            for c in range(s2):
                if r == 0 and c == 0:
                    continue
                feat = feat + a[r * s1 + c:r * s1 + c + 1, :]
        feat = feat * (1.0 / float(s2 * s2))

    # --- encoder.fc + Dropout(identity in eval) + fused layer-0 LSTM input
    #     projection: latent @ W_ih^T + (b_ih + b_hh) ---
    lat = jnp.dot(feat.astype(jnp.bfloat16), wfc_ref[...],
                  preferred_element_type=jnp.float32) + bfc_ref[...]
    xp = jnp.dot(lat.astype(jnp.bfloat16), wih_ref[...],
                 preferred_element_type=jnp.float32) + bih_ref[...]
    out_ref[...] = xp.reshape(out_ref.shape)


def im2col_nhwc(x, k, stride):
    # x: (N, H, W, C) -> patches (N*OH*OW, k*k*C) with K ordered (kh, kw, C)
    N, H, W, C = x.shape
    OH = (H - k) // stride + 1
    OW = (W - k) // stride + 1
    cols = []
    for i in range(k):
        for j in range(k):
            cols.append(x[:, i:i + stride * OH:stride, j:j + stride * OW:stride, :])
    p = jnp.stack(cols, axis=3)                       # (N, OH, OW, k*k, C)
    return p.reshape(N * OH * OW, k * k * C), OH, OW


def _tap_weights(w):
    """torch conv weight (Cout, Cin, 3, 3) -> (9*Cin, Cout) bf16, grouped per tap."""
    cout, cin, k, _ = w.shape
    return w.transpose(2, 3, 1, 0).reshape(k * k * cin, cout).astype(jnp.bfloat16)


def fused_cnn_encoder_xproj(xc, params, lstm0):
    """One Pallas kernel: CNN encoder + fc + layer-0 LSTM input projection.

    xc: (BT, H, W, C) NHWC float32.  Returns xproj (BT, 4*hidden) float32.
    Grid over the BT images; weights are resident (constant index_map) and all
    activations live in VMEM only.
    """
    BT, H, W, C = xc.shape
    assert H == W, "square inputs only"
    s0 = (H - 3) // 2 + 1
    assert (s0 - 4) // 2 >= 5, "input spatial size too small for n_cnn_layers=2"

    # im2col for the strided first conv only (K = 9*C, tiny), in bf16.
    patches1, oh, ow = im2col_nhwc(xc, 3, 2)
    assert oh == s0 and ow == s0
    patches1 = patches1.reshape(BT, s0 * s0, 9 * C).astype(jnp.bfloat16)

    w1 = params['enc_conv1_w'].transpose(2, 3, 1, 0).reshape(9 * C, 64).astype(jnp.bfloat16)
    b1 = params['enc_conv1_b'].reshape(1, -1).astype(jnp.float32)
    w01, b01 = _tap_weights(params['blk0_c1_w']), params['blk0_c1_b'].reshape(1, -1).astype(jnp.float32)
    w02, b02 = _tap_weights(params['blk0_c2_w']), params['blk0_c2_b'].reshape(1, -1).astype(jnp.float32)
    w11, b11 = _tap_weights(params['blk1_c1_w']), params['blk1_c1_b'].reshape(1, -1).astype(jnp.float32)
    w12, b12 = _tap_weights(params['blk1_c2_w']), params['blk1_c2_b'].reshape(1, -1).astype(jnp.float32)
    wfc = params['fc_w'].astype(jnp.bfloat16)
    bfc = params['fc_b'].reshape(1, -1).astype(jnp.float32)
    wih = lstm0['wih'].astype(jnp.bfloat16)
    bih = lstm0['b'].reshape(1, -1).astype(jnp.float32)
    four_h = wih.shape[1]

    def full(arr):  # whole (small) array resident per grid step
        return pl.BlockSpec(arr.shape, lambda b: (0,) * arr.ndim)

    out = pl.pallas_call(
        functools.partial(_encoder_kernel, s0=s0),
        out_shape=jax.ShapeDtypeStruct((BT, 1, four_h), jnp.float32),
        grid=(BT,),
        in_specs=[
            pl.BlockSpec((1, s0 * s0, 9 * C), lambda b: (b, 0, 0)),
            full(w1), full(b1), full(w01), full(b01), full(w02), full(b02),
            full(w11), full(b11), full(w12), full(b12),
            full(wfc), full(bfc), full(wih), full(bih),
        ],
        out_specs=pl.BlockSpec((1, 1, four_h), lambda b: (b, 0, 0)),
        compiler_params=pltpu.CompilerParams(
            dimension_semantics=("parallel",)),
    )(patches1, w1, b1, w01, b01, w02, b02, w11, b11, w12, b12,
      wfc, bfc, wih, bih)
    return out.reshape(BT, four_h)


# ---------------------------------------------------------------------------
# Pallas LSTM kernels (input projection hoisted; fused 4H gate matmul)
# ---------------------------------------------------------------------------
def _run_recurrence(T, step_fn):
    # Fully unroll for small static T (gives the scheduler visibility to
    # overlap the per-step gate matmul / EUP work); loop for long sequences.
    if T <= 32:
        for t in range(T):
            step_fn(t)
    else:
        def body(t, c):
            step_fn(t)
            return c
        lax.fori_loop(0, T, body, 0, unroll=4)


def _lstm_cell_step(t, xproj_ref, whh_ref, h_scr, c_scr, hidden):
    h_prev = h_scr[...]                                           # (B, H) f32
    gates = xproj_ref[t] + jnp.dot(                               # (B, 4H) f32
        h_prev.astype(jnp.bfloat16), whh_ref[...],
        preferred_element_type=jnp.float32)
    # Full-width EUP passes over all 4H lanes, then per-gate selects.
    sg = jax.nn.sigmoid(gates)
    tg = jnp.tanh(gates)
    i_g = sg[:, 0 * hidden:1 * hidden]
    f_g = sg[:, 1 * hidden:2 * hidden]
    g_g = tg[:, 2 * hidden:3 * hidden]
    o_g = sg[:, 3 * hidden:4 * hidden]
    c_new = f_g * c_scr[...] + i_g * g_g
    h_new = o_g * jnp.tanh(c_new)
    c_scr[...] = c_new
    h_scr[...] = h_new
    return h_new


def _lstm_seq_kernel(xproj_ref, whh_ref, seq_ref, h_scr, c_scr, *, hidden):
    h_scr[...] = jnp.zeros_like(h_scr)
    c_scr[...] = jnp.zeros_like(c_scr)

    def step(t):
        seq_ref[t] = _lstm_cell_step(t, xproj_ref, whh_ref, h_scr, c_scr, hidden)

    _run_recurrence(xproj_ref.shape[0], step)


def _lstm_last_kernel(xproj_ref, whh_ref, w_out_ref, b_out_ref, o_ref,
                      h_scr, c_scr, *, hidden):
    # Last LSTM layer: no per-step sequence writeback; fc1 fused into epilogue.
    h_scr[...] = jnp.zeros_like(h_scr)
    c_scr[...] = jnp.zeros_like(c_scr)

    def step(t):
        _lstm_cell_step(t, xproj_ref, whh_ref, h_scr, c_scr, hidden)

    _run_recurrence(xproj_ref.shape[0], step)
    logits = jnp.dot(h_scr[...].astype(jnp.bfloat16), w_out_ref[...],
                     preferred_element_type=jnp.float32) + b_out_ref[...]
    o_ref[...] = logits.astype(o_ref.dtype)


def lstm_layer_seq(xproj, whh):
    """Non-final LSTM layer: returns full hidden sequence (T, B, H)."""
    T, B, _ = xproj.shape
    H = whh.shape[0]
    vmem = pl.BlockSpec(memory_space=pltpu.MemorySpace.VMEM)
    # TODO(synk): for production T/B, stream T in chunks (emit_pipeline) and
    # keep xproj in bf16 so the whole (T,B,4H) projection is not VMEM-resident
    # (v7x has only 64 MiB of VMEM per TensorCore).
    return pl.pallas_call(
        functools.partial(_lstm_seq_kernel, hidden=H),
        out_shape=jax.ShapeDtypeStruct((T, B, H), jnp.float32),
        in_specs=[vmem, vmem],
        out_specs=vmem,
        scratch_shapes=[pltpu.VMEM((B, H), jnp.float32),   # h
                        pltpu.VMEM((B, H), jnp.float32)],  # c
    )(xproj.astype(jnp.float32), whh.astype(jnp.bfloat16))


def lstm_last_layer_logits(xproj, whh, fc1_w, fc1_b):
    """Final LSTM layer with the decoder fc1 fused into the epilogue."""
    T, B, _ = xproj.shape
    H = whh.shape[0]
    N = fc1_w.shape[1]
    vmem = pl.BlockSpec(memory_space=pltpu.MemorySpace.VMEM)
    return pl.pallas_call(
        functools.partial(_lstm_last_kernel, hidden=H),
        out_shape=jax.ShapeDtypeStruct((B, N), jnp.float32),
        in_specs=[vmem, vmem, vmem, vmem],
        out_specs=vmem,
        scratch_shapes=[pltpu.VMEM((B, H), jnp.float32),   # h
                        pltpu.VMEM((B, H), jnp.float32)],  # c
    )(xproj.astype(jnp.float32), whh.astype(jnp.bfloat16),
      fc1_w.astype(jnp.bfloat16), fc1_b.reshape(1, N).astype(jnp.float32))


# ---------------------------------------------------------------------------
# Parameters (deterministic synthetic init)
# ---------------------------------------------------------------------------
def _winit(key, shape, fan_in):
    return jax.random.normal(key, shape, dtype=jnp.float32) / jnp.sqrt(float(fan_in))


def init_params(key, *, channel_in=3, latent_size=32, hidden=32, n_classes=5,
                n_rnn_layers=1):
    keys = list(jax.random.split(key, 64))
    nk = lambda: keys.pop(0)
    p = {}
    # CNN_Encoder (n_cnn_layers = 2, channels = [64, 128, ...])
    p['enc_conv1_w'] = _winit(nk(), (64, channel_in, 3, 3), channel_in * 9)
    p['enc_conv1_b'] = _winit(nk(), (64,), channel_in * 9)
    # layers["0"] = ConvBlock(64, 64, relu, bn=False, pool=max_2)
    p['blk0_c1_w'] = _winit(nk(), (64, 64, 3, 3), 64 * 9)
    p['blk0_c1_b'] = _winit(nk(), (64,), 64 * 9)
    p['blk0_c2_w'] = _winit(nk(), (64, 64, 3, 3), 64 * 9)
    p['blk0_c2_b'] = _winit(nk(), (64,), 64 * 9)
    # encoder.conv2 = ConvBlock(64, 128, relu, bn=False, pool='adap')
    p['blk1_c1_w'] = _winit(nk(), (128, 64, 3, 3), 64 * 9)
    p['blk1_c1_b'] = _winit(nk(), (128,), 64 * 9)
    p['blk1_c2_w'] = _winit(nk(), (128, 128, 3, 3), 128 * 9)
    p['blk1_c2_b'] = _winit(nk(), (128,), 128 * 9)
    # encoder.fc = Linear(128, latent_size)  (stored as (in, out))
    p['fc_w'] = _winit(nk(), (128, latent_size), 128)
    p['fc_b'] = _winit(nk(), (latent_size,), 128)
    # LSTM_Decoder: nn.LSTM(latent_size, hidden, num_layers=n_rnn_layers)
    # Fused gate layout: [i | f | g | o] along the last (4H) dim.
    # NOTE: b stores b_ih + b_hh combined (sum the two when importing weights).
    lstm = []
    for layer in range(n_rnn_layers):
        e_in = latent_size if layer == 0 else hidden
        lstm.append({
            'wih': _winit(nk(), (e_in, 4 * hidden), e_in),
            'whh': _winit(nk(), (hidden, 4 * hidden), hidden),
            'b':   _winit(nk(), (4 * hidden,), hidden),
        })
    p['lstm'] = lstm
    # decoder.fc1 = Linear(hidden, n_classes)  (stored as (in, out))
    p['fc1_w'] = _winit(nk(), (hidden, n_classes), hidden)
    p['fc1_b'] = _winit(nk(), (n_classes,), hidden)
    return p


# ---------------------------------------------------------------------------
# Full forward pass (2 Pallas launches: fused encoder, LSTM+fc1)
# ---------------------------------------------------------------------------
@jax.jit
def cnn_lstm_forward(params, x):
    B, T, C, H, W = x.shape
    BT = B * T
    # single NCHW -> NHWC transpose at the network input
    xc = x.reshape(BT, C, H, W).transpose(0, 2, 3, 1)

    # --- CNN_Encoder + fc + Dropout(identity in eval) + layer-0 LSTM input
    #     projection, fused in one Pallas kernel (grid over the BT images) ---
    # TODO(synk): nn.Dropout(p=0.1) is identity in inference mode (no RNG mask).
    xproj0 = fused_cnn_encoder_xproj(xc, params, params['lstm'][0])  # (BT, 4H)

    # time-major (T, B, 4H); row index of xproj0 is b*T + t
    four_h = xproj0.shape[1]
    xproj = xproj0.reshape(B, T, four_h).transpose(1, 0, 2)

    # --- LSTM_Decoder (unidirectional, attention=False) ---
    n_layers = len(params['lstm'])
    seq = None
    logits = None
    for li, lp in enumerate(params['lstm']):
        if li > 0:
            # hoisted input projection for deeper layers (tiny -> left to XLA)
            Tq, Bq, Hq = seq.shape
            xproj = (seq.reshape(Tq * Bq, Hq) @ lp['wih'] + lp['b']
                     ).reshape(Tq, Bq, -1)
        if li == n_layers - 1:
            logits = lstm_last_layer_logits(xproj, lp['whh'],
                                            params['fc1_w'], params['fc1_b'])
        else:
            seq = lstm_layer_seq(xproj, lp['whh'])
    return logits


if __name__ == "__main__":
    key = jax.random.PRNGKey(0)
    kx, kp = jax.random.split(key)

    # Small shapes consistent with the module (n_cnn_layers=2 needs H=W>=32).
    B, T, C, H, W = 2, 4, 3, 32, 32
    latent_size, hidden, n_classes = 32, 32, 5

    x = jax.random.normal(kx, (B, T, C, H, W), dtype=jnp.float32)
    params = init_params(kp, channel_in=C, latent_size=latent_size,
                         hidden=hidden, n_classes=n_classes, n_rnn_layers=1)

    out = cnn_lstm_forward(params, x)
    out = jax.block_until_ready(out)
    assert out.shape == (B, n_classes), out.shape
    assert bool(jnp.all(jnp.isfinite(out)))
    print("KERNEL_OK")
</pallas_src>

<mosaic_0001>
module attributes {stable_mosaic.version = 11 : i64} {
  func.func @_encoder_kernel(%arg0: i32, %arg1: memref<1x225x27xbf16, #tpu.memory_space<vmem>>, %arg2: memref<27x64xbf16, #tpu.memory_space<vmem>>, %arg3: memref<1x64xf32, #tpu.memory_space<vmem>>, %arg4: memref<576x64xbf16, #tpu.memory_space<vmem>>, %arg5: memref<1x64xf32, #tpu.memory_space<vmem>>, %arg6: memref<576x64xbf16, #tpu.memory_space<vmem>>, %arg7: memref<1x64xf32, #tpu.memory_space<vmem>>, %arg8: memref<576x128xbf16, #tpu.memory_space<vmem>>, %arg9: memref<1x128xf32, #tpu.memory_space<vmem>>, %arg10: memref<1152x128xbf16, #tpu.memory_space<vmem>>, %arg11: memref<1x128xf32, #tpu.memory_space<vmem>>, %arg12: memref<128x32xbf16, #tpu.memory_space<vmem>>, %arg13: memref<1x32xf32, #tpu.memory_space<vmem>>, %arg14: memref<32x128xbf16, #tpu.memory_space<vmem>>, %arg15: memref<1x128xf32, #tpu.memory_space<vmem>>, %arg16: memref<1x1x128xf32, #tpu.memory_space<vmem>>) attributes {dimension_semantics = [#tpu.dimension_semantics<parallel>], iteration_bounds = array<i64: 8>, scalar_prefetch = 0 : i64, scratch_operands = 0 : i64, tpu.core_type = #tpu.core_type<tc>, window_params = [{transform_indices = @transform_0, window_bounds = array<i64: 1, 225, 27>}, {pipeline_mode = #tpu.pipeline_mode<synchronous>, transform_indices = @transform_1, window_bounds = array<i64: 27, 64>}, {pipeline_mode = #tpu.pipeline_mode<synchronous>, transform_indices = @transform_2, window_bounds = array<i64: 1, 64>}, {pipeline_mode = #tpu.pipeline_mode<synchronous>, transform_indices = @transform_3, window_bounds = array<i64: 576, 64>}, {pipeline_mode = #tpu.pipeline_mode<synchronous>, transform_indices = @transform_4, window_bounds = array<i64: 1, 64>}, {pipeline_mode = #tpu.pipeline_mode<synchronous>, transform_indices = @transform_5, window_bounds = array<i64: 576, 64>}, {pipeline_mode = #tpu.pipeline_mode<synchronous>, transform_indices = @transform_6, window_bounds = array<i64: 1, 64>}, {pipeline_mode = #tpu.pipeline_mode<synchronous>, transform_indices = @transform_7, window_bounds = array<i64: 576, 128>}, {pipeline_mode = #tpu.pipeline_mode<synchronous>, transform_indices = @transform_8, window_bounds = array<i64: 1, 128>}, {pipeline_mode = #tpu.pipeline_mode<synchronous>, transform_indices = @transform_9, window_bounds = array<i64: 1152, 128>}, {pipeline_mode = #tpu.pipeline_mode<synchronous>, transform_indices = @transform_10, window_bounds = array<i64: 1, 128>}, {pipeline_mode = #tpu.pipeline_mode<synchronous>, transform_indices = @transform_11, window_bounds = array<i64: 128, 32>}, {pipeline_mode = #tpu.pipeline_mode<synchronous>, transform_indices = @transform_12, window_bounds = array<i64: 1, 32>}, {pipeline_mode = #tpu.pipeline_mode<synchronous>, transform_indices = @transform_13, window_bounds = array<i64: 32, 128>}, {pipeline_mode = #tpu.pipeline_mode<synchronous>, transform_indices = @transform_14, window_bounds = array<i64: 1, 128>}, {transform_indices = @transform_15, window_bounds = array<i64: 1, 1, 128>}]} {
    %c0 = arith.constant 0 : index
    %c0_0 = arith.constant 0 : index
    %c0_1 = arith.constant 0 : index
    %0 = vector.load %arg1[%c0, %c0_0, %c0_1] : memref<1x225x27xbf16, #tpu.memory_space<vmem>>, vector<1x225x27xbf16>
    %1 = vector.shape_cast %0 : vector<1x225x27xbf16> to vector<225x27xbf16>
    %c0_2 = arith.constant 0 : index
    %c0_3 = arith.constant 0 : index
    %2 = vector.load %arg2[%c0_2, %c0_3] : memref<27x64xbf16, #tpu.memory_space<vmem>>, vector<27x64xbf16>
    %cst = arith.constant dense<0.000000e+00> : vector<225x64xf32>
    %3 = tpu.matmul %1, %2, %cst {dimension_numbers = #tpu.dot_dimension_numbers<[1], [0], [0], [1], [0, 0, 1, 1], [], []>} : vector<225x27xbf16>, vector<27x64xbf16>, vector<225x64xf32> -> vector<225x64xf32>
    %c0_4 = arith.constant 0 : index
    %c0_5 = arith.constant 0 : index
    %4 = vector.load %arg3[%c0_4, %c0_5] : memref<1x64xf32, #tpu.memory_space<vmem>>, vector<1x64xf32>
    %5 = vector.broadcast %4 : vector<1x64xf32> to vector<225x64xf32>
    %6 = arith.addf %3, %5 : vector<225x64xf32>
    %cst_6 = arith.constant 0.000000e+00 : f32
    %7 = vector.broadcast %cst_6 : f32 to vector<8x64xf32>
    %8 = tpu.concatenate %6, %7 in 0 : vector<225x64xf32>, vector<8x64xf32> -> vector<233x64xf32>
    %9 = arith.truncf %8 : vector<233x64xf32> to vector<233x64xbf16>
    %cst_7 = arith.constant 0.000000e+00 : f32
    %10 = vector.broadcast %cst_7 : f32 to vector<195x64xf32>
    %11 = vector.extract_strided_slice %9 {offsets = [0, 0], sizes = [195, 64], strides = [1, 1]} : vector<233x64xbf16> to vector<195x64xbf16>
    %c0_8 = arith.constant 0 : index
    %c0_9 = arith.constant 0 : index
    %12 = vector.load %arg4[%c0_8, %c0_9] : memref<576x64xbf16, #tpu.memory_space<vmem>>, vector<64x64xbf16>
    %cst_10 = arith.constant dense<0.000000e+00> : vector<195x64xf32>
    %13 = tpu.matmul %11, %12, %cst_10 {dimension_numbers = #tpu.dot_dimension_numbers<[1], [0], [0], [1], [0, 0, 1, 1], [], []>} : vector<195x64xbf16>, vector<64x64xbf16>, vector<195x64xf32> -> vector<195x64xf32>
    %14 = arith.addf %10, %13 : vector<195x64xf32>
    %15 = vector.extract_strided_slice %9 {offsets = [1, 0], sizes = [195, 64], strides = [1, 1]} : vector<233x64xbf16> to vector<195x64xbf16>
    %c64 = arith.constant 64 : index
    %c0_11 = arith.constant 0 : index
    %16 = vector.load %arg4[%c64, %c0_11] : memref<576x64xbf16, #tpu.memory_space<vmem>>, vector<64x64xbf16>
    %cst_12 = arith.constant dense<0.000000e+00> : vector<195x64xf32>
    %17 = tpu.matmul %15, %16, %cst_12 {dimension_numbers = #tpu.dot_dimension_numbers<[1], [0], [0], [1], [0, 0, 1, 1], [], []>} : vector<195x64xbf16>, vector<64x64xbf16>, vector<195x64xf32> -> vector<195x64xf32>
    %18 = arith.addf %14, %17 : vector<195x64xf32>
    %19 = vector.extract_strided_slice %9 {offsets = [2, 0], sizes = [195, 64], strides = [1, 1]} : vector<233x64xbf16> to vector<195x64xbf16>
    %c128 = arith.constant 128 : index
    %c0_13 = arith.constant 0 : index
    %20 = vector.load %arg4[%c128, %c0_13] : memref<576x64xbf16, #tpu.memory_space<vmem>>, vector<64x64xbf16>
    %cst_14 = arith.constant dense<0.000000e+00> : vector<195x64xf32>
    %21 = tpu.matmul %19, %20, %cst_14 {dimension_numbers = #tpu.dot_dimension_numbers<[1], [0], [0], [1], [0, 0, 1, 1], [], []>} : vector<195x64xbf16>, vector<64x64xbf16>, vector<195x64xf32> -> vector<195x64xf32>
    %22 = arith.addf %18, %21 : vector<195x64xf32>
    %23 = vector.extract_strided_slice %9 {offsets = [15, 0], sizes = [195, 64], strides = [1, 1]} : vector<233x64xbf16> to vector<195x64xbf16>
    %c192 = arith.constant 192 : index
    %c0_15 = arith.constant 0 : index
    %24 = vector.load %arg4[%c192, %c0_15] : memref<576x64xbf16, #tpu.memory_space<vmem>>, vector<64x64xbf16>
    %cst_16 = arith.constant dense<0.000000e+00> : vector<195x64xf32>
    %25 = tpu.matmul %23, %24, %cst_16 {dimension_numbers = #tpu.dot_dimension_numbers<[1], [0], [0], [1], [0, 0, 1, 1], [], []>} : vector<195x64xbf16>, vector<64x64xbf16>, vector<195x64xf32> -> vector<195x64xf32>
    %26 = arith.addf %22, %25 : vector<195x64xf32>
    %27 = vector.extract_strided_slice %9 {offsets = [16, 0], sizes = [195, 64], strides = [1, 1]} : vector<233x64xbf16> to vector<195x64xbf16>
    %c256 = arith.constant 256 : index
    %c0_17 = arith.constant 0 : index
    %28 = vector.load %arg4[%c256, %c0_17] : memref<576x64xbf16, #tpu.memory_space<vmem>>, vector<64x64xbf16>
    %cst_18 = arith.constant dense<0.000000e+00> : vector<195x64xf32>
    %29 = tpu.matmul %27, %28, %cst_18 {dimension_numbers = #tpu.dot_dimension_numbers<[1], [0], [0], [1], [0, 0, 1, 1], [], []>} : vector<195x64xbf16>, vector<64x64xbf16>, vector<195x64xf32> -> vector<195x64xf32>
    %30 = arith.addf %26, %29 : vector<195x64xf32>
    %31 = vector.extract_strided_slice %9 {offsets = [17, 0], sizes = [195, 64], strides = [1, 1]} : vector<233x64xbf16> to vector<195x64xbf16>
    %c320 = arith.constant 320 : index
    %c0_19 = arith.constant 0 : index
    %32 = vector.load %arg4[%c320, %c0_19] : memref<576x64xbf16, #tpu.memory_space<vmem>>, vector<64x64xbf16>
    %cst_20 = arith.constant dense<0.000000e+00> : vector<195x64xf32>
    %33 = tpu.matmul %31, %32, %cst_20 {dimension_numbers = #tpu.dot_dimension_numbers<[1], [0], [0], [1], [0, 0, 1, 1], [], []>} : vector<195x64xbf16>, vector<64x64xbf16>, vector<195x64xf32> -> vector<195x64xf32>
    %34 = arith.addf %30, %33 : vector<195x64xf32>
    %35 = vector.extract_strided_slice %9 {offsets = [30, 0], sizes = [195, 64], strides = [1, 1]} : vector<233x64xbf16> to vector<195x64xbf16>
    %c384 = arith.constant 384 : index
    %c0_21 = arith.constant 0 : index
    %36 = vector.load %arg4[%c384, %c0_21] : memref<576x64xbf16, #tpu.memory_space<vmem>>, vector<64x64xbf16>
    %cst_22 = arith.constant dense<0.000000e+00> : vector<195x64xf32>
    %37 = tpu.matmul %35, %36, %cst_22 {dimension_numbers = #tpu.dot_dimension_numbers<[1], [0], [0], [1], [0, 0, 1, 1], [], []>} : vector<195x64xbf16>, vector<64x64xbf16>, vector<195x64xf32> -> vector<195x64xf32>
    %38 = arith.addf %34, %37 : vector<195x64xf32>
    %39 = vector.extract_strided_slice %9 {offsets = [31, 0], sizes = [195, 64], strides = [1, 1]} : vector<233x64xbf16> to vector<195x64xbf16>
    %c448 = arith.constant 448 : index
    %c0_23 = arith.constant 0 : index
    %40 = vector.load %arg4[%c448, %c0_23] : memref<576x64xbf16, #tpu.memory_space<vmem>>, vector<64x64xbf16>
    %cst_24 = arith.constant dense<0.000000e+00> : vector<195x64xf32>
    %41 = tpu.matmul %39, %40, %cst_24 {dimension_numbers = #tpu.dot_dimension_numbers<[1], [0], [0], [1], [0, 0, 1, 1], [], []>} : vector<195x64xbf16>, vector<64x64xbf16>, vector<195x64xf32> -> vector<195x64xf32>
    %42 = arith.addf %38, %41 : vector<195x64xf32>
    %43 = vector.extract_strided_slice %9 {offsets = [32, 0], sizes = [195, 64], strides = [1, 1]} : vector<233x64xbf16> to vector<195x64xbf16>
    %c512 = arith.constant 512 : index
    %c0_25 = arith.constant 0 : index
    %44 = vector.load %arg4[%c512, %c0_25] : memref<576x64xbf16, #tpu.memory_space<vmem>>, vector<64x64xbf16>
    %cst_26 = arith.constant dense<0.000000e+00> : vector<195x64xf32>
    %45 = tpu.matmul %43, %44, %cst_26 {dimension_numbers = #tpu.dot_dimension_numbers<[1], [0], [0], [1], [0, 0, 1, 1], [], []>} : vector<195x64xbf16>, vector<64x64xbf16>, vector<195x64xf32> -> vector<195x64xf32>
    %46 = arith.addf %42, %45 : vector<195x64xf32>
    %c0_27 = arith.constant 0 : index
    %c0_28 = arith.constant 0 : index
    %47 = vector.load %arg5[%c0_27, %c0_28] : memref<1x64xf32, #tpu.memory_space<vmem>>, vector<1x64xf32>
    %48 = vector.broadcast %47 : vector<1x64xf32> to vector<195x64xf32>
    %49 = arith.addf %46, %48 : vector<195x64xf32>
    %cst_29 = arith.constant 0.000000e+00 : f32
    %50 = vector.broadcast %cst_29 : f32 to vector<195x64xf32>
    %51 = arith.maximumf %49, %50 : vector<195x64xf32>
    %cst_30 = arith.constant 0.000000e+00 : f32
    %52 = vector.broadcast %cst_30 : f32 to vector<8x64xf32>
    %53 = tpu.concatenate %51, %52 in 0 : vector<195x64xf32>, vector<8x64xf32> -> vector<203x64xf32>
    %54 = arith.truncf %53 : vector<203x64xf32> to vector<203x64xbf16>
    %cst_31 = arith.constant 0.000000e+00 : f32
    %55 = vector.broadcast %cst_31 : f32 to vector<165x64xf32>
    %56 = vector.extract_strided_slice %54 {offsets = [0, 0], sizes = [165, 64], strides = [1, 1]} : vector<203x64xbf16> to vector<165x64xbf16>
    %c0_32 = arith.constant 0 : index
    %c0_33 = arith.constant 0 : index
    %57 = vector.load %arg6[%c0_32, %c0_33] : memref<576x64xbf16, #tpu.memory_space<vmem>>, vector<64x64xbf16>
    %cst_34 = arith.constant dense<0.000000e+00> : vector<165x64xf32>
    %58 = tpu.matmul %56, %57, %cst_34 {dimension_numbers = #tpu.dot_dimension_numbers<[1], [0], [0], [1], [0, 0, 1, 1], [], []>} : vector<165x64xbf16>, vector<64x64xbf16>, vector<165x64xf32> -> vector<165x64xf32>
    %59 = arith.addf %55, %58 : vector<165x64xf32>
    %60 = vector.extract_strided_slice %54 {offsets = [1, 0], sizes = [165, 64], strides = [1, 1]} : vector<203x64xbf16> to vector<165x64xbf16>
    %c64_35 = arith.constant 64 : index
    %c0_36 = arith.constant 0 : index
    %61 = vector.load %arg6[%c64_35, %c0_36] : memref<576x64xbf16, #tpu.memory_space<vmem>>, vector<64x64xbf16>
    %cst_37 = arith.constant dense<0.000000e+00> : vector<165x64xf32>
    %62 = tpu.matmul %60, %61, %cst_37 {dimension_numbers = #tpu.dot_dimension_numbers<[1], [0], [0], [1], [0, 0, 1, 1], [], []>} : vector<165x64xbf16>, vector<64x64xbf16>, vector<165x64xf32> -> vector<165x64xf32>
    %63 = arith.addf %59, %62 : vector<165x64xf32>
    %64 = vector.extract_strided_slice %54 {offsets = [2, 0], sizes = [165, 64], strides = [1, 1]} : vector<203x64xbf16> to vector<165x64xbf16>
    %c128_38 = arith.constant 128 : index
    %c0_39 = arith.constant 0 : index
    %65 = vector.load %arg6[%c128_38, %c0_39] : memref<576x64xbf16, #tpu.memory_space<vmem>>, vector<64x64xbf16>
    %cst_40 = arith.constant dense<0.000000e+00> : vector<165x64xf32>
    %66 = tpu.matmul %64, %65, %cst_40 {dimension_numbers = #tpu.dot_dimension_numbers<[1], [0], [0], [1], [0, 0, 1, 1], [], []>} : vector<165x64xbf16>, vector<64x64xbf16>, vector<165x64xf32> -> vector<165x64xf32>
    %67 = arith.addf %63, %66 : vector<165x64xf32>
    %68 = vector.extract_strided_slice %54 {offsets = [15, 0], sizes = [165, 64], strides = [1, 1]} : vector<203x64xbf16> to vector<165x64xbf16>
    %c192_41 = arith.constant 192 : index
    %c0_42 = arith.constant 0 : index
    %69 = vector.load %arg6[%c192_41, %c0_42] : memref<576x64xbf16, #tpu.memory_space<vmem>>, vector<64x64xbf16>
    %cst_43 = arith.constant dense<0.000000e+00> : vector<165x64xf32>
    %70 = tpu.matmul %68, %69, %cst_43 {dimension_numbers = #tpu.dot_dimension_numbers<[1], [0], [0], [1], [0, 0, 1, 1], [], []>} : vector<165x64xbf16>, vector<64x64xbf16>, vector<165x64xf32> -> vector<165x64xf32>
    %71 = arith.addf %67, %70 : vector<165x64xf32>
    %72 = vector.extract_strided_slice %54 {offsets = [16, 0], sizes = [165, 64], strides = [1, 1]} : vector<203x64xbf16> to vector<165x64xbf16>
    %c256_44 = arith.constant 256 : index
    %c0_45 = arith.constant 0 : index
    %73 = vector.load %arg6[%c256_44, %c0_45] : memref<576x64xbf16, #tpu.memory_space<vmem>>, vector<64x64xbf16>
    %cst_46 = arith.constant dense<0.000000e+00> : vector<165x64xf32>
    %74 = tpu.matmul %72, %73, %cst_46 {dimension_numbers = #tpu.dot_dimension_numbers<[1], [0], [0], [1], [0, 0, 1, 1], [], []>} : vector<165x64xbf16>, vector<64x64xbf16>, vector<165x64xf32> -> vector<165x64xf32>
    %75 = arith.addf %71, %74 : vector<165x64xf32>
    %76 = vector.extract_strided_slice %54 {offsets = [17, 0], sizes = [165, 64], strides = [1, 1]} : vector<203x64xbf16> to vector<165x64xbf16>
    %c320_47 = arith.constant 320 : index
    %c0_48 = arith.constant 0 : index
    %77 = vector.load %arg6[%c320_47, %c0_48] : memref<576x64xbf16, #tpu.memory_space<vmem>>, vector<64x64xbf16>
    %cst_49 = arith.constant dense<0.000000e+00> : vector<165x64xf32>
    %78 = tpu.matmul %76, %77, %cst_49 {dimension_numbers = #tpu.dot_dimension_numbers<[1], [0], [0], [1], [0, 0, 1, 1], [], []>} : vector<165x64xbf16>, vector<64x64xbf16>, vector<165x64xf32> -> vector<165x64xf32>
    %79 = arith.addf %75, %78 : vector<165x64xf32>
    %80 = vector.extract_strided_slice %54 {offsets = [30, 0], sizes = [165, 64], strides = [1, 1]} : vector<203x64xbf16> to vector<165x64xbf16>
    %c384_50 = arith.constant 384 : index
    %c0_51 = arith.constant 0 : index
    %81 = vector.load %arg6[%c384_50, %c0_51] : memref<576x64xbf16, #tpu.memory_space<vmem>>, vector<64x64xbf16>
    %cst_52 = arith.constant dense<0.000000e+00> : vector<165x64xf32>
    %82 = tpu.matmul %80, %81, %cst_52 {dimension_numbers = #tpu.dot_dimension_numbers<[1], [0], [0], [1], [0, 0, 1, 1], [], []>} : vector<165x64xbf16>, vector<64x64xbf16>, vector<165x64xf32> -> vector<165x64xf32>
    %83 = arith.addf %79, %82 : vector<165x64xf32>
    %84 = vector.extract_strided_slice %54 {offsets = [31, 0], sizes = [165, 64], strides = [1, 1]} : vector<203x64xbf16> to vector<165x64xbf16>
    %c448_53 = arith.constant 448 : index
    %c0_54 = arith.constant 0 : index
    %85 = vector.load %arg6[%c448_53, %c0_54] : memref<576x64xbf16, #tpu.memory_space<vmem>>, vector<64x64xbf16>
    %cst_55 = arith.constant dense<0.000000e+00> : vector<165x64xf32>
    %86 = tpu.matmul %84, %85, %cst_55 {dimension_numbers = #tpu.dot_dimension_numbers<[1], [0], [0], [1], [0, 0, 1, 1], [], []>} : vector<165x64xbf16>, vector<64x64xbf16>, vector<165x64xf32> -> vector<165x64xf32>
    %87 = arith.addf %83, %86 : vector<165x64xf32>
    %88 = vector.extract_strided_slice %54 {offsets = [32, 0], sizes = [165, 64], strides = [1, 1]} : vector<203x64xbf16> to vector<165x64xbf16>
    %c512_56 = arith.constant 512 : index
    %c0_57 = arith.constant 0 : index
    %89 = vector.load %arg6[%c512_56, %c0_57] : memref<576x64xbf16, #tpu.memory_space<vmem>>, vector<64x64xbf16>
    %cst_58 = arith.constant dense<0.000000e+00> : vector<165x64xf32>
    %90 = tpu.matmul %88, %89, %cst_58 {dimension_numbers = #tpu.dot_dimension_numbers<[1], [0], [0], [1], [0, 0, 1, 1], [], []>} : vector<165x64xbf16>, vector<64x64xbf16>, vector<165x64xf32> -> vector<165x64xf32>
    %91 = arith.addf %87, %90 : vector<165x64xf32>
    %c0_59 = arith.constant 0 : index
    %c0_60 = arith.constant 0 : index
    %92 = vector.load %arg7[%c0_59, %c0_60] : memref<1x64xf32, #tpu.memory_space<vmem>>, vector<1x64xf32>
    %93 = vector.broadcast %92 : vector<1x64xf32> to vector<165x64xf32>
    %94 = arith.addf %91, %93 : vector<165x64xf32>
    %cst_61 = arith.constant 0.000000e+00 : f32
    %95 = vector.broadcast %cst_61 : f32 to vector<165x64xf32>
    %96 = arith.maximumf %94, %95 : vector<165x64xf32>
    %97 = vector.extract_strided_slice %96 {offsets = [0, 0], sizes = [129, 64], strides = [1, 1]} : vector<165x64xf32> to vector<129x64xf32>
    %98 = vector.extract_strided_slice %96 {offsets = [1, 0], sizes = [129, 64], strides = [1, 1]} : vector<165x64xf32> to vector<129x64xf32>
    %99 = arith.maximumf %97, %98 : vector<129x64xf32>
    %100 = vector.extract_strided_slice %96 {offsets = [15, 0], sizes = [129, 64], strides = [1, 1]} : vector<165x64xf32> to vector<129x64xf32>
    %101 = vector.extract_strided_slice %96 {offsets = [16, 0], sizes = [129, 64], strides = [1, 1]} : vector<165x64xf32> to vector<129x64xf32>
    %102 = arith.maximumf %100, %101 : vector<129x64xf32>
    %103 = arith.maximumf %99, %102 : vector<129x64xf32>
    %104 = vector.extract_strided_slice %103 {offsets = [0, 0], sizes = [1, 64], strides = [1, 1]} : vector<129x64xf32> to vector<1x64xf32>
    %105 = vector.extract_strided_slice %103 {offsets = [2, 0], sizes = [1, 64], strides = [1, 1]} : vector<129x64xf32> to vector<1x64xf32>
    %106 = vector.extract_strided_slice %103 {offsets = [4, 0], sizes = [1, 64], strides = [1, 1]} : vector<129x64xf32> to vector<1x64xf32>
    %107 = vector.extract_strided_slice %103 {offsets = [6, 0], sizes = [1, 64], strides = [1, 1]} : vector<129x64xf32> to vector<1x64xf32>
    %108 = vector.extract_strided_slice %103 {offsets = [8, 0], sizes = [1, 64], strides = [1, 1]} : vector<129x64xf32> to vector<1x64xf32>
    %109 = vector.extract_strided_slice %103 {offsets = [30, 0], sizes = [1, 64], strides = [1, 1]} : vector<129x64xf32> to vector<1x64xf32>
    %110 = vector.extract_strided_slice %103 {offsets = [32, 0], sizes = [1, 64], strides = [1, 1]} : vector<129x64xf32> to vector<1x64xf32>
    %111 = vector.extract_strided_slice %103 {offsets = [34, 0], sizes = [1, 64], strides = [1, 1]} : vector<129x64xf32> to vector<1x64xf32>
    %112 = vector.extract_strided_slice %103 {offsets = [36, 0], sizes = [1, 64], strides = [1, 1]} : vector<129x64xf32> to vector<1x64xf32>
    %113 = vector.extract_strided_slice %103 {offsets = [38, 0], sizes = [1, 64], strides = [1, 1]} : vector<129x64xf32> to vector<1x64xf32>
    %114 = vector.extract_strided_slice %103 {offsets = [60, 0], sizes = [1, 64], strides = [1, 1]} : vector<129x64xf32> to vector<1x64xf32>
    %115 = vector.extract_strided_slice %103 {offsets = [62, 0], sizes = [1, 64], strides = [1, 1]} : vector<129x64xf32> to vector<1x64xf32>
    %116 = vector.extract_strided_slice %103 {offsets = [64, 0], sizes = [1, 64], strides = [1, 1]} : vector<129x64xf32> to vector<1x64xf32>
    %117 = vector.extract_strided_slice %103 {offsets = [66, 0], sizes = [1, 64], strides = [1, 1]} : vector<129x64xf32> to vector<1x64xf32>
    %118 = vector.extract_strided_slice %103 {offsets = [68, 0], sizes = [1, 64], strides = [1, 1]} : vector<129x64xf32> to vector<1x64xf32>
    %119 = vector.extract_strided_slice %103 {offsets = [90, 0], sizes = [1, 64], strides = [1, 1]} : vector<129x64xf32> to vector<1x64xf32>
    %120 = vector.extract_strided_slice %103 {offsets = [92, 0], sizes = [1, 64], strides = [1, 1]} : vector<129x64xf32> to vector<1x64xf32>
    %121 = vector.extract_strided_slice %103 {offsets = [94, 0], sizes = [1, 64], strides = [1, 1]} : vector<129x64xf32> to vector<1x64xf32>
    %122 = vector.extract_strided_slice %103 {offsets = [96, 0], sizes = [1, 64], strides = [1, 1]} : vector<129x64xf32> to vector<1x64xf32>
    %123 = vector.extract_strided_slice %103 {offsets = [98, 0], sizes = [1, 64], strides = [1, 1]} : vector<129x64xf32> to vector<1x64xf32>
    %124 = vector.extract_strided_slice %103 {offsets = [120, 0], sizes = [1, 64], strides = [1, 1]} : vector<129x64xf32> to vector<1x64xf32>
    %125 = vector.extract_strided_slice %103 {offsets = [122, 0], sizes = [1, 64], strides = [1, 1]} : vector<129x64xf32> to vector<1x64xf32>
    %126 = vector.extract_strided_slice %103 {offsets = [124, 0], sizes = [1, 64], strides = [1, 1]} : vector<129x64xf32> to vector<1x64xf32>
    %127 = vector.extract_strided_slice %103 {offsets = [126, 0], sizes = [1, 64], strides = [1, 1]} : vector<129x64xf32> to vector<1x64xf32>
    %128 = vector.extract_strided_slice %103 {offsets = [128, 0], sizes = [1, 64], strides = [1, 1]} : vector<129x64xf32> to vector<1x64xf32>
    %129 = tpu.concatenate %104, %105, %106, %107, %108, %109, %110, %111, %112, %113, %114, %115, %116, %117, %118, %119 in 0 : vector<1x64xf32>, vector<1x64xf32>, vector<1x64xf32>, vector<1x64xf32>, vector<1x64xf32>, vector<1x64xf32>, vector<1x64xf32>, vector<1x64xf32>, vector<1x64xf32>, vector<1x64xf32>, vector<1x64xf32>, vector<1x64xf32>, vector<1x64xf32>, vector<1x64xf32>, vector<1x64xf32>, vector<1x64xf32> -> vector<16x64xf32>
    %130 = tpu.concatenate %120, %121, %122, %123, %124, %125, %126, %127, %128 in 0 : vector<1x64xf32>, vector<1x64xf32>, vector<1x64xf32>, vector<1x64xf32>, vector<1x64xf32>, vector<1x64xf32>, vector<1x64xf32>, vector<1x64xf32>, vector<1x64xf32> -> vector<9x64xf32>
    %131 = tpu.concatenate %129, %130 in 0 : vector<16x64xf32>, vector<9x64xf32> -> vector<25x64xf32>
    %cst_62 = arith.constant 0.000000e+00 : f32
    %132 = vector.broadcast %cst_62 : f32 to vector<8x64xf32>
    %133 = tpu.concatenate %131, %132 in 0 : vector<25x64xf32>, vector<8x64xf32> -> vector<33x64xf32>
    %134 = arith.truncf %133 : vector<33x64xf32> to vector<33x64xbf16>
    %cst_63 = arith.constant 0.000000e+00 : f32
    %135 = vector.broadcast %cst_63 : f32 to vector<15x128xf32>
    %136 = vector.extract_strided_slice %134 {offsets = [0, 0], sizes = [15, 64], strides = [1, 1]} : vector<33x64xbf16> to vector<15x64xbf16>
    %c0_64 = arith.constant 0 : index
    %c0_65 = arith.constant 0 : index
    %137 = vector.load %arg8[%c0_64, %c0_65] : memref<576x128xbf16, #tpu.memory_space<vmem>>, vector<64x128xbf16>
    %cst_66 = arith.constant dense<0.000000e+00> : vector<15x128xf32>
    %138 = tpu.matmul %136, %137, %cst_66 {dimension_numbers = #tpu.dot_dimension_numbers<[1], [0], [0], [1], [0, 0, 1, 1], [], []>} : vector<15x64xbf16>, vector<64x128xbf16>, vector<15x128xf32> -> vector<15x128xf32>
    %139 = arith.addf %135, %138 : vector<15x128xf32>
    %140 = vector.extract_strided_slice %134 {offsets = [1, 0], sizes = [15, 64], strides = [1, 1]} : vector<33x64xbf16> to vector<15x64xbf16>
    %c64_67 = arith.constant 64 : index
    %c0_68 = arith.constant 0 : index
    %141 = vector.load %arg8[%c64_67, %c0_68] : memref<576x128xbf16, #tpu.memory_space<vmem>>, vector<64x128xbf16>
    %cst_69 = arith.constant dense<0.000000e+00> : vector<15x128xf32>
    %142 = tpu.matmul %140, %141, %cst_69 {dimension_numbers = #tpu.dot_dimension_numbers<[1], [0], [0], [1], [0, 0, 1, 1], [], []>} : vector<15x64xbf16>, vector<64x128xbf16>, vector<15x128xf32> -> vector<15x128xf32>
    %143 = arith.addf %139, %142 : vector<15x128xf32>
    %144 = vector.extract_strided_slice %134 {offsets = [2, 0], sizes = [15, 64], strides = [1, 1]} : vector<33x64xbf16> to vector<15x64xbf16>
    %c128_70 = arith.constant 128 : index
    %c0_71 = arith.constant 0 : index
    %145 = vector.load %arg8[%c128_70, %c0_71] : memref<576x128xbf16, #tpu.memory_space<vmem>>, vector<64x128xbf16>
    %cst_72 = arith.constant dense<0.000000e+00> : vector<15x128xf32>
    %146 = tpu.matmul %144, %145, %cst_72 {dimension_numbers = #tpu.dot_dimension_numbers<[1], [0], [0], [1], [0, 0, 1, 1], [], []>} : vector<15x64xbf16>, vector<64x128xbf16>, vector<15x128xf32> -> vector<15x128xf32>
    %147 = arith.addf %143, %146 : vector<15x128xf32>
    %148 = vector.extract_strided_slice %134 {offsets = [5, 0], sizes = [15, 64], strides = [1, 1]} : vector<33x64xbf16> to vector<15x64xbf16>
    %c192_73 = arith.constant 192 : index
    %c0_74 = arith.constant 0 : index
    %149 = vector.load %arg8[%c192_73, %c0_74] : memref<576x128xbf16, #tpu.memory_space<vmem>>, vector<64x128xbf16>
    %cst_75 = arith.constant dense<0.000000e+00> : vector<15x128xf32>
    %150 = tpu.matmul %148, %149, %cst_75 {dimension_numbers = #tpu.dot_dimension_numbers<[1], [0], [0], [1], [0, 0, 1, 1], [], []>} : vector<15x64xbf16>, vector<64x128xbf16>, vector<15x128xf32> -> vector<15x128xf32>
    %151 = arith.addf %147, %150 : vector<15x128xf32>
    %152 = vector.extract_strided_slice %134 {offsets = [6, 0], sizes = [15, 64], strides = [1, 1]} : vector<33x64xbf16> to vector<15x64xbf16>
    %c256_76 = arith.constant 256 : index
    %c0_77 = arith.constant 0 : index
    %153 = vector.load %arg8[%c256_76, %c0_77] : memref<576x128xbf16, #tpu.memory_space<vmem>>, vector<64x128xbf16>
    %cst_78 = arith.constant dense<0.000000e+00> : vector<15x128xf32>
    %154 = tpu.matmul %152, %153, %cst_78 {dimension_numbers = #tpu.dot_dimension_numbers<[1], [0], [0], [1], [0, 0, 1, 1], [], []>} : vector<15x64xbf16>, vector<64x128xbf16>, vector<15x128xf32> -> vector<15x128xf32>
    %155 = arith.addf %151, %154 : vector<15x128xf32>
    %156 = vector.extract_strided_slice %134 {offsets = [7, 0], sizes = [15, 64], strides = [1, 1]} : vector<33x64xbf16> to vector<15x64xbf16>
    %c320_79 = arith.constant 320 : index
    %c0_80 = arith.constant 0 : index
    %157 = vector.load %arg8[%c320_79, %c0_80] : memref<576x128xbf16, #tpu.memory_space<vmem>>, vector<64x128xbf16>
    %cst_81 = arith.constant dense<0.000000e+00> : vector<15x128xf32>
    %158 = tpu.matmul %156, %157, %cst_81 {dimension_numbers = #tpu.dot_dimension_numbers<[1], [0], [0], [1], [0, 0, 1, 1], [], []>} : vector<15x64xbf16>, vector<64x128xbf16>, vector<15x128xf32> -> vector<15x128xf32>
    %159 = arith.addf %155, %158 : vector<15x128xf32>
    %160 = vector.extract_strided_slice %134 {offsets = [10, 0], sizes = [15, 64], strides = [1, 1]} : vector<33x64xbf16> to vector<15x64xbf16>
    %c384_82 = arith.constant 384 : index
    %c0_83 = arith.constant 0 : index
    %161 = vector.load %arg8[%c384_82, %c0_83] : memref<576x128xbf16, #tpu.memory_space<vmem>>, vector<64x128xbf16>
    %cst_84 = arith.constant dense<0.000000e+00> : vector<15x128xf32>
    %162 = tpu.matmul %160, %161, %cst_84 {dimension_numbers = #tpu.dot_dimension_numbers<[1], [0], [0], [1], [0, 0, 1, 1], [], []>} : vector<15x64xbf16>, vector<64x128xbf16>, vector<15x128xf32> -> vector<15x128xf32>
    %163 = arith.addf %159, %162 : vector<15x128xf32>
    %164 = vector.extract_strided_slice %134 {offsets = [11, 0], sizes = [15, 64], strides = [1, 1]} : vector<33x64xbf16> to vector<15x64xbf16>
    %c448_85 = arith.constant 448 : index
    %c0_86 = arith.constant 0 : index
    %165 = vector.load %arg8[%c448_85, %c0_86] : memref<576x128xbf16, #tpu.memory_space<vmem>>, vector<64x128xbf16>
    %cst_87 = arith.constant dense<0.000000e+00> : vector<15x128xf32>
    %166 = tpu.matmul %164, %165, %cst_87 {dimension_numbers = #tpu.dot_dimension_numbers<[1], [0], [0], [1], [0, 0, 1, 1], [], []>} : vector<15x64xbf16>, vector<64x128xbf16>, vector<15x128xf32> -> vector<15x128xf32>
    %167 = arith.addf %163, %166 : vector<15x128xf32>
    %168 = vector.extract_strided_slice %134 {offsets = [12, 0], sizes = [15, 64], strides = [1, 1]} : vector<33x64xbf16> to vector<15x64xbf16>
    %c512_88 = arith.constant 512 : index
    %c0_89 = arith.constant 0 : index
    %169 = vector.load %arg8[%c512_88, %c0_89] : memref<576x128xbf16, #tpu.memory_space<vmem>>, vector<64x128xbf16>
    %cst_90 = arith.constant dense<0.000000e+00> : vector<15x128xf32>
    %170 = tpu.matmul %168, %169, %cst_90 {dimension_numbers = #tpu.dot_dimension_numbers<[1], [0], [0], [1], [0, 0, 1, 1], [], []>} : vector<15x64xbf16>, vector<64x128xbf16>, vector<15x128xf32> -> vector<15x128xf32>
    %171 = arith.addf %167, %170 : vector<15x128xf32>
    %c0_91 = arith.constant 0 : index
    %c0_92 = arith.constant 0 : index
    %172 = vector.load %arg9[%c0_91, %c0_92] : memref<1x128xf32, #tpu.memory_space<vmem>>, vector<1x128xf32>
    %173 = vector.broadcast %172 : vector<1x128xf32> to vector<15x128xf32>
    %174 = arith.addf %171, %173 : vector<15x128xf32>
    %cst_93 = arith.constant 0.000000e+00 : f32
    %175 = vector.broadcast %cst_93 : f32 to vector<15x128xf32>
    %176 = arith.maximumf %174, %175 : vector<15x128xf32>
    %cst_94 = arith.constant 0.000000e+00 : f32
    %177 = vector.broadcast %cst_94 : f32 to vector<8x128xf32>
    %178 = tpu.concatenate %176, %177 in 0 : vector<15x128xf32>, vector<8x128xf32> -> vector<23x128xf32>
    %179 = arith.truncf %178 : vector<23x128xf32> to vector<23x128xbf16>
    %cst_95 = arith.constant 0.000000e+00 : f32
    %180 = vector.broadcast %cst_95 : f32 to vector<1x128xf32>
    %181 = vector.extract_strided_slice %179 {offsets = [0, 0], sizes = [1, 128], strides = [1, 1]} : vector<23x128xbf16> to vector<1x128xbf16>
    %c0_96 = arith.constant 0 : index
    %c0_97 = arith.constant 0 : index
    %182 = vector.load %arg10[%c0_96, %c0_97] : memref<1152x128xbf16, #tpu.memory_space<vmem>>, vector<128x128xbf16>
    %cst_98 = arith.constant dense<0.000000e+00> : vector<1x128xf32>
    %183 = tpu.matmul %181, %182, %cst_98 {dimension_numbers = #tpu.dot_dimension_numbers<[1], [0], [0], [1], [0, 0, 1, 1], [], []>} : vector<1x128xbf16>, vector<128x128xbf16>, vector<1x128xf32> -> vector<1x128xf32>
    %184 = arith.addf %180, %183 : vector<1x128xf32>
    %185 = vector.extract_strided_slice %179 {offsets = [1, 0], sizes = [1, 128], strides = [1, 1]} : vector<23x128xbf16> to vector<1x128xbf16>
    %c128_99 = arith.constant 128 : index
    %c0_100 = arith.constant 0 : index
    %186 = vector.load %arg10[%c128_99, %c0_100] : memref<1152x128xbf16, #tpu.memory_space<vmem>>, vector<128x128xbf16>
    %cst_101 = arith.constant dense<0.000000e+00> : vector<1x128xf32>
    %187 = tpu.matmul %185, %186, %cst_101 {dimension_numbers = #tpu.dot_dimension_numbers<[1], [0], [0], [1], [0, 0, 1, 1], [], []>} : vector<1x128xbf16>, vector<128x128xbf16>, vector<1x128xf32> -> vector<1x128xf32>
    %188 = arith.addf %184, %187 : vector<1x128xf32>
    %189 = vector.extract_strided_slice %179 {offsets = [2, 0], sizes = [1, 128], strides = [1, 1]} : vector<23x128xbf16> to vector<1x128xbf16>
    %c256_102 = arith.constant 256 : index
    %c0_103 = arith.constant 0 : index
    %190 = vector.load %arg10[%c256_102, %c0_103] : memref<1152x128xbf16, #tpu.memory_space<vmem>>, vector<128x128xbf16>
    %cst_104 = arith.constant dense<0.000000e+00> : vector<1x128xf32>
    %191 = tpu.matmul %189, %190, %cst_104 {dimension_numbers = #tpu.dot_dimension_numbers<[1], [0], [0], [1], [0, 0, 1, 1], [], []>} : vector<1x128xbf16>, vector<128x128xbf16>, vector<1x128xf32> -> vector<1x128xf32>
    %192 = arith.addf %188, %191 : vector<1x128xf32>
    %193 = vector.extract_strided_slice %179 {offsets = [5, 0], sizes = [1, 128], strides = [1, 1]} : vector<23x128xbf16> to vector<1x128xbf16>
    %c384_105 = arith.constant 384 : index
    %c0_106 = arith.constant 0 : index
    %194 = vector.load %arg10[%c384_105, %c0_106] : memref<1152x128xbf16, #tpu.memory_space<vmem>>, vector<128x128xbf16>
    %cst_107 = arith.constant dense<0.000000e+00> : vector<1x128xf32>
    %195 = tpu.matmul %193, %194, %cst_107 {dimension_numbers = #tpu.dot_dimension_numbers<[1], [0], [0], [1], [0, 0, 1, 1], [], []>} : vector<1x128xbf16>, vector<128x128xbf16>, vector<1x128xf32> -> vector<1x128xf32>
    %196 = arith.addf %192, %195 : vector<1x128xf32>
    %197 = vector.extract_strided_slice %179 {offsets = [6, 0], sizes = [1, 128], strides = [1, 1]} : vector<23x128xbf16> to vector<1x128xbf16>
    %c512_108 = arith.constant 512 : index
    %c0_109 = arith.constant 0 : index
    %198 = vector.load %arg10[%c512_108, %c0_109] : memref<1152x128xbf16, #tpu.memory_space<vmem>>, vector<128x128xbf16>
    %cst_110 = arith.constant dense<0.000000e+00> : vector<1x128xf32>
    %199 = tpu.matmul %197, %198, %cst_110 {dimension_numbers = #tpu.dot_dimension_numbers<[1], [0], [0], [1], [0, 0, 1, 1], [], []>} : vector<1x128xbf16>, vector<128x128xbf16>, vector<1x128xf32> -> vector<1x128xf32>
    %200 = arith.addf %196, %199 : vector<1x128xf32>
    %201 = vector.extract_strided_slice %179 {offsets = [7, 0], sizes = [1, 128], strides = [1, 1]} : vector<23x128xbf16> to vector<1x128xbf16>
    %c640 = arith.constant 640 : index
    %c0_111 = arith.constant 0 : index
    %202 = vector.load %arg10[%c640, %c0_111] : memref<1152x128xbf16, #tpu.memory_space<vmem>>, vector<128x128xbf16>
    %cst_112 = arith.constant dense<0.000000e+00> : vector<1x128xf32>
    %203 = tpu.matmul %201, %202, %cst_112 {dimension_numbers = #tpu.dot_dimension_numbers<[1], [0], [0], [1], [0, 0, 1, 1], [], []>} : vector<1x128xbf16>, vector<128x128xbf16>, vector<1x128xf32> -> vector<1x128xf32>
    %204 = arith.addf %200, %203 : vector<1x128xf32>
    %205 = vector.extract_strided_slice %179 {offsets = [10, 0], sizes = [1, 128], strides = [1, 1]} : vector<23x128xbf16> to vector<1x128xbf16>
    %c768 = arith.constant 768 : index
    %c0_113 = arith.constant 0 : index
    %206 = vector.load %arg10[%c768, %c0_113] : memref<1152x128xbf16, #tpu.memory_space<vmem>>, vector<128x128xbf16>
    %cst_114 = arith.constant dense<0.000000e+00> : vector<1x128xf32>
    %207 = tpu.matmul %205, %206, %cst_114 {dimension_numbers = #tpu.dot_dimension_numbers<[1], [0], [0], [1], [0, 0, 1, 1], [], []>} : vector<1x128xbf16>, vector<128x128xbf16>, vector<1x128xf32> -> vector<1x128xf32>
    %208 = arith.addf %204, %207 : vector<1x128xf32>
    %209 = vector.extract_strided_slice %179 {offsets = [11, 0], sizes = [1, 128], strides = [1, 1]} : vector<23x128xbf16> to vector<1x128xbf16>
    %c896 = arith.constant 896 : index
    %c0_115 = arith.constant 0 : index
    %210 = vector.load %arg10[%c896, %c0_115] : memref<1152x128xbf16, #tpu.memory_space<vmem>>, vector<128x128xbf16>
    %cst_116 = arith.constant dense<0.000000e+00> : vector<1x128xf32>
    %211 = tpu.matmul %209, %210, %cst_116 {dimension_numbers = #tpu.dot_dimension_numbers<[1], [0], [0], [1], [0, 0, 1, 1], [], []>} : vector<1x128xbf16>, vector<128x128xbf16>, vector<1x128xf32> -> vector<1x128xf32>
    %212 = arith.addf %208, %211 : vector<1x128xf32>
    %213 = vector.extract_strided_slice %179 {offsets = [12, 0], sizes = [1, 128], strides = [1, 1]} : vector<23x128xbf16> to vector<1x128xbf16>
    %c1024 = arith.constant 1024 : index
    %c0_117 = arith.constant 0 : index
    %214 = vector.load %arg10[%c1024, %c0_117] : memref<1152x128xbf16, #tpu.memory_space<vmem>>, vector<128x128xbf16>
    %cst_118 = arith.constant dense<0.000000e+00> : vector<1x128xf32>
    %215 = tpu.matmul %213, %214, %cst_118 {dimension_numbers = #tpu.dot_dimension_numbers<[1], [0], [0], [1], [0, 0, 1, 1], [], []>} : vector<1x128xbf16>, vector<128x128xbf16>, vector<1x128xf32> -> vector<1x128xf32>
    %216 = arith.addf %212, %215 : vector<1x128xf32>
    %c0_119 = arith.constant 0 : index
    %c0_120 = arith.constant 0 : index
    %217 = vector.load %arg11[%c0_119, %c0_120] : memref<1x128xf32, #tpu.memory_space<vmem>>, vector<1x128xf32>
    %218 = arith.addf %216, %217 : vector<1x128xf32>
    %cst_121 = arith.constant 0.000000e+00 : f32
    %219 = vector.broadcast %cst_121 : f32 to vector<1x128xf32>
    %220 = arith.maximumf %218, %219 : vector<1x128xf32>
    %221 = arith.truncf %220 : vector<1x128xf32> to vector<1x128xbf16>
    %c0_122 = arith.constant 0 : index
    %c0_123 = arith.constant 0 : index
    %222 = vector.load %arg12[%c0_122, %c0_123] : memref<128x32xbf16, #tpu.memory_space<vmem>>, vector<128x32xbf16>
    %cst_124 = arith.constant dense<0.000000e+00> : vector<1x32xf32>
    %223 = tpu.matmul %221, %222, %cst_124 {dimension_numbers = #tpu.dot_dimension_numbers<[1], [0], [0], [1], [0, 0, 1, 1], [], []>} : vector<1x128xbf16>, vector<128x32xbf16>, vector<1x32xf32> -> vector<1x32xf32>
    %c0_125 = arith.constant 0 : index
    %c0_126 = arith.constant 0 : index
    %224 = vector.load %arg13[%c0_125, %c0_126] : memref<1x32xf32, #tpu.memory_space<vmem>>, vector<1x32xf32>
    %225 = arith.addf %223, %224 : vector<1x32xf32>
    %226 = arith.truncf %225 : vector<1x32xf32> to vector<1x32xbf16>
    %c0_127 = arith.constant 0 : index
    %c0_128 = arith.constant 0 : index
    %227 = vector.load %arg14[%c0_127, %c0_128] : memref<32x128xbf16, #tpu.memory_space<vmem>>, vector<32x128xbf16>
    %cst_129 = arith.constant dense<0.000000e+00> : vector<1x128xf32>
    %228 = tpu.matmul %226, %227, %cst_129 {dimension_numbers = #tpu.dot_dimension_numbers<[1], [0], [0], [1], [0, 0, 1, 1], [], []>} : vector<1x32xbf16>, vector<32x128xbf16>, vector<1x128xf32> -> vector<1x128xf32>
    %c0_130 = arith.constant 0 : index
    %c0_131 = arith.constant 0 : index
    %229 = vector.load %arg15[%c0_130, %c0_131] : memref<1x128xf32, #tpu.memory_space<vmem>>, vector<1x128xf32>
    %230 = arith.addf %228, %229 : vector<1x128xf32>
    %231 = vector.shape_cast %230 : vector<1x128xf32> to vector<1x1x128xf32>
    %c0_132 = arith.constant 0 : index
    %c0_133 = arith.constant 0 : index
    %c0_134 = arith.constant 0 : index
    %232 = vector.load %arg16[%c0_132, %c0_133, %c0_134] : memref<1x1x128xf32, #tpu.memory_space<vmem>>, vector<1x1x128xf32>
    tpu.vector_store %arg16[%c0_132, %c0_133, %c0_134], %231 {strides = array<i32>} : memref<1x1x128xf32, #tpu.memory_space<vmem>>, vector<1x1x128xf32>,
    return
  }
  func.func @transform_0(%arg0: i32) -> (i32, i32, i32) {
    %c0_i32 = arith.constant 0 : i32
    %c0_i32_0 = arith.constant 0 : i32
    %c0_i32_1 = arith.constant 0 : i32
    return %arg0, %c0_i32, %c0_i32_0 : i32, i32, i32
  }
  func.func @transform_1(%arg0: i32) -> (i32, i32) {
    %c0_i32 = arith.constant 0 : i32
    %c0_i32_0 = arith.constant 0 : i32
    %c0_i32_1 = arith.constant 0 : i32
    return %c0_i32, %c0_i32_0 : i32, i32
  }
  func.func @transform_2(%arg0: i32) -> (i32, i32) {
    %c0_i32 = arith.constant 0 : i32
    %c0_i32_0 = arith.constant 0 : i32
    %c0_i32_1 = arith.constant 0 : i32
    return %c0_i32, %c0_i32_0 : i32, i32
  }
  func.func @transform_3(%arg0: i32) -> (i32, i32) {
    %c0_i32 = arith.constant 0 : i32
    %c0_i32_0 = arith.constant 0 : i32
    %c0_i32_1 = arith.constant 0 : i32
    return %c0_i32, %c0_i32_0 : i32, i32
  }
  func.func @transform_4(%arg0: i32) -> (i32, i32) {
    %c0_i32 = arith.constant 0 : i32
    %c0_i32_0 = arith.constant 0 : i32
    %c0_i32_1 = arith.constant 0 : i32
    return %c0_i32, %c0_i32_0 : i32, i32
  }
  func.func @transform_5(%arg0: i32) -> (i32, i32) {
    %c0_i32 = arith.constant 0 : i32
    %c0_i32_0 = arith.constant 0 : i32
    %c0_i32_1 = arith.constant 0 : i32
    return %c0_i32, %c0_i32_0 : i32, i32
  }
  func.func @transform_6(%arg0: i32) -> (i32, i32) {
    %c0_i32 = arith.constant 0 : i32
    %c0_i32_0 = arith.constant 0 : i32
    %c0_i32_1 = arith.constant 0 : i32
    return %c0_i32, %c0_i32_0 : i32, i32
  }
  func.func @transform_7(%arg0: i32) -> (i32, i32) {
    %c0_i32 = arith.constant 0 : i32
    %c0_i32_0 = arith.constant 0 : i32
    %c0_i32_1 = arith.constant 0 : i32
    return %c0_i32, %c0_i32_0 : i32, i32
  }
  func.func @transform_8(%arg0: i32) -> (i32, i32) {
    %c0_i32 = arith.constant 0 : i32
    %c0_i32_0 = arith.constant 0 : i32
    %c0_i32_1 = arith.constant 0 : i32
    return %c0_i32, %c0_i32_0 : i32, i32
  }
  func.func @transform_9(%arg0: i32) -> (i32, i32) {
    %c0_i32 = arith.constant 0 : i32
    %c0_i32_0 = arith.constant 0 : i32
    %c0_i32_1 = arith.constant 0 : i32
    return %c0_i32, %c0_i32_0 : i32, i32
  }
  func.func @transform_10(%arg0: i32) -> (i32, i32) {
    %c0_i32 = arith.constant 0 : i32
    %c0_i32_0 = arith.constant 0 : i32
    %c0_i32_1 = arith.constant 0 : i32
    return %c0_i32, %c0_i32_0 : i32, i32
  }
  func.func @transform_11(%arg0: i32) -> (i32, i32) {
    %c0_i32 = arith.constant 0 : i32
    %c0_i32_0 = arith.constant 0 : i32
    %c0_i32_1 = arith.constant 0 : i32
    return %c0_i32, %c0_i32_0 : i32, i32
  }
  func.func @transform_12(%arg0: i32) -> (i32, i32) {
    %c0_i32 = arith.constant 0 : i32
    %c0_i32_0 = arith.constant 0 : i32
    %c0_i32_1 = arith.constant 0 : i32
    return %c0_i32, %c0_i32_0 : i32, i32
  }
  func.func @transform_13(%arg0: i32) -> (i32, i32) {
    %c0_i32 = arith.constant 0 : i32
    %c0_i32_0 = arith.constant 0 : i32
    %c0_i32_1 = arith.constant 0 : i32
    return %c0_i32, %c0_i32_0 : i32, i32
  }
  func.func @transform_14(%arg0: i32) -> (i32, i32) {
    %c0_i32 = arith.constant 0 : i32
    %c0_i32_0 = arith.constant 0 : i32
    %c0_i32_1 = arith.constant 0 : i32
    return %c0_i32, %c0_i32_0 : i32, i32
  }
  func.func @transform_15(%arg0: i32) -> (i32, i32, i32) {
    %c0_i32 = arith.constant 0 : i32
    %c0_i32_0 = arith.constant 0 : i32
    %c0_i32_1 = arith.constant 0 : i32
    return %arg0, %c0_i32, %c0_i32_0 : i32, i32, i32
  }
}

module attributes {stable_mosaic.version = 11 : i64} {
  func.func @_lstm_last_kernel(%arg0: memref<4x2x128xf32, #tpu.memory_space<vmem>>, %arg1: memref<32x128xbf16, #tpu.memory_space<vmem>>, %arg2: memref<32x5xbf16, #tpu.memory_space<vmem>>, %arg3: memref<1x5xf32, #tpu.memory_space<vmem>>, %arg4: memref<2x5xf32, #tpu.memory_space<vmem>>, %arg5: memref<2x32xf32, #tpu.memory_space<vmem>>, %arg6: memref<2x32xf32, #tpu.memory_space<vmem>>) attributes {dimension_semantics = [], scalar_prefetch = 0 : i64, scratch_operands = 2 : i64, tpu.core_type = #tpu.core_type<tc>} {
    %cst = arith.constant 0.000000e+00 : f32
    %0 = vector.broadcast %cst : f32 to vector<2x32xf32>
    %c0 = arith.constant 0 : index
    %c0_0 = arith.constant 0 : index
    %1 = vector.load %arg5[%c0, %c0_0] : memref<2x32xf32, #tpu.memory_space<vmem>>, vector<2x32xf32>
    tpu.vector_store %arg5[%c0, %c0_0], %0 {strides = array<i32>} : memref<2x32xf32, #tpu.memory_space<vmem>>, vector<2x32xf32>,
    %cst_1 = arith.constant 0.000000e+00 : f32
    %2 = vector.broadcast %cst_1 : f32 to vector<2x32xf32>
    %c0_2 = arith.constant 0 : index
    %c0_3 = arith.constant 0 : index
    %3 = vector.load %arg6[%c0_2, %c0_3] : memref<2x32xf32, #tpu.memory_space<vmem>>, vector<2x32xf32>
    tpu.vector_store %arg6[%c0_2, %c0_3], %2 {strides = array<i32>} : memref<2x32xf32, #tpu.memory_space<vmem>>, vector<2x32xf32>,
    %c0_4 = arith.constant 0 : index
    %c0_5 = arith.constant 0 : index
    %4 = vector.load %arg5[%c0_4, %c0_5] : memref<2x32xf32, #tpu.memory_space<vmem>>, vector<2x32xf32>
    %c0_6 = arith.constant 0 : index
    %c0_7 = arith.constant 0 : index
    %c0_8 = arith.constant 0 : index
    %5 = vector.load %arg0[%c0_6, %c0_7, %c0_8] : memref<4x2x128xf32, #tpu.memory_space<vmem>>, vector<1x2x128xf32>
    %6 = vector.shape_cast %5 : vector<1x2x128xf32> to vector<2x128xf32>
    %7 = arith.truncf %4 : vector<2x32xf32> to vector<2x32xbf16>
    %c0_9 = arith.constant 0 : index
    %c0_10 = arith.constant 0 : index
    %8 = vector.load %arg1[%c0_9, %c0_10] : memref<32x128xbf16, #tpu.memory_space<vmem>>, vector<32x128xbf16>
    %cst_11 = arith.constant dense<0.000000e+00> : vector<2x128xf32>
    %9 = tpu.matmul %7, %8, %cst_11 {dimension_numbers = #tpu.dot_dimension_numbers<[1], [0], [0], [1], [0, 0, 1, 1], [], []>} : vector<2x32xbf16>, vector<32x128xbf16>, vector<2x128xf32> -> vector<2x128xf32>
    %10 = arith.addf %6, %9 : vector<2x128xf32>
    %11 = arith.negf %10 : vector<2x128xf32>
    %12 = math.exp %11 : vector<2x128xf32>
    %cst_12 = arith.constant 1.000000e+00 : f32
    %13 = vector.broadcast %cst_12 : f32 to vector<2x128xf32>
    %14 = arith.addf %13, %12 : vector<2x128xf32>
    %15 = arith.divf %13, %14 : vector<2x128xf32>
    %16 = math.tanh %10 : vector<2x128xf32>
    %17 = vector.extract_strided_slice %15 {offsets = [0, 0], sizes = [2, 32], strides = [1, 1]} : vector<2x128xf32> to vector<2x32xf32>
    %18 = vector.extract_strided_slice %15 {offsets = [0, 32], sizes = [2, 32], strides = [1, 1]} : vector<2x128xf32> to vector<2x32xf32>
    %19 = vector.extract_strided_slice %16 {offsets = [0, 64], sizes = [2, 32], strides = [1, 1]} : vector<2x128xf32> to vector<2x32xf32>
    %20 = vector.extract_strided_slice %15 {offsets = [0, 96], sizes = [2, 32], strides = [1, 1]} : vector<2x128xf32> to vector<2x32xf32>
    %c0_13 = arith.constant 0 : index
    %c0_14 = arith.constant 0 : index
    %21 = vector.load %arg6[%c0_13, %c0_14] : memref<2x32xf32, #tpu.memory_space<vmem>>, vector<2x32xf32>
    %22 = arith.mulf %18, %21 : vector<2x32xf32>
    %23 = arith.mulf %17, %19 : vector<2x32xf32>
    %24 = arith.addf %22, %23 : vector<2x32xf32>
    %25 = math.tanh %24 : vector<2x32xf32>
    %26 = arith.mulf %20, %25 : vector<2x32xf32>
    %c0_15 = arith.constant 0 : index
    %c0_16 = arith.constant 0 : index
    %27 = vector.load %arg6[%c0_15, %c0_16] : memref<2x32xf32, #tpu.memory_space<vmem>>, vector<2x32xf32>
    tpu.vector_store %arg6[%c0_15, %c0_16], %24 {strides = array<i32>} : memref<2x32xf32, #tpu.memory_space<vmem>>, vector<2x32xf32>,
    %c0_17 = arith.constant 0 : index
    %c0_18 = arith.constant 0 : index
    %28 = vector.load %arg5[%c0_17, %c0_18] : memref<2x32xf32, #tpu.memory_space<vmem>>, vector<2x32xf32>
    tpu.vector_store %arg5[%c0_17, %c0_18], %26 {strides = array<i32>} : memref<2x32xf32, #tpu.memory_space<vmem>>, vector<2x32xf32>,
    %c0_19 = arith.constant 0 : index
    %c0_20 = arith.constant 0 : index
    %29 = vector.load %arg5[%c0_19, %c0_20] : memref<2x32xf32, #tpu.memory_space<vmem>>, vector<2x32xf32>
    %c1 = arith.constant 1 : index
    %c0_21 = arith.constant 0 : index
    %c0_22 = arith.constant 0 : index
    %30 = vector.load %arg0[%c1, %c0_21, %c0_22] : memref<4x2x128xf32, #tpu.memory_space<vmem>>, vector<1x2x128xf32>
    %31 = vector.shape_cast %30 : vector<1x2x128xf32> to vector<2x128xf32>
    %32 = arith.truncf %29 : vector<2x32xf32> to vector<2x32xbf16>
    %c0_23 = arith.constant 0 : index
    %c0_24 = arith.constant 0 : index
    %33 = vector.load %arg1[%c0_23, %c0_24] : memref<32x128xbf16, #tpu.memory_space<vmem>>, vector<32x128xbf16>
    %cst_25 = arith.constant dense<0.000000e+00> : vector<2x128xf32>
    %34 = tpu.matmul %32, %33, %cst_25 {dimension_numbers = #tpu.dot_dimension_numbers<[1], [0], [0], [1], [0, 0, 1, 1], [], []>} : vector<2x32xbf16>, vector<32x128xbf16>, vector<2x128xf32> -> vector<2x128xf32>
    %35 = arith.addf %31, %34 : vector<2x128xf32>
    %36 = arith.negf %35 : vector<2x128xf32>
    %37 = math.exp %36 : vector<2x128xf32>
    %cst_26 = arith.constant 1.000000e+00 : f32
    %38 = vector.broadcast %cst_26 : f32 to vector<2x128xf32>
    %39 = arith.addf %38, %37 : vector<2x128xf32>
    %40 = arith.divf %38, %39 : vector<2x128xf32>
    %41 = math.tanh %35 : vector<2x128xf32>
    %42 = vector.extract_strided_slice %40 {offsets = [0, 0], sizes = [2, 32], strides = [1, 1]} : vector<2x128xf32> to vector<2x32xf32>
    %43 = vector.extract_strided_slice %40 {offsets = [0, 32], sizes = [2, 32], strides = [1, 1]} : vector<2x128xf32> to vector<2x32xf32>
    %44 = vector.extract_strided_slice %41 {offsets = [0, 64], sizes = [2, 32], strides = [1, 1]} : vector<2x128xf32> to vector<2x32xf32>
    %45 = vector.extract_strided_slice %40 {offsets = [0, 96], sizes = [2, 32], strides = [1, 1]} : vector<2x128xf32> to vector<2x32xf32>
    %c0_27 = arith.constant 0 : index
    %c0_28 = arith.constant 0 : index
    %46 = vector.load %arg6[%c0_27, %c0_28] : memref<2x32xf32, #tpu.memory_space<vmem>>, vector<2x32xf32>
    %47 = arith.mulf %43, %46 : vector<2x32xf32>
    %48 = arith.mulf %42, %44 : vector<2x32xf32>
    %49 = arith.addf %47, %48 : vector<2x32xf32>
    %50 = math.tanh %49 : vector<2x32xf32>
    %51 = arith.mulf %45, %50 : vector<2x32xf32>
    %c0_29 = arith.constant 0 : index
    %c0_30 = arith.constant 0 : index
    %52 = vector.load %arg6[%c0_29, %c0_30] : memref<2x32xf32, #tpu.memory_space<vmem>>, vector<2x32xf32>
    tpu.vector_store %arg6[%c0_29, %c0_30], %49 {strides = array<i32>} : memref<2x32xf32, #tpu.memory_space<vmem>>, vector<2x32xf32>,
    %c0_31 = arith.constant 0 : index
    %c0_32 = arith.constant 0 : index
    %53 = vector.load %arg5[%c0_31, %c0_32] : memref<2x32xf32, #tpu.memory_space<vmem>>, vector<2x32xf32>
    tpu.vector_store %arg5[%c0_31, %c0_32], %51 {strides = array<i32>} : memref<2x32xf32, #tpu.memory_space<vmem>>, vector<2x32xf32>,
    %c0_33 = arith.constant 0 : index
    %c0_34 = arith.constant 0 : index
    %54 = vector.load %arg5[%c0_33, %c0_34] : memref<2x32xf32, #tpu.memory_space<vmem>>, vector<2x32xf32>
    %c2 = arith.constant 2 : index
    %c0_35 = arith.constant 0 : index
    %c0_36 = arith.constant 0 : index
    %55 = vector.load %arg0[%c2, %c0_35, %c0_36] : memref<4x2x128xf32, #tpu.memory_space<vmem>>, vector<1x2x128xf32>
    %56 = vector.shape_cast %55 : vector<1x2x128xf32> to vector<2x128xf32>
    %57 = arith.truncf %54 : vector<2x32xf32> to vector<2x32xbf16>
    %c0_37 = arith.constant 0 : index
    %c0_38 = arith.constant 0 : index
    %58 = vector.load %arg1[%c0_37, %c0_38] : memref<32x128xbf16, #tpu.memory_space<vmem>>, vector<32x128xbf16>
    %cst_39 = arith.constant dense<0.000000e+00> : vector<2x128xf32>
    %59 = tpu.matmul %57, %58, %cst_39 {dimension_numbers = #tpu.dot_dimension_numbers<[1], [0], [0], [1], [0, 0, 1, 1], [], []>} : vector<2x32xbf16>, vector<32x128xbf16>, vector<2x128xf32> -> vector<2x128xf32>
    %60 = arith.addf %56, %59 : vector<2x128xf32>
    %61 = arith.negf %60 : vector<2x128xf32>
    %62 = math.exp %61 : vector<2x128xf32>
    %cst_40 = arith.constant 1.000000e+00 : f32
    %63 = vector.broadcast %cst_40 : f32 to vector<2x128xf32>
    %64 = arith.addf %63, %62 : vector<2x128xf32>
    %65 = arith.divf %63, %64 : vector<2x128xf32>
    %66 = math.tanh %60 : vector<2x128xf32>
    %67 = vector.extract_strided_slice %65 {offsets = [0, 0], sizes = [2, 32], strides = [1, 1]} : vector<2x128xf32> to vector<2x32xf32>
    %68 = vector.extract_strided_slice %65 {offsets = [0, 32], sizes = [2, 32], strides = [1, 1]} : vector<2x128xf32> to vector<2x32xf32>
    %69 = vector.extract_strided_slice %66 {offsets = [0, 64], sizes = [2, 32], strides = [1, 1]} : vector<2x128xf32> to vector<2x32xf32>
    %70 = vector.extract_strided_slice %65 {offsets = [0, 96], sizes = [2, 32], strides = [1, 1]} : vector<2x128xf32> to vector<2x32xf32>
    %c0_41 = arith.constant 0 : index
    %c0_42 = arith.constant 0 : index
    %71 = vector.load %arg6[%c0_41, %c0_42] : memref<2x32xf32, #tpu.memory_space<vmem>>, vector<2x32xf32>
    %72 = arith.mulf %68, %71 : vector<2x32xf32>
    %73 = arith.mulf %67, %69 : vector<2x32xf32>
    %74 = arith.addf %72, %73 : vector<2x32xf32>
    %75 = math.tanh %74 : vector<2x32xf32>
    %76 = arith.mulf %70, %75 : vector<2x32xf32>
    %c0_43 = arith.constant 0 : index
    %c0_44 = arith.constant 0 : index
    %77 = vector.load %arg6[%c0_43, %c0_44] : memref<2x32xf32, #tpu.memory_space<vmem>>, vector<2x32xf32>
    tpu.vector_store %arg6[%c0_43, %c0_44], %74 {strides = array<i32>} : memref<2x32xf32, #tpu.memory_space<vmem>>, vector<2x32xf32>,
    %c0_45 = arith.constant 0 : index
    %c0_46 = arith.constant 0 : index
    %78 = vector.load %arg5[%c0_45, %c0_46] : memref<2x32xf32, #tpu.memory_space<vmem>>, vector<2x32xf32>
    tpu.vector_store %arg5[%c0_45, %c0_46], %76 {strides = array<i32>} : memref<2x32xf32, #tpu.memory_space<vmem>>, vector<2x32xf32>,
    %c0_47 = arith.constant 0 : index
    %c0_48 = arith.constant 0 : index
    %79 = vector.load %arg5[%c0_47, %c0_48] : memref<2x32xf32, #tpu.memory_space<vmem>>, vector<2x32xf32>
    %c3 = arith.constant 3 : index
    %c0_49 = arith.constant 0 : index
    %c0_50 = arith.constant 0 : index
    %80 = vector.load %arg0[%c3, %c0_49, %c0_50] : memref<4x2x128xf32, #tpu.memory_space<vmem>>, vector<1x2x128xf32>
    %81 = vector.shape_cast %80 : vector<1x2x128xf32> to vector<2x128xf32>
    %82 = arith.truncf %79 : vector<2x32xf32> to vector<2x32xbf16>
    %c0_51 = arith.constant 0 : index
    %c0_52 = arith.constant 0 : index
    %83 = vector.load %arg1[%c0_51, %c0_52] : memref<32x128xbf16, #tpu.memory_space<vmem>>, vector<32x128xbf16>
    %cst_53 = arith.constant dense<0.000000e+00> : vector<2x128xf32>
    %84 = tpu.matmul %82, %83, %cst_53 {dimension_numbers = #tpu.dot_dimension_numbers<[1], [0], [0], [1], [0, 0, 1, 1], [], []>} : vector<2x32xbf16>, vector<32x128xbf16>, vector<2x128xf32> -> vector<2x128xf32>
    %85 = arith.addf %81, %84 : vector<2x128xf32>
    %86 = arith.negf %85 : vector<2x128xf32>
    %87 = math.exp %86 : vector<2x128xf32>
    %cst_54 = arith.constant 1.000000e+00 : f32
    %88 = vector.broadcast %cst_54 : f32 to vector<2x128xf32>
    %89 = arith.addf %88, %87 : vector<2x128xf32>
    %90 = arith.divf %88, %89 : vector<2x128xf32>
    %91 = math.tanh %85 : vector<2x128xf32>
    %92 = vector.extract_strided_slice %90 {offsets = [0, 0], sizes = [2, 32], strides = [1, 1]} : vector<2x128xf32> to vector<2x32xf32>
    %93 = vector.extract_strided_slice %90 {offsets = [0, 32], sizes = [2, 32], strides = [1, 1]} : vector<2x128xf32> to vector<2x32xf32>
    %94 = vector.extract_strided_slice %91 {offsets = [0, 64], sizes = [2, 32], strides = [1, 1]} : vector<2x128xf32> to vector<2x32xf32>
    %95 = vector.extract_strided_slice %90 {offsets = [0, 96], sizes = [2, 32], strides = [1, 1]} : vector<2x128xf32> to vector<2x32xf32>
    %c0_55 = arith.constant 0 : index
    %c0_56 = arith.constant 0 : index
    %96 = vector.load %arg6[%c0_55, %c0_56] : memref<2x32xf32, #tpu.memory_space<vmem>>, vector<2x32xf32>
    %97 = arith.mulf %93, %96 : vector<2x32xf32>
    %98 = arith.mulf %92, %94 : vector<2x32xf32>
    %99 = arith.addf %97, %98 : vector<2x32xf32>
    %100 = math.tanh %99 : vector<2x32xf32>
    %101 = arith.mulf %95, %100 : vector<2x32xf32>
    %c0_57 = arith.constant 0 : index
    %c0_58 = arith.constant 0 : index
    %102 = vector.load %arg6[%c0_57, %c0_58] : memref<2x32xf32, #tpu.memory_space<vmem>>, vector<2x32xf32>
    tpu.vector_store %arg6[%c0_57, %c0_58], %99 {strides = array<i32>} : memref<2x32xf32, #tpu.memory_space<vmem>>, vector<2x32xf32>,
    %c0_59 = arith.constant 0 : index
    %c0_60 = arith.constant 0 : index
    %103 = vector.load %arg5[%c0_59, %c0_60] : memref<2x32xf32, #tpu.memory_space<vmem>>, vector<2x32xf32>
    tpu.vector_store %arg5[%c0_59, %c0_60], %101 {strides = array<i32>} : memref<2x32xf32, #tpu.memory_space<vmem>>, vector<2x32xf32>,
    %c0_61 = arith.constant 0 : index
    %c0_62 = arith.constant 0 : index
    %104 = vector.load %arg5[%c0_61, %c0_62] : memref<2x32xf32, #tpu.memory_space<vmem>>, vector<2x32xf32>
    %105 = arith.truncf %104 : vector<2x32xf32> to vector<2x32xbf16>
    %c0_63 = arith.constant 0 : index
    %c0_64 = arith.constant 0 : index
    %106 = vector.load %arg2[%c0_63, %c0_64] : memref<32x5xbf16, #tpu.memory_space<vmem>>, vector<32x5xbf16>
    %cst_65 = arith.constant dense<0.000000e+00> : vector<2x5xf32>
    %107 = tpu.matmul %105, %106, %cst_65 {dimension_numbers = #tpu.dot_dimension_numbers<[1], [0], [0], [1], [0, 0, 1, 1], [], []>} : vector<2x32xbf16>, vector<32x5xbf16>, vector<2x5xf32> -> vector<2x5xf32>
    %c0_66 = arith.constant 0 : index
    %c0_67 = arith.constant 0 : index
    %108 = vector.load %arg3[%c0_66, %c0_67] : memref<1x5xf32, #tpu.memory_space<vmem>>, vector<1x5xf32>
    %109 = vector.broadcast %108 : vector<1x5xf32> to vector<2x5xf32>
    %110 = arith.addf %107, %109 : vector<2x5xf32>
    %c0_68 = arith.constant 0 : index
    %c0_69 = arith.constant 0 : index
    %111 = vector.load %arg4[%c0_68, %c0_69] : memref<2x5xf32, #tpu.memory_space<vmem>>, vector<2x5xf32>
    tpu.vector_store %arg4[%c0_68, %c0_69], %110 {strides = array<i32>} : memref<2x5xf32, #tpu.memory_space<vmem>>, vector<2x5xf32>,
    return
  }
}

</mosaic_0001>

<bundles_post_ra>
// kernel: cnn_lstm_forward.3
= control target key start
LH: loop header
LB: loop body
LE: loop exit
PB: predicated region body
PF: predicated region fallthrough
CT: control target
= control target key end

     0   :  { %v668_v1 = vmov 0.0   ;;  %vm669_vm0 = vmmov 0   ;;  %vm19_vm1 = vcmask 254976   ;;  %s817_s0 = inlined_call_operand.vmem [shape: f32[4,2,128], index: 0, kind: input, shape index: {}]   ;;  %s818_s1 = inlined_call_operand.vmem [shape: bf16[32,128], index: 1, kind: input, shape index: {}]   ;;  %s819_s2 = inlined_call_operand.vmem [shape: bf16[32,5], index: 2, kind: input, shape index: {}]   ;;  %s820_s3 = inlined_call_operand.vmem [shape: f32[1,5], index: 3, kind: input, shape index: {}]   ;;  %s821_s4 = inlined_call_operand.hbm [shape: f32[2,5], index: 4, kind: output, shape index: {}]  }
   0x1   :  { %v602_v0 = vld [vmem:[%s818_s1] sm:$0xff]   ;;  %556 = vmatprep.subr.bf16.mxu0 %v668_v1  ;;  %564 = vmatprep.subr.bf16.mxu1 %v668_v1  ;;  %v603_v2 = vld [vmem:[%s818_s1 + $0x8] sm:$0xff]   ;;  %20 = vst.msk [vmem:[#allocation2] sm:$0x3] %vm19_vm1, %v668_v1  ;;  %21 = vst.msk [vmem:[#allocation3] sm:$0x3] %vm19_vm1, %v668_v1 }
   0x2   :  { %557 = vmatpush3.bf16.msra.mxu0 %v602_v0  ;;  %560 = vmatprep.mubr.msk.bf16.mxu0 %vm669_vm0, %v668_v1 }
   0x3   :  { %558 = vmatprep.subr.bf16.mxu0 %v668_v1  ;;  %568 = vmatprep.mubr.msk.bf16.mxu1 %vm669_vm0, %v668_v1 }
   0x6   :  { %559 = vmatpush3.bf16.msra.mxu0 %v603_v2 }
   0x7   :  { %572 = vmatprep.subr.bf16.mxu0 %v668_v1 }
   0x8   :  { %9 = vsyncpa [#allocation5], 0  ;;  %v22_v3 = vld [vmem:[#allocation2] sm:$0x3]  ;;  %vm41_vm2 = vcmask 261120   ;;  %s670_s21 = smov 64  }
   0x9   :  { %v24_v4 = vpack.c.bf16 %v22_v3, %v22_v3  ;;  %v23_v5 = vld [vmem:[%s817_s0] sm:$0x3]  ;;  %v93_v12 = vld [vmem:[#allocation3] sm:$0x3]  ;;  %s671_s22 = smov 32   ;;  %s672_s23 = smov 96  }
   0xa   :  { %v604_v24 = vld [vmem:[%s818_s1] sm:$0xff]   ;;  %v605_v25 = vld [vmem:[%s818_s1 + $0x8] sm:$0xff]   ;;  %vm502_vm3 = vcmask 33792  }
   0xb   :  { %561 = vmatmul.mubr.msk.bf16.vlgmr.msra.gmra.mrb[0].mxu0 %vm41_vm2, %v24_v4  ;;  %565 = vmatpush3.bf16.msra.mxu1 %v604_v24  ;;  %v522_v33 = vld [vmem:[%s817_s0 + $0x2] sm:$0x3]  ;;  %v607_v52 = vld [vmem:[%s818_s1 + $0x8] sm:$0xff]   ;;  %v527_v60 = vld [vmem:[%s817_s0 + $0x4] sm:$0x3] }
   0xc   :  { %576 = vmatprep.mubr.msk.bf16.mxu0 %vm669_vm0, %v668_v1  ;;  %566 = vmatprep.subr.bf16.mxu1 %v668_v1  ;;  %v606_v51 = vld [vmem:[%s818_s1] sm:$0xff]  }
   0xd   :  { %573 = vmatpush3.bf16.msra.mxu0 %v606_v51  ;;  %v532_v24 = vld [vmem:[%s817_s0 + $0x6] sm:$0x3] }
   0xe   :  { %574 = vmatprep.subr.bf16.mxu0 %v668_v1 }
   0xf   :  { %567 = vmatpush3.bf16.msra.mxu1 %v605_v25 }
  0x10   :  { %580 = vmatprep.subr.bf16.mxu1 %v668_v1 }
  0x11   :  { %575 = vmatpush3.bf16.msra.mxu0 %v607_v52 }
  0x12   :  { %588 = vmatprep.subr.bf16.mxu0 %v668_v1 }
  0xde   :  { %v79_v6 = vpop.f32.mrb[0].mxu0 }
  0xdf   :  { %v85_v7 = vadd.f32 %v79_v6, %v23_v5  ;;  %v562_v8 = vpop.f32.mrb[1].mxu0 }
  0xe0   :  { %v82_v9 = vpop.f32.mrb[2].mxu0 }
  0xe1   :  { %612 = vtanh.f32 %v85_v7  ;;  %v563_v10 = vpop.f32.mrb[3].mxu0  ;;  %v521_v13 = vmul.f32 -1.442695, %v85_v7 }
  0xe3   :  { %614 = vpow2.f32 %v521_v13 }
  0xeb   :  { %v613_v11 = vpop.eup %612 }
  0xec   :  { %100 = vrot.lane.b32.xlu0 %v613_v11, %s670_s21 }
  0xed   :  { %v615_v14 = vpop.eup %614 }
  0xee   :  { %v89_v15 = vadd.f32 1.0, %v615_v14 }
  0xf0   :  { %95 = vrot.lane.b32.xlu0 %v93_v12, %s671_s22  ;;  %616 = vrcp.f32 %v89_v15  ;;  %v608_v15 = vld [vmem:[%s818_s1] sm:$0xff]  }
  0xfa   :  { %v617_v16 = vpop.eup %616 }
 0x15e   :  { %v101_v17 = vpop.permute.xlu0 %100 }
 0x15f   :  { %v103_v18 = vmul.f32 %v617_v16, %v101_v17 }
 0x161   :  { %105 = vrot.lane.b32.xlu1 %v103_v18, %s671_s22 }
 0x162   :  { %v96_v19 = vpop.permute.xlu0 %95 }
 0x163   :  { %v98_v20 = vmul.f32 %v617_v16, %v96_v19 }
 0x1d3   :  { %v106_v21 = vpop.permute.xlu1 %105 }
 0x1d4   :  { %v108_v22 = vadd.f32 %v106_v21, %v98_v20 }
 0x1d6   :  { %618 = vtanh.f32 %v108_v22 }
 0x1e0   :  { %v619_v23 = vpop.eup %618 }
 0x1e1   :  { %111 = vrot.lane.b32.xlu1 %v619_v23, %s670_s21 }
 0x1e5   :  { %116 = vrot.lane.b32.xlu1 %v108_v22, %s672_s23 }
 0x253   :  { %v112_v26 = vpop.permute.xlu1 %111 }
 0x254   :  { %v114_v27 = vmul.f32 %v617_v16, %v112_v26  ;;  %v609_v16 = vld [vmem:[%s818_s1 + $0x8] sm:$0xff]  }
 0x256   :  { %121 = vrot.lane.b32.xlu0 %v114_v27, %s671_s22 }
 0x257   :  { %v117_v28 = vpop.permute.xlu1 %116 }
 0x258   :  { %119 = vst.msk [vmem:[#allocation3] sm:$0x3] %vm19_vm1, %v117_v28 }
 0x25f   :  { %v196_v29 = vld [vmem:[#allocation3] sm:$0x3] }
 0x260   :  { %198 = vrot.lane.b32.xlu1 %v196_v29, %s671_s22 }
 0x2c8   :  { %v122_v30 = vpop.permute.xlu0 %121 }
 0x2c9   :  { %124 = vst.msk [vmem:[#allocation2] sm:$0x3] %vm19_vm1, %v122_v30 }
 0x2d0   :  { %v125_v31 = vld [vmem:[#allocation2] sm:$0x3] }
 0x2d1   :  { %v128_v32 = vpack.c.bf16 %v125_v31, %v125_v31 }
 0x2d2   :  { %v199_v46 = vpop.permute.xlu1 %198 }
 0x2d3   :  { %569 = vmatmul.mubr.msk.bf16.vlgmr.msra.gmra.mrb[0].mxu1 %vm41_vm2, %v128_v32 }
 0x2d4   :  { %584 = vmatprep.mubr.msk.bf16.mxu1 %vm669_vm0, %v668_v1  ;;  %581 = vmatpush3.bf16.msra.mxu1 %v608_v15 }
 0x2d5   :  { %582 = vmatprep.subr.bf16.mxu1 %v668_v1 }
 0x2d8   :  { %583 = vmatpush3.bf16.msra.mxu1 %v609_v16 }
 0x3a6   :  { %v182_v34 = vpop.f32.mrb[0].mxu1 }
 0x3a7   :  { %v188_v35 = vadd.f32 %v522_v33, %v182_v34  ;;  %v570_v36 = vpop.f32.mrb[1].mxu1 }
 0x3a8   :  { %v185_v37 = vpop.f32.mrb[2].mxu1 }
 0x3a9   :  { %620 = vtanh.f32 %v188_v35  ;;  %v571_v38 = vpop.f32.mrb[3].mxu1  ;;  %v526_v40 = vmul.f32 -1.442695, %v188_v35 }
 0x3ab   :  { %622 = vpow2.f32 %v526_v40 }
 0x3b3   :  { %v621_v39 = vpop.eup %620 }
 0x3b4   :  { %203 = vrot.lane.b32.xlu0 %v621_v39, %s670_s21 }
 0x3b5   :  { %v623_v41 = vpop.eup %622 }
 0x3b6   :  { %v192_v42 = vadd.f32 1.0, %v623_v41 }
 0x3b8   :  { %624 = vrcp.f32 %v192_v42  ;;  %v610_v42 = vld [vmem:[%s819_s2] sm:$0xff]  }
 0x3c2   :  { %v625_v43 = vpop.eup %624 }
 0x3c3   :  { %v201_v47 = vmul.f32 %v625_v43, %v199_v46 }
 0x426   :  { %v204_v44 = vpop.permute.xlu0 %203 }
 0x427   :  { %v206_v45 = vmul.f32 %v625_v43, %v204_v44 }
 0x429   :  { %208 = vrot.lane.b32.xlu0 %v206_v45, %s671_s22 }
 0x49b   :  { %v209_v48 = vpop.permute.xlu0 %208 }
 0x49c   :  { %v211_v49 = vadd.f32 %v209_v48, %v201_v47 }
 0x49e   :  { %626 = vtanh.f32 %v211_v49 }
 0x4a8   :  { %v627_v50 = vpop.eup %626 }
 0x4a9   :  { %214 = vrot.lane.b32.xlu1 %v627_v50, %s670_s21  ;;  %v537_v50 = vld [vmem:[%s820_s3] ss:$0 sm:$0xff] }
 0x4ad   :  { %219 = vrot.lane.b32.xlu1 %v211_v49, %s672_s23 }
 0x51b   :  { %v215_v53 = vpop.permute.xlu1 %214 }
 0x51c   :  { %v217_v54 = vmul.f32 %v625_v43, %v215_v53  ;;  %v611_v43 = vld [vmem:[%s819_s2 + $0x8] sm:$0xff]   ;;  %s673_s2 = smov [#allocation4]  }
 0x51d   :  { %s510_s20 = sshll.u32 %s673_s2, 4  ;;  %s511_s20 = int_to_ptr.vmem [resolvable:$true] %s510_s20 }
 0x51e   :  { %224 = vrot.lane.b32.xlu0 %v217_v54, %s671_s22  ;;  %p649_p1 = scmp.lt.s32.totalorder %s511_s20, %s511_s20 }
 0x51f   :  { %v220_v55 = vpop.permute.xlu1 %219 }
 0x520   :  { %222 = vst.msk [vmem:[#allocation3] sm:$0x3] %vm19_vm1, %v220_v55 }
 0x527   :  { %v299_v56 = vld [vmem:[#allocation3] sm:$0x3] }
 0x528   :  { %301 = vrot.lane.b32.xlu1 %v299_v56, %s671_s22 }
 0x590   :  { %v225_v57 = vpop.permute.xlu0 %224 }
 0x591   :  { %227 = vst.msk [vmem:[#allocation2] sm:$0x3] %vm19_vm1, %v225_v57 }
 0x598   :  { %v228_v58 = vld [vmem:[#allocation2] sm:$0x3] }
 0x599   :  { %v231_v59 = vpack.c.bf16 %v228_v58, %v228_v58 }
 0x59a   :  { %v302_v10 = vpop.permute.xlu1 %301 }
 0x59b   :  { %577 = vmatmul.mubr.msk.bf16.vlgmr.msra.gmra.mrb[4].mxu0 %vm41_vm2, %v231_v59 }
 0x59c   :  { %592 = vmatprep.mubr.msk.bf16.mxu0 %vm669_vm0, %v668_v1  ;;  %589 = vmatpush3.bf16.msra.mxu0 %v610_v42 }
 0x59d   :  { %590 = vmatprep.subr.bf16.mxu0 %v668_v1 }
 0x5a0   :  { %591 = vmatpush3.bf16.msra.mxu0 %v611_v43 }
 0x66e   :  { %v285_v61 = vpop.f32.mrb[4].mxu0 }
 0x66f   :  { %v291_v62 = vadd.f32 %v527_v60, %v285_v61  ;;  %v578_v63 = vpop.f32.mrb[5].mxu0 }
 0x670   :  { %v288_v0 = vpop.f32.mrb[6].mxu0 }
 0x671   :  { %628 = vtanh.f32 %v291_v62  ;;  %v579_v2 = vpop.f32.mrb[7].mxu0  ;;  %v531_v4 = vmul.f32 -1.442695, %v291_v62 }
 0x673   :  { %630 = vpow2.f32 %v531_v4 }
 0x67b   :  { %v629_v3 = vpop.eup %628 }
 0x67c   :  { %306 = vrot.lane.b32.xlu0 %v629_v3, %s670_s21 }
 0x67d   :  { %v631_v5 = vpop.eup %630 }
 0x67e   :  { %v295_v6 = vadd.f32 1.0, %v631_v5 }
 0x680   :  { %632 = vrcp.f32 %v295_v6 }
 0x68a   :  { %v633_v7 = vpop.eup %632 }
 0x68b   :  { %v304_v11 = vmul.f32 %v633_v7, %v302_v10 }
 0x6ee   :  { %v307_v8 = vpop.permute.xlu0 %306 }
 0x6ef   :  { %v309_v9 = vmul.f32 %v633_v7, %v307_v8 }
 0x6f1   :  { %311 = vrot.lane.b32.xlu0 %v309_v9, %s671_s22 }
 0x763   :  { %v312_v12 = vpop.permute.xlu0 %311 }
 0x764   :  { %v314_v13 = vadd.f32 %v312_v12, %v304_v11 }
 0x766   :  { %634 = vtanh.f32 %v314_v13 }
 0x770   :  { %v635_v14 = vpop.eup %634 }
 0x771   :  { %317 = vrot.lane.b32.xlu1 %v635_v14, %s670_s21 }
 0x775   :  { %322 = vrot.lane.b32.xlu1 %v314_v13, %s672_s23 }
 0x7e3   :  { %v318_v17 = vpop.permute.xlu1 %317 }
 0x7e4   :  { %v320_v18 = vmul.f32 %v633_v7, %v318_v17 }
 0x7e6   :  { %327 = vrot.lane.b32.xlu0 %v320_v18, %s671_s22 }
 0x7e7   :  { %v323_v19 = vpop.permute.xlu1 %322 }
 0x7e8   :  { %325 = vst.msk [vmem:[#allocation3] sm:$0x3] %vm19_vm1, %v323_v19 }
 0x7ef   :  { %v402_v20 = vld [vmem:[#allocation3] sm:$0x3] }
 0x7f0   :  { %404 = vrot.lane.b32.xlu1 %v402_v20, %s671_s22 }
 0x858   :  { %v328_v21 = vpop.permute.xlu0 %327 }
 0x859   :  { %330 = vst.msk [vmem:[#allocation2] sm:$0x3] %vm19_vm1, %v328_v21 }
 0x860   :  { %v331_v22 = vld [vmem:[#allocation2] sm:$0x3] }
 0x861   :  { %v334_v23 = vpack.c.bf16 %v331_v22, %v331_v22 }
 0x862   :  { %v405_v37 = vpop.permute.xlu1 %404 }
 0x863   :  { %585 = vmatmul.mubr.msk.bf16.vlgmr.msra.gmra.mrb[4].mxu1 %vm41_vm2, %v334_v23 }
 0x936   :  { %v388_v25 = vpop.f32.mrb[4].mxu1 }
 0x937   :  { %v394_v26 = vadd.f32 %v532_v24, %v388_v25  ;;  %v586_v27 = vpop.f32.mrb[5].mxu1 }
 0x938   :  { %v391_v28 = vpop.f32.mrb[6].mxu1 }
 0x939   :  { %636 = vtanh.f32 %v394_v26  ;;  %v587_v29 = vpop.f32.mrb[7].mxu1  ;;  %v536_v31 = vmul.f32 -1.442695, %v394_v26 }
 0x93b   :  { %638 = vpow2.f32 %v536_v31 }
 0x943   :  { %v637_v30 = vpop.eup %636 }
 0x944   :  { %409 = vrot.lane.b32.xlu0 %v637_v30, %s670_s21 }
 0x945   :  { %v639_v32 = vpop.eup %638 }
 0x946   :  { %v398_v33 = vadd.f32 1.0, %v639_v32 }
 0x948   :  { %640 = vrcp.f32 %v398_v33 }
 0x952   :  { %v641_v34 = vpop.eup %640 }
 0x953   :  { %v407_v38 = vmul.f32 %v641_v34, %v405_v37 }
 0x9b6   :  { %v410_v35 = vpop.permute.xlu0 %409 }
 0x9b7   :  { %v412_v36 = vmul.f32 %v641_v34, %v410_v35 }
 0x9b9   :  { %414 = vrot.lane.b32.xlu0 %v412_v36, %s671_s22 }
 0xa2b   :  { %v415_v39 = vpop.permute.xlu0 %414 }
 0xa2c   :  { %v417_v40 = vadd.f32 %v415_v39, %v407_v38 }
 0xa2e   :  { %642 = vtanh.f32 %v417_v40 }
 0xa38   :  { %v643_v41 = vpop.eup %642 }
 0xa39   :  { %420 = vrot.lane.b32.xlu1 %v643_v41, %s670_s21  ;;  %s644_s21 = scalar_lea.vmem %s511_s20, 32 }
 0xa3a   :  { %p645_p0 = scmp.ne.s32.totalorder %s511_s20, %s644_s21  ;;  %p650_p2 = scmp.lt.s32.totalorder %s644_s21, %s644_s21 }
 0xa3c   :  { %p651_p3 = por %p650_p2, %p649_p1 }
 0xa3d   :  { %425 = vrot.lane.b32.xlu1 %v417_v40, %s672_s23 }
 0xa3e   :  { %p652_p4 = pnand %p651_p3, %p645_p0 }
 0xaab   :  { %v421_v44 = vpop.permute.xlu1 %420 }
 0xaac   :  { %v423_v45 = vmul.f32 %v641_v34, %v421_v44 }
 0xaae   :  { %430 = vrot.lane.b32.xlu0 %v423_v45, %s671_s22 }
 0xaaf   :  { %v426_v46 = vpop.permute.xlu1 %425 }
 0xab0   :  { %428 = vst.msk [vmem:[#allocation3] sm:$0x3] %vm19_vm1, %v426_v46 }
 0xb20   :  { %v431_v47 = vpop.permute.xlu0 %430 }
 0xb21   :  { %433 = vst.msk [vmem:[#allocation2] sm:$0x3] %vm19_vm1, %v431_v47 }
 0xb28   :  { %v434_v48 = vld [vmem:[#allocation2] sm:$0x3] }
 0xb29   :  { %v435_v49 = vpack.c.bf16 %v434_v48, %v434_v48 }
 0xb2b   :  { %593 = vmatmul.mubr.msk.bf16.vlgmr.msra.gmra.mrb[8].mxu0 %vm41_vm2, %v435_v49 }
 0xbfe   :  { %v496_v1 = vpop.f32.mrb[8].mxu0 }
 0xbff   :  { %v497_v51 = vadd.f32 %v537_v50, %v496_v1  ;;  %v594_v52 = vpop.f32.mrb[9].mxu0 }
 0xc00   :  { %v499_v53 = vpop.f32.mrb[10].mxu0 }
 0xc01   :  { %v595_v54 = vpop.f32.mrb[11].mxu0  ;;  %503 = vst.msk [vmem:[#allocation4] sm:$0x3] %vm502_vm3, %v497_v51 }
 0xc02   :  { %655 = shalt.err (!%p652_p4)
}
 0xc03   :  { %s656_s3 = scalar_lea.hbm %s821_s4, 32 }
 0xc04   :  { %p657_p5 = scmp.ne.s32.totalorder %s821_s4, %s656_s3  ;;  %p660_p6 = scmp.lt.u32.totalorder %s656_s3, %s821_s4 }
 0xc06   :  { %p662_p7 = pnand %p660_p6, %p657_p5 }
 0xc08   :  { %665 = shalt.err (!%p662_p7)
}
 0xc09   :  { %513 = dma.vmem_to_hbm [thread:$0]  %s511_s20, 32, %s821_s4, [#allocation5]  }
 0xc0a   :  { %666 = dma.done.wait [#allocation5], 32  }
 0xc0b   :  { %667 = vsyncadd [#allocation5], 4294967264 }
 0xc0c   :  { %517 = vsyncpa [#allocation5], 1 }

// kernel: cnn_lstm_forward.2
= control target key start
LH: loop header
LB: loop body
LE: loop exit
PB: predicated region body
PF: predicated region fallthrough
CT: control target
= control target key end

     0   :  { %s9699_s18 = smov 0   ;;  %s12844_s0 = inlined_call_operand.vmem [shape: bf16[8,225,27], index: 0, kind: input, shape index: {}]   ;;  %s12845_s1 = inlined_call_operand.vmem [shape: bf16[27,64], index: 1, kind: input, shape index: {}]   ;;  %s12846_s2 = inlined_call_operand.vmem [shape: f32[1,64], index: 2, kind: input, shape index: {}]   ;;  %s12847_s3 = inlined_call_operand.vmem [shape: bf16[576,64], index: 3, kind: input, shape index: {}]   ;;  %s12848_s4 = inlined_call_operand.vmem [shape: f32[1,64], index: 4, kind: input, shape index: {}]   ;;  %s12849_s5 = inlined_call_operand.vmem [shape: bf16[576,64], index: 5, kind: input, shape index: {}]   ;;  %s12850_s6 = inlined_call_operand.vmem [shape: f32[1,64], index: 6, kind: input, shape index: {}]   ;;  %s12851_s7 = inlined_call_operand.vmem [shape: bf16[576,128], index: 7, kind: input, shape index: {}]   ;;  %s12852_s8 = inlined_call_operand.vmem [shape: f32[1,128], index: 8, kind: input, shape index: {}]   ;;  %s12853_s9 = inlined_call_operand.vmem [shape: bf16[1152,128], index: 9, kind: input, shape index: {}]   ;;  %s12854_s10 = inlined_call_operand.vmem [shape: f32[1,128], index: 10, kind: input, shape index: {}]   ;;  %s12855_s11 = inlined_call_operand.vmem [shape: bf16[128,32], index: 11, kind: input, shape index: {}]   ;;  %s12856_s12 = inlined_call_operand.vmem [shape: f32[1,32], index: 12, kind: input, shape index: {}]   ;;  %s12857_s13 = inlined_call_operand.vmem [shape: bf16[32,128], index: 13, kind: input, shape index: {}]   ;;  %s12858_s14 = inlined_call_operand.vmem [shape: f32[1,128], index: 14, kind: input, shape index: {}]   ;;  %s12859_s15 = inlined_call_operand.vmem [shape: f32[8,1,128], index: 15, kind: output, shape index: {}]  }
   0x1 LB: > { %s7091_s19 = sadd.s32 4294967295, %s9613_s18   ;;  %p7095_p0 = scmp.ge.s32.totalorder %s9613_s18, 1  ;;  %s9613_s18 = sphi %s9699_s18, %s25_s18  }
   0x2   : > { %p437_p1 = scmp.lt.s32.totalorder %s9613_s18, 9 }
   0x4   : > { %p438_p2 = pnand %p7095_p0, %p437_p1 }
   0x6   : > { %441 = sbr.rel (%p438_p2) target bundleno = 2655 (0xa5f), region = 80 }
   0xd   : > { %v9398_v0 = vld [vmem:[%s12845_s1] sm:$0xff]   ;;  %v12883_v1 = vmov 0.0   ;;  %v9399_v2 = vld [vmem:[%s12845_s1 + $0x8] sm:$0x3f]   ;;  %vm662_vm0 = vcmask 1044480   ;;  %vm663_vm1 = vcmask 1045504  }
   0xe   : > { %7997 = vmatprep.subr.bf16.mxu0 %v12883_v1  ;;  %8061 = vmatprep.subr.bf16.mxu1 %v12883_v1  ;;  %p483_p3 = scmp.lt.s32.totalorder %s7091_s19, 7  ;;  %v9616_v3 = vmov 65535   ;;  %vm9617_vm2 = vmmov 0   ;;  %vm616_vm3 = vcmask 220160   ;;  %v9414_v19 = vld [vmem:[%s12847_s3 + $0x40] sm:$0xff]   ;;  %v9416_v21 = vld [vmem:[%s12847_s3 + $0x48] sm:$0xff]  }
   0xf   : > { %7998 = vmatpush3.bf16.msra.mxu0 %v9398_v0  ;;  %v664_v4 = vsel %vm662_vm0, 4294967295, %v9616_v3  ;;  %8001 = vmatprep.mubr.msk.bf16.mxu0 %vm9617_vm2, %v12883_v1  ;;  %v9415_v20 = vld [vmem:[%s12847_s3 + $0x20] sm:$0xff]   ;;  %v9417_v22 = vld [vmem:[%s12847_s3 + $0x28] sm:$0xff]   ;;  %v9419_v24 = vld [vmem:[%s12847_s3 + $0x50] sm:$0xff]   ;;  %vm982_vm4 = vcmask 523264   ;;  %vm1365_vm5 = vcmask 1046528  }
  0x10   : > { %7999 = vmatprep.subr.bf16.mxu0 %v12883_v1  ;;  %v665_v5 = vsel %vm663_vm1, %v664_v4, 0  ;;  %s12973_s19 = smov (!%p483_p3, %s7091_s19), 7  ;;  %8069 = vmatprep.mubr.msk.bf16.mxu1 %vm9617_vm2, %v12883_v1  ;;  %v9420_v25 = vld [vmem:[%s12847_s3 + $0x30] sm:$0xff]   ;;  %v9421_v26 = vld [vmem:[%s12847_s3 + $0x58] sm:$0xff]   ;;  %v9826_v30 = vld [vmem:[%s12846_s2] ss:$0 sm:$0xff] }
  0x11   : > { %v667_v6 = vand.u32 %v9399_v2, %v665_v5  ;;  %s9385_s24 = smul.u32 116, %s12973_s19  ;;  %8062 = vmatpush3.bf16.msra.mxu1 %v9415_v20  ;;  %v9422_v27 = vld [vmem:[%s12847_s3 + $0x38] sm:$0xff]   ;;  %v9427_v52 = vld [vmem:[%s12847_s3 + $0x80] sm:$0xff]   ;;  %vm854_vm6 = vsmask.f32 7424  ;;  %v9428_v2 = vld [vmem:[%s12847_s3 + $0x88] sm:$0xff]   ;;  %s490_s25 = scalar_lea.vmem %s12859_s15, %s12973_s19 }
  0x12   : > { %8063 = vmatprep.subr.bf16.mxu1 %v12883_v1  ;;  %v9423_v58 = vld [vmem:[%s12847_s3] sm:$0xff]   ;;  %vm1623_vm7 = vsmask.f32 256  ;;  %vm821_vm8 = vcmask 1040384   ;;  %vm3008_vm9 = vcmask 1042432   ;;  %vm5104_vm10 = vcmask 1041408  }
  0x13   : > { %8000 = vmatpush3.bf16.msra.mxu0 %v667_v6  ;;  %s9728_s27 = scalar_lea.vmem %s12844_s0, %s9385_s24  ;;  %v9424_v6 = vld [vmem:[%s12847_s3 + $0x8] sm:$0xff]   ;;  %vm5107_vm11 = vcmask 1043456   ;;  %vm5396_vm12 = vsmask.f32 5376  ;;  %vm5569_vm13 = vsmask.f32 4352 }
  0x14   : > { %8181 = vmatprep.subr.bf16.mxu0 %v12883_v1  ;;  %v9400_v7 = vld [vmem:[%s9728_s27] sm:$0xff]   ;;  %v9401_v8 = vld [vmem:[%s9728_s27 + $0x8] sm:$0xff]   ;;  %v9402_v9 = vld [vmem:[%s9728_s27 + $0x10] sm:$0xff]   ;;  %vm5737_vm14 = vsmask.f32 2304  ;;  %vm9618_vm15 = vmmov 1  }
  0x15   : > { %v9403_v10 = vld [vmem:[%s9728_s27 + $0x18] sm:$0xff]   ;;  %v9404_v11 = vld [vmem:[%s9728_s27 + $0x20] sm:$0xff]   ;;  %v9405_v12 = vld [vmem:[%s9728_s27 + $0x28] sm:$0xff]   ;;  %8064 = vmatpush3.bf16.msra.mxu1 %v9417_v22 }
  0x16   : > { %8002 = vmatmul.mubr.msk.bf16.vlgmr.msra.gmra.mrb[0].mxu0 %vm616_vm3, %v9400_v7  ;;  %v9406_v13 = vld [vmem:[%s9728_s27 + $0x30] sm:$0xff]   ;;  %v9407_v14 = vld [vmem:[%s9728_s27 + $0x38] sm:$0xff]   ;;  %v9408_v15 = vld [vmem:[%s9728_s27 + $0x40] sm:$0xff]   ;;  %8065 = vmatprep.subr.bf16.mxu1 %v12883_v1 }
  0x17   : > { %8005 = vmatprep.mubr.msk.bf16.mxu0 %vm9617_vm2, %v12883_v1  ;;  %v9409_v16 = vld [vmem:[%s9728_s27 + $0x48] sm:$0xff]   ;;  %v9410_v17 = vld [vmem:[%s9728_s27 + $0x50] sm:$0xff]   ;;  %v9411_v18 = vld [vmem:[%s9728_s27 + $0x58] sm:$0xff]   ;;  %8182 = vmatpush3.bf16.msra.mxu0 %v9414_v19 }
  0x18   : > { %8183 = vmatprep.subr.bf16.mxu0 %v12883_v1  ;;  %v9412_v23 = vld [vmem:[%s9728_s27 + $0x60] sm:$0xff]   ;;  %v9413_v28 = vld [vmem:[%s9728_s27 + $0x68] sm:$0xff]   ;;  %v9418_v29 = vld [vmem:[%s9728_s27 + $0x70] ss:$0 sps:$4 sm:$0x11]  }
  0x19   : > { %8066 = vmatpush3.bf16.msra.mxu1 %v9420_v25 }
  0x1a   : > { %8067 = vmatprep.subr.bf16.mxu1 %v12883_v1 }
  0x1b   : > { %8184 = vmatpush3.bf16.msra.mxu0 %v9416_v21 }
  0x1c   : > { %8185 = vmatprep.subr.bf16.mxu0 %v12883_v1 }
  0x1d   : > { %8068 = vmatpush3.bf16.msra.mxu1 %v9422_v27  ;;  %v9426_v27 = vld [vmem:[%s12847_s3 + $0x18] sm:$0xff]  }
  0x1e   : > { %8006 = vmatmul.mubr.msk.bf16.gmra.mrb[4].mxu0 %vm616_vm3, %v9401_v8  ;;  %8121 = vmatprep.subr.bf16.mxu1 %v12883_v1 }
  0x1f   : > { %8009 = vmatprep.mubr.msk.bf16.mxu0 %vm9617_vm2, %v12883_v1  ;;  %8186 = vmatpush3.bf16.msra.mxu0 %v9419_v24  ;;  %v9430_v24 = vld [vmem:[%s12847_s3 + $0x98] sm:$0xff]  }
  0x20   : > { %8187 = vmatprep.subr.bf16.mxu0 %v12883_v1 }
  0x23   : > { %8188 = vmatpush3.bf16.msra.mxu0 %v9421_v26 }
  0x24   : > { %8301 = vmatprep.subr.bf16.mxu0 %v12883_v1 }
  0x26   : > { %8010 = vmatmul.mubr.msk.bf16.gmra.mrb[8].mxu0 %vm616_vm3, %v9402_v9 }
  0x27   : > { %8013 = vmatprep.mubr.msk.bf16.mxu0 %vm9617_vm2, %v12883_v1 }
  0x2e   : > { %8014 = vmatmul.mubr.msk.bf16.gmra.mrb[12].mxu0 %vm616_vm3, %v9403_v10 }
  0x2f   : > { %8017 = vmatprep.mubr.msk.bf16.mxu0 %vm9617_vm2, %v12883_v1 }
  0x36   : > { %8018 = vmatmul.mubr.msk.bf16.gmra.mrb[16].mxu0 %vm616_vm3, %v9404_v11  ;;  %v9429_v11 = vld [vmem:[%s12847_s3 + $0x90] sm:$0xff]  }
  0x37   : > { %8021 = vmatprep.mubr.msk.bf16.mxu0 %vm9617_vm2, %v12883_v1 }
  0x3e   : > { %8022 = vmatmul.mubr.msk.bf16.gmra.mrb[20].mxu0 %vm616_vm3, %v9405_v12 }
  0x3f   : > { %8025 = vmatprep.mubr.msk.bf16.mxu0 %vm9617_vm2, %v12883_v1 }
  0x46   : > { %8026 = vmatmul.mubr.msk.bf16.gmra.mrb[24].mxu0 %vm616_vm3, %v9406_v13 }
  0x47   : > { %8029 = vmatprep.mubr.msk.bf16.mxu0 %vm9617_vm2, %v12883_v1 }
  0x4e   : > { %8030 = vmatmul.mubr.msk.bf16.gmra.mrb[28].mxu0 %vm616_vm3, %v9407_v14 }
  0x4f   : > { %8033 = vmatprep.mubr.msk.bf16.mxu0 %vm9617_vm2, %v12883_v1 }
  0x56   : > { %8034 = vmatmul.mubr.msk.bf16.gmra.mrb[32].mxu0 %vm616_vm3, %v9408_v15 }
  0x57   : > { %8037 = vmatprep.mubr.msk.bf16.mxu0 %vm9617_vm2, %v12883_v1 }
  0x5e   : > { %8038 = vmatmul.mubr.msk.bf16.gmra.mrb[36].mxu0 %vm616_vm3, %v9409_v16 }
  0x5f   : > { %8041 = vmatprep.mubr.msk.bf16.mxu0 %vm9617_vm2, %v12883_v1 }
  0x66   : > { %8042 = vmatmul.mubr.msk.bf16.gmra.mrb[40].mxu0 %vm616_vm3, %v9410_v17  ;;  %v9425_v17 = vld [vmem:[%s12847_s3 + $0x10] sm:$0xff]  }
  0x67   : > { %8045 = vmatprep.mubr.msk.bf16.mxu0 %vm9617_vm2, %v12883_v1 }
  0x6e   : > { %8046 = vmatmul.mubr.msk.bf16.gmra.mrb[44].mxu0 %vm616_vm3, %v9411_v18 }
  0x6f   : > { %8049 = vmatprep.mubr.msk.bf16.mxu0 %vm9617_vm2, %v12883_v1 }
  0x76   : > { %8050 = vmatmul.mubr.msk.bf16.gmra.mrb[48].mxu0 %vm616_vm3, %v9412_v23 }
  0x77   : > { %8053 = vmatprep.mubr.msk.bf16.mxu0 %vm9617_vm2, %v12883_v1 }
  0x7e   : > { %8054 = vmatmul.mubr.msk.bf16.gmra.mrb[52].mxu0 %vm616_vm3, %v9413_v28 }
  0x7f   : > { %8057 = vmatprep.mubr.msk.bf16.mxu0 %vm9617_vm2, %v12883_v1 }
  0x86   : > { %8058 = vmatmul.mubr.msk.bf16.gmra.mrb[56].mxu0 %vm616_vm3, %v9418_v29 }
  0x87   : > { %8189 = vmatprep.mubr.msk.bf16.mxu0 %vm9617_vm2, %v12883_v1 }
  0xe9   : > { %v703_v31 = vpop.f32.mrb[0].mxu0 }
  0xea   : > { %v8003_v32 = vpop.f32.mrb[1].mxu0  ;;  %v704_v34 = vadd.f32 %v9826_v30, %v703_v31 }
  0xeb   : > { %v706_v33 = vpop.f32.mrb[2].mxu0 }
  0xec   : > { %v707_v35 = vadd.f32 %v9826_v30, %v706_v33  ;;  %v8004_v36 = vpop.f32.mrb[3].mxu0 }
  0xee   : > { %v9830_v37 = vpack.c.bf16 %v707_v35, %v704_v34 }
  0xf0   : > { %v858_v40 = vshll.u32 %v9830_v37, 16  ;;  %v1366_v47 = vrot.slane %v9830_v37, 1  ;;  %v856_v49 = vshrl.u32 %v9830_v37, 16 }
  0xf1   : > { %v711_v38 = vpop.f32.mrb[4].mxu0 }
  0xf2   : > { %v8007_v39 = vpop.f32.mrb[5].mxu0  ;;  %v712_v42 = vadd.f32 %v9826_v30, %v711_v38  ;;  %v860_v46 = vrot.slane %v858_v40, 1  ;;  %v1624_v3 = vrot.slane %v856_v49, 7 }
  0xf3   : > { %v714_v41 = vpop.f32.mrb[6].mxu0 }
  0xf4   : > { %v715_v43 = vadd.f32 %v9826_v30, %v714_v41  ;;  %v8008_v44 = vpop.f32.mrb[7].mxu0  ;;  %v861_v56 = vor.u32 %v860_v46, %v856_v49 }
  0xf6   : > { %v9835_v45 = vpack.c.bf16 %v715_v43, %v712_v42 }
  0xf8   : > { %v1367_v48 = vrot.slane %v9835_v45, 1  ;;  %v863_v50 = vshll.u32 %v9835_v45, 16  ;;  %v867_v51 = vshrl.u32 %v9835_v45, 16 }
  0xf9   : > { %v719_v53 = vpop.f32.mrb[8].mxu0 }
  0xfa   : > { %v8011_v54 = vpop.f32.mrb[9].mxu0  ;;  %v1368_v55 = vsel %vm1365_vm5, %v1366_v47, %v1367_v48  ;;  %v865_v57 = vrot.slane %v863_v50, 1  ;;  %v1625_v59 = vrot.slane %v867_v51, 7  ;;  %v720_v61 = vadd.f32 %v9826_v30, %v719_v53 }
  0xfb   : > { %v722_v60 = vpop.f32.mrb[10].mxu0  ;;  %8190 = vmatmul.mubr.msk.bf16.vlgmr.msra.gmra.mrb[60].mxu0 %vm982_vm4, %v1368_v55 }
  0xfc   : > { %v723_v62 = vadd.f32 %v9826_v30, %v722_v60  ;;  %v8012_v63 = vpop.f32.mrb[11].mxu0  ;;  %v866_v0 = vsel %vm854_vm6, %v861_v56, %v865_v57  ;;  %8193 = vmatprep.mubr.msk.bf16.mxu0 %vm9617_vm2, %v12883_v1  ;;  %8302 = vmatpush3.bf16.msra.mxu0 %v9427_v52  ;;  %v1626_v4 = vor.u32 %v1625_v59, %v863_v50 }
  0xfd   : > { %8070 = vmatmul.mubr.msk.bf16.vlgmr.msra.gmra.mrb[0].mxu1 %vm982_vm4, %v866_v0  ;;  %8303 = vmatprep.subr.bf16.mxu0 %v12883_v1  ;;  %v869_v15 = vor.u32 %v867_v51, %v865_v57 }
  0xfe   : > { %v9860_v5 = vpack.c.bf16 %v723_v62, %v720_v61  ;;  %8122 = vmatpush3.bf16.msra.mxu1 %v9423_v58  ;;  %8073 = vmatprep.mubr.msk.bf16.mxu1 %vm9617_vm2, %v12883_v1  ;;  %v9869_v7 = vsel %vm1623_vm7, %v1624_v3, %v1626_v4 }
  0xff   : > { %8123 = vmatprep.subr.bf16.mxu1 %v12883_v1 }
 0x100   : > { %v1369_v8 = vrot.slane %v9860_v5, 1  ;;  %v871_v9 = vshll.u32 %v9860_v5, 16  ;;  %v875_v10 = vshrl.u32 %v9860_v5, 16  ;;  %8304 = vmatpush3.bf16.msra.mxu0 %v9428_v2 }
 0x101   : > { %v727_v12 = vpop.f32.mrb[12].mxu0  ;;  %8305 = vmatprep.subr.bf16.mxu0 %v12883_v1 }
 0x102   : > { %v8015_v13 = vpop.f32.mrb[13].mxu0  ;;  %v1370_v14 = vsel %vm1365_vm5, %v1367_v48, %v1369_v8  ;;  %v873_v16 = vrot.slane %v871_v9, 1  ;;  %8124 = vmatpush3.bf16.msra.mxu1 %v9424_v6  ;;  %v1628_v19 = vrot.slane %v875_v10, 7  ;;  %v728_v20 = vadd.f32 %v9826_v30, %v727_v12 }
 0x103   : > { %v730_v18 = vpop.f32.mrb[14].mxu0  ;;  %8194 = vmatmul.mubr.msk.bf16.gmra.mrb[64].mxu0 %vm982_vm4, %v1370_v14  ;;  %8125 = vmatprep.subr.bf16.mxu1 %v12883_v1 }
 0x104   : > { %v731_v21 = vadd.f32 %v9826_v30, %v730_v18  ;;  %v8016_v22 = vpop.f32.mrb[15].mxu0  ;;  %v9887_v23 = vsel %vm854_vm6, %v869_v15, %v873_v16  ;;  %8197 = vmatprep.mubr.msk.bf16.mxu0 %vm9617_vm2, %v12883_v1  ;;  %8306 = vmatpush3.bf16.msra.mxu0 %v9429_v11  ;;  %v1629_v25 = vor.u32 %v1628_v19, %v871_v9 }
 0x105   : > { %8074 = vmatmul.mubr.msk.bf16.gmra.mrb[4].mxu1 %vm982_vm4, %v9887_v23  ;;  %8307 = vmatprep.subr.bf16.mxu0 %v12883_v1  ;;  %v877_v36 = vor.u32 %v875_v10, %v873_v16 }
 0x106   : > { %v9897_v26 = vpack.c.bf16 %v731_v21, %v728_v20  ;;  %8077 = vmatprep.mubr.msk.bf16.mxu1 %vm9617_vm2, %v12883_v1  ;;  %8126 = vmatpush3.bf16.msra.mxu1 %v9425_v17  ;;  %v9906_v28 = vsel %vm1623_vm7, %v1625_v59, %v1629_v25 }
 0x107   : > { %8127 = vmatprep.subr.bf16.mxu1 %v12883_v1  ;;  %12886 = vst [vmem:[#allocation2_spill] sm:$0xff] %v9906_v28 }
 0x108   : > { %v1371_v29 = vrot.slane %v9897_v26, 1  ;;  %v879_v31 = vshll.u32 %v9897_v26, 16  ;;  %v883_v32 = vshrl.u32 %v9897_v26, 16  ;;  %8308 = vmatpush3.bf16.msra.mxu0 %v9430_v24 }
 0x109   : > { %v735_v33 = vpop.f32.mrb[16].mxu0  ;;  %8421 = vmatprep.subr.bf16.mxu0 %v12883_v1 }
 0x10a   : > { %v8019_v34 = vpop.f32.mrb[17].mxu0  ;;  %v1372_v35 = vsel %vm1365_vm5, %v1369_v8, %v1371_v29  ;;  %v881_v38 = vrot.slane %v879_v31, 1  ;;  %8128 = vmatpush3.bf16.msra.mxu1 %v9426_v27  ;;  %v1631_v40 = vrot.slane %v883_v32, 7  ;;  %v736_v41 = vadd.f32 %v9826_v30, %v735_v33 }
 0x10b   : > { %v738_v39 = vpop.f32.mrb[18].mxu0  ;;  %8198 = vmatmul.mubr.msk.bf16.gmra.mrb[68].mxu0 %vm982_vm4, %v1372_v35  ;;  %8241 = vmatprep.subr.bf16.mxu1 %v12883_v1 }
 0x10c   : > { %v739_v42 = vadd.f32 %v9826_v30, %v738_v39  ;;  %v8020_v43 = vpop.f32.mrb[19].mxu0  ;;  %v9918_v44 = vsel %vm854_vm6, %v877_v36, %v881_v38  ;;  %8201 = vmatprep.mubr.msk.bf16.mxu0 %vm9617_vm2, %v12883_v1  ;;  %v1632_v46 = vor.u32 %v1631_v40, %v879_v31  ;;  %v885_v55 = vor.u32 %v883_v32, %v881_v38 }
 0x10d   : > { %8078 = vmatmul.mubr.msk.bf16.gmra.mrb[8].mxu1 %vm982_vm4, %v9918_v44 }
 0x10e   : > { %v9924_v47 = vpack.c.bf16 %v739_v42, %v736_v41  ;;  %8081 = vmatprep.mubr.msk.bf16.mxu1 %vm9617_vm2, %v12883_v1  ;;  %v9929_v48 = vsel %vm1623_vm7, %v1628_v19, %v1632_v46 }
 0x10f   : > { %12887 = vst [vmem:[#allocation3_spill] sm:$0xff] %v9929_v48 }
 0x110   : > { %v1373_v49 = vrot.slane %v9924_v47, 1  ;;  %v887_v50 = vshll.u32 %v9924_v47, 16  ;;  %v891_v51 = vshrl.u32 %v9924_v47, 16 }
 0x111   : > { %v743_v52 = vpop.f32.mrb[20].mxu0 }
 0x112   : > { %v8023_v53 = vpop.f32.mrb[21].mxu0  ;;  %v1374_v54 = vsel %vm1365_vm5, %v1371_v29, %v1373_v49  ;;  %v889_v56 = vrot.slane %v887_v50, 1  ;;  %v1634_v58 = vrot.slane %v891_v51, 7  ;;  %v744_v59 = vadd.f32 %v9826_v30, %v743_v52 }
 0x113   : > { %v746_v57 = vpop.f32.mrb[22].mxu0  ;;  %8202 = vmatmul.mubr.msk.bf16.gmra.mrb[72].mxu0 %vm982_vm4, %v1374_v54 }
 0x114   : > { %v747_v60 = vadd.f32 %v9826_v30, %v746_v57  ;;  %v8024_v61 = vpop.f32.mrb[23].mxu0  ;;  %v9939_v62 = vsel %vm854_vm6, %v885_v55, %v889_v56  ;;  %8205 = vmatprep.mubr.msk.bf16.mxu0 %vm9617_vm2, %v12883_v1  ;;  %v1635_v63 = vor.u32 %v1634_v58, %v887_v50  ;;  %v893_v11 = vor.u32 %v891_v51, %v889_v56 }
 0x115   : > { %8082 = vmatmul.mubr.msk.bf16.gmra.mrb[12].mxu1 %vm982_vm4, %v9939_v62 }
 0x116   : > { %v9945_v0 = vpack.c.bf16 %v747_v60, %v744_v59  ;;  %8085 = vmatprep.mubr.msk.bf16.mxu1 %vm9617_vm2, %v12883_v1  ;;  %v9950_v2 = vsel %vm1623_vm7, %v1631_v40, %v1635_v63 }
 0x117   : > { %12888 = vst [vmem:[#allocation4_spill] sm:$0xff] %v9950_v2 }
 0x118   : > { %v1375_v3 = vrot.slane %v9945_v0, 1  ;;  %v895_v4 = vshll.u32 %v9945_v0, 16  ;;  %v899_v6 = vshrl.u32 %v9945_v0, 16 }
 0x119   : > { %v751_v8 = vpop.f32.mrb[24].mxu0 }
 0x11a   : > { %v8027_v9 = vpop.f32.mrb[25].mxu0  ;;  %v1376_v10 = vsel %vm1365_vm5, %v1373_v49, %v1375_v3  ;;  %v897_v12 = vrot.slane %v895_v4, 1  ;;  %v1637_v14 = vrot.slane %v899_v6, 7  ;;  %v752_v15 = vadd.f32 %v9826_v30, %v751_v8 }
 0x11b   : > { %v754_v13 = vpop.f32.mrb[26].mxu0  ;;  %8206 = vmatmul.mubr.msk.bf16.gmra.mrb[76].mxu0 %vm982_vm4, %v1376_v10 }
 0x11c   : > { %v755_v16 = vadd.f32 %v9826_v30, %v754_v13  ;;  %v8028_v17 = vpop.f32.mrb[27].mxu0  ;;  %v9960_v18 = vsel %vm854_vm6, %v893_v11, %v897_v12  ;;  %8209 = vmatprep.mubr.msk.bf16.mxu0 %vm9617_vm2, %v12883_v1  ;;  %v1638_v19 = vor.u32 %v1637_v14, %v895_v4  ;;  %v901_v32 = vor.u32 %v899_v6, %v897_v12 }
 0x11d   : > { %8086 = vmatmul.mubr.msk.bf16.gmra.mrb[16].mxu1 %vm982_vm4, %v9960_v18 }
 0x11e   : > { %v9966_v20 = vpack.c.bf16 %v755_v16, %v752_v15  ;;  %8089 = vmatprep.mubr.msk.bf16.mxu1 %vm9617_vm2, %v12883_v1  ;;  %v9971_v21 = vsel %vm1623_vm7, %v1634_v58, %v1638_v19 }
 0x11f   : > { %12889 = vst [vmem:[#allocation5_spill] sm:$0xff] %v9971_v21 }
 0x120   : > { %v1377_v22 = vrot.slane %v9966_v20, 1  ;;  %v903_v24 = vshll.u32 %v9966_v20, 16  ;;  %v907_v25 = vshrl.u32 %v9966_v20, 16 }
 0x121   : > { %v759_v27 = vpop.f32.mrb[28].mxu0 }
 0x122   : > { %v8031_v29 = vpop.f32.mrb[29].mxu0  ;;  %v1378_v31 = vsel %vm1365_vm5, %v1375_v3, %v1377_v22  ;;  %v905_v33 = vrot.slane %v903_v24, 1  ;;  %v1640_v35 = vrot.slane %v907_v25, 7  ;;  %v760_v36 = vadd.f32 %v9826_v30, %v759_v27 }
 0x123   : > { %v762_v34 = vpop.f32.mrb[30].mxu0  ;;  %8210 = vmatmul.mubr.msk.bf16.gmra.mrb[80].mxu0 %vm982_vm4, %v1378_v31 }
 0x124   : > { %v763_v38 = vadd.f32 %v9826_v30, %v762_v34  ;;  %v8032_v39 = vpop.f32.mrb[31].mxu0  ;;  %v9981_v40 = vsel %vm854_vm6, %v901_v32, %v905_v33  ;;  %8213 = vmatprep.mubr.msk.bf16.mxu0 %vm9617_vm2, %v12883_v1  ;;  %v1641_v41 = vor.u32 %v1640_v35, %v903_v24  ;;  %v909_v54 = vor.u32 %v907_v25, %v905_v33 }
 0x125   : > { %8090 = vmatmul.mubr.msk.bf16.gmra.mrb[20].mxu1 %vm982_vm4, %v9981_v40 }
 0x126   : > { %v9987_v42 = vpack.c.bf16 %v763_v38, %v760_v36  ;;  %8093 = vmatprep.mubr.msk.bf16.mxu1 %vm9617_vm2, %v12883_v1  ;;  %v9992_v43 = vsel %vm1623_vm7, %v1637_v14, %v1641_v41 }
 0x127   : > { %12890 = vst [vmem:[#allocation6_spill] sm:$0xff] %v9992_v43 }
 0x128   : > { %v1379_v46 = vrot.slane %v9987_v42, 1  ;;  %v911_v49 = vshll.u32 %v9987_v42, 16  ;;  %v915_v50 = vshrl.u32 %v9987_v42, 16 }
 0x129   : > { %v767_v51 = vpop.f32.mrb[32].mxu0 }
 0x12a   : > { %v8035_v52 = vpop.f32.mrb[33].mxu0  ;;  %v1380_v53 = vsel %vm1365_vm5, %v1377_v22, %v1379_v46  ;;  %v913_v55 = vrot.slane %v911_v49, 1  ;;  %v1643_v57 = vrot.slane %v915_v50, 7  ;;  %v768_v58 = vadd.f32 %v9826_v30, %v767_v51 }
 0x12b   : > { %v770_v56 = vpop.f32.mrb[34].mxu0  ;;  %8214 = vmatmul.mubr.msk.bf16.gmra.mrb[84].mxu0 %vm982_vm4, %v1380_v53 }
 0x12c   : > { %v771_v59 = vadd.f32 %v9826_v30, %v770_v56  ;;  %v8036_v60 = vpop.f32.mrb[35].mxu0  ;;  %v10002_v61 = vsel %vm854_vm6, %v909_v54, %v913_v55  ;;  %8217 = vmatprep.mubr.msk.bf16.mxu0 %vm9617_vm2, %v12883_v1  ;;  %v1644_v63 = vor.u32 %v1643_v57, %v911_v49  ;;  %v917_v13 = vor.u32 %v915_v50, %v913_v55 }
 0x12d   : > { %8094 = vmatmul.mubr.msk.bf16.gmra.mrb[24].mxu1 %vm982_vm4, %v10002_v61 }
 0x12e   : > { %v10008_v3 = vpack.c.bf16 %v771_v59, %v768_v58  ;;  %8097 = vmatprep.mubr.msk.bf16.mxu1 %vm9617_vm2, %v12883_v1  ;;  %v10013_v4 = vsel %vm1623_vm7, %v1640_v35, %v1644_v63 }
 0x12f   : > { %12891 = vst [vmem:[#allocation7_spill] sm:$0xff] %v10013_v4 }
 0x130   : > { %v1381_v6 = vrot.slane %v10008_v3, 1  ;;  %v919_v8 = vshll.u32 %v10008_v3, 16  ;;  %v923_v9 = vshrl.u32 %v10008_v3, 16 }
 0x131   : > { %v775_v10 = vpop.f32.mrb[36].mxu0 }
 0x132   : > { %v8039_v11 = vpop.f32.mrb[37].mxu0  ;;  %v1382_v12 = vsel %vm1365_vm5, %v1379_v46, %v1381_v6  ;;  %v921_v14 = vrot.slane %v919_v8, 1  ;;  %v1646_v16 = vrot.slane %v923_v9, 7  ;;  %v776_v17 = vadd.f32 %v9826_v30, %v775_v10 }
 0x133   : > { %v778_v15 = vpop.f32.mrb[38].mxu0  ;;  %8218 = vmatmul.mubr.msk.bf16.gmra.mrb[88].mxu0 %vm982_vm4, %v1382_v12 }
 0x134   : > { %v779_v19 = vadd.f32 %v9826_v30, %v778_v15  ;;  %v8040_v22 = vpop.f32.mrb[39].mxu0  ;;  %v10023_v24 = vsel %vm854_vm6, %v917_v13, %v921_v14  ;;  %8221 = vmatprep.mubr.msk.bf16.mxu0 %vm9617_vm2, %v12883_v1  ;;  %v1647_v25 = vor.u32 %v1646_v16, %v919_v8  ;;  %v925_v38 = vor.u32 %v923_v9, %v921_v14 }
 0x135   : > { %8098 = vmatmul.mubr.msk.bf16.gmra.mrb[28].mxu1 %vm982_vm4, %v10023_v24 }
 0x136   : > { %v10029_v27 = vpack.c.bf16 %v779_v19, %v776_v17  ;;  %8101 = vmatprep.mubr.msk.bf16.mxu1 %vm9617_vm2, %v12883_v1  ;;  %v10034_v29 = vsel %vm1623_vm7, %v1643_v57, %v1647_v25 }
 0x137   : > { %12892 = vst [vmem:[#allocation8_spill] sm:$0xff] %v10034_v29 }
 0x138   : > { %v1383_v31 = vrot.slane %v10029_v27, 1  ;;  %v927_v32 = vshll.u32 %v10029_v27, 16  ;;  %v931_v33 = vshrl.u32 %v10029_v27, 16 }
 0x139   : > { %v783_v34 = vpop.f32.mrb[40].mxu0 }
 0x13a   : > { %v8043_v35 = vpop.f32.mrb[41].mxu0  ;;  %v1384_v36 = vsel %vm1365_vm5, %v1381_v6, %v1383_v31  ;;  %v929_v39 = vrot.slane %v927_v32, 1  ;;  %v1649_v46 = vrot.slane %v931_v33, 7  ;;  %v784_v49 = vadd.f32 %v9826_v30, %v783_v34 }
 0x13b   : > { %v786_v41 = vpop.f32.mrb[42].mxu0  ;;  %8222 = vmatmul.mubr.msk.bf16.gmra.mrb[92].mxu0 %vm982_vm4, %v1384_v36 }
 0x13c   : > { %v787_v50 = vadd.f32 %v9826_v30, %v786_v41  ;;  %v8044_v51 = vpop.f32.mrb[43].mxu0  ;;  %v10044_v52 = vsel %vm854_vm6, %v925_v38, %v929_v39  ;;  %8225 = vmatprep.mubr.msk.bf16.mxu0 %vm9617_vm2, %v12883_v1  ;;  %v1650_v53 = vor.u32 %v1649_v46, %v927_v32  ;;  %v933_v6 = vor.u32 %v931_v33, %v929_v39 }
 0x13d   : > { %12893 = vst [vmem:[#allocation9_spill] sm:$0xff] %v10044_v52  ;;  %8102 = vmatmul.mubr.msk.bf16.gmra.mrb[32].mxu1 %vm982_vm4, %v10044_v52 }
 0x13e   : > { %v10050_v54 = vpack.c.bf16 %v787_v50, %v784_v49  ;;  %8105 = vmatprep.mubr.msk.bf16.mxu1 %vm9617_vm2, %v12883_v1  ;;  %v10055_v55 = vsel %vm1623_vm7, %v1646_v16, %v1650_v53 }
 0x13f   : > { %12895 = vst [vmem:[#allocation11_spill] sm:$0xff] %v10055_v55 }
 0x140   : > { %12894 = vst [vmem:[#allocation10_spill] sm:$0xff] %v10050_v54  ;;  %v1385_v56 = vrot.slane %v10050_v54, 1  ;;  %v935_v57 = vshll.u32 %v10050_v54, 16  ;;  %v939_v58 = vshrl.u32 %v10050_v54, 16 }
 0x141   : > { %v791_v59 = vpop.f32.mrb[44].mxu0 }
 0x142   : > { %v8047_v60 = vpop.f32.mrb[45].mxu0  ;;  %v1386_v63 = vsel %vm1365_vm5, %v1383_v31, %v1385_v56  ;;  %v937_v8 = vrot.slane %v935_v57, 1  ;;  %v1652_v10 = vrot.slane %v939_v58, 7  ;;  %v792_v11 = vadd.f32 %v9826_v30, %v791_v59 }
 0x143   : > { %v794_v9 = vpop.f32.mrb[46].mxu0  ;;  %8226 = vmatmul.mubr.msk.bf16.gmra.mrb[96].mxu0 %vm982_vm4, %v1386_v63 }
 0x144   : > { %v795_v12 = vadd.f32 %v9826_v30, %v794_v9  ;;  %v8048_v13 = vpop.f32.mrb[47].mxu0  ;;  %v10065_v14 = vsel %vm854_vm6, %v933_v6, %v937_v8  ;;  %8229 = vmatprep.mubr.msk.bf16.mxu0 %vm9617_vm2, %v12883_v1  ;;  %v1653_v15 = vor.u32 %v1652_v10, %v935_v57  ;;  %v941_v34 = vor.u32 %v939_v58, %v937_v8 }
 0x145   : > { %12896 = vst [vmem:[#allocation12_spill] sm:$0xff] %v10065_v14  ;;  %8106 = vmatmul.mubr.msk.bf16.gmra.mrb[36].mxu1 %vm982_vm4, %v10065_v14 }
 0x146   : > { %v10071_v16 = vpack.c.bf16 %v795_v12, %v792_v11  ;;  %8109 = vmatprep.mubr.msk.bf16.mxu1 %vm9617_vm2, %v12883_v1  ;;  %v10076_v17 = vsel %vm1623_vm7, %v1649_v46, %v1653_v15 }
 0x147   : > { %12898 = vst [vmem:[#allocation14_spill] sm:$0xff] %v10076_v17 }
 0x148   : > { %12897 = vst [vmem:[#allocation13_spill] sm:$0xff] %v10071_v16  ;;  %v1387_v19 = vrot.slane %v10071_v16, 1  ;;  %v943_v22 = vshll.u32 %v10071_v16, 16  ;;  %v947_v25 = vshrl.u32 %v10071_v16, 16 }
 0x149   : > { %v799_v31 = vpop.f32.mrb[48].mxu0 }
 0x14a   : > { %v8051_v32 = vpop.f32.mrb[49].mxu0  ;;  %v1388_v33 = vsel %vm1365_vm5, %v1385_v56, %v1387_v19  ;;  %v945_v35 = vrot.slane %v943_v22, 1  ;;  %v1655_v38 = vrot.slane %v947_v25, 7  ;;  %v800_v39 = vadd.f32 %v9826_v30, %v799_v31 }
 0x14b   : > { %v802_v36 = vpop.f32.mrb[50].mxu0  ;;  %8230 = vmatmul.mubr.msk.bf16.gmra.mrb[100].mxu0 %vm982_vm4, %v1388_v33 }
 0x14c   : > { %v803_v41 = vadd.f32 %v9826_v30, %v802_v36  ;;  %v8052_v46 = vpop.f32.mrb[51].mxu0  ;;  %v10086_v49 = vsel %vm854_vm6, %v941_v34, %v945_v35  ;;  %8233 = vmatprep.mubr.msk.bf16.mxu0 %vm9617_vm2, %v12883_v1  ;;  %v1656_v50 = vor.u32 %v1655_v38, %v943_v22  ;;  %v949_v8 = vor.u32 %v947_v25, %v945_v35 }
 0x14d   : > { %12899 = vst [vmem:[#allocation15_spill] sm:$0xff] %v10086_v49  ;;  %8110 = vmatmul.mubr.msk.bf16.gmra.mrb[40].mxu1 %vm982_vm4, %v10086_v49  ;;  %v9436_v46 = vld [vmem:[%s12847_s3 + $0xc8] sm:$0xff]  }
 0x14e   : > { %v10092_v51 = vpack.c.bf16 %v803_v41, %v800_v39  ;;  %8113 = vmatprep.mubr.msk.bf16.mxu1 %vm9617_vm2, %v12883_v1  ;;  %v10097_v53 = vsel %vm1623_vm7, %v1652_v10, %v1656_v50  ;;  %v9435_v39 = vld [vmem:[%s12847_s3 + $0xc0] sm:$0xff]   ;;  %v9432_v50 = vld [vmem:[%s12847_s3 + $0x68] sm:$0xff]  }
 0x14f   : > { %12901 = vst [vmem:[#allocation17_spill] sm:$0xff] %v10097_v53  ;;  %v9431_v41 = vld [vmem:[%s12847_s3 + $0x60] sm:$0xff]  }
 0x150   : > { %12900 = vst [vmem:[#allocation16_spill] sm:$0xff] %v10092_v51  ;;  %v1389_v56 = vrot.slane %v10092_v51, 1  ;;  %v951_v57 = vshll.u32 %v10092_v51, 16  ;;  %v955_v58 = vshrl.u32 %v10092_v51, 16 }
 0x151   : > { %v807_v59 = vpop.f32.mrb[52].mxu0 }
 0x152   : > { %v808_v60 = vadd.f32 %v9826_v30, %v807_v59  ;;  %v8055_v63 = vpop.f32.mrb[53].mxu0  ;;  %v1390_v6 = vsel %vm1365_vm5, %v1387_v19, %v1389_v56  ;;  %v953_v9 = vrot.slane %v951_v57, 1  ;;  %v10105_v12 = vrot.slane %v955_v58, 7 }
 0x153   : > { %v810_v11 = vpop.f32.mrb[54].mxu0  ;;  %8234 = vmatmul.mubr.msk.bf16.gmra.mrb[104].mxu0 %vm982_vm4, %v1390_v6  ;;  %v2302_v59 = vrot.slane %v9860_v5, 7  ;;  %v9443_v63 = vld [vmem:[%s12847_s3 + $0x100] sm:$0xff]  }
 0x154   : > { %v811_v10 = vadd.f32 %v9826_v30, %v810_v11  ;;  %v10109_v13 = vsel %vm854_vm6, %v949_v8, %v953_v9  ;;  %8237 = vmatprep.mubr.msk.bf16.mxu0 %vm9617_vm2, %v12883_v1  ;;  %v8056_v15 = vpop.f32.mrb[55].mxu0  ;;  %v1659_v19 = vor.u32 %v10105_v12, %v951_v57  ;;  %v957_v32 = vor.u32 %v955_v58, %v953_v9  ;;  %v9438_v57 = vld [vmem:[%s12847_s3 + $0xd8] sm:$0xff]   ;;  %v9439_v8 = vld [vmem:[%s12847_s3 + $0xa0] sm:$0xff]  }
 0x155   : > { %12902 = vst [vmem:[#allocation18_spill] sm:$0xff] %v10109_v13  ;;  %8114 = vmatmul.mubr.msk.bf16.gmra.mrb[44].mxu1 %vm982_vm4, %v10109_v13  ;;  %v9434_v58 = vld [vmem:[%s12847_s3 + $0x78] sm:$0xff]   ;;  %v2304_v11 = vrot.slane %v9897_v26, 7 }
 0x156   : > { %v10116_v22 = vpack.c.bf16 %v811_v10, %v808_v60  ;;  %8117 = vmatprep.mubr.msk.bf16.mxu1 %vm9617_vm2, %v12883_v1  ;;  %v10121_v25 = vsel %vm1623_vm7, %v1655_v38, %v1659_v19  ;;  %v2301_v60 = vrot.slane %v9835_v45, 7  ;;  %v9440_v10 = vld [vmem:[%s12847_s3 + $0xa8] sm:$0xff]  }
 0x157   : > { %12903 = vst [vmem:[#allocation19_spill] sm:$0xff] %v10121_v25 }
 0x158   : > { %v12860_v30 = vshll.u32 %v10116_v22, 16  ;;  %v2303_v6 = vsel %vm821_vm8, %v2301_v60, %v2302_v59 }
 0x159   : > { %v10124_v31 = vpop.f32.mrb[56].mxu0 }
 0x15a   : > { %v8059_v33 = vpop.f32.mrb[57].mxu0  ;;  %v10128_v34 = vrot.slane %v12860_v30, 1 }
 0x15b   : > { %8238 = vmatmul.mubr.msk.bf16.gmra.mrb[108].mxu0 %vm982_vm4, %v1389_v56  ;;  %v818_v35 = vpop.f32.mrb[58].mxu0  ;;  %v9437_v56 = vld [vmem:[%s12847_s3 + $0xd0] sm:$0xff]  }
 0x15c   : > { %12904 = vst [vmem:[#allocation20_spill] sm:$0xff] %v10128_v34  ;;  %8309 = vmatprep.mubr.msk.bf16.mxu0 %vm9617_vm2, %v12883_v1  ;;  %v8060_v36 = vpop.f32.mrb[59].mxu0  ;;  %v10135_v38 = vsel %vm854_vm6, %v957_v32, %v10128_v34 }
 0x15d   : > { %12905 = vst [vmem:[#allocation21_spill] sm:$0xff] %v10135_v38  ;;  %8118 = vmatmul.mubr.msk.bf16.gmra.mrb[48].mxu1 %vm982_vm4, %v957_v32  ;;  %v9445_v32 = vld [vmem:[%s12847_s3 + $0x110] sm:$0xff]  }
 0x15e   : > { %8129 = vmatprep.mubr.msk.bf16.mxu1 %vm9617_vm2, %v12883_v1 }
 0x163   : > { %8310 = vmatmul.mubr.msk.bf16.vlgmr.msra.gmra.mrb[112].mxu0 %vm982_vm4, %v9835_v45 }
 0x164   : > { %8313 = vmatprep.mubr.msk.bf16.mxu0 %vm9617_vm2, %v12883_v1  ;;  %8422 = vmatpush3.bf16.msra.mxu0 %v9435_v39  ;;  %v2305_v39 = vsel %vm821_vm8, %v2302_v59, %v2304_v11 }
 0x165   : > { %8130 = vmatmul.mubr.msk.bf16.vlgmr.msra.gmra.mrb[52].mxu1 %vm982_vm4, %v9830_v37  ;;  %8423 = vmatprep.subr.bf16.mxu0 %v12883_v1  ;;  %v9433_v37 = vld [vmem:[%s12847_s3 + $0x70] sm:$0xff]  }
 0x166   : > { %8242 = vmatpush3.bf16.msra.mxu1 %v9431_v41  ;;  %8133 = vmatprep.mubr.msk.bf16.mxu1 %vm9617_vm2, %v12883_v1  ;;  %v9441_v41 = vld [vmem:[%s12847_s3 + $0xb0] sm:$0xff]  }
 0x167   : > { %8243 = vmatprep.subr.bf16.mxu1 %v12883_v1 }
 0x168   : > { %8424 = vmatpush3.bf16.msra.mxu0 %v9436_v46 }
 0x169   : > { %8425 = vmatprep.subr.bf16.mxu0 %v12883_v1 }
 0x16a   : > { %8244 = vmatpush3.bf16.msra.mxu1 %v9432_v50  ;;  %v9446_v50 = vld [vmem:[%s12847_s3 + $0x118] sm:$0xff]  }
 0x16b   : > { %8314 = vmatmul.mubr.msk.bf16.gmra.mrb[116].mxu0 %vm982_vm4, %v9860_v5  ;;  %8245 = vmatprep.subr.bf16.mxu1 %v12883_v1 }
 0x16c   : > { %8317 = vmatprep.mubr.msk.bf16.mxu0 %vm9617_vm2, %v12883_v1  ;;  %8426 = vmatpush3.bf16.msra.mxu0 %v9437_v56 }
 0x16d   : > { %8134 = vmatmul.mubr.msk.bf16.gmra.mrb[56].mxu1 %vm982_vm4, %v9835_v45  ;;  %8427 = vmatprep.subr.bf16.mxu0 %v12883_v1  ;;  %v9444_v45 = vld [vmem:[%s12847_s3 + $0x108] sm:$0xff]  }
 0x16e   : > { %8137 = vmatprep.mubr.msk.bf16.mxu1 %vm9617_vm2, %v12883_v1  ;;  %8246 = vmatpush3.bf16.msra.mxu1 %v9433_v37  ;;  %v2306_v37 = vrot.slane %v9924_v47, 7 }
 0x16f   : > { %8247 = vmatprep.subr.bf16.mxu1 %v12883_v1 }
 0x170   : > { %8428 = vmatpush3.bf16.msra.mxu0 %v9438_v57  ;;  %v9442_v57 = vld [vmem:[%s12847_s3 + $0xb8] sm:$0xff]  }
 0x171   : > { %8541 = vmatprep.subr.bf16.mxu0 %v12883_v1 }
 0x172   : > { %8248 = vmatpush3.bf16.msra.mxu1 %v9434_v58 }
 0x173   : > { %8318 = vmatmul.mubr.msk.bf16.gmra.mrb[120].mxu0 %vm982_vm4, %v9897_v26  ;;  %8361 = vmatprep.subr.bf16.mxu1 %v12883_v1 }
 0x174   : > { %8321 = vmatprep.mubr.msk.bf16.mxu0 %vm9617_vm2, %v12883_v1 }
 0x175   : > { %8138 = vmatmul.mubr.msk.bf16.gmra.mrb[60].mxu1 %vm982_vm4, %v9860_v5 }
 0x176   : > { %8141 = vmatprep.mubr.msk.bf16.mxu1 %vm9617_vm2, %v12883_v1 }
 0x17b   : > { %8322 = vmatmul.mubr.msk.bf16.gmra.mrb[124].mxu0 %vm982_vm4, %v9924_v47 }
 0x17c   : > { %8325 = vmatprep.mubr.msk.bf16.mxu0 %vm9617_vm2, %v12883_v1 }
 0x17d   : > { %8142 = vmatmul.mubr.msk.bf16.gmra.mrb[64].mxu1 %vm982_vm4, %v9897_v26 }
 0x17e   : > { %8145 = vmatprep.mubr.msk.bf16.mxu1 %vm9617_vm2, %v12883_v1 }
 0x183   : > { %8326 = vmatmul.mubr.msk.bf16.gmra.mrb[128].mxu0 %vm982_vm4, %v9945_v0 }
 0x184   : > { %8329 = vmatprep.mubr.msk.bf16.mxu0 %vm9617_vm2, %v12883_v1 }
 0x185   : > { %8146 = vmatmul.mubr.msk.bf16.gmra.mrb[68].mxu1 %vm982_vm4, %v9924_v47 }
 0x186   : > { %8149 = vmatprep.mubr.msk.bf16.mxu1 %vm9617_vm2, %v12883_v1 }
 0x18b   : > { %8330 = vmatmul.mubr.msk.bf16.gmra.mrb[132].mxu0 %vm982_vm4, %v9966_v20 }
 0x18c   : > { %8333 = vmatprep.mubr.msk.bf16.mxu0 %vm9617_vm2, %v12883_v1 }
 0x18d   : > { %8150 = vmatmul.mubr.msk.bf16.gmra.mrb[72].mxu1 %vm982_vm4, %v9945_v0 }
 0x18e   : > { %8153 = vmatprep.mubr.msk.bf16.mxu1 %vm9617_vm2, %v12883_v1 }
 0x193   : > { %8334 = vmatmul.mubr.msk.bf16.gmra.mrb[136].mxu0 %vm982_vm4, %v9987_v42 }
 0x194   : > { %8337 = vmatprep.mubr.msk.bf16.mxu0 %vm9617_vm2, %v12883_v1 }
 0x195   : > { %8154 = vmatmul.mubr.msk.bf16.gmra.mrb[76].mxu1 %vm982_vm4, %v9966_v20 }
 0x196   : > { %8157 = vmatprep.mubr.msk.bf16.mxu1 %vm9617_vm2, %v12883_v1 }
 0x19b   : > { %8338 = vmatmul.mubr.msk.bf16.gmra.mrb[140].mxu0 %vm982_vm4, %v10008_v3 }
 0x19c   : > { %8341 = vmatprep.mubr.msk.bf16.mxu0 %vm9617_vm2, %v12883_v1 }
 0x19d   : > { %8158 = vmatmul.mubr.msk.bf16.gmra.mrb[80].mxu1 %vm982_vm4, %v9987_v42 }
 0x19e   : > { %8161 = vmatprep.mubr.msk.bf16.mxu1 %vm9617_vm2, %v12883_v1 }
 0x1a3   : > { %8342 = vmatmul.mubr.msk.bf16.gmra.mrb[144].mxu0 %vm982_vm4, %v10029_v27 }
 0x1a4   : > { %8345 = vmatprep.mubr.msk.bf16.mxu0 %vm9617_vm2, %v12883_v1 }
 0x1a5   : > { %8162 = vmatmul.mubr.msk.bf16.gmra.mrb[84].mxu1 %vm982_vm4, %v10008_v3 }
 0x1a6   : > { %8165 = vmatprep.mubr.msk.bf16.mxu1 %vm9617_vm2, %v12883_v1 }
 0x1ab   : > { %8346 = vmatmul.mubr.msk.bf16.gmra.mrb[148].mxu0 %vm982_vm4, %v10050_v54 }
 0x1ac   : > { %8349 = vmatprep.mubr.msk.bf16.mxu0 %vm9617_vm2, %v12883_v1 }
 0x1ad   : > { %8166 = vmatmul.mubr.msk.bf16.gmra.mrb[88].mxu1 %vm982_vm4, %v10029_v27 }
 0x1ae   : > { %8169 = vmatprep.mubr.msk.bf16.mxu1 %vm9617_vm2, %v12883_v1 }
 0x1b3   : > { %8350 = vmatmul.mubr.msk.bf16.gmra.mrb[152].mxu0 %vm982_vm4, %v10071_v16 }
 0x1b4   : > { %8353 = vmatprep.mubr.msk.bf16.mxu0 %vm9617_vm2, %v12883_v1 }
 0x1b5   : > { %8170 = vmatmul.mubr.msk.bf16.gmra.mrb[92].mxu1 %vm982_vm4, %v10050_v54 }
 0x1b6   : > { %8173 = vmatprep.mubr.msk.bf16.mxu1 %vm9617_vm2, %v12883_v1 }
 0x1bb   : > { %8354 = vmatmul.mubr.msk.bf16.gmra.mrb[156].mxu0 %vm982_vm4, %v10092_v51 }
 0x1bc   : > { %8357 = vmatprep.mubr.msk.bf16.mxu0 %vm9617_vm2, %v12883_v1 }
 0x1bd   : > { %8174 = vmatmul.mubr.msk.bf16.gmra.mrb[96].mxu1 %vm982_vm4, %v10071_v16 }
 0x1be   : > { %8177 = vmatprep.mubr.msk.bf16.mxu1 %vm9617_vm2, %v12883_v1 }
 0x1c3   : > { %8358 = vmatmul.mubr.msk.bf16.gmra.mrb[160].mxu0 %vm982_vm4, %v10116_v22 }
 0x1c4   : > { %8429 = vmatprep.mubr.msk.bf16.mxu0 %vm9617_vm2, %v12883_v1 }
 0x1c5   : > { %8178 = vmatmul.mubr.msk.bf16.gmra.mrb[100].mxu1 %vm982_vm4, %v10092_v51 }
 0x1c6   : > { %8249 = vmatprep.mubr.msk.bf16.mxu1 %vm9617_vm2, %v12883_v1 }
 0x1cb   : > { %8430 = vmatmul.mubr.msk.bf16.vlgmr.msra.gmra.mrb[164].mxu0 %vm982_vm4, %v2303_v6 }
 0x1cc   : > { %8433 = vmatprep.mubr.msk.bf16.mxu0 %vm9617_vm2, %v12883_v1  ;;  %8542 = vmatpush3.bf16.msra.mxu0 %v9443_v63 }
 0x1cd   : > { %8250 = vmatmul.mubr.msk.bf16.vlgmr.msra.gmra.mrb[104].mxu1 %vm982_vm4, %v9869_v7  ;;  %8543 = vmatprep.subr.bf16.mxu0 %v12883_v1 }
 0x1ce   : > { %8362 = vmatpush3.bf16.msra.mxu1 %v9439_v8  ;;  %v10294_v9 = vpop.f32.mrb[60].mxu0  ;;  %8253 = vmatprep.mubr.msk.bf16.mxu1 %vm9617_vm2, %v12883_v1 }
 0x1cf   : > { %v8191_v15 = vpop.f32.mrb[61].mxu0  ;;  %8363 = vmatprep.subr.bf16.mxu1 %v12883_v1 }
 0x1d0   : > { %v10303_v19 = vpop.f32.mrb[0].mxu1  ;;  %v10305_v7 = vpop.f32.mrb[62].mxu0  ;;  %8544 = vmatpush3.bf16.msra.mxu0 %v9444_v45  ;;  %v2307_v45 = vsel %vm821_vm8, %v2304_v11, %v2306_v37 }
 0x1d1   : > { %v8071_v33 = vpop.f32.mrb[1].mxu1  ;;  %v8192_v35 = vpop.f32.mrb[63].mxu0  ;;  %8545 = vmatprep.subr.bf16.mxu0 %v12883_v1 }
 0x1d2   : > { %v10311_v36 = vpop.f32.mrb[2].mxu1  ;;  %8364 = vmatpush3.bf16.msra.mxu1 %v9440_v10 }
 0x1d3   : > { %v8072_v46 = vpop.f32.mrb[3].mxu1  ;;  %8434 = vmatmul.mubr.msk.bf16.gmra.mrb[168].mxu0 %vm982_vm4, %v2305_v39  ;;  %8365 = vmatprep.subr.bf16.mxu1 %v12883_v1 }
 0x1d4   : > { %8437 = vmatprep.mubr.msk.bf16.mxu0 %vm9617_vm2, %v12883_v1  ;;  %8546 = vmatpush3.bf16.msra.mxu0 %v9445_v32  ;;  %v2308_v32 = vrot.slane %v9945_v0, 7 }
 0x1d5   : > { %8254 = vmatmul.mubr.msk.bf16.gmra.mrb[108].mxu1 %vm982_vm4, %v9906_v28  ;;  %8547 = vmatprep.subr.bf16.mxu0 %v12883_v1 }
 0x1d6   : > { %v10327_v56 = vpop.f32.mrb[64].mxu0  ;;  %8257 = vmatprep.mubr.msk.bf16.mxu1 %vm9617_vm2, %v12883_v1  ;;  %8366 = vmatpush3.bf16.msra.mxu1 %v9441_v41 }
 0x1d7   : > { %v8195_v58 = vpop.f32.mrb[65].mxu0  ;;  %8367 = vmatprep.subr.bf16.mxu1 %v12883_v1 }
 0x1d8   : > { %v10336_v59 = vpop.f32.mrb[4].mxu1  ;;  %v10338_v60 = vpop.f32.mrb[66].mxu0  ;;  %8548 = vmatpush3.bf16.msra.mxu0 %v9446_v50  ;;  %v2309_v50 = vsel %vm821_vm8, %v2306_v37, %v2308_v32 }
 0x1d9   : > { %v8075_v63 = vpop.f32.mrb[5].mxu1  ;;  %v8196_v6 = vpop.f32.mrb[67].mxu0  ;;  %8653 = vmatprep.subr.bf16.mxu0 %v12883_v1 }
 0x1da   : > { %v10341_v8 = vpop.f32.mrb[6].mxu1  ;;  %8368 = vmatpush3.bf16.msra.mxu1 %v9442_v57  ;;  %v2310_v63 = vrot.slane %v9966_v20, 7 }
 0x1db   : > { %v8076_v10 = vpop.f32.mrb[7].mxu1  ;;  %8438 = vmatmul.mubr.msk.bf16.gmra.mrb[172].mxu0 %vm982_vm4, %v2307_v45  ;;  %8481 = vmatprep.subr.bf16.mxu1 %v12883_v1 }
 0x1dc   : > { %8441 = vmatprep.mubr.msk.bf16.mxu0 %vm9617_vm2, %v12883_v1 }
 0x1dd   : > { %8258 = vmatmul.mubr.msk.bf16.gmra.mrb[112].mxu1 %vm982_vm4, %v9929_v48 }
 0x1de   : > { %v10350_v15 = vpop.f32.mrb[68].mxu0  ;;  %8261 = vmatprep.mubr.msk.bf16.mxu1 %vm9617_vm2, %v12883_v1 }
 0x1df   : > { %v8199_v11 = vpop.f32.mrb[69].mxu0 }
 0x1e0   : > { %v10355_v33 = vpop.f32.mrb[8].mxu1  ;;  %v10357_v35 = vpop.f32.mrb[70].mxu0 }
 0x1e1   : > { %v8079_v39 = vpop.f32.mrb[9].mxu1  ;;  %v8200_v41 = vpop.f32.mrb[71].mxu0 }
 0x1e2   : > { %v10359_v46 = vpop.f32.mrb[10].mxu1  ;;  %v2311_v41 = vsel %vm821_vm8, %v2308_v32, %v2310_v63 }
 0x1e3   : > { %v8080_v57 = vpop.f32.mrb[11].mxu1  ;;  %8442 = vmatmul.mubr.msk.bf16.gmra.mrb[176].mxu0 %vm982_vm4, %v2309_v50 }
 0x1e4   : > { %8445 = vmatprep.mubr.msk.bf16.mxu0 %vm9617_vm2, %v12883_v1 }
 0x1e5   : > { %8262 = vmatmul.mubr.msk.bf16.gmra.mrb[116].mxu1 %vm982_vm4, %v9950_v2 }
 0x1e6   : > { %v10367_v58 = vpop.f32.mrb[72].mxu0  ;;  %8265 = vmatprep.mubr.msk.bf16.mxu1 %vm9617_vm2, %v12883_v1 }
 0x1e7   : > { %v8203_v6 = vpop.f32.mrb[73].mxu0 }
 0x1e8   : > { %v10372_v45 = vpop.f32.mrb[12].mxu1  ;;  %v10374_v37 = vpop.f32.mrb[74].mxu0  ;;  %v2312_v6 = vrot.slane %v9987_v42, 7 }
 0x1e9   : > { %v8083_v10 = vpop.f32.mrb[13].mxu1  ;;  %v8204_v11 = vpop.f32.mrb[75].mxu0 }
 0x1ea   : > { %v10376_v39 = vpop.f32.mrb[14].mxu1  ;;  %v2313_v2 = vsel %vm821_vm8, %v2310_v63, %v2312_v6 }
 0x1eb   : > { %v8084_v50 = vpop.f32.mrb[15].mxu1  ;;  %8446 = vmatmul.mubr.msk.bf16.gmra.mrb[180].mxu0 %vm982_vm4, %v2311_v41 }
 0x1ec   : > { %8449 = vmatprep.mubr.msk.bf16.mxu0 %vm9617_vm2, %v12883_v1 }
 0x1ed   : > { %8266 = vmatmul.mubr.msk.bf16.gmra.mrb[120].mxu1 %vm982_vm4, %v9971_v21  ;;  %v2314_v21 = vrot.slane %v10008_v3, 7 }
 0x1ee   : > { %v10384_v57 = vpop.f32.mrb[76].mxu0  ;;  %8269 = vmatprep.mubr.msk.bf16.mxu1 %vm9617_vm2, %v12883_v1 }
 0x1ef   : > { %v8207_v10 = vpop.f32.mrb[77].mxu0  ;;  %v2315_v34 = vsel %vm821_vm8, %v2312_v6, %v2314_v21 }
 0x1f0   : > { %v10389_v11 = vpop.f32.mrb[16].mxu1  ;;  %v10391_v32 = vpop.f32.mrb[78].mxu0 }
 0x1f1   : > { %v8087_v50 = vpop.f32.mrb[17].mxu1  ;;  %v8208_v41 = vpop.f32.mrb[79].mxu0 }
 0x1f2   : > { %v10393_v30 = vpop.f32.mrb[18].mxu1 }
 0x1f3   : > { %v8088_v48 = vpop.f32.mrb[19].mxu1  ;;  %8450 = vmatmul.mubr.msk.bf16.gmra.mrb[184].mxu0 %vm982_vm4, %v2313_v2 }
 0x1f4   : > { %8453 = vmatprep.mubr.msk.bf16.mxu0 %vm9617_vm2, %v12883_v1 }
 0x1f5   : > { %8270 = vmatmul.mubr.msk.bf16.gmra.mrb[124].mxu1 %vm982_vm4, %v9992_v43  ;;  %v2316_v43 = vrot.slane %v10029_v27, 7 }
 0x1f6   : > { %v10401_v10 = vpop.f32.mrb[80].mxu0  ;;  %8273 = vmatprep.mubr.msk.bf16.mxu1 %vm9617_vm2, %v12883_v1 }
 0x1f7   : > { %v8211_v50 = vpop.f32.mrb[81].mxu0  ;;  %v2317_v49 = vsel %vm821_vm8, %v2314_v21, %v2316_v43 }
 0x1f8   : > { %v10406_v41 = vpop.f32.mrb[20].mxu1  ;;  %v10408_v63 = vpop.f32.mrb[82].mxu0 }
 0x1f9   : > { %v8091_v48 = vpop.f32.mrb[21].mxu1  ;;  %v8212_v2 = vpop.f32.mrb[83].mxu0 }
 0x1fa   : > { %v10410_v28 = vpop.f32.mrb[22].mxu1 }
 0x1fb   : > { %v8092_v38 = vpop.f32.mrb[23].mxu1  ;;  %8454 = vmatmul.mubr.msk.bf16.gmra.mrb[188].mxu0 %vm982_vm4, %v2315_v34 }
 0x1fc   : > { %8457 = vmatprep.mubr.msk.bf16.mxu0 %vm9617_vm2, %v12883_v1 }
 0x1fd   : > { %8274 = vmatmul.mubr.msk.bf16.gmra.mrb[128].mxu1 %vm982_vm4, %v10013_v4  ;;  %v2318_v4 = vrot.slane %v10050_v54, 7 }
 0x1fe   : > { %v10418_v50 = vpop.f32.mrb[84].mxu0  ;;  %8277 = vmatprep.mubr.msk.bf16.mxu1 %vm9617_vm2, %v12883_v1 }
 0x1ff   : > { %12906 = vst [vmem:[#allocation22_spill] sm:$0xff] %v10418_v50  ;;  %v8215_v48 = vpop.f32.mrb[85].mxu0  ;;  %v2319_v52 = vsel %vm821_vm8, %v2316_v43, %v2318_v4 }
 0x200   : > { %v10423_v2 = vpop.f32.mrb[24].mxu1  ;;  %v10425_v6 = vpop.f32.mrb[86].mxu0 }
 0x201   : > { %12907 = vst [vmem:[#allocation23_spill] sm:$0xff] %v10425_v6  ;;  %v8095_v38 = vpop.f32.mrb[25].mxu1  ;;  %v8216_v34 = vpop.f32.mrb[87].mxu0 }
 0x202   : > { %v10427_v13 = vpop.f32.mrb[26].mxu1 }
 0x203   : > { %v8096_v14 = vpop.f32.mrb[27].mxu1  ;;  %8458 = vmatmul.mubr.msk.bf16.gmra.mrb[192].mxu0 %vm982_vm4, %v2317_v49 }
 0x204   : > { %8461 = vmatprep.mubr.msk.bf16.mxu0 %vm9617_vm2, %v12883_v1 }
 0x205   : > { %8278 = vmatmul.mubr.msk.bf16.gmra.mrb[132].mxu1 %vm982_vm4, %v10034_v29  ;;  %v2320_v29 = vrot.slane %v10071_v16, 7 }
 0x206   : > { %v10435_v48 = vpop.f32.mrb[88].mxu0  ;;  %8281 = vmatprep.mubr.msk.bf16.mxu1 %vm9617_vm2, %v12883_v1 }
 0x207   : > { %12908 = vst [vmem:[#allocation24_spill] sm:$0xff] %v10435_v48  ;;  %v8219_v38 = vpop.f32.mrb[89].mxu0  ;;  %v2321_v48 = vsel %vm821_vm8, %v2318_v4, %v2320_v29 }
 0x208   : > { %v10440_v34 = vpop.f32.mrb[28].mxu1  ;;  %v10442_v21 = vpop.f32.mrb[90].mxu0 }
 0x209   : > { %12909 = vst [vmem:[#allocation25_spill] sm:$0xff] %v10442_v21  ;;  %v8099_v14 = vpop.f32.mrb[29].mxu1  ;;  %v8220_v49 = vpop.f32.mrb[91].mxu0 }
 0x20a   : > { %v10444_v6 = vpop.f32.mrb[30].mxu1 }
 0x20b   : > { %v8100_v50 = vpop.f32.mrb[31].mxu1  ;;  %8462 = vmatmul.mubr.msk.bf16.gmra.mrb[196].mxu0 %vm982_vm4, %v2319_v52 }
 0x20c   : > { %8465 = vmatprep.mubr.msk.bf16.mxu0 %vm9617_vm2, %v12883_v1 }
 0x20d   : > { %8282 = vmatmul.mubr.msk.bf16.gmra.mrb[136].mxu1 %vm982_vm4, %v10055_v55  ;;  %v2322_v55 = vrot.slane %v10092_v51, 7 }
 0x20e   : > { %v10452_v38 = vpop.f32.mrb[92].mxu0  ;;  %8285 = vmatprep.mubr.msk.bf16.mxu1 %vm9617_vm2, %v12883_v1 }
 0x20f   : > { %12910 = vst [vmem:[#allocation26_spill] sm:$0xff] %v10452_v38  ;;  %v8223_v14 = vpop.f32.mrb[93].mxu0  ;;  %v2323_v38 = vsel %vm821_vm8, %v2320_v29, %v2322_v55 }
 0x210   : > { %v10457_v49 = vpop.f32.mrb[32].mxu1  ;;  %v10459_v43 = vpop.f32.mrb[94].mxu0 }
 0x211   : > { %12911 = vst [vmem:[#allocation27_spill] sm:$0xff] %v10459_v43  ;;  %v8103_v50 = vpop.f32.mrb[33].mxu1  ;;  %v8224_v52 = vpop.f32.mrb[95].mxu0 }
 0x212   : > { %v10461_v21 = vpop.f32.mrb[34].mxu1 }
 0x213   : > { %v8104_v54 = vpop.f32.mrb[35].mxu1  ;;  %8466 = vmatmul.mubr.msk.bf16.gmra.mrb[200].mxu0 %vm982_vm4, %v2321_v48 }
 0x214   : > { %8469 = vmatprep.mubr.msk.bf16.mxu0 %vm9617_vm2, %v12883_v1 }
 0x215   : > { %8286 = vmatmul.mubr.msk.bf16.gmra.mrb[140].mxu1 %vm982_vm4, %v10076_v17 }
 0x216   : > { %v10469_v14 = vpop.f32.mrb[96].mxu0  ;;  %8289 = vmatprep.mubr.msk.bf16.mxu1 %vm9617_vm2, %v12883_v1 }
 0x217   : > { %12912 = vst [vmem:[#allocation28_spill] sm:$0xff] %v10469_v14  ;;  %v8227_v50 = vpop.f32.mrb[97].mxu0 }
 0x218   : > { %v10474_v52 = vpop.f32.mrb[36].mxu1  ;;  %v10476_v4 = vpop.f32.mrb[98].mxu0  ;;  %v9605_v50 = vld [vmem:[%s12846_s2] ss:$0 sm:$0xff] }
 0x219   : > { %12913 = vst [vmem:[#allocation29_spill] sm:$0xff] %v10476_v4  ;;  %v8107_v54 = vpop.f32.mrb[37].mxu1  ;;  %v8228_v48 = vpop.f32.mrb[99].mxu0  ;;  %v816_v17 = vadd.f32 %v9605_v50, %v10124_v31  ;;  %v12879_v4 = vshrl.u32 %v10116_v22, 16 }
 0x21a   : > { %v10478_v43 = vpop.f32.mrb[38].mxu1  ;;  %v2324_v48 = vrot.slane %v10116_v22, 7 }
 0x21b   : > { %12914 = vst [vmem:[#allocation30_spill] sm:$0xff] %v10478_v43  ;;  %v8108_v16 = vpop.f32.mrb[39].mxu1  ;;  %8470 = vmatmul.mubr.msk.bf16.gmra.mrb[204].mxu0 %vm982_vm4, %v2323_v38  ;;  %v822_v14 = vsel %vm821_vm8, %v816_v17, 0.0 }
 0x21c   : > { %8473 = vmatprep.mubr.msk.bf16.mxu0 %vm9617_vm2, %v12883_v1  ;;  %v10506_v43 = vpack.c.bf16 %v12883_v1, %v822_v14 }
 0x21d   : > { %8290 = vmatmul.mubr.msk.bf16.gmra.mrb[144].mxu1 %vm982_vm4, %v10097_v53  ;;  %v2325_v53 = vsel %vm821_vm8, %v2322_v55, %v2324_v48 }
 0x21e   : > { %v10490_v54 = vpop.f32.mrb[100].mxu0  ;;  %8293 = vmatprep.mubr.msk.bf16.mxu1 %vm9617_vm2, %v12883_v1  ;;  %v2326_v55 = vrot.slane %v10506_v43, 7 }
 0x21f   : > { %12915 = vst [vmem:[#allocation31_spill] sm:$0xff] %v10490_v54  ;;  %v8231_v29 = vpop.f32.mrb[101].mxu0 }
 0x220   : > { %v10495_v16 = vpop.f32.mrb[40].mxu1  ;;  %v10497_v38 = vpop.f32.mrb[102].mxu0  ;;  %v10512_v29 = vrot.slane %v12879_v4, 7 }
 0x221   : > { %12916 = vst [vmem:[#allocation32_spill] sm:$0xff] %v10497_v38  ;;  %v8111_v31 = vpop.f32.mrb[41].mxu1  ;;  %v8232_v50 = vpop.f32.mrb[103].mxu0 }
 0x222   : > { %v10501_v51 = vpop.f32.mrb[42].mxu1  ;;  %12918 = vst [vmem:[#allocation34_spill] sm:$0xff] %v10512_v29  ;;  %v12920_v31 = vshll.u32 %v10116_v22, 16 }
 0x223   : > { %12917 = vst [vmem:[#allocation33_spill] sm:$0xff] %v10501_v51  ;;  %v8112_v54 = vpop.f32.mrb[43].mxu1  ;;  %8474 = vmatmul.mubr.msk.bf16.gmra.mrb[208].mxu0 %vm982_vm4, %v2325_v53 }
 0x224   : > { %8477 = vmatprep.mubr.msk.bf16.mxu0 %vm9617_vm2, %v12883_v1  ;;  %v1667_v50 = vor.u32 %v12920_v31, %v10512_v29  ;;  %v9449_v29 = vld [vmem:[%s12847_s3 + $0xf0] sm:$0xff]  }
 0x225   : > { %8294 = vmatmul.mubr.msk.bf16.gmra.mrb[148].mxu1 %vm982_vm4, %v10121_v25  ;;  %v2327_v25 = vsel %vm821_vm8, %v2324_v48, %v2326_v55 }
 0x226   : > { %v10516_v17 = vpop.f32.mrb[104].mxu0  ;;  %8297 = vmatprep.mubr.msk.bf16.mxu1 %vm9617_vm2, %v12883_v1 }
 0x227   : > { %12919 = vst [vmem:[#allocation35_spill] sm:$0xff] %v10516_v17  ;;  %v8235_v53 = vpop.f32.mrb[105].mxu0 }
 0x228   : > { %v10521_v14 = vpop.f32.mrb[44].mxu1  ;;  %v10523_v54 = vpop.f32.mrb[106].mxu0  ;;  %v10534_v53 = vsel %vm1623_vm7, %v10105_v12, %v1667_v50  ;;  %v9447_v12 = vld [vmem:[%s12847_s3 + $0xe0] sm:$0xff]  }
 0x229   : > { %v8115_v4 = vpop.f32.mrb[45].mxu1  ;;  %v8236_v38 = vpop.f32.mrb[107].mxu0  ;;  %12921 = vst [vmem:[#allocation36_spill] sm:$0xff] %v10534_v53 }
 0x22a   : > { %v10528_v51 = vpop.f32.mrb[46].mxu1 }
 0x22b   : > { %v8116_v17 = vpop.f32.mrb[47].mxu1  ;;  %8478 = vmatmul.mubr.msk.bf16.gmra.mrb[212].mxu0 %vm982_vm4, %v2327_v25 }
 0x22c   : > { %8549 = vmatprep.mubr.msk.bf16.mxu0 %vm9617_vm2, %v12883_v1 }
 0x22d   : > { %8298 = vmatmul.mubr.msk.bf16.gmra.mrb[152].mxu1 %vm982_vm4, %v10534_v53 }
 0x22e   : > { %v10540_v31 = vpop.f32.mrb[108].mxu0  ;;  %8369 = vmatprep.mubr.msk.bf16.mxu1 %vm9617_vm2, %v12883_v1 }
 0x22f   : > { %v8239_v4 = vpop.f32.mrb[109].mxu0 }
 0x230   : > { %v10544_v48 = vpop.f32.mrb[48].mxu1  ;;  %v1587_v38 = vpop.f32.mrb[110].mxu0 }
 0x231   : > { %v8119_v25 = vpop.f32.mrb[49].mxu1  ;;  %v8240_v17 = vpop.f32.mrb[111].mxu0  ;;  %v9448_v38 = vld [vmem:[%s12847_s3 + $0xe8] sm:$0xff]  }
 0x232   : > { %v1155_v55 = vpop.f32.mrb[50].mxu1 }
 0x233   : > { %v8120_v50 = vpop.f32.mrb[51].mxu1  ;;  %8550 = vmatmul.mubr.msk.bf16.vlgmr.msra.gmra.mrb[216].mxu0 %vm982_vm4, %v9860_v5 }
 0x234   : > { %8553 = vmatprep.mubr.msk.bf16.mxu0 %vm9617_vm2, %v12883_v1 }
 0x235   : > { %8370 = vmatmul.mubr.msk.bf16.vlgmr.msra.gmra.mrb[156].mxu1 %vm982_vm4, %v9887_v23 }
 0x236   : > { %8482 = vmatpush3.bf16.msra.mxu1 %v9447_v12  ;;  %v10555_v4 = vpop.f32.mrb[112].mxu0  ;;  %8373 = vmatprep.mubr.msk.bf16.mxu1 %vm9617_vm2, %v12883_v1 }
 0x237   : > { %12922 = vst [vmem:[#allocation37_spill] sm:$0xff] %v10555_v4  ;;  %v8311_v25 = vpop.f32.mrb[113].mxu0  ;;  %8483 = vmatprep.subr.bf16.mxu1 %v12883_v1 }
 0x238   : > { %v1242_v5 = vpop.f32.mrb[52].mxu1  ;;  %v10563_v17 = vpop.f32.mrb[114].mxu0 }
 0x239   : > { %v1243_v55 = vadd.f32 %v1242_v5, %v10303_v19  ;;  %v8131_v50 = vpop.f32.mrb[53].mxu1  ;;  %v8312_v23 = vpop.f32.mrb[115].mxu0 }
 0x23a   : > { %v1245_v12 = vpop.f32.mrb[54].mxu1  ;;  %8484 = vmatpush3.bf16.msra.mxu1 %v9448_v38 }
 0x23b   : > { %v1246_v53 = vadd.f32 %v1245_v12, %v10311_v36  ;;  %v8132_v4 = vpop.f32.mrb[55].mxu1  ;;  %8554 = vmatmul.mubr.msk.bf16.gmra.mrb[220].mxu0 %vm982_vm4, %v9897_v26  ;;  %8485 = vmatprep.subr.bf16.mxu1 %v12883_v1  ;;  %v10574_v25 = vadd.f32 %v10294_v9, %v1243_v55  ;;  %v9450_v26 = vld [vmem:[%s12847_s3 + $0xf8] sm:$0xff]  }
 0x23c   : > { %8557 = vmatprep.mubr.msk.bf16.mxu0 %vm9617_vm2, %v12883_v1 }
 0x23d   : > { %8374 = vmatmul.mubr.msk.bf16.gmra.mrb[160].mxu1 %vm982_vm4, %v9918_v44  ;;  %v10581_v19 = vadd.f32 %v10305_v7, %v1246_v53 }
 0x23e   : > { %v10583_v38 = vpop.f32.mrb[116].mxu0  ;;  %8377 = vmatprep.mubr.msk.bf16.mxu1 %vm9617_vm2, %v12883_v1  ;;  %8486 = vmatpush3.bf16.msra.mxu1 %v9449_v29 }
 0x23f   : > { %v8315_v9 = vpop.f32.mrb[117].mxu0  ;;  %8487 = vmatprep.subr.bf16.mxu1 %v12883_v1 }
 0x240   : > { %v1250_v36 = vpop.f32.mrb[56].mxu1  ;;  %v10591_v4 = vpop.f32.mrb[118].mxu0 }
 0x241   : > { %v1251_v44 = vadd.f32 %v1250_v36, %v10336_v59  ;;  %v8135_v7 = vpop.f32.mrb[57].mxu1  ;;  %v8316_v53 = vpop.f32.mrb[119].mxu0 }
 0x242   : > { %v1253_v5 = vpop.f32.mrb[58].mxu1  ;;  %8488 = vmatpush3.bf16.msra.mxu1 %v9450_v26 }
 0x243   : > { %v1254_v55 = vadd.f32 %v1253_v5, %v10341_v8  ;;  %v8136_v50 = vpop.f32.mrb[59].mxu1  ;;  %8558 = vmatmul.mubr.msk.bf16.gmra.mrb[224].mxu0 %vm982_vm4, %v9924_v47  ;;  %v10598_v29 = vadd.f32 %v10327_v56, %v1251_v44  ;;  %8601 = vmatprep.subr.bf16.mxu1 %v12883_v1 }
 0x244   : > { %8561 = vmatprep.mubr.msk.bf16.mxu0 %vm9617_vm2, %v12883_v1 }
 0x245   : > { %8378 = vmatmul.mubr.msk.bf16.gmra.mrb[164].mxu1 %vm982_vm4, %v9939_v62  ;;  %v10606_v59 = vadd.f32 %v10338_v60, %v1254_v55 }
 0x246   : > { %v10608_v23 = vpop.f32.mrb[120].mxu0  ;;  %8381 = vmatprep.mubr.msk.bf16.mxu1 %vm9617_vm2, %v12883_v1 }
 0x247   : > { %v8319_v47 = vpop.f32.mrb[121].mxu0 }
 0x248   : > { %v1258_v8 = vpop.f32.mrb[60].mxu1  ;;  %v10612_v56 = vpop.f32.mrb[122].mxu0 }
 0x249   : > { %v1259_v12 = vadd.f32 %v1258_v8, %v10355_v33  ;;  %v8139_v26 = vpop.f32.mrb[61].mxu1  ;;  %v8320_v9 = vpop.f32.mrb[123].mxu0 }
 0x24a   : > { %v1261_v36 = vpop.f32.mrb[62].mxu1 }
 0x24b   : > { %v1262_v44 = vadd.f32 %v1261_v36, %v10359_v46  ;;  %v8140_v62 = vpop.f32.mrb[63].mxu1  ;;  %8562 = vmatmul.mubr.msk.bf16.gmra.mrb[228].mxu0 %vm982_vm4, %v9945_v0  ;;  %v10619_v60 = vadd.f32 %v10350_v15, %v1259_v12 }
 0x24c   : > { %8565 = vmatprep.mubr.msk.bf16.mxu0 %vm9617_vm2, %v12883_v1 }
 0x24d   : > { %8382 = vmatmul.mubr.msk.bf16.gmra.mrb[168].mxu1 %vm982_vm4, %v9960_v18  ;;  %v10626_v33 = vadd.f32 %v10357_v35, %v1262_v44 }
 0x24e   : > { %v10628_v7 = vpop.f32.mrb[124].mxu0  ;;  %8385 = vmatprep.mubr.msk.bf16.mxu1 %vm9617_vm2, %v12883_v1 }
 0x24f   : > { %v8323_v46 = vpop.f32.mrb[125].mxu0 }
 0x250   : > { %v1266_v53 = vpop.f32.mrb[64].mxu1  ;;  %v10632_v0 = vpop.f32.mrb[126].mxu0 }
 0x251   : > { %v1267_v15 = vadd.f32 %v1266_v53, %v10372_v45  ;;  %v8143_v5 = vpop.f32.mrb[65].mxu1  ;;  %v8324_v55 = vpop.f32.mrb[127].mxu0 }
 0x252   : > { %v1269_v50 = vpop.f32.mrb[66].mxu1 }
 0x253   : > { %v1270_v47 = vadd.f32 %v1269_v50, %v10376_v39  ;;  %v8144_v18 = vpop.f32.mrb[67].mxu1  ;;  %8566 = vmatmul.mubr.msk.bf16.gmra.mrb[232].mxu0 %vm982_vm4, %v9966_v20  ;;  %v10639_v35 = vadd.f32 %v10367_v58, %v1267_v15 }
 0x254   : > { %8569 = vmatprep.mubr.msk.bf16.mxu0 %vm9617_vm2, %v12883_v1 }
 0x255   : > { %8386 = vmatmul.mubr.msk.bf16.gmra.mrb[172].mxu1 %vm982_vm4, %v9981_v40  ;;  %v10646_v45 = vadd.f32 %v10374_v37, %v1270_v47 }
 0x256   : > { %v10648_v8 = vpop.f32.mrb[128].mxu0  ;;  %8389 = vmatprep.mubr.msk.bf16.mxu1 %vm9617_vm2, %v12883_v1 }
 0x257   : > { %v8327_v39 = vpop.f32.mrb[129].mxu0 }
 0x258   : > { %v1274_v12 = vpop.f32.mrb[68].mxu1  ;;  %v10652_v20 = vpop.f32.mrb[130].mxu0 }
 0x259   : > { %v1275_v58 = vadd.f32 %v1274_v12, %v10389_v11  ;;  %v8147_v26 = vpop.f32.mrb[69].mxu1  ;;  %v8328_v9 = vpop.f32.mrb[131].mxu0 }
 0x25a   : > { %v1277_v36 = vpop.f32.mrb[70].mxu1  ;;  %v12924_v9 = vld [vmem:[#allocation9_spill] sm:$0xff] }
 0x25b   : > { %v1278_v44 = vadd.f32 %v1277_v36, %v10393_v30  ;;  %v8148_v40 = vpop.f32.mrb[71].mxu1  ;;  %8570 = vmatmul.mubr.msk.bf16.gmra.mrb[236].mxu0 %vm982_vm4, %v9987_v42  ;;  %v10659_v37 = vadd.f32 %v10384_v57, %v1275_v58  ;;  %v12925_v36 = vld [vmem:[#allocation23_spill] sm:$0xff] }
 0x25c   : > { %8573 = vmatprep.mubr.msk.bf16.mxu0 %vm9617_vm2, %v12883_v1 }
 0x25d   : > { %8390 = vmatmul.mubr.msk.bf16.gmra.mrb[176].mxu1 %vm982_vm4, %v10002_v61  ;;  %v10666_v11 = vadd.f32 %v10391_v32, %v1278_v44 }
 0x25e   : > { %v10668_v62 = vpop.f32.mrb[132].mxu0  ;;  %8393 = vmatprep.mubr.msk.bf16.mxu1 %vm9617_vm2, %v12883_v1 }
 0x25f   : > { %v8331_v30 = vpop.f32.mrb[133].mxu0 }
 0x260   : > { %v1282_v46 = vpop.f32.mrb[72].mxu1  ;;  %v10672_v42 = vpop.f32.mrb[134].mxu0 }
 0x261   : > { %v1283_v57 = vadd.f32 %v1282_v46, %v10406_v41  ;;  %v8151_v53 = vpop.f32.mrb[73].mxu1  ;;  %v8332_v15 = vpop.f32.mrb[135].mxu0 }
 0x262   : > { %v1285_v5 = vpop.f32.mrb[74].mxu1 }
 0x263   : > { %v1286_v55 = vadd.f32 %v1285_v5, %v10410_v28  ;;  %v8152_v61 = vpop.f32.mrb[75].mxu1  ;;  %8574 = vmatmul.mubr.msk.bf16.gmra.mrb[240].mxu0 %vm982_vm4, %v10008_v3  ;;  %v10679_v32 = vadd.f32 %v10401_v10, %v1283_v57 }
 0x264   : > { %8577 = vmatprep.mubr.msk.bf16.mxu0 %vm9617_vm2, %v12883_v1  ;;  %v12927_v61 = vld [vmem:[#allocation24_spill] sm:$0xff] }
 0x265   : > { %8394 = vmatmul.mubr.msk.bf16.gmra.mrb[180].mxu1 %vm982_vm4, %v10023_v24  ;;  %v10686_v41 = vadd.f32 %v10408_v63, %v1286_v55  ;;  %v12923_v63 = vld [vmem:[#allocation22_spill] sm:$0xff] }
 0x266   : > { %v10688_v50 = vpop.f32.mrb[136].mxu0  ;;  %8397 = vmatprep.mubr.msk.bf16.mxu1 %vm9617_vm2, %v12883_v1  ;;  %v12926_v55 = vld [vmem:[#allocation10_spill] sm:$0xff] }
 0x267   : > { %v8335_v28 = vpop.f32.mrb[137].mxu0 }
 0x268   : > { %v1290_v47 = vpop.f32.mrb[76].mxu1  ;;  %v10692_v3 = vpop.f32.mrb[138].mxu0 }
 0x269   : > { %v1291_v10 = vadd.f32 %v1290_v47, %v10423_v2  ;;  %v8155_v18 = vpop.f32.mrb[77].mxu1  ;;  %v8336_v39 = vpop.f32.mrb[139].mxu0  ;;  %v12928_v47 = vld [vmem:[#allocation12_spill] sm:$0xff] }
 0x26a   : > { %v1293_v12 = vpop.f32.mrb[78].mxu1 }
 0x26b   : > { %v1294_v58 = vadd.f32 %v1293_v12, %v10427_v13  ;;  %v8156_v24 = vpop.f32.mrb[79].mxu1  ;;  %8578 = vmatmul.mubr.msk.bf16.gmra.mrb[244].mxu0 %vm982_vm4, %v10029_v27  ;;  %v10699_v26 = vadd.f32 %v12923_v63, %v1291_v10  ;;  %v12929_v10 = vld [vmem:[#allocation25_spill] sm:$0xff] }
 0x26c   : > { %8581 = vmatprep.mubr.msk.bf16.mxu0 %vm9617_vm2, %v12883_v1 }
 0x26d   : > { %8398 = vmatmul.mubr.msk.bf16.gmra.mrb[184].mxu1 %vm982_vm4, %v12924_v9  ;;  %v10706_v2 = vadd.f32 %v12925_v36, %v1294_v58 }
 0x26e   : > { %v10708_v44 = vpop.f32.mrb[140].mxu0  ;;  %8401 = vmatprep.mubr.msk.bf16.mxu1 %vm9617_vm2, %v12883_v1 }
 0x26f   : > { %v8339_v13 = vpop.f32.mrb[141].mxu0 }
 0x270   : > { %v1298_v40 = vpop.f32.mrb[80].mxu1  ;;  %v10712_v27 = vpop.f32.mrb[142].mxu0 }
 0x271   : > { %v1299_v30 = vadd.f32 %v1298_v40, %v10440_v34  ;;  %v8159_v46 = vpop.f32.mrb[81].mxu1  ;;  %v8340_v57 = vpop.f32.mrb[143].mxu0  ;;  %v12930_v40 = vld [vmem:[#allocation13_spill] sm:$0xff] }
 0x272   : > { %v1301_v53 = vpop.f32.mrb[82].mxu1  ;;  %v12932_v57 = vld [vmem:[#allocation15_spill] sm:$0xff] }
 0x273   : > { %v1302_v15 = vadd.f32 %v1301_v53, %v10444_v6  ;;  %v8160_v5 = vpop.f32.mrb[83].mxu1  ;;  %8582 = vmatmul.mubr.msk.bf16.gmra.mrb[248].mxu0 %vm982_vm4, %v12926_v55  ;;  %v10719_v28 = vadd.f32 %v12927_v61, %v1299_v30  ;;  %v12931_v30 = vld [vmem:[#allocation26_spill] sm:$0xff]  ;;  %v12933_v53 = vld [vmem:[#allocation27_spill] sm:$0xff] }
 0x274   : > { %8585 = vmatprep.mubr.msk.bf16.mxu0 %vm9617_vm2, %v12883_v1 }
 0x275   : > { %8402 = vmatmul.mubr.msk.bf16.gmra.mrb[188].mxu1 %vm982_vm4, %v12928_v47  ;;  %v10726_v34 = vadd.f32 %v12929_v10, %v1302_v15 }
 0x276   : > { %v10728_v18 = vpop.f32.mrb[144].mxu0  ;;  %8405 = vmatprep.mubr.msk.bf16.mxu1 %vm9617_vm2, %v12883_v1 }
 0x277   : > { %v8343_v6 = vpop.f32.mrb[145].mxu0 }
 0x278   : > { %v1306_v39 = vpop.f32.mrb[84].mxu1  ;;  %v10732_v12 = vpop.f32.mrb[146].mxu0 }
 0x279   : > { %v1307_v58 = vadd.f32 %v1306_v39, %v10457_v49  ;;  %v8163_v24 = vpop.f32.mrb[85].mxu1  ;;  %v8344_v63 = vpop.f32.mrb[147].mxu0  ;;  %v12934_v39 = vld [vmem:[#allocation30_spill] sm:$0xff] }
 0x27a   : > { %v1309_v9 = vpop.f32.mrb[86].mxu1  ;;  %v12935_v63 = vld [vmem:[#allocation16_spill] sm:$0xff] }
 0x27b   : > { %v1310_v36 = vadd.f32 %v1309_v9, %v10461_v21  ;;  %v8164_v13 = vpop.f32.mrb[87].mxu1  ;;  %8586 = vmatmul.mubr.msk.bf16.gmra.mrb[252].mxu0 %vm982_vm4, %v12930_v40  ;;  %v10739_v46 = vadd.f32 %v12931_v30, %v1307_v58  ;;  %v12936_v9 = vld [vmem:[#allocation28_spill] sm:$0xff]  ;;  %v12938_v40 = vld [vmem:[#allocation29_spill] sm:$0xff] }
 0x27c   : > { %8589 = vmatprep.mubr.msk.bf16.mxu0 %vm9617_vm2, %v12883_v1  ;;  %v12937_v13 = vld [vmem:[#allocation18_spill] sm:$0xff] }
 0x27d   : > { %8406 = vmatmul.mubr.msk.bf16.gmra.mrb[192].mxu1 %vm982_vm4, %v12932_v57  ;;  %v10746_v49 = vadd.f32 %v12933_v53, %v1310_v36 }
 0x27e   : > { %v10748_v15 = vpop.f32.mrb[148].mxu0  ;;  %8409 = vmatprep.mubr.msk.bf16.mxu1 %vm9617_vm2, %v12883_v1 }
 0x27f   : > { %v8347_v21 = vpop.f32.mrb[149].mxu0 }
 0x280   : > { %v1314_v5 = vpop.f32.mrb[88].mxu1  ;;  %v10752_v55 = vpop.f32.mrb[150].mxu0 }
 0x281   : > { %v1315_v61 = vadd.f32 %v1314_v5, %v10474_v52  ;;  %v8167_v47 = vpop.f32.mrb[89].mxu1  ;;  %v8348_v10 = vpop.f32.mrb[151].mxu0 }
 0x282   : > { %v1317_v6 = vpop.f32.mrb[90].mxu1 }
 0x283   : > { %v1318_v58 = vadd.f32 %v1317_v6, %v12934_v39  ;;  %v8168_v24 = vpop.f32.mrb[91].mxu1  ;;  %8590 = vmatmul.mubr.msk.bf16.gmra.mrb[0].mxu0 %vm982_vm4, %v12935_v63  ;;  %v10759_v36 = vadd.f32 %v12936_v9, %v1315_v61  ;;  %v12939_v6 = vld [vmem:[#allocation33_spill] sm:$0xff] }
 0x284   : > { %8593 = vmatprep.mubr.msk.bf16.mxu0 %vm9617_vm2, %v12883_v1  ;;  %v12941_v9 = vld [vmem:[#allocation21_spill] sm:$0xff] }
 0x285   : > { %8410 = vmatmul.mubr.msk.bf16.gmra.mrb[196].mxu1 %vm982_vm4, %v12937_v13  ;;  %v10766_v52 = vadd.f32 %v12938_v40, %v1318_v58  ;;  %v12940_v58 = vld [vmem:[#allocation31_spill] sm:$0xff]  ;;  %v12942_v13 = vld [vmem:[#allocation32_spill] sm:$0xff] }
 0x286   : > { %v10768_v30 = vpop.f32.mrb[152].mxu0  ;;  %8413 = vmatprep.mubr.msk.bf16.mxu1 %vm9617_vm2, %v12883_v1 }
 0x287   : > { %v8351_v57 = vpop.f32.mrb[153].mxu0 }
 0x288   : > { %v1322_v53 = vpop.f32.mrb[92].mxu1  ;;  %v10772_v21 = vpop.f32.mrb[154].mxu0 }
 0x289   : > { %v1323_v5 = vadd.f32 %v1322_v53, %v10495_v16  ;;  %v8171_v61 = vpop.f32.mrb[93].mxu1  ;;  %v8352_v47 = vpop.f32.mrb[155].mxu0 }
 0x28a   : > { %v1325_v10 = vpop.f32.mrb[94].mxu1 }
 0x28b   : > { %v1326_v39 = vadd.f32 %v1325_v10, %v12939_v6  ;;  %v8172_v24 = vpop.f32.mrb[95].mxu1  ;;  %8594 = vmatmul.mubr.msk.bf16.gmra.mrb[4].mxu0 %vm982_vm4, %v10116_v22  ;;  %v10779_v63 = vadd.f32 %v12940_v58, %v1323_v5 }
 0x28c   : > { %8597 = vmatprep.mubr.msk.bf16.mxu0 %vm9617_vm2, %v12883_v1 }
 0x28d   : > { %8414 = vmatmul.mubr.msk.bf16.gmra.mrb[200].mxu1 %vm982_vm4, %v12941_v9  ;;  %v10786_v16 = vadd.f32 %v12942_v13, %v1326_v39  ;;  %v12944_v39 = vshrl.u32 %v10116_v22, 16  ;;  %v12945_v9 = vld [vmem:[#allocation20_spill] sm:$0xff] }
 0x28e   : > { %v10788_v40 = vpop.f32.mrb[156].mxu0  ;;  %8417 = vmatprep.mubr.msk.bf16.mxu1 %vm9617_vm2, %v12883_v1  ;;  %v12946_v1 = vld [vmem:[#allocation35_spill] sm:$0xff] }
 0x28f   : > { %12943 = vst [vmem:[#allocation22_spill] sm:$0xff] %v10788_v40  ;;  %v8355_v57 = vpop.f32.mrb[157].mxu0  ;;  %v2098_v13 = vor.u32 %v12945_v9, %v12944_v39  ;;  %v12947_v40 = vmov 0.0   ;;  %v12948_v9 = vld [vmem:[#allocation2_spill] sm:$0xff] }
 0x290   : > { %v1330_v53 = vpop.f32.mrb[96].mxu1  ;;  %v10792_v61 = vpop.f32.mrb[158].mxu0 }
 0x291   : > { %v1331_v5 = vadd.f32 %v1330_v53, %v10521_v14  ;;  %v8175_v47 = vpop.f32.mrb[97].mxu1  ;;  %v8356_v10 = vpop.f32.mrb[159].mxu0 }
 0x292   : > { %v1333_v6 = vpop.f32.mrb[98].mxu1 }
 0x293   : > { %v1334_v24 = vadd.f32 %v1333_v6, %v10528_v51  ;;  %v8176_v58 = vpop.f32.mrb[99].mxu1  ;;  %8598 = vmatmul.mubr.msk.bf16.gmra.mrb[8].mxu0 %vm982_vm4, %v10506_v43  ;;  %v10802_v57 = vadd.f32 %v12946_v1, %v1331_v5 }
 0x294   : > { %8661 = vmatprep.mubr.msk.bf16.mxu0 %vm9617_vm2, %v12947_v40 }
 0x295   : > { %8418 = vmatmul.mubr.msk.bf16.gmra.mrb[204].mxu1 %vm982_vm4, %v2098_v13  ;;  %v10808_v14 = vadd.f32 %v10523_v54, %v1334_v24 }
 0x296   : > { %v10810_v51 = vpop.f32.mrb[160].mxu0  ;;  %8489 = vmatprep.mubr.msk.bf16.mxu1 %vm9617_vm2, %v12947_v40 }
 0x297   : > { %v8359_v53 = vpop.f32.mrb[161].mxu0 }
 0x298   : > { %v1338_v22 = vpop.f32.mrb[100].mxu1  ;;  %v2060_v47 = vpop.f32.mrb[162].mxu0 }
 0x299   : > { %v1339_v10 = vadd.f32 %v1338_v22, %v10544_v48  ;;  %v8179_v1 = vpop.f32.mrb[101].mxu1  ;;  %v8360_v5 = vpop.f32.mrb[163].mxu0 }
 0x29a   : > { %v1341_v6 = vpop.f32.mrb[102].mxu1  ;;  %v12949_v5 = vld [vmem:[#allocation37_spill] sm:$0xff] }
 0x29b   : > { %v8180_v58 = vpop.f32.mrb[103].mxu1  ;;  %v10816_v39 = vadd.f32 %v10540_v31, %v1339_v10 }
 0x29c   : > { %v9451_v58 = vld [vmem:[%s12849_s5 + $0x20] sm:$0xff]  }
 0x29d   : > { %8490 = vmatmul.mubr.msk.bf16.vlgmr.msra.gmra.mrb[208].mxu1 %vm982_vm4, %v12948_v9  ;;  %v12950_v9 = vld [vmem:[#allocation3_spill] sm:$0xff] }
 0x29e   : > { %v10820_v54 = vpop.f32.mrb[164].mxu0  ;;  %8493 = vmatprep.mubr.msk.bf16.mxu1 %vm9617_vm2, %v12947_v40  ;;  %8602 = vmatpush3.bf16.msra.mxu1 %v9451_v58 }
 0x29f   : > { %v8431_v24 = vpop.f32.mrb[165].mxu0  ;;  %8603 = vmatprep.subr.bf16.mxu1 %v12947_v40 }
 0x2a0   : > { %v1766_v13 = vpop.f32.mrb[104].mxu1  ;;  %v10824_v53 = vpop.f32.mrb[166].mxu0 }
 0x2a1   : > { %v1868_v48 = vadd.f32 %v1766_v13, %v10574_v25  ;;  %v8251_v22 = vpop.f32.mrb[105].mxu1  ;;  %v8432_v47 = vpop.f32.mrb[167].mxu0 }
 0x2a2   : > { %v1769_v1 = vpop.f32.mrb[106].mxu1 }
 0x2a3   : > { %v1869_v31 = vadd.f32 %v1769_v1, %v10581_v19  ;;  %v8252_v10 = vpop.f32.mrb[107].mxu1  ;;  %v10829_v6 = vadd.f32 %v12949_v5, %v1868_v48 }
 0x2a5   : > { %8494 = vmatmul.mubr.msk.bf16.gmra.mrb[212].mxu1 %vm982_vm4, %v12950_v9  ;;  %v10837_v24 = vadd.f32 %v10563_v17, %v1869_v31  ;;  %v12951_v9 = vld [vmem:[#allocation4_spill] sm:$0xff] }
 0x2a6   : > { %v10839_v25 = vpop.f32.mrb[168].mxu0  ;;  %8497 = vmatprep.mubr.msk.bf16.mxu1 %vm9617_vm2, %v12947_v40 }
 0x2a7   : > { %v8435_v19 = vpop.f32.mrb[169].mxu0 }
 0x2a8   : > { %v1774_v13 = vpop.f32.mrb[108].mxu1  ;;  %v10844_v48 = vpop.f32.mrb[170].mxu0 }
 0x2a9   : > { %v1870_v22 = vadd.f32 %v1774_v13, %v10598_v29  ;;  %v8255_v47 = vpop.f32.mrb[109].mxu1  ;;  %v8436_v1 = vpop.f32.mrb[171].mxu0 }
 0x2aa   : > { %v1777_v10 = vpop.f32.mrb[110].mxu1 }
 0x2ab   : > { %v1871_v17 = vadd.f32 %v1777_v10, %v10606_v59  ;;  %v8256_v31 = vpop.f32.mrb[111].mxu1  ;;  %v10849_v5 = vadd.f32 %v10583_v38, %v1870_v22 }
 0x2ad   : > { %8498 = vmatmul.mubr.msk.bf16.gmra.mrb[216].mxu1 %vm982_vm4, %v12951_v9  ;;  %v10854_v58 = vadd.f32 %v10591_v4, %v1871_v17  ;;  %v12952_v17 = vld [vmem:[#allocation5_spill] sm:$0xff] }
 0x2ae   : > { %v10856_v19 = vpop.f32.mrb[172].mxu0  ;;  %8501 = vmatprep.mubr.msk.bf16.mxu1 %vm9617_vm2, %v12947_v40 }
 0x2af   : > { %v8439_v29 = vpop.f32.mrb[173].mxu0 }
 0x2b0   : > { %v1782_v13 = vpop.f32.mrb[112].mxu1  ;;  %v10860_v47 = vpop.f32.mrb[174].mxu0 }
 0x2b1   : > { %v1872_v59 = vadd.f32 %v1782_v13, %v10619_v60  ;;  %v8259_v1 = vpop.f32.mrb[113].mxu1  ;;  %v8440_v38 = vpop.f32.mrb[175].mxu0 }
 0x2b2   : > { %v1785_v22 = vpop.f32.mrb[114].mxu1 }
 0x2b3   : > { %v1873_v10 = vadd.f32 %v1785_v22, %v10626_v33  ;;  %v8260_v31 = vpop.f32.mrb[115].mxu1  ;;  %v10865_v4 = vadd.f32 %v10608_v23, %v1872_v59 }
 0x2b5   : > { %8502 = vmatmul.mubr.msk.bf16.gmra.mrb[220].mxu1 %vm982_vm4, %v12952_v17  ;;  %v10870_v9 = vadd.f32 %v10612_v56, %v1873_v10  ;;  %v9452_v10 = vld [vmem:[%s12849_s5 + $0x28] sm:$0xff]   ;;  %v12953_v17 = vld [vmem:[#allocation6_spill] sm:$0xff] }
 0x2b6   : > { %v10872_v29 = vpop.f32.mrb[176].mxu0  ;;  %8505 = vmatprep.mubr.msk.bf16.mxu1 %vm9617_vm2, %v12947_v40  ;;  %8604 = vmatpush3.bf16.msra.mxu1 %v9452_v10 }
 0x2b7   : > { %v8443_v60 = vpop.f32.mrb[177].mxu0  ;;  %8605 = vmatprep.subr.bf16.mxu1 %v12947_v40 }
 0x2b8   : > { %v1790_v13 = vpop.f32.mrb[116].mxu1  ;;  %v10876_v1 = vpop.f32.mrb[178].mxu0 }
 0x2b9   : > { %v1874_v33 = vadd.f32 %v1790_v13, %v10639_v35  ;;  %v8263_v38 = vpop.f32.mrb[117].mxu1  ;;  %v8444_v23 = vpop.f32.mrb[179].mxu0 }
 0x2ba   : > { %v1793_v59 = vpop.f32.mrb[118].mxu1 }
 0x2bb   : > { %v1875_v22 = vadd.f32 %v1793_v59, %v10646_v45  ;;  %v8264_v31 = vpop.f32.mrb[119].mxu1  ;;  %v10881_v56 = vadd.f32 %v10628_v7, %v1874_v33 }
 0x2bd   : > { %8506 = vmatmul.mubr.msk.bf16.gmra.mrb[224].mxu1 %vm982_vm4, %v12953_v17  ;;  %v10889_v60 = vadd.f32 %v10632_v0, %v1875_v22  ;;  %v12954_v17 = vld [vmem:[#allocation7_spill] sm:$0xff] }
 0x2be   : > { %v10891_v35 = vpop.f32.mrb[180].mxu0  ;;  %8509 = vmatprep.mubr.msk.bf16.mxu1 %vm9617_vm2, %v12947_v40 }
 0x2bf   : > { %v8447_v45 = vpop.f32.mrb[181].mxu0 }
 0x2c0   : > { %v1798_v7 = vpop.f32.mrb[120].mxu1  ;;  %v10896_v13 = vpop.f32.mrb[182].mxu0 }
 0x2c1   : > { %v1876_v33 = vadd.f32 %v1798_v7, %v10659_v37  ;;  %v8267_v38 = vpop.f32.mrb[121].mxu1  ;;  %v8448_v23 = vpop.f32.mrb[183].mxu0 }
 0x2c2   : > { %v1801_v59 = vpop.f32.mrb[122].mxu1 }
 0x2c3   : > { %v1877_v0 = vadd.f32 %v1801_v59, %v10666_v11  ;;  %v8268_v22 = vpop.f32.mrb[123].mxu1  ;;  %v10901_v31 = vadd.f32 %v10648_v8, %v1876_v33 }
 0x2c5   : > { %8510 = vmatmul.mubr.msk.bf16.gmra.mrb[228].mxu1 %vm982_vm4, %v12954_v17  ;;  %v10906_v10 = vadd.f32 %v10652_v20, %v1877_v0  ;;  %v12955_v0 = vld [vmem:[#allocation8_spill] sm:$0xff] }
 0x2c6   : > { %v10908_v45 = vpop.f32.mrb[184].mxu0  ;;  %8513 = vmatprep.mubr.msk.bf16.mxu1 %vm9617_vm2, %v12947_v40 }
 0x2c7   : > { %v8451_v37 = vpop.f32.mrb[185].mxu0 }
 0x2c8   : > { %v1806_v7 = vpop.f32.mrb[124].mxu1  ;;  %v10912_v38 = vpop.f32.mrb[186].mxu0 }
 0x2c9   : > { %v1878_v11 = vadd.f32 %v1806_v7, %v10679_v32  ;;  %v8271_v23 = vpop.f32.mrb[125].mxu1  ;;  %v8452_v8 = vpop.f32.mrb[187].mxu0 }
 0x2ca   : > { %v1809_v33 = vpop.f32.mrb[126].mxu1 }
 0x2cb   : > { %v1879_v59 = vadd.f32 %v1809_v33, %v10686_v41  ;;  %v8272_v22 = vpop.f32.mrb[127].mxu1  ;;  %v10917_v20 = vadd.f32 %v10668_v62, %v1878_v11 }
 0x2cd   : > { %8514 = vmatmul.mubr.msk.bf16.gmra.mrb[232].mxu1 %vm982_vm4, %v12955_v0  ;;  %v10922_v17 = vadd.f32 %v10672_v42, %v1879_v59  ;;  %v12956_v59 = vld [vmem:[#allocation11_spill] sm:$0xff] }
 0x2ce   : > { %v10924_v37 = vpop.f32.mrb[188].mxu0  ;;  %8517 = vmatprep.mubr.msk.bf16.mxu1 %vm9617_vm2, %v12947_v40 }
 0x2cf   : > { %v8455_v32 = vpop.f32.mrb[189].mxu0 }
 0x2d0   : > { %v1814_v7 = vpop.f32.mrb[128].mxu1  ;;  %v10928_v23 = vpop.f32.mrb[190].mxu0 }
 0x2d1   : > { %v1880_v41 = vadd.f32 %v1814_v7, %v10699_v26  ;;  %v8275_v8 = vpop.f32.mrb[129].mxu1  ;;  %v8456_v62 = vpop.f32.mrb[191].mxu0  ;;  %v9453_v26 = vld [vmem:[%s12849_s5 + $0x30] sm:$0xff]  }
 0x2d2   : > { %v1817_v11 = vpop.f32.mrb[130].mxu1  ;;  %8606 = vmatpush3.bf16.msra.mxu1 %v9453_v26 }
 0x2d3   : > { %v1881_v33 = vadd.f32 %v1817_v11, %v10706_v2  ;;  %v8276_v22 = vpop.f32.mrb[131].mxu1  ;;  %v10933_v42 = vadd.f32 %v10688_v50, %v1880_v41  ;;  %8607 = vmatprep.subr.bf16.mxu1 %v12947_v40 }
 0x2d5   : > { %8518 = vmatmul.mubr.msk.bf16.gmra.mrb[236].mxu1 %vm982_vm4, %v12956_v59  ;;  %v10938_v0 = vadd.f32 %v10692_v3, %v1881_v33  ;;  %v12957_v59 = vld [vmem:[#allocation14_spill] sm:$0xff] }
 0x2d6   : > { %v10940_v32 = vpop.f32.mrb[192].mxu0  ;;  %8521 = vmatprep.mubr.msk.bf16.mxu1 %vm9617_vm2, %v12947_v40 }
 0x2d7   : > { %v8459_v2 = vpop.f32.mrb[193].mxu0 }
 0x2d8   : > { %v1822_v7 = vpop.f32.mrb[132].mxu1  ;;  %v10947_v8 = vpop.f32.mrb[194].mxu0 }
 0x2d9   : > { %v1882_v50 = vadd.f32 %v1822_v7, %v10719_v28  ;;  %v8279_v41 = vpop.f32.mrb[133].mxu1  ;;  %v8460_v62 = vpop.f32.mrb[195].mxu0 }
 0x2da   : > { %v1825_v3 = vpop.f32.mrb[134].mxu1 }
 0x2db   : > { %v1883_v11 = vadd.f32 %v1825_v3, %v10726_v34  ;;  %v8280_v33 = vpop.f32.mrb[135].mxu1  ;;  %v10953_v22 = vadd.f32 %v10708_v44, %v1882_v50 }
 0x2dd   : > { %8522 = vmatmul.mubr.msk.bf16.gmra.mrb[240].mxu1 %vm982_vm4, %v12957_v59  ;;  %v10958_v2 = vadd.f32 %v10712_v27, %v1883_v11  ;;  %v12958_v11 = vld [vmem:[#allocation17_spill] sm:$0xff] }
 0x2de   : > { %v10960_v26 = vpop.f32.mrb[196].mxu0  ;;  %8525 = vmatprep.mubr.msk.bf16.mxu1 %vm9617_vm2, %v12947_v40 }
 0x2df   : > { %v8463_v28 = vpop.f32.mrb[197].mxu0 }
 0x2e0   : > { %v1830_v7 = vpop.f32.mrb[136].mxu1  ;;  %v10964_v41 = vpop.f32.mrb[198].mxu0 }
 0x2e1   : > { %v1884_v34 = vadd.f32 %v1830_v7, %v10739_v46  ;;  %v8283_v62 = vpop.f32.mrb[137].mxu1  ;;  %v8464_v44 = vpop.f32.mrb[199].mxu0 }
 0x2e2   : > { %v1833_v50 = vpop.f32.mrb[138].mxu1 }
 0x2e3   : > { %v1885_v3 = vadd.f32 %v1833_v50, %v10746_v49  ;;  %v8284_v33 = vpop.f32.mrb[139].mxu1  ;;  %v10969_v27 = vadd.f32 %v10728_v18, %v1884_v34 }
 0x2e5   : > { %8526 = vmatmul.mubr.msk.bf16.gmra.mrb[244].mxu1 %vm982_vm4, %v12958_v11  ;;  %v10974_v59 = vadd.f32 %v10732_v12, %v1885_v3  ;;  %v9454_v3 = vld [vmem:[%s12849_s5] sm:$0xff]   ;;  %v12959_v11 = vld [vmem:[#allocation19_spill] sm:$0xff] }
 0x2e6   : > { %v10976_v28 = vpop.f32.mrb[200].mxu0  ;;  %8529 = vmatprep.mubr.msk.bf16.mxu1 %vm9617_vm2, %v12947_v40  ;;  %8654 = vmatpush3.bf16.msra.mxu0 %v9454_v3 }
 0x2e7   : > { %v8467_v46 = vpop.f32.mrb[201].mxu0  ;;  %8655 = vmatprep.subr.bf16.mxu0 %v12947_v40 }
 0x2e8   : > { %v1838_v7 = vpop.f32.mrb[140].mxu1  ;;  %v10980_v62 = vpop.f32.mrb[202].mxu0 }
 0x2e9   : > { %v1886_v49 = vadd.f32 %v1838_v7, %v10759_v36  ;;  %v8287_v44 = vpop.f32.mrb[141].mxu1  ;;  %v8468_v18 = vpop.f32.mrb[203].mxu0 }
 0x2ea   : > { %v1841_v34 = vpop.f32.mrb[142].mxu1 }
 0x2eb   : > { %v1887_v50 = vadd.f32 %v1841_v34, %v10766_v52  ;;  %v8288_v33 = vpop.f32.mrb[143].mxu1  ;;  %v10985_v12 = vadd.f32 %v10748_v15, %v1886_v49  ;;  %v2561_v52 = vshrl.u32 %v10506_v43, 16 }
 0x2ed   : > { %8530 = vmatmul.mubr.msk.bf16.gmra.mrb[248].mxu1 %vm982_vm4, %v12959_v11  ;;  %v10993_v46 = vadd.f32 %v10752_v55, %v1887_v50  ;;  %v9456_v55 = vld [vmem:[%s12849_s5 + $0x8] sm:$0xff]  }
 0x2ee   : > { %v10995_v36 = vpop.f32.mrb[204].mxu0  ;;  %8533 = vmatprep.mubr.msk.bf16.mxu1 %vm9617_vm2, %v12947_v40  ;;  %8656 = vmatpush3.bf16.msra.mxu0 %v9456_v55 }
 0x2ef   : > { %12960 = vst [vmem:[#allocation9_spill] sm:$0xff] %v10995_v36  ;;  %v8471_v15 = vpop.f32.mrb[205].mxu0  ;;  %v2564_v36 = vshll.u32 %v10506_v43, 16  ;;  %8657 = vmatprep.subr.bf16.mxu0 %v12947_v40  ;;  %v9455_v43 = vld [vmem:[%s12849_s5 + $0x38] sm:$0xff]  }
 0x2f0   : > { %v1846_v7 = vpop.f32.mrb[144].mxu1  ;;  %v11001_v49 = vpop.f32.mrb[206].mxu0  ;;  %v2563_v15 = vrot.slane %v2561_v52, 7  ;;  %8608 = vmatpush3.bf16.msra.mxu1 %v9455_v43 }
 0x2f1   : > { %v1888_v44 = vadd.f32 %v1846_v7, %v10779_v63  ;;  %v8291_v18 = vpop.f32.mrb[145].mxu1  ;;  %v8472_v34 = vpop.f32.mrb[207].mxu0  ;;  %v12961_v63 = vld [vmem:[#allocation36_spill] sm:$0xff]  ;;  %8705 = vmatprep.subr.bf16.mxu1 %v12947_v40 }
 0x2f2   : > { %v1849_v50 = vpop.f32.mrb[146].mxu1  ;;  %v2566_v52 = vor.u32 %v2564_v36, %v2563_v15  ;;  %v12962_v15 = vld [vmem:[#allocation22_spill] sm:$0xff] }
 0x2f3   : > { %v1889_v33 = vadd.f32 %v1849_v50, %v10786_v16  ;;  %v8292_v3 = vpop.f32.mrb[147].mxu1  ;;  %v11009_v11 = vadd.f32 %v10768_v30, %v1888_v44  ;;  %v9457_v16 = vld [vmem:[%s12849_s5 + $0x10] sm:$0xff]  }
 0x2f4   : > { %8658 = vmatpush3.bf16.msra.mxu0 %v9457_v16 }
 0x2f5   : > { %8534 = vmatmul.mubr.msk.bf16.gmra.mrb[252].mxu1 %vm982_vm4, %v12961_v63  ;;  %v11016_v7 = vadd.f32 %v10772_v21, %v1889_v33  ;;  %8659 = vmatprep.subr.bf16.mxu0 %v12947_v40  ;;  %v9458_v33 = vld [vmem:[%s12849_s5 + $0x18] sm:$0xff]  }
 0x2f6   : > { %v11021_v18 = vpop.f32.mrb[208].mxu0  ;;  %8537 = vmatprep.mubr.msk.bf16.mxu1 %vm9617_vm2, %v12947_v40 }
 0x2f7   : > { %v8475_v30 = vpop.f32.mrb[209].mxu0 }
 0x2f8   : > { %v1854_v44 = vpop.f32.mrb[148].mxu1  ;;  %v11028_v34 = vpop.f32.mrb[210].mxu0  ;;  %8660 = vmatpush3.bf16.msra.mxu0 %v9458_v33  ;;  %v12963_v30 = vld [vmem:[#allocation34_spill] sm:$0xff] }
 0x2f9   : > { %v1890_v21 = vadd.f32 %v1854_v44, %v10802_v57  ;;  %v8295_v55 = vpop.f32.mrb[149].mxu1  ;;  %v8476_v50 = vpop.f32.mrb[211].mxu0  ;;  %v2567_v57 = vsel %vm1623_vm7, %v12963_v30, %v2566_v52  ;;  %8757 = vmatprep.subr.bf16.mxu0 %v12947_v40 }
 0x2fa   : > { %v1857_v3 = vpop.f32.mrb[150].mxu1 }
 0x2fb   : > { %v1891_v63 = vadd.f32 %v1857_v3, %v10808_v14  ;;  %v8296_v36 = vpop.f32.mrb[151].mxu1  ;;  %v11038_v16 = vadd.f32 %v12962_v15, %v1890_v21 }
 0x2fd   : > { %8538 = vmatmul.mubr.msk.bf16.gmra.mrb[0].mxu1 %vm982_vm4, %v2567_v57  ;;  %v11045_v43 = vadd.f32 %v10792_v61, %v1891_v63 }
 0x2fe   : > { %v11047_v44 = vpop.f32.mrb[212].mxu0  ;;  %8609 = vmatprep.mubr.msk.bf16.mxu1 %vm9617_vm2, %v12947_v40 }
 0x2ff   : > { %12964 = vst [vmem:[#allocation23_spill] sm:$0xff] %v11047_v44  ;;  %v8479_v14 = vpop.f32.mrb[213].mxu0 }
 0x300   : > { %v1862_v55 = vpop.f32.mrb[152].mxu1  ;;  %v2524_v21 = vpop.f32.mrb[214].mxu0 }
 0x301   : > { %v1892_v50 = vadd.f32 %v1862_v55, %v10816_v39  ;;  %v8299_v33 = vpop.f32.mrb[153].mxu1  ;;  %v8480_v3 = vpop.f32.mrb[215].mxu0 }
 0x302   : > { %v1865_v52 = vpop.f32.mrb[154].mxu1 }
 0x303   : > { %v8300_v36 = vpop.f32.mrb[155].mxu1  ;;  %v11053_v15 = vadd.f32 %v10810_v51, %v1892_v50 }
 0x306   : > { %v11055_v30 = vpop.f32.mrb[216].mxu0 }
 0x307   : > { %v8551_v61 = vpop.f32.mrb[217].mxu0 }
 0x308   : > { %v2163_v63 = vpop.f32.mrb[156].mxu1  ;;  %v11057_v57 = vpop.f32.mrb[218].mxu0 }
 0x309   : > { %v2265_v40 = vadd.f32 %v2163_v63, %v10829_v6  ;;  %v8371_v14 = vpop.f32.mrb[157].mxu1  ;;  %v8552_v44 = vpop.f32.mrb[219].mxu0 }
 0x30a   : > { %v2166_v21 = vpop.f32.mrb[158].mxu1 }
 0x30b   : > { %v2266_v39 = vadd.f32 %v2166_v21, %v10837_v24  ;;  %v8372_v55 = vpop.f32.mrb[159].mxu1  ;;  %v11062_v33 = vadd.f32 %v10820_v54, %v2265_v40 }
 0x30d   : > { %v11065_v51 = vadd.f32 %v10824_v53, %v2266_v39 }
 0x30e   : > { %v11067_v50 = vpop.f32.mrb[220].mxu0 }
 0x30f   : > { %v8555_v3 = vpop.f32.mrb[221].mxu0 }
 0x310   : > { %v2171_v52 = vpop.f32.mrb[160].mxu1  ;;  %v11069_v36 = vpop.f32.mrb[222].mxu0 }
 0x311   : > { %v2267_v6 = vadd.f32 %v2171_v52, %v10849_v5  ;;  %v8375_v61 = vpop.f32.mrb[161].mxu1  ;;  %v8556_v44 = vpop.f32.mrb[223].mxu0 }
 0x312   : > { %v2174_v63 = vpop.f32.mrb[162].mxu1 }
 0x313   : > { %v2268_v24 = vadd.f32 %v2174_v63, %v10854_v58  ;;  %v8376_v14 = vpop.f32.mrb[163].mxu1  ;;  %v11074_v40 = vadd.f32 %v10839_v25, %v2267_v6 }
 0x315   : > { %v11077_v54 = vadd.f32 %v10844_v48, %v2268_v24 }
 0x316   : > { %v11079_v53 = vpop.f32.mrb[224].mxu0 }
 0x317   : > { %v8559_v21 = vpop.f32.mrb[225].mxu0 }
 0x318   : > { %v2179_v39 = vpop.f32.mrb[164].mxu1  ;;  %v11081_v55 = vpop.f32.mrb[226].mxu0 }
 0x319   : > { %v2269_v5 = vadd.f32 %v2179_v39, %v10865_v4  ;;  %v8379_v3 = vpop.f32.mrb[165].mxu1  ;;  %v8560_v52 = vpop.f32.mrb[227].mxu0 }
 0x31a   : > { %v2182_v61 = vpop.f32.mrb[166].mxu1 }
 0x31b   : > { %v2270_v58 = vadd.f32 %v2182_v61, %v10870_v9  ;;  %v8380_v44 = vpop.f32.mrb[167].mxu1  ;;  %v11086_v25 = vadd.f32 %v10856_v19, %v2269_v5 }
 0x31d   : > { %v11089_v48 = vadd.f32 %v10860_v47, %v2270_v58 }
 0x31e   : > { %v11091_v6 = vpop.f32.mrb[228].mxu0 }
 0x31f   : > { %v8563_v63 = vpop.f32.mrb[229].mxu0 }
 0x320   : > { %v2187_v24 = vpop.f32.mrb[168].mxu1  ;;  %v11093_v14 = vpop.f32.mrb[230].mxu0 }
 0x321   : > { %v2271_v4 = vadd.f32 %v2187_v24, %v10881_v56  ;;  %v8383_v21 = vpop.f32.mrb[169].mxu1  ;;  %v8564_v39 = vpop.f32.mrb[231].mxu0 }
 0x322   : > { %v2190_v3 = vpop.f32.mrb[170].mxu1 }
 0x323   : > { %v2272_v9 = vadd.f32 %v2190_v3, %v10889_v60  ;;  %v8384_v52 = vpop.f32.mrb[171].mxu1  ;;  %v11098_v19 = vadd.f32 %v10872_v29, %v2271_v4 }
 0x325   : > { %v11101_v47 = vadd.f32 %v10876_v1, %v2272_v9 }
 0x326   : > { %v11103_v5 = vpop.f32.mrb[232].mxu0 }
 0x327   : > { %v8567_v61 = vpop.f32.mrb[233].mxu0 }
 0x328   : > { %v2195_v58 = vpop.f32.mrb[172].mxu1  ;;  %v11105_v44 = vpop.f32.mrb[234].mxu0 }
 0x329   : > { %v2273_v56 = vadd.f32 %v2195_v58, %v10901_v31  ;;  %v8387_v63 = vpop.f32.mrb[173].mxu1  ;;  %v8568_v24 = vpop.f32.mrb[235].mxu0 }
 0x32a   : > { %v2198_v21 = vpop.f32.mrb[174].mxu1 }
 0x32b   : > { %v2274_v60 = vadd.f32 %v2198_v21, %v10906_v10  ;;  %v8388_v39 = vpop.f32.mrb[175].mxu1  ;;  %v11110_v29 = vadd.f32 %v10891_v35, %v2273_v56 }
 0x32d   : > { %v11113_v1 = vadd.f32 %v10896_v13, %v2274_v60 }
 0x32e   : > { %v11115_v4 = vpop.f32.mrb[236].mxu0 }
 0x32f   : > { %v8571_v3 = vpop.f32.mrb[237].mxu0 }
 0x330   : > { %v2203_v9 = vpop.f32.mrb[176].mxu1  ;;  %v11117_v52 = vpop.f32.mrb[238].mxu0 }
 0x331   : > { %v2275_v31 = vadd.f32 %v2203_v9, %v10917_v20  ;;  %v8391_v61 = vpop.f32.mrb[177].mxu1  ;;  %v8572_v58 = vpop.f32.mrb[239].mxu0 }
 0x332   : > { %v2206_v63 = vpop.f32.mrb[178].mxu1 }
 0x333   : > { %v2276_v10 = vadd.f32 %v2206_v63, %v10922_v17  ;;  %v8392_v24 = vpop.f32.mrb[179].mxu1  ;;  %v11122_v35 = vadd.f32 %v10908_v45, %v2275_v31 }
 0x335   : > { %v11125_v13 = vadd.f32 %v10912_v38, %v2276_v10 }
 0x336   : > { %v11127_v56 = vpop.f32.mrb[240].mxu0 }
 0x337   : > { %v8575_v21 = vpop.f32.mrb[241].mxu0 }
 0x338   : > { %v2211_v60 = vpop.f32.mrb[180].mxu1  ;;  %v11129_v39 = vpop.f32.mrb[242].mxu0 }
 0x339   : > { %v2277_v20 = vadd.f32 %v2211_v60, %v10933_v42  ;;  %v8395_v3 = vpop.f32.mrb[181].mxu1  ;;  %v8576_v9 = vpop.f32.mrb[243].mxu0 }
 0x33a   : > { %v2214_v61 = vpop.f32.mrb[182].mxu1 }
 0x33b   : > { %v2278_v17 = vadd.f32 %v2214_v61, %v10938_v0  ;;  %v8396_v58 = vpop.f32.mrb[183].mxu1  ;;  %v11134_v45 = vadd.f32 %v10924_v37, %v2277_v20 }
 0x33d   : > { %v11137_v38 = vadd.f32 %v10928_v23, %v2278_v17 }
 0x33e   : > { %v11139_v31 = vpop.f32.mrb[244].mxu0 }
 0x33f   : > { %v8579_v63 = vpop.f32.mrb[245].mxu0 }
 0x340   : > { %v2219_v10 = vpop.f32.mrb[184].mxu1  ;;  %v11141_v24 = vpop.f32.mrb[246].mxu0 }
 0x341   : > { %v2279_v42 = vadd.f32 %v2219_v10, %v10953_v22  ;;  %v8399_v21 = vpop.f32.mrb[185].mxu1  ;;  %v8580_v60 = vpop.f32.mrb[247].mxu0 }
 0x342   : > { %v2222_v3 = vpop.f32.mrb[186].mxu1 }
 0x343   : > { %v2280_v0 = vadd.f32 %v2222_v3, %v10958_v2  ;;  %v8400_v9 = vpop.f32.mrb[187].mxu1  ;;  %v11146_v37 = vadd.f32 %v10940_v32, %v2279_v42 }
 0x345   : > { %v11149_v23 = vadd.f32 %v10947_v8, %v2280_v0 }
 0x346   : > { %v11151_v20 = vpop.f32.mrb[248].mxu0 }
 0x347   : > { %v8583_v61 = vpop.f32.mrb[249].mxu0 }
 0x348   : > { %v2227_v17 = vpop.f32.mrb[188].mxu1  ;;  %v11153_v58 = vpop.f32.mrb[250].mxu0 }
 0x349   : > { %v2281_v22 = vadd.f32 %v2227_v17, %v10969_v27  ;;  %v8403_v63 = vpop.f32.mrb[189].mxu1  ;;  %v8584_v10 = vpop.f32.mrb[251].mxu0 }
 0x34a   : > { %v2230_v21 = vpop.f32.mrb[190].mxu1 }
 0x34b   : > { %v2282_v2 = vadd.f32 %v2230_v21, %v10974_v59  ;;  %v8404_v60 = vpop.f32.mrb[191].mxu1  ;;  %v11158_v32 = vadd.f32 %v10960_v26, %v2281_v22 }
 0x34d   : > { %v11161_v8 = vadd.f32 %v10964_v41, %v2282_v2 }
 0x34e   : > { %v11163_v42 = vpop.f32.mrb[252].mxu0 }
 0x34f   : > { %v8587_v3 = vpop.f32.mrb[253].mxu0 }
 0x350   : > { %v2235_v0 = vpop.f32.mrb[192].mxu1  ;;  %v11165_v9 = vpop.f32.mrb[254].mxu0 }
 0x351   : > { %v2283_v27 = vadd.f32 %v2235_v0, %v10985_v12  ;;  %v8407_v61 = vpop.f32.mrb[193].mxu1  ;;  %v8588_v17 = vpop.f32.mrb[255].mxu0 }
 0x352   : > { %v2238_v63 = vpop.f32.mrb[194].mxu1 }
 0x353   : > { %v2284_v59 = vadd.f32 %v2238_v63, %v10993_v46  ;;  %v8408_v10 = vpop.f32.mrb[195].mxu1  ;;  %v11170_v26 = vadd.f32 %v10976_v28, %v2283_v27  ;;  %v12965_v63 = vld [vmem:[#allocation9_spill] sm:$0xff] }
 0x355   : > { %v11173_v41 = vadd.f32 %v10980_v62, %v2284_v59 }
 0x356   : > { %v11175_v22 = vpop.f32.mrb[0].mxu0 }
 0x357   : > { %v8591_v21 = vpop.f32.mrb[1].mxu0 }
 0x358   : > { %v2243_v2 = vpop.f32.mrb[196].mxu1  ;;  %v11177_v60 = vpop.f32.mrb[2].mxu0 }
 0x359   : > { %v2285_v12 = vadd.f32 %v2243_v2, %v11009_v11  ;;  %v8411_v3 = vpop.f32.mrb[197].mxu1  ;;  %v8592_v0 = vpop.f32.mrb[3].mxu0 }
 0x35a   : > { %v2246_v61 = vpop.f32.mrb[198].mxu1 }
 0x35b   : > { %v2286_v46 = vadd.f32 %v2246_v61, %v11016_v7  ;;  %v8412_v17 = vpop.f32.mrb[199].mxu1  ;;  %v11182_v28 = vadd.f32 %v12965_v63, %v2285_v12 }
 0x35d   : > { %v11185_v62 = vadd.f32 %v11001_v49, %v2286_v46 }
 0x35e   : > { %v11187_v27 = vpop.f32.mrb[4].mxu0 }
 0x35f   : > { %12966 = vst [vmem:[#allocation10_spill] sm:$0xff] %v11187_v27  ;;  %v8595_v59 = vpop.f32.mrb[5].mxu0  ;;  %v12968_v27 = vld [vmem:[#allocation23_spill] sm:$0xff] }
 0x360   : > { %v2251_v10 = vpop.f32.mrb[200].mxu1  ;;  %v11189_v21 = vpop.f32.mrb[6].mxu0 }
 0x361   : > { %12967 = vst [vmem:[#allocation24_spill] sm:$0xff] %v11189_v21  ;;  %v2287_v11 = vadd.f32 %v2251_v10, %v11038_v16  ;;  %v8415_v2 = vpop.f32.mrb[201].mxu1  ;;  %v8596_v3 = vpop.f32.mrb[7].mxu0 }
 0x362   : > { %v2254_v0 = vpop.f32.mrb[202].mxu1 }
 0x363   : > { %v2288_v7 = vadd.f32 %v2254_v0, %v11045_v43  ;;  %v8416_v61 = vpop.f32.mrb[203].mxu1  ;;  %v11194_v12 = vadd.f32 %v11021_v18, %v2287_v11 }
 0x365   : > { %v11197_v49 = vadd.f32 %v11028_v34, %v2288_v7  ;;  %v11209_v34 = vld [vmem:[%s12848_s4] ss:$0 sm:$0xff] }
 0x366   : > { %v11199_v46 = vpop.f32.mrb[8].mxu0 }
 0x367   : > { %v8599_v17 = vpop.f32.mrb[9].mxu0 }
 0x368   : > { %v2259_v63 = vpop.f32.mrb[204].mxu1  ;;  %v2923_v59 = vpop.f32.mrb[10].mxu0 }
 0x369   : > { %v2289_v21 = vadd.f32 %v2259_v63, %v11053_v15  ;;  %v8419_v16 = vpop.f32.mrb[205].mxu1  ;;  %v8600_v10 = vpop.f32.mrb[11].mxu0 }
 0x36a   : > { %v2262_v2 = vpop.f32.mrb[206].mxu1 }
 0x36b   : > { %v8420_v3 = vpop.f32.mrb[207].mxu1  ;;  %v11203_v43 = vadd.f32 %v12968_v27, %v2289_v21 }
 0x370   : > { %v2629_v0 = vpop.f32.mrb[208].mxu1 }
 0x371   : > { %v2731_v18 = vadd.f32 %v2629_v0, %v11062_v33  ;;  %v8491_v11 = vpop.f32.mrb[209].mxu1 }
 0x372   : > { %v2632_v7 = vpop.f32.mrb[210].mxu1 }
 0x373   : > { %v2926_v61 = vadd.f32 %v11055_v30, %v2731_v18  ;;  %v2732_v15 = vadd.f32 %v2632_v7, %v11065_v51  ;;  %v8492_v17 = vpop.f32.mrb[211].mxu1  ;;  %v9462_v30 = vld [vmem:[%s12849_s5 + $0x60] sm:$0xff]   ;;  %v12969_v7 = vmov 0.0  }
 0x375   : > { %v2958_v63 = vadd.f32 %v11209_v34, %v2926_v61  ;;  %v2927_v27 = vadd.f32 %v11057_v57, %v2732_v15  ;;  %v9463_v61 = vld [vmem:[%s12849_s5 + $0x68] sm:$0xff]  }
 0x377   : > { %v2959_v21 = vadd.f32 %v11209_v34, %v2927_v27  ;;  %v2983_v33 = vmax.f32 %v2958_v63, 0.0 }
 0x378   : > { %v2637_v59 = vpop.f32.mrb[212].mxu1 }
 0x379   : > { %v2984_v16 = vmax.f32 %v2959_v21, 0.0  ;;  %v2733_v10 = vadd.f32 %v2637_v59, %v11074_v40  ;;  %v8495_v2 = vpop.f32.mrb[213].mxu1 }
 0x37a   : > { %v2640_v3 = vpop.f32.mrb[214].mxu1 }
 0x37b   : > { %v11220_v0 = vpack.c.bf16 %v2984_v16, %v2983_v33  ;;  %v2928_v51 = vadd.f32 %v11067_v50, %v2733_v10  ;;  %v2734_v18 = vadd.f32 %v2640_v3, %v11077_v54  ;;  %v8496_v57 = vpop.f32.mrb[215].mxu1  ;;  %v9465_v10 = vld [vmem:[%s12849_s5 + $0x70] sm:$0xff]  }
 0x37c   : > { %v9466_v57 = vld [vmem:[%s12849_s5 + $0x78] sm:$0xff]  }
 0x37d   : > { %8662 = vmatmul.mubr.msk.bf16.vlgmr.msra.gmra.mrb[12].mxu0 %vm982_vm4, %v11220_v0  ;;  %v2960_v11 = vadd.f32 %v11209_v34, %v2928_v51  ;;  %v2929_v40 = vadd.f32 %v11069_v36, %v2734_v18  ;;  %v3042_v50 = vshll.u32 %v11220_v0, 16  ;;  %v3040_v51 = vshrl.u32 %v11220_v0, 16 }
 0x37e   : > { %8665 = vmatprep.mubr.msk.bf16.mxu0 %vm9617_vm2, %v12969_v7  ;;  %8758 = vmatpush3.bf16.msra.mxu0 %v9462_v30 }
 0x37f   : > { %8759 = vmatprep.subr.bf16.mxu0 %v12969_v7  ;;  %v2961_v54 = vadd.f32 %v11209_v34, %v2929_v40  ;;  %v2985_v27 = vmax.f32 %v2960_v11, 0.0  ;;  %v3044_v2 = vrot.slane %v3042_v50, 1 }
 0x380   : > { %v2645_v15 = vpop.f32.mrb[216].mxu1 }
 0x381   : > { %v2735_v17 = vadd.f32 %v2645_v15, %v11086_v25  ;;  %v8499_v63 = vpop.f32.mrb[217].mxu1  ;;  %v2986_v36 = vmax.f32 %v2961_v54, 0.0 }
 0x382   : > { %v2648_v21 = vpop.f32.mrb[218].mxu1  ;;  %8760 = vmatpush3.bf16.msra.mxu0 %v9463_v61  ;;  %v9459_v61 = vld [vmem:[%s12849_s5 + $0x40] sm:$0xff]  }
 0x383   : > { %v2930_v59 = vadd.f32 %v11079_v53, %v2735_v17  ;;  %v2736_v33 = vadd.f32 %v2648_v21, %v11089_v48  ;;  %v8500_v16 = vpop.f32.mrb[219].mxu1  ;;  %8761 = vmatprep.subr.bf16.mxu0 %v12969_v7  ;;  %v11243_v3 = vpack.c.bf16 %v2986_v36, %v2985_v27  ;;  %v3707_v27 = vrot.slane %v3040_v51, 7 }
 0x385   : > { %v2962_v25 = vadd.f32 %v11209_v34, %v2930_v59  ;;  %v2931_v30 = vadd.f32 %v11081_v55, %v2736_v33  ;;  %v3047_v53 = vshll.u32 %v11243_v3, 16  ;;  %8666 = vmatmul.mubr.msk.bf16.gmra.mrb[16].mxu0 %vm982_vm4, %v11243_v3  ;;  %v3051_v48 = vshrl.u32 %v11243_v3, 16 }
 0x386   : > { %8669 = vmatprep.mubr.msk.bf16.mxu0 %vm9617_vm2, %v12969_v7  ;;  %8762 = vmatpush3.bf16.msra.mxu0 %v9465_v10  ;;  %v3045_v55 = vor.u32 %v3044_v2, %v3040_v51 }
 0x387   : > { %v2963_v18 = vadd.f32 %v11209_v34, %v2931_v30  ;;  %v3049_v40 = vrot.slane %v3047_v53, 1  ;;  %v3708_v50 = vrot.slane %v3051_v48, 7  ;;  %8763 = vmatprep.subr.bf16.mxu0 %v12969_v7  ;;  %v2987_v54 = vmax.f32 %v2962_v25, 0.0 }
 0x388   : > { %v2653_v11 = vpop.f32.mrb[220].mxu1 }
 0x389   : > { %v2988_v15 = vmax.f32 %v2963_v18, 0.0  ;;  %v2737_v17 = vadd.f32 %v2653_v11, %v11098_v19  ;;  %v8503_v63 = vpop.f32.mrb[221].mxu1  ;;  %v3050_v21 = vsel %vm854_vm6, %v3045_v55, %v3049_v40  ;;  %v3709_v59 = vor.u32 %v3708_v50, %v3047_v53  ;;  %v9460_v19 = vld [vmem:[%s12849_s5 + $0x48] sm:$0xff]   ;;  %v9461_v11 = vld [vmem:[%s12849_s5 + $0x50] sm:$0xff]  }
 0x38a   : > { %v2656_v36 = vpop.f32.mrb[222].mxu1  ;;  %8610 = vmatmul.mubr.msk.bf16.vlgmr.msra.gmra.mrb[4].mxu1 %vm982_vm4, %v3050_v21  ;;  %8764 = vmatpush3.bf16.msra.mxu0 %v9466_v57  ;;  %v3053_v18 = vor.u32 %v3051_v48, %v3049_v40 }
 0x38b   : > { %v11264_v33 = vpack.c.bf16 %v2988_v15, %v2987_v54  ;;  %v2932_v16 = vadd.f32 %v11091_v6, %v2737_v17  ;;  %v2738_v10 = vadd.f32 %v2656_v36, %v11101_v47  ;;  %v8504_v2 = vpop.f32.mrb[223].mxu1  ;;  %8706 = vmatpush3.bf16.msra.mxu1 %v9459_v61  ;;  %8613 = vmatprep.mubr.msk.bf16.mxu1 %vm9617_vm2, %v12969_v7 }
 0x38c   : > { %v11275_v25 = vsel %vm1623_vm7, %v3707_v27, %v3709_v59  ;;  %8707 = vmatprep.subr.bf16.mxu1 %v12969_v7  ;;  %8861 = vmatprep.subr.bf16.mxu0 %v12969_v7 }
 0x38d   : > { %v2964_v30 = vadd.f32 %v11209_v34, %v2932_v16  ;;  %v2933_v6 = vadd.f32 %v11093_v14, %v2738_v10  ;;  %v3055_v47 = vshll.u32 %v11264_v33, 16  ;;  %v3059_v51 = vshrl.u32 %v11264_v33, 16  ;;  %8670 = vmatmul.mubr.msk.bf16.gmra.mrb[20].mxu0 %vm982_vm4, %v11264_v33 }
 0x38e   : > { %8673 = vmatprep.mubr.msk.bf16.mxu0 %vm9617_vm2, %v12969_v7 }
 0x38f   : > { %v2965_v53 = vadd.f32 %v11209_v34, %v2933_v6  ;;  %v3057_v57 = vrot.slane %v3055_v47, 1  ;;  %v3711_v55 = vrot.slane %v3059_v51, 7  ;;  %8708 = vmatpush3.bf16.msra.mxu1 %v9460_v19  ;;  %v2989_v61 = vmax.f32 %v2964_v30, 0.0 }
 0x390   : > { %v2661_v14 = vpop.f32.mrb[224].mxu1  ;;  %8709 = vmatprep.subr.bf16.mxu1 %v12969_v7 }
 0x391   : > { %v2990_v54 = vmax.f32 %v2965_v53, 0.0  ;;  %v2739_v15 = vadd.f32 %v2661_v14, %v11110_v29  ;;  %v8507_v17 = vpop.f32.mrb[225].mxu1  ;;  %v11293_v63 = vsel %vm854_vm6, %v3053_v18, %v3057_v57  ;;  %v3712_v40 = vor.u32 %v3711_v55, %v3055_v47  ;;  %v9464_v29 = vld [vmem:[%s12849_s5 + $0x58] sm:$0xff]  }
 0x392   : > { %v2664_v48 = vpop.f32.mrb[226].mxu1  ;;  %8614 = vmatmul.mubr.msk.bf16.gmra.mrb[8].mxu1 %vm982_vm4, %v11293_v63  ;;  %v3061_v30 = vor.u32 %v3059_v51, %v3057_v57 }
 0x393   : > { %v11296_v27 = vpack.c.bf16 %v2990_v54, %v2989_v61  ;;  %v2934_v36 = vadd.f32 %v11103_v5, %v2739_v15  ;;  %v2740_v21 = vadd.f32 %v2664_v48, %v11113_v1  ;;  %v8508_v59 = vpop.f32.mrb[227].mxu1  ;;  %8617 = vmatprep.mubr.msk.bf16.mxu1 %vm9617_vm2, %v12969_v7  ;;  %8710 = vmatpush3.bf16.msra.mxu1 %v9461_v11 }
 0x394   : > { %v11308_v16 = vsel %vm1623_vm7, %v3708_v50, %v3712_v40  ;;  %8711 = vmatprep.subr.bf16.mxu1 %v12969_v7 }
 0x395   : > { %v2966_v10 = vadd.f32 %v11209_v34, %v2934_v36  ;;  %v2935_v5 = vadd.f32 %v11105_v44, %v2740_v21  ;;  %v3063_v1 = vshll.u32 %v11296_v27, 16  ;;  %v3067_v2 = vshrl.u32 %v11296_v27, 16  ;;  %8674 = vmatmul.mubr.msk.bf16.gmra.mrb[24].mxu0 %vm982_vm4, %v11296_v27 }
 0x396   : > { %8677 = vmatprep.mubr.msk.bf16.mxu0 %vm9617_vm2, %v12969_v7 }
 0x397   : > { %v2967_v19 = vadd.f32 %v11209_v34, %v2935_v5  ;;  %v3065_v6 = vrot.slane %v3063_v1, 1  ;;  %v3714_v50 = vrot.slane %v3067_v2, 7  ;;  %8712 = vmatpush3.bf16.msra.mxu1 %v9464_v29  ;;  %v2991_v44 = vmax.f32 %v2966_v10, 0.0 }
 0x398   : > { %v2669_v47 = vpop.f32.mrb[228].mxu1  ;;  %8809 = vmatprep.subr.bf16.mxu1 %v12969_v7 }
 0x399   : > { %v2992_v53 = vmax.f32 %v2967_v19, 0.0  ;;  %v2741_v18 = vadd.f32 %v2669_v47, %v11122_v35  ;;  %v8511_v14 = vpop.f32.mrb[229].mxu1  ;;  %v11322_v11 = vsel %vm854_vm6, %v3061_v30, %v3065_v6  ;;  %v3715_v54 = vor.u32 %v3714_v50, %v3063_v1 }
 0x39a   : > { %v2672_v61 = vpop.f32.mrb[230].mxu1  ;;  %8618 = vmatmul.mubr.msk.bf16.gmra.mrb[12].mxu1 %vm982_vm4, %v11322_v11  ;;  %v3069_v21 = vor.u32 %v3067_v2, %v3065_v6 }
 0x39b   : > { %v11325_v51 = vpack.c.bf16 %v2992_v53, %v2991_v44  ;;  %v2936_v57 = vadd.f32 %v11115_v4, %v2741_v18  ;;  %v2742_v15 = vadd.f32 %v2672_v61, %v11125_v13  ;;  %v8512_v17 = vpop.f32.mrb[231].mxu1  ;;  %8621 = vmatprep.mubr.msk.bf16.mxu1 %vm9617_vm2, %v12969_v7  ;;  %v11334_v35 = vsel %vm1623_vm7, %v3711_v55, %v3715_v54 }
 0x39d   : > { %v2968_v48 = vadd.f32 %v11209_v34, %v2936_v57  ;;  %v2937_v40 = vadd.f32 %v11117_v52, %v2742_v15  ;;  %v3071_v36 = vshll.u32 %v11325_v51, 16  ;;  %v3075_v4 = vshrl.u32 %v11325_v51, 16  ;;  %8678 = vmatmul.mubr.msk.bf16.gmra.mrb[28].mxu0 %vm982_vm4, %v11325_v51 }
 0x39e   : > { %8681 = vmatprep.mubr.msk.bf16.mxu0 %vm9617_vm2, %v12969_v7 }
 0x39f   : > { %v2969_v13 = vadd.f32 %v11209_v34, %v2937_v40  ;;  %v3073_v59 = vrot.slane %v3071_v36, 1  ;;  %v3717_v55 = vrot.slane %v3075_v4, 7  ;;  %v2993_v10 = vmax.f32 %v2968_v48, 0.0 }
 0x3a0   : > { %v2677_v29 = vpop.f32.mrb[232].mxu1 }
 0x3a1   : > { %v2994_v5 = vmax.f32 %v2969_v13, 0.0  ;;  %v2743_v52 = vadd.f32 %v2677_v29, %v11134_v45  ;;  %v8515_v1 = vpop.f32.mrb[233].mxu1  ;;  %v11347_v19 = vsel %vm854_vm6, %v3069_v21, %v3073_v59  ;;  %v3718_v47 = vor.u32 %v3717_v55, %v3071_v36 }
 0x3a2   : > { %v2680_v30 = vpop.f32.mrb[234].mxu1  ;;  %8622 = vmatmul.mubr.msk.bf16.gmra.mrb[16].mxu1 %vm982_vm4, %v11347_v19  ;;  %v3077_v54 = vor.u32 %v3075_v4, %v3073_v59 }
 0x3a3   : > { %v11349_v44 = vpack.c.bf16 %v2994_v5, %v2993_v10  ;;  %v2938_v2 = vadd.f32 %v11127_v56, %v2743_v52  ;;  %v2744_v6 = vadd.f32 %v2680_v30, %v11137_v38  ;;  %v8516_v53 = vpop.f32.mrb[235].mxu1  ;;  %8625 = vmatprep.mubr.msk.bf16.mxu1 %vm9617_vm2, %v12969_v7  ;;  %v11358_v45 = vsel %vm1623_vm7, %v3714_v50, %v3718_v47 }
 0x3a5   : > { %v2970_v18 = vadd.f32 %v11209_v34, %v2938_v2  ;;  %v2939_v14 = vadd.f32 %v11129_v39, %v2744_v6  ;;  %v3079_v61 = vshll.u32 %v11349_v44, 16  ;;  %v3083_v56 = vshrl.u32 %v11349_v44, 16  ;;  %8682 = vmatmul.mubr.msk.bf16.gmra.mrb[32].mxu0 %vm982_vm4, %v11349_v44 }
 0x3a6   : > { %8685 = vmatprep.mubr.msk.bf16.mxu0 %vm9617_vm2, %v12969_v7 }
 0x3a7   : > { %v2971_v38 = vadd.f32 %v11209_v34, %v2939_v14  ;;  %v3081_v57 = vrot.slane %v3079_v61, 1  ;;  %v3720_v50 = vrot.slane %v3083_v56, 7  ;;  %v2995_v17 = vmax.f32 %v2970_v18, 0.0 }
 0x3a8   : > { %v2685_v15 = vpop.f32.mrb[236].mxu1 }
 0x3a9   : > { %v2996_v48 = vmax.f32 %v2971_v38, 0.0  ;;  %v2745_v39 = vadd.f32 %v2685_v15, %v11146_v37  ;;  %v8519_v40 = vpop.f32.mrb[237].mxu1  ;;  %v11371_v36 = vsel %vm854_vm6, %v3077_v54, %v3081_v57  ;;  %v3721_v21 = vor.u32 %v3720_v50, %v3079_v61 }
 0x3aa   : > { %v2688_v13 = vpop.f32.mrb[238].mxu1  ;;  %8626 = vmatmul.mubr.msk.bf16.gmra.mrb[20].mxu1 %vm982_vm4, %v11371_v36  ;;  %v3085_v30 = vor.u32 %v3083_v56, %v3081_v57 }
 0x3ab   : > { %v11373_v29 = vpack.c.bf16 %v2996_v48, %v2995_v17  ;;  %v2940_v4 = vadd.f32 %v11139_v31, %v2745_v39  ;;  %v2746_v59 = vadd.f32 %v2688_v13, %v11149_v23  ;;  %v8520_v10 = vpop.f32.mrb[239].mxu1  ;;  %8629 = vmatprep.mubr.msk.bf16.mxu1 %vm9617_vm2, %v12969_v7  ;;  %v11382_v37 = vsel %vm1623_vm7, %v3717_v55, %v3721_v21 }
 0x3ad   : > { %v2972_v5 = vadd.f32 %v11209_v34, %v2940_v4  ;;  %v2941_v52 = vadd.f32 %v11141_v24, %v2746_v59  ;;  %v3087_v1 = vshll.u32 %v11373_v29, 16  ;;  %v3091_v31 = vshrl.u32 %v11373_v29, 16  ;;  %8686 = vmatmul.mubr.msk.bf16.gmra.mrb[36].mxu0 %vm982_vm4, %v11373_v29 }
 0x3ae   : > { %8689 = vmatprep.mubr.msk.bf16.mxu0 %vm9617_vm2, %v12969_v7 }
 0x3af   : > { %v2973_v23 = vadd.f32 %v11209_v34, %v2941_v52  ;;  %v3089_v47 = vrot.slane %v3087_v1, 1  ;;  %v3723_v55 = vrot.slane %v3091_v31, 7  ;;  %v2997_v6 = vmax.f32 %v2972_v5, 0.0 }
 0x3b0   : > { %v2693_v2 = vpop.f32.mrb[240].mxu1 }
 0x3b1   : > { %v2998_v53 = vmax.f32 %v2973_v23, 0.0  ;;  %v2747_v24 = vadd.f32 %v2693_v2, %v11158_v32  ;;  %v8523_v18 = vpop.f32.mrb[241].mxu1  ;;  %v11395_v14 = vsel %vm854_vm6, %v3085_v30, %v3089_v47  ;;  %v3724_v38 = vor.u32 %v3723_v55, %v3087_v1 }
 0x3b2   : > { %v2696_v61 = vpop.f32.mrb[242].mxu1  ;;  %8630 = vmatmul.mubr.msk.bf16.gmra.mrb[24].mxu1 %vm982_vm4, %v11395_v14  ;;  %v3093_v40 = vor.u32 %v3091_v31, %v3089_v47 }
 0x3b3   : > { %v11397_v54 = vpack.c.bf16 %v2998_v53, %v2997_v6  ;;  %v2942_v56 = vadd.f32 %v11151_v20, %v2747_v24  ;;  %v2748_v57 = vadd.f32 %v2696_v61, %v11161_v8  ;;  %v8524_v15 = vpop.f32.mrb[243].mxu1  ;;  %8633 = vmatprep.mubr.msk.bf16.mxu1 %vm9617_vm2, %v12969_v7  ;;  %v11406_v32 = vsel %vm1623_vm7, %v3720_v50, %v3724_v38 }
 0x3b5   : > { %v2974_v17 = vadd.f32 %v11209_v34, %v2942_v56  ;;  %v2943_v48 = vadd.f32 %v11153_v58, %v2748_v57  ;;  %v3095_v39 = vshll.u32 %v11397_v54, 16  ;;  %v3099_v20 = vshrl.u32 %v11397_v54, 16  ;;  %8690 = vmatmul.mubr.msk.bf16.gmra.mrb[40].mxu0 %vm982_vm4, %v11397_v54 }
 0x3b6   : > { %8693 = vmatprep.mubr.msk.bf16.mxu0 %vm9617_vm2, %v12969_v7 }
 0x3b7   : > { %v2975_v8 = vadd.f32 %v11209_v34, %v2943_v48  ;;  %v3097_v13 = vrot.slane %v3095_v39, 1  ;;  %v3726_v50 = vrot.slane %v3099_v20, 7  ;;  %v2999_v4 = vmax.f32 %v2974_v17, 0.0 }
 0x3b8   : > { %v2701_v21 = vpop.f32.mrb[244].mxu1 }
 0x3b9   : > { %v3000_v59 = vmax.f32 %v2975_v8, 0.0  ;;  %v2749_v58 = vadd.f32 %v2701_v21, %v11170_v26  ;;  %v8527_v10 = vpop.f32.mrb[245].mxu1  ;;  %v11419_v5 = vsel %vm854_vm6, %v3093_v40, %v3097_v13  ;;  %v3727_v1 = vor.u32 %v3726_v50, %v3095_v39 }
 0x3ba   : > { %v2704_v52 = vpop.f32.mrb[246].mxu1  ;;  %8634 = vmatmul.mubr.msk.bf16.gmra.mrb[28].mxu1 %vm982_vm4, %v11419_v5  ;;  %v3101_v24 = vor.u32 %v3099_v20, %v3097_v13 }
 0x3bb   : > { %v11421_v23 = vpack.c.bf16 %v3000_v59, %v2999_v4  ;;  %v2944_v31 = vadd.f32 %v11163_v42, %v2749_v58  ;;  %v2750_v30 = vadd.f32 %v2704_v52, %v11173_v41  ;;  %v8528_v47 = vpop.f32.mrb[247].mxu1  ;;  %8637 = vmatprep.mubr.msk.bf16.mxu1 %vm9617_vm2, %v12969_v7  ;;  %v11430_v26 = vsel %vm1623_vm7, %v3723_v55, %v3727_v1 }
 0x3bd   : > { %v2976_v2 = vadd.f32 %v11209_v34, %v2944_v31  ;;  %v2945_v6 = vadd.f32 %v11165_v9, %v2750_v30  ;;  %v3103_v53 = vshll.u32 %v11421_v23, 16  ;;  %v3107_v42 = vshrl.u32 %v11421_v23, 16  ;;  %8694 = vmatmul.mubr.msk.bf16.gmra.mrb[44].mxu0 %vm982_vm4, %v11421_v23 }
 0x3be   : > { %8697 = vmatprep.mubr.msk.bf16.mxu0 %vm9617_vm2, %v12969_v7 }
 0x3bf   : > { %v2977_v41 = vadd.f32 %v11209_v34, %v2945_v6  ;;  %v3105_v18 = vrot.slane %v3103_v53, 1  ;;  %v3729_v55 = vrot.slane %v3107_v42, 7  ;;  %v3001_v38 = vmax.f32 %v2976_v2, 0.0 }
 0x3c0   : > { %v2709_v61 = vpop.f32.mrb[248].mxu1 }
 0x3c1   : > { %v3002_v56 = vmax.f32 %v2977_v41, 0.0  ;;  %v2751_v9 = vadd.f32 %v2709_v61, %v11182_v28  ;;  %v8531_v57 = vpop.f32.mrb[249].mxu1  ;;  %v11443_v15 = vsel %vm854_vm6, %v3101_v24, %v3105_v18  ;;  %v3730_v48 = vor.u32 %v3729_v55, %v3103_v53  ;;  %v12970_v53 = vld [vmem:[#allocation10_spill] sm:$0xff]  ;;  %v12971_v61 = vld [vmem:[#allocation24_spill] sm:$0xff] }
 0x3c2   : > { %v2712_v17 = vpop.f32.mrb[250].mxu1  ;;  %8638 = vmatmul.mubr.msk.bf16.gmra.mrb[32].mxu1 %vm982_vm4, %v11443_v15  ;;  %v3109_v59 = vor.u32 %v3107_v42, %v3105_v18 }
 0x3c3   : > { %v11445_v39 = vpack.c.bf16 %v3002_v56, %v3001_v38  ;;  %v2946_v20 = vadd.f32 %v11175_v22, %v2751_v9  ;;  %v2752_v8 = vadd.f32 %v2712_v17, %v11185_v62  ;;  %v8532_v40 = vpop.f32.mrb[251].mxu1  ;;  %8641 = vmatprep.mubr.msk.bf16.mxu1 %vm9617_vm2, %v12969_v7  ;;  %v11454_v28 = vsel %vm1623_vm7, %v3726_v50, %v3730_v48 }
 0x3c5   : > { %v2978_v13 = vadd.f32 %v11209_v34, %v2946_v20  ;;  %v2947_v21 = vadd.f32 %v11177_v60, %v2752_v8  ;;  %v3111_v4 = vshll.u32 %v11445_v39, 16  ;;  %v3115_v22 = vshrl.u32 %v11445_v39, 16  ;;  %8698 = vmatmul.mubr.msk.bf16.gmra.mrb[48].mxu0 %vm982_vm4, %v11445_v39 }
 0x3c6   : > { %8701 = vmatprep.mubr.msk.bf16.mxu0 %vm9617_vm2, %v12969_v7 }
 0x3c7   : > { %v2979_v62 = vadd.f32 %v11209_v34, %v2947_v21  ;;  %v3113_v58 = vrot.slane %v3111_v4, 1  ;;  %v3732_v50 = vrot.slane %v3115_v22, 7  ;;  %v3003_v52 = vmax.f32 %v2978_v13, 0.0 }
 0x3c8   : > { %v2717_v10 = vpop.f32.mrb[252].mxu1 }
 0x3c9   : > { %v3004_v1 = vmax.f32 %v2979_v62, 0.0  ;;  %v2753_v60 = vadd.f32 %v2717_v10, %v11194_v12  ;;  %v8535_v31 = vpop.f32.mrb[253].mxu1  ;;  %v11467_v30 = vsel %vm854_vm6, %v3109_v59, %v3113_v58  ;;  %v3733_v2 = vor.u32 %v3732_v50, %v3111_v4 }
 0x3ca   : > { %v2720_v47 = vpop.f32.mrb[254].mxu1  ;;  %8642 = vmatmul.mubr.msk.bf16.gmra.mrb[36].mxu1 %vm982_vm4, %v11467_v30  ;;  %v3117_v57 = vor.u32 %v3115_v22, %v3113_v58  ;;  %v9473_v31 = vld [vmem:[%s12849_s5 + $0xb0] sm:$0xff]  }
 0x3cb   : > { %v11469_v6 = vpack.c.bf16 %v3004_v1, %v3003_v52  ;;  %v2948_v42 = vadd.f32 %v12970_v53, %v2753_v60  ;;  %v2754_v41 = vadd.f32 %v2720_v47, %v11197_v49  ;;  %v8536_v24 = vpop.f32.mrb[255].mxu1  ;;  %8645 = vmatprep.mubr.msk.bf16.mxu1 %vm9617_vm2, %v12969_v7  ;;  %v11478_v12 = vsel %vm1623_vm7, %v3729_v55, %v3733_v2  ;;  %v9471_v1 = vld [vmem:[%s12849_s5 + $0xa8] sm:$0xff]   ;;  %v9474_v2 = vld [vmem:[%s12849_s5 + $0xb8] sm:$0xff]  }
 0x3cc   : > { %v3485_v47 = vrot.slane %v11243_v3, 1  ;;  %v3484_v53 = vrot.slane %v11220_v0, 1  ;;  %v9468_v24 = vld [vmem:[%s12849_s5 + $0x88] sm:$0xff]   ;;  %v3487_v0 = vrot.slane %v11264_v33, 1 }
 0x3cd   : > { %v2980_v18 = vadd.f32 %v11209_v34, %v2948_v42  ;;  %v2949_v38 = vadd.f32 %v12971_v61, %v2754_v41  ;;  %v3119_v56 = vshll.u32 %v11469_v6, 16  ;;  %v3123_v9 = vshrl.u32 %v11469_v6, 16  ;;  %8702 = vmatmul.mubr.msk.bf16.gmra.mrb[52].mxu0 %vm982_vm4, %v11469_v6  ;;  %v9467_v42 = vld [vmem:[%s12849_s5 + $0x80] sm:$0xff]  }
 0x3ce   : > { %8765 = vmatprep.mubr.msk.bf16.mxu0 %vm9617_vm2, %v12969_v7  ;;  %v3486_v41 = vsel %vm1365_vm5, %v3484_v53, %v3485_v47  ;;  %v3488_v61 = vsel %vm1365_vm5, %v3485_v47, %v3487_v0  ;;  %v9481_v47 = vld [vmem:[%s12849_s5 + $0xf0] sm:$0xff]  }
 0x3cf   : > { %v2981_v49 = vadd.f32 %v11209_v34, %v2949_v38  ;;  %v3121_v17 = vrot.slane %v3119_v56, 1  ;;  %v11489_v55 = vrot.slane %v3123_v9, 7  ;;  %v3005_v20 = vmax.f32 %v2980_v18, 0.0  ;;  %v9469_v18 = vld [vmem:[%s12849_s5 + $0x90] sm:$0xff]   ;;  %v9472_v38 = vld [vmem:[%s12849_s5 + $0x98] sm:$0xff]  }
 0x3d0   : > { %v2725_v48 = vpop.f32.mrb[0].mxu1  ;;  %v9477_v53 = vld [vmem:[%s12849_s5 + $0xd0] sm:$0xff]  }
 0x3d1   : > { %v3006_v8 = vmax.f32 %v2981_v49, 0.0  ;;  %v2755_v40 = vadd.f32 %v2725_v48, %v11203_v43  ;;  %v8539_v13 = vpop.f32.mrb[1].mxu1  ;;  %v11493_v21 = vsel %vm854_vm6, %v3117_v57, %v3121_v17  ;;  %v3736_v62 = vor.u32 %v11489_v55, %v3119_v56  ;;  %v9470_v43 = vld [vmem:[%s12849_s5 + $0xa0] sm:$0xff]  }
 0x3d2   : > { %v2728_v4 = vpop.f32.mrb[2].mxu1  ;;  %8646 = vmatmul.mubr.msk.bf16.gmra.mrb[40].mxu1 %vm982_vm4, %v11493_v21  ;;  %v3125_v52 = vor.u32 %v3123_v9, %v3121_v17  ;;  %v3489_v56 = vrot.slane %v11296_v27, 1  ;;  %v3491_v49 = vrot.slane %v11325_v51, 1  ;;  %v3493_v17 = vrot.slane %v11349_v44, 1 }
 0x3d3   : > { %v11496_v34 = vpack.c.bf16 %v3006_v8, %v3005_v20  ;;  %v11499_v22 = vadd.f32 %v11199_v46, %v2755_v40  ;;  %v8540_v59 = vpop.f32.mrb[3].mxu1  ;;  %8649 = vmatprep.mubr.msk.bf16.mxu1 %vm9617_vm2, %v12969_v7  ;;  %v11509_v58 = vsel %vm1623_vm7, %v3732_v50, %v3736_v62  ;;  %v3495_v20 = vrot.slane %v11373_v29, 1 }
 0x3d4   : > { %v3490_v9 = vsel %vm1365_vm5, %v3487_v0, %v3489_v56  ;;  %v3492_v57 = vsel %vm1365_vm5, %v3489_v56, %v3491_v49  ;;  %v3494_v48 = vsel %vm1365_vm5, %v3491_v49, %v3493_v17  ;;  %v3497_v40 = vrot.slane %v11397_v54, 1 }
 0x3d5   : > { %v3742_v10 = vshll.u32 %v11496_v34, 16  ;;  %8766 = vmatmul.mubr.msk.bf16.vlgmr.msra.gmra.mrb[56].mxu0 %vm982_vm4, %v11275_v25  ;;  %v3739_v46 = vshrl.u32 %v11496_v34, 16  ;;  %v3496_v8 = vsel %vm1365_vm5, %v3493_v17, %v3495_v20  ;;  %v3499_v4 = vrot.slane %v11421_v23, 1 }
 0x3d6   : > { %8769 = vmatprep.mubr.msk.bf16.mxu0 %vm9617_vm2, %v12969_v7  ;;  %8862 = vmatpush3.bf16.msra.mxu0 %v9470_v43  ;;  %v3498_v13 = vsel %vm1365_vm5, %v3495_v20, %v3497_v40  ;;  %v3501_v43 = vrot.slane %v11445_v39, 1 }
 0x3d7   : > { %v4119_v50 = vrot.slane %v3742_v10, 1  ;;  %8863 = vmatprep.subr.bf16.mxu0 %v12969_v7  ;;  %v3500_v62 = vsel %vm1365_vm5, %v3497_v40, %v3499_v4  ;;  %v11633_v59 = vrot.slane %v3739_v46, 7 }
 0x3d9   : > { %v11524_v60 = vsel %vm854_vm6, %v3125_v52, %v4119_v50  ;;  %v11528_v25 = vor.u32 %v4119_v50, %v3739_v46  ;;  %v3503_v50 = vrot.slane %v11469_v6, 1 }
 0x3da   : > { %8650 = vmatmul.mubr.msk.bf16.gmra.mrb[44].mxu1 %vm982_vm4, %v3125_v52  ;;  %8864 = vmatpush3.bf16.msra.mxu0 %v9471_v1  ;;  %v3744_v52 = vor.u32 %v3742_v10, %v11633_v59  ;;  %v3502_v1 = vsel %vm1365_vm5, %v3499_v4, %v3501_v43 }
 0x3db   : > { %8713 = vmatprep.mubr.msk.bf16.mxu1 %vm9617_vm2, %v12969_v7  ;;  %8865 = vmatprep.subr.bf16.mxu0 %v12969_v7  ;;  %v3504_v10 = vsel %vm1365_vm5, %v3501_v43, %v3503_v50 }
 0x3dc   : > { %v11649_v46 = vsel %vm1623_vm7, %v11489_v55, %v3744_v52  ;;  %v9479_v55 = vld [vmem:[%s12849_s5 + $0xe8] sm:$0xff]  }
 0x3dd   : > { %8770 = vmatmul.mubr.msk.bf16.gmra.mrb[60].mxu0 %vm982_vm4, %v11308_v16 }
 0x3de   : > { %8773 = vmatprep.mubr.msk.bf16.mxu0 %vm9617_vm2, %v12969_v7  ;;  %8866 = vmatpush3.bf16.msra.mxu0 %v9473_v31  ;;  %v9478_v31 = vld [vmem:[%s12849_s5 + $0xe0] sm:$0xff]  }
 0x3df   : > { %8867 = vmatprep.subr.bf16.mxu0 %v12969_v7 }
 0x3e2   : > { %8714 = vmatmul.mubr.msk.bf16.vlgmr.msra.gmra.mrb[48].mxu1 %vm982_vm4, %v3486_v41  ;;  %8868 = vmatpush3.bf16.msra.mxu0 %v9474_v2  ;;  %v9475_v2 = vld [vmem:[%s12849_s5 + $0xc0] sm:$0xff]  }
 0x3e3   : > { %8810 = vmatpush3.bf16.msra.mxu1 %v9467_v42  ;;  %8717 = vmatprep.mubr.msk.bf16.mxu1 %vm9617_vm2, %v12969_v7 }
 0x3e4   : > { %8811 = vmatprep.subr.bf16.mxu1 %v12969_v7  ;;  %8965 = vmatprep.subr.bf16.mxu0 %v12969_v7 }
 0x3e5   : > { %8774 = vmatmul.mubr.msk.bf16.gmra.mrb[64].mxu0 %vm982_vm4, %v11334_v35 }
 0x3e6   : > { %8777 = vmatprep.mubr.msk.bf16.mxu0 %vm9617_vm2, %v12969_v7 }
 0x3e7   : > { %8812 = vmatpush3.bf16.msra.mxu1 %v9468_v24 }
 0x3e8   : > { %8813 = vmatprep.subr.bf16.mxu1 %v12969_v7 }
 0x3ea   : > { %8718 = vmatmul.mubr.msk.bf16.gmra.mrb[52].mxu1 %vm982_vm4, %v3488_v61 }
 0x3eb   : > { %8721 = vmatprep.mubr.msk.bf16.mxu1 %vm9617_vm2, %v12969_v7  ;;  %8814 = vmatpush3.bf16.msra.mxu1 %v9469_v18 }
 0x3ec   : > { %8815 = vmatprep.subr.bf16.mxu1 %v12969_v7 }
 0x3ed   : > { %8778 = vmatmul.mubr.msk.bf16.gmra.mrb[68].mxu0 %vm982_vm4, %v11358_v45 }
 0x3ee   : > { %8781 = vmatprep.mubr.msk.bf16.mxu0 %vm9617_vm2, %v12969_v7 }
 0x3ef   : > { %8816 = vmatpush3.bf16.msra.mxu1 %v9472_v38 }
 0x3f0   : > { %8913 = vmatprep.subr.bf16.mxu1 %v12969_v7 }
 0x3f2   : > { %8722 = vmatmul.mubr.msk.bf16.gmra.mrb[56].mxu1 %vm982_vm4, %v3490_v9 }
 0x3f3   : > { %8725 = vmatprep.mubr.msk.bf16.mxu1 %vm9617_vm2, %v12969_v7 }
 0x3f5   : > { %8782 = vmatmul.mubr.msk.bf16.gmra.mrb[72].mxu0 %vm982_vm4, %v11382_v37 }
 0x3f6   : > { %8785 = vmatprep.mubr.msk.bf16.mxu0 %vm9617_vm2, %v12969_v7 }
 0x3fa   : > { %8726 = vmatmul.mubr.msk.bf16.gmra.mrb[60].mxu1 %vm982_vm4, %v3492_v57 }
 0x3fb   : > { %8729 = vmatprep.mubr.msk.bf16.mxu1 %vm9617_vm2, %v12969_v7 }
 0x3fd   : > { %8786 = vmatmul.mubr.msk.bf16.gmra.mrb[76].mxu0 %vm982_vm4, %v11406_v32 }
 0x3fe   : > { %8789 = vmatprep.mubr.msk.bf16.mxu0 %vm9617_vm2, %v12969_v7 }
 0x402   : > { %8730 = vmatmul.mubr.msk.bf16.gmra.mrb[64].mxu1 %vm982_vm4, %v3494_v48 }
 0x403   : > { %8733 = vmatprep.mubr.msk.bf16.mxu1 %vm9617_vm2, %v12969_v7 }
 0x405   : > { %8790 = vmatmul.mubr.msk.bf16.gmra.mrb[80].mxu0 %vm982_vm4, %v11430_v26 }
 0x406   : > { %8793 = vmatprep.mubr.msk.bf16.mxu0 %vm9617_vm2, %v12969_v7 }
 0x40a   : > { %8734 = vmatmul.mubr.msk.bf16.gmra.mrb[68].mxu1 %vm982_vm4, %v3496_v8 }
 0x40b   : > { %8737 = vmatprep.mubr.msk.bf16.mxu1 %vm9617_vm2, %v12969_v7 }
 0x40d   : > { %8794 = vmatmul.mubr.msk.bf16.gmra.mrb[84].mxu0 %vm982_vm4, %v11454_v28 }
 0x40e   : > { %8797 = vmatprep.mubr.msk.bf16.mxu0 %vm9617_vm2, %v12969_v7 }
 0x412   : > { %8738 = vmatmul.mubr.msk.bf16.gmra.mrb[72].mxu1 %vm982_vm4, %v3498_v13 }
 0x413   : > { %8741 = vmatprep.mubr.msk.bf16.mxu1 %vm9617_vm2, %v12969_v7 }
 0x415   : > { %8798 = vmatmul.mubr.msk.bf16.gmra.mrb[88].mxu0 %vm982_vm4, %v11478_v12 }
 0x416   : > { %8801 = vmatprep.mubr.msk.bf16.mxu0 %vm9617_vm2, %v12969_v7 }
 0x41a   : > { %8742 = vmatmul.mubr.msk.bf16.gmra.mrb[76].mxu1 %vm982_vm4, %v3500_v62 }
 0x41b   : > { %8745 = vmatprep.mubr.msk.bf16.mxu1 %vm9617_vm2, %v12969_v7 }
 0x41d   : > { %8802 = vmatmul.mubr.msk.bf16.gmra.mrb[92].mxu0 %vm982_vm4, %v11509_v58 }
 0x41e   : > { %8805 = vmatprep.mubr.msk.bf16.mxu0 %vm9617_vm2, %v12969_v7 }
 0x422   : > { %8746 = vmatmul.mubr.msk.bf16.gmra.mrb[80].mxu1 %vm982_vm4, %v3502_v1 }
 0x423   : > { %8749 = vmatprep.mubr.msk.bf16.mxu1 %vm9617_vm2, %v12969_v7 }
 0x425   : > { %8806 = vmatmul.mubr.msk.bf16.gmra.mrb[96].mxu0 %vm982_vm4, %v11649_v46 }
 0x426   : > { %8869 = vmatprep.mubr.msk.bf16.mxu0 %vm9617_vm2, %v12969_v7 }
 0x42a   : > { %8750 = vmatmul.mubr.msk.bf16.gmra.mrb[84].mxu1 %vm982_vm4, %v3504_v10 }
 0x42b   : > { %8753 = vmatprep.mubr.msk.bf16.mxu1 %vm9617_vm2, %v12969_v7 }
 0x42d   : > { %8870 = vmatmul.mubr.msk.bf16.vlgmr.msra.gmra.mrb[100].mxu0 %vm982_vm4, %v11293_v63  ;;  %v9482_v63 = vld [vmem:[%s12849_s5 + $0xf8] sm:$0xff]  }
 0x42e   : > { %8873 = vmatprep.mubr.msk.bf16.mxu0 %vm9617_vm2, %v12969_v7  ;;  %8966 = vmatpush3.bf16.msra.mxu0 %v9478_v31 }
 0x42f   : > { %8967 = vmatprep.subr.bf16.mxu0 %v12969_v7 }
 0x432   : > { %8754 = vmatmul.mubr.msk.bf16.gmra.mrb[88].mxu1 %vm982_vm4, %v3503_v50  ;;  %8968 = vmatpush3.bf16.msra.mxu0 %v9479_v55 }
 0x433   : > { %8817 = vmatprep.mubr.msk.bf16.mxu1 %vm9617_vm2, %v12969_v7  ;;  %8969 = vmatprep.subr.bf16.mxu0 %v12969_v7 }
 0x435   : > { %8874 = vmatmul.mubr.msk.bf16.gmra.mrb[104].mxu0 %vm982_vm4, %v11322_v11  ;;  %v9476_v11 = vld [vmem:[%s12849_s5 + $0xc8] sm:$0xff]  }
 0x436   : > { %8877 = vmatprep.mubr.msk.bf16.mxu0 %vm9617_vm2, %v12969_v7  ;;  %8970 = vmatpush3.bf16.msra.mxu0 %v9481_v47 }
 0x437   : > { %8971 = vmatprep.subr.bf16.mxu0 %v12969_v7 }
 0x43a   : > { %8818 = vmatmul.mubr.msk.bf16.vlgmr.msra.gmra.mrb[92].mxu1 %vm982_vm4, %v11243_v3  ;;  %8972 = vmatpush3.bf16.msra.mxu0 %v9482_v63 }
 0x43b   : > { %8914 = vmatpush3.bf16.msra.mxu1 %v9475_v2  ;;  %8821 = vmatprep.mubr.msk.bf16.mxu1 %vm9617_vm2, %v12969_v7 }
 0x43c   : > { %8915 = vmatprep.subr.bf16.mxu1 %v12969_v7  ;;  %9069 = vmatprep.subr.bf16.mxu0 %v12969_v7 }
 0x43d   : > { %8878 = vmatmul.mubr.msk.bf16.gmra.mrb[108].mxu0 %vm982_vm4, %v11347_v19  ;;  %v9480_v19 = vld [vmem:[%s12849_s5 + $0xd8] sm:$0xff]  }
 0x43e   : > { %8881 = vmatprep.mubr.msk.bf16.mxu0 %vm9617_vm2, %v12969_v7 }
 0x43f   : > { %8916 = vmatpush3.bf16.msra.mxu1 %v9476_v11 }
 0x440   : > { %8917 = vmatprep.subr.bf16.mxu1 %v12969_v7 }
 0x442   : > { %8822 = vmatmul.mubr.msk.bf16.gmra.mrb[96].mxu1 %vm982_vm4, %v11264_v33 }
 0x443   : > { %8825 = vmatprep.mubr.msk.bf16.mxu1 %vm9617_vm2, %v12969_v7  ;;  %8918 = vmatpush3.bf16.msra.mxu1 %v9477_v53 }
 0x444   : > { %8919 = vmatprep.subr.bf16.mxu1 %v12969_v7 }
 0x445   : > { %8882 = vmatmul.mubr.msk.bf16.gmra.mrb[112].mxu0 %vm982_vm4, %v11371_v36 }
 0x446   : > { %8885 = vmatprep.mubr.msk.bf16.mxu0 %vm9617_vm2, %v12969_v7 }
 0x447   : > { %8920 = vmatpush3.bf16.msra.mxu1 %v9480_v19 }
 0x448   : > { %9017 = vmatprep.subr.bf16.mxu1 %v12969_v7 }
 0x44a   : > { %8826 = vmatmul.mubr.msk.bf16.gmra.mrb[100].mxu1 %vm982_vm4, %v11296_v27 }
 0x44b   : > { %8829 = vmatprep.mubr.msk.bf16.mxu1 %vm9617_vm2, %v12969_v7 }
 0x44d   : > { %8886 = vmatmul.mubr.msk.bf16.gmra.mrb[116].mxu0 %vm982_vm4, %v11395_v14 }
 0x44e   : > { %8889 = vmatprep.mubr.msk.bf16.mxu0 %vm9617_vm2, %v12969_v7 }
 0x450   : > { %v3381_v42 = vpop.f32.mrb[12].mxu0 }
 0x451   : > { %v8663_v36 = vpop.f32.mrb[13].mxu0 }
 0x452   : > { %v3384_v41 = vpop.f32.mrb[14].mxu0  ;;  %8830 = vmatmul.mubr.msk.bf16.gmra.mrb[104].mxu1 %vm982_vm4, %v11325_v51 }
 0x453   : > { %v8664_v24 = vpop.f32.mrb[15].mxu0  ;;  %8833 = vmatprep.mubr.msk.bf16.mxu1 %vm9617_vm2, %v12969_v7 }
 0x455   : > { %8890 = vmatmul.mubr.msk.bf16.gmra.mrb[120].mxu0 %vm982_vm4, %v11419_v5 }
 0x456   : > { %8893 = vmatprep.mubr.msk.bf16.mxu0 %vm9617_vm2, %v12969_v7 }
 0x458   : > { %v3389_v14 = vpop.f32.mrb[16].mxu0 }
 0x459   : > { %v8667_v0 = vpop.f32.mrb[17].mxu0 }
 0x45a   : > { %v3392_v18 = vpop.f32.mrb[18].mxu0  ;;  %8834 = vmatmul.mubr.msk.bf16.gmra.mrb[108].mxu1 %vm982_vm4, %v11349_v44 }
 0x45b   : > { %v8668_v61 = vpop.f32.mrb[19].mxu0  ;;  %8837 = vmatprep.mubr.msk.bf16.mxu1 %vm9617_vm2, %v12969_v7 }
 0x45d   : > { %v3217_v38 = vpop.f32.mrb[4].mxu1  ;;  %8894 = vmatmul.mubr.msk.bf16.gmra.mrb[124].mxu0 %vm982_vm4, %v11443_v15 }
 0x45e   : > { %v11741_v56 = vadd.f32 %v3381_v42, %v3217_v38  ;;  %v8611_v5 = vpop.f32.mrb[5].mxu1  ;;  %8897 = vmatprep.mubr.msk.bf16.mxu0 %vm9617_vm2, %v12969_v7 }
 0x45f   : > { %v3220_v9 = vpop.f32.mrb[6].mxu1 }
 0x460   : > { %v11745_v49 = vadd.f32 %v3384_v41, %v3220_v9  ;;  %v8612_v57 = vpop.f32.mrb[7].mxu1  ;;  %v3397_v17 = vpop.f32.mrb[20].mxu0 }
 0x461   : > { %v8671_v48 = vpop.f32.mrb[21].mxu0 }
 0x462   : > { %v3400_v20 = vpop.f32.mrb[22].mxu0  ;;  %8838 = vmatmul.mubr.msk.bf16.gmra.mrb[112].mxu1 %vm982_vm4, %v11373_v29 }
 0x463   : > { %v8672_v8 = vpop.f32.mrb[23].mxu0  ;;  %8841 = vmatprep.mubr.msk.bf16.mxu1 %vm9617_vm2, %v12969_v7 }
 0x465   : > { %v3225_v15 = vpop.f32.mrb[8].mxu1  ;;  %8898 = vmatmul.mubr.msk.bf16.gmra.mrb[128].mxu0 %vm982_vm4, %v11467_v30 }
 0x466   : > { %v11753_v40 = vadd.f32 %v3389_v14, %v3225_v15  ;;  %v8615_v13 = vpop.f32.mrb[9].mxu1  ;;  %8901 = vmatprep.mubr.msk.bf16.mxu0 %vm9617_vm2, %v12969_v7 }
 0x467   : > { %v3228_v4 = vpop.f32.mrb[10].mxu1 }
 0x468   : > { %v11757_v62 = vadd.f32 %v3392_v18, %v3228_v4  ;;  %v8616_v43 = vpop.f32.mrb[11].mxu1  ;;  %v3405_v52 = vpop.f32.mrb[24].mxu0 }
 0x469   : > { %v8675_v1 = vpop.f32.mrb[25].mxu0 }
 0x46a   : > { %v3408_v50 = vpop.f32.mrb[26].mxu0  ;;  %8842 = vmatmul.mubr.msk.bf16.gmra.mrb[116].mxu1 %vm982_vm4, %v11397_v54 }
 0x46b   : > { %v8676_v10 = vpop.f32.mrb[27].mxu0  ;;  %8845 = vmatprep.mubr.msk.bf16.mxu1 %vm9617_vm2, %v12969_v7 }
 0x46d   : > { %v3233_v30 = vpop.f32.mrb[12].mxu1  ;;  %8902 = vmatmul.mubr.msk.bf16.gmra.mrb[132].mxu0 %vm982_vm4, %v11493_v21 }
 0x46e   : > { %v11765_v31 = vadd.f32 %v3397_v17, %v3233_v30  ;;  %v8619_v55 = vpop.f32.mrb[13].mxu1  ;;  %8905 = vmatprep.mubr.msk.bf16.mxu0 %vm9617_vm2, %v12969_v7 }
 0x46f   : > { %v3236_v47 = vpop.f32.mrb[14].mxu1 }
 0x470   : > { %v11769_v63 = vadd.f32 %v3400_v20, %v3236_v47  ;;  %v8620_v2 = vpop.f32.mrb[15].mxu1  ;;  %v3413_v11 = vpop.f32.mrb[28].mxu0 }
 0x471   : > { %v8679_v53 = vpop.f32.mrb[29].mxu0 }
 0x472   : > { %v3416_v19 = vpop.f32.mrb[30].mxu0  ;;  %8846 = vmatmul.mubr.msk.bf16.gmra.mrb[120].mxu1 %vm982_vm4, %v11421_v23 }
 0x473   : > { %v8680_v42 = vpop.f32.mrb[31].mxu0  ;;  %8849 = vmatprep.mubr.msk.bf16.mxu1 %vm9617_vm2, %v12969_v7 }
 0x474   : > { %v4299_v42 = vrot.slane %v11243_v3, 7  ;;  %v9484_v3 = vld [vmem:[%s12849_s5 + $0x108] sm:$0xff]  }
 0x475   : > { %v3241_v21 = vpop.f32.mrb[16].mxu1  ;;  %8906 = vmatmul.mubr.msk.bf16.gmra.mrb[136].mxu0 %vm982_vm4, %v11524_v60 }
 0x476   : > { %v11777_v36 = vadd.f32 %v3405_v52, %v3241_v21  ;;  %v8623_v41 = vpop.f32.mrb[17].mxu1  ;;  %8909 = vmatprep.mubr.msk.bf16.mxu0 %vm9617_vm2, %v12969_v7 }
 0x477   : > { %v3244_v24 = vpop.f32.mrb[18].mxu1  ;;  %v9483_v41 = vld [vmem:[%s12849_s5 + $0x100] sm:$0xff]  }
 0x478   : > { %v11781_v14 = vadd.f32 %v3408_v50, %v3244_v24  ;;  %v8624_v0 = vpop.f32.mrb[19].mxu1  ;;  %v3421_v18 = vpop.f32.mrb[32].mxu0 }
 0x479   : > { %v8683_v61 = vpop.f32.mrb[33].mxu0 }
 0x47a   : > { %v3424_v38 = vpop.f32.mrb[34].mxu0  ;;  %8850 = vmatmul.mubr.msk.bf16.gmra.mrb[124].mxu1 %vm982_vm4, %v11445_v39 }
 0x47b   : > { %v8684_v5 = vpop.f32.mrb[35].mxu0  ;;  %8853 = vmatprep.mubr.msk.bf16.mxu1 %vm9617_vm2, %v12969_v7 }
 0x47d   : > { %v3249_v60 = vpop.f32.mrb[20].mxu1  ;;  %8910 = vmatmul.mubr.msk.bf16.gmra.mrb[140].mxu0 %vm982_vm4, %v11528_v25 }
 0x47e   : > { %v11789_v9 = vadd.f32 %v3413_v11, %v3249_v60  ;;  %v8627_v57 = vpop.f32.mrb[21].mxu1  ;;  %8973 = vmatprep.mubr.msk.bf16.mxu0 %vm9617_vm2, %v12969_v7  ;;  %v4300_v11 = vrot.slane %v11264_v33, 7 }
 0x47f   : > { %v3252_v17 = vpop.f32.mrb[22].mxu1  ;;  %v4302_v57 = vrot.slane %v11296_v27, 7 }
 0x480   : > { %v11793_v48 = vadd.f32 %v3416_v19, %v3252_v17  ;;  %v8628_v20 = vpop.f32.mrb[23].mxu1  ;;  %v3429_v8 = vpop.f32.mrb[36].mxu0  ;;  %v4301_v61 = vsel %vm821_vm8, %v4299_v42, %v4300_v11 }
 0x481   : > { %v8687_v15 = vpop.f32.mrb[37].mxu0 }
 0x482   : > { %v3432_v13 = vpop.f32.mrb[38].mxu0  ;;  %8854 = vmatmul.mubr.msk.bf16.gmra.mrb[128].mxu1 %vm982_vm4, %v11469_v6  ;;  %v9485_v15 = vld [vmem:[%s12849_s5 + $0x110] sm:$0xff]  }
 0x483   : > { %v8688_v4 = vpop.f32.mrb[39].mxu0  ;;  %8857 = vmatprep.mubr.msk.bf16.mxu1 %vm9617_vm2, %v12969_v7 }
 0x485   : > { %v3257_v25 = vpop.f32.mrb[24].mxu1  ;;  %8974 = vmatmul.mubr.msk.bf16.vlgmr.msra.gmra.mrb[144].mxu0 %vm982_vm4, %v11308_v16 }
 0x486   : > { %v11801_v43 = vadd.f32 %v3421_v18, %v3257_v25  ;;  %v8631_v52 = vpop.f32.mrb[25].mxu1  ;;  %8977 = vmatprep.mubr.msk.bf16.mxu0 %vm9617_vm2, %v12969_v7 }
 0x487   : > { %v3260_v1 = vpop.f32.mrb[26].mxu1  ;;  %v4303_v52 = vsel %vm821_vm8, %v4300_v11, %v4302_v57 }
 0x488   : > { %v11805_v50 = vadd.f32 %v3424_v38, %v3260_v1  ;;  %v8632_v10 = vpop.f32.mrb[27].mxu1  ;;  %v3437_v30 = vpop.f32.mrb[40].mxu0 }
 0x489   : > { %v8691_v55 = vpop.f32.mrb[41].mxu0 }
 0x48a   : > { %v3440_v47 = vpop.f32.mrb[42].mxu0  ;;  %8858 = vmatmul.mubr.msk.bf16.gmra.mrb[132].mxu1 %vm982_vm4, %v11496_v34 }
 0x48b   : > { %v8692_v2 = vpop.f32.mrb[43].mxu0  ;;  %8921 = vmatprep.mubr.msk.bf16.mxu1 %vm9617_vm2, %v12969_v7 }
 0x48d   : > { %v3265_v16 = vpop.f32.mrb[28].mxu1  ;;  %8978 = vmatmul.mubr.msk.bf16.gmra.mrb[148].mxu0 %vm982_vm4, %v11334_v35 }
 0x48e   : > { %v11814_v53 = vadd.f32 %v3429_v8, %v3265_v16  ;;  %v8635_v19 = vpop.f32.mrb[29].mxu1  ;;  %8981 = vmatprep.mubr.msk.bf16.mxu0 %vm9617_vm2, %v12969_v7 }
 0x48f   : > { %v3268_v21 = vpop.f32.mrb[30].mxu1 }
 0x490   : > { %v11822_v24 = vadd.f32 %v3432_v13, %v3268_v21  ;;  %v8636_v0 = vpop.f32.mrb[31].mxu1  ;;  %v3445_v18 = vpop.f32.mrb[44].mxu0 }
 0x491   : > { %v8695_v35 = vpop.f32.mrb[45].mxu0 }
 0x492   : > { %v3448_v38 = vpop.f32.mrb[46].mxu0  ;;  %8922 = vmatmul.mubr.msk.bf16.vlgmr.msra.gmra.mrb[136].mxu1 %vm982_vm4, %v4301_v61  ;;  %v4306_v61 = vrot.slane %v11349_v44, 7 }
 0x493   : > { %9018 = vmatpush3.bf16.msra.mxu1 %v9483_v41  ;;  %v8696_v5 = vpop.f32.mrb[47].mxu0  ;;  %8925 = vmatprep.mubr.msk.bf16.mxu1 %vm9617_vm2, %v12969_v7 }
 0x494   : > { %9019 = vmatprep.subr.bf16.mxu1 %v12969_v7 }
 0x495   : > { %v3273_v60 = vpop.f32.mrb[32].mxu1  ;;  %8982 = vmatmul.mubr.msk.bf16.gmra.mrb[152].mxu0 %vm982_vm4, %v11358_v45 }
 0x496   : > { %v11835_v17 = vadd.f32 %v3437_v30, %v3273_v60  ;;  %v8639_v20 = vpop.f32.mrb[33].mxu1  ;;  %8985 = vmatprep.mubr.msk.bf16.mxu0 %vm9617_vm2, %v12969_v7  ;;  %v9486_v30 = vld [vmem:[%s12849_s5 + $0x118] sm:$0xff]  }
 0x497   : > { %v3276_v8 = vpop.f32.mrb[34].mxu1  ;;  %9020 = vmatpush3.bf16.msra.mxu1 %v9484_v3 }
 0x498   : > { %v11842_v13 = vadd.f32 %v3440_v47, %v3276_v8  ;;  %v8640_v4 = vpop.f32.mrb[35].mxu1  ;;  %v3453_v25 = vpop.f32.mrb[48].mxu0  ;;  %9021 = vmatprep.subr.bf16.mxu1 %v12969_v7  ;;  %v4304_v47 = vrot.slane %v11325_v51, 7 }
 0x499   : > { %v8699_v45 = vpop.f32.mrb[49].mxu0 }
 0x49a   : > { %v3456_v1 = vpop.f32.mrb[50].mxu0  ;;  %8926 = vmatmul.mubr.msk.bf16.gmra.mrb[140].mxu1 %vm982_vm4, %v4303_v52  ;;  %v4305_v0 = vsel %vm821_vm8, %v4302_v57, %v4304_v47  ;;  %v4307_v8 = vsel %vm821_vm8, %v4304_v47, %v4306_v61 }
 0x49b   : > { %v8700_v10 = vpop.f32.mrb[51].mxu0  ;;  %8929 = vmatprep.mubr.msk.bf16.mxu1 %vm9617_vm2, %v12969_v7  ;;  %9022 = vmatpush3.bf16.msra.mxu1 %v9485_v15 }
 0x49c   : > { %9023 = vmatprep.subr.bf16.mxu1 %v12969_v7 }
 0x49d   : > { %v3281_v55 = vpop.f32.mrb[36].mxu1  ;;  %8986 = vmatmul.mubr.msk.bf16.gmra.mrb[156].mxu0 %vm982_vm4, %v11382_v37 }
 0x49e   : > { %v11856_v2 = vadd.f32 %v3445_v18, %v3281_v55  ;;  %v8643_v16 = vpop.f32.mrb[37].mxu1  ;;  %8989 = vmatprep.mubr.msk.bf16.mxu0 %vm9617_vm2, %v12969_v7 }
 0x49f   : > { %v3284_v11 = vpop.f32.mrb[38].mxu1  ;;  %9024 = vmatpush3.bf16.msra.mxu1 %v9486_v30 }
 0x4a0   : > { %v11860_v19 = vadd.f32 %v3448_v38, %v3284_v11  ;;  %v8644_v42 = vpop.f32.mrb[39].mxu1  ;;  %v3460_v21 = vpop.f32.mrb[52].mxu0  ;;  %9141 = vmatprep.subr.bf16.mxu1 %v12969_v7  ;;  %v4310_v11 = vrot.slane %v11397_v54, 7 }
 0x4a1   : > { %v8703_v41 = vpop.f32.mrb[53].mxu0 }
 0x4a2   : > { %v3462_v37 = vpop.f32.mrb[54].mxu0  ;;  %8930 = vmatmul.mubr.msk.bf16.gmra.mrb[144].mxu1 %vm982_vm4, %v4305_v0 }
 0x4a3   : > { %v8704_v18 = vpop.f32.mrb[55].mxu0  ;;  %8933 = vmatprep.mubr.msk.bf16.mxu1 %vm9617_vm2, %v12969_v7 }
 0x4a5   : > { %v3289_v35 = vpop.f32.mrb[40].mxu1  ;;  %8990 = vmatmul.mubr.msk.bf16.gmra.mrb[160].mxu0 %vm982_vm4, %v11406_v32 }
 0x4a6   : > { %v11870_v38 = vadd.f32 %v3453_v25, %v3289_v35  ;;  %v8647_v5 = vpop.f32.mrb[41].mxu1  ;;  %8993 = vmatprep.mubr.msk.bf16.mxu0 %vm9617_vm2, %v12969_v7  ;;  %v4308_v25 = vrot.slane %v11373_v29, 7 }
 0x4a7   : > { %v3292_v3 = vpop.f32.mrb[42].mxu1 }
 0x4a8   : > { %v8648_v60 = vpop.f32.mrb[43].mxu1  ;;  %v3837_v57 = vpop.f32.mrb[56].mxu0  ;;  %v4309_v55 = vsel %vm821_vm8, %v4306_v61, %v4308_v25  ;;  %v9606_v61 = vld [vmem:[%s12848_s4] ss:$0 sm:$0xff] }
 0x4a9   : > { %v8767_v20 = vpop.f32.mrb[57].mxu0 }
 0x4aa   : > { %v3840_v15 = vpop.f32.mrb[58].mxu0  ;;  %8934 = vmatmul.mubr.msk.bf16.gmra.mrb[148].mxu1 %vm982_vm4, %v4307_v8  ;;  %v4312_v8 = vrot.slane %v11421_v23, 7 }
 0x4ab   : > { %v8768_v4 = vpop.f32.mrb[59].mxu0  ;;  %8937 = vmatprep.mubr.msk.bf16.mxu1 %vm9617_vm2, %v12969_v7 }
 0x4ad   : > { %v3296_v32 = vpop.f32.mrb[44].mxu1  ;;  %8994 = vmatmul.mubr.msk.bf16.gmra.mrb[164].mxu0 %vm982_vm4, %v11430_v26 }
 0x4ae   : > { %v8651_v45 = vpop.f32.mrb[45].mxu1  ;;  %8997 = vmatprep.mubr.msk.bf16.mxu0 %vm9617_vm2, %v12969_v7 }
 0x4af   : > { %v3298_v52 = vpop.f32.mrb[46].mxu1 }
 0x4b0   : > { %v8652_v1 = vpop.f32.mrb[47].mxu1  ;;  %v3845_v10 = vpop.f32.mrb[60].mxu0 }
 0x4b1   : > { %v8771_v30 = vpop.f32.mrb[61].mxu0 }
 0x4b2   : > { %v3848_v47 = vpop.f32.mrb[62].mxu0  ;;  %8938 = vmatmul.mubr.msk.bf16.gmra.mrb[152].mxu1 %vm982_vm4, %v4309_v55 }
 0x4b3   : > { %v8772_v16 = vpop.f32.mrb[63].mxu0  ;;  %8941 = vmatprep.mubr.msk.bf16.mxu1 %vm9617_vm2, %v12969_v7 }
 0x4b5   : > { %v3596_v26 = vpop.f32.mrb[48].mxu1  ;;  %8998 = vmatmul.mubr.msk.bf16.gmra.mrb[168].mxu0 %vm982_vm4, %v11454_v28  ;;  %v2982_v28 = vadd.f32 %v9606_v61, %v11499_v22 }
 0x4b6   : > { %v3680_v42 = vadd.f32 %v3596_v26, %v11741_v56  ;;  %v8715_v21 = vpop.f32.mrb[49].mxu1  ;;  %9001 = vmatprep.mubr.msk.bf16.mxu0 %vm9617_vm2, %v12969_v7  ;;  %v4311_v56 = vsel %vm821_vm8, %v4308_v25, %v4310_v11 }
 0x4b7   : > { %v3599_v41 = vpop.f32.mrb[50].mxu1 }
 0x4b8   : > { %v3681_v0 = vadd.f32 %v3599_v41, %v11745_v49  ;;  %v8716_v37 = vpop.f32.mrb[51].mxu1  ;;  %v3853_v18 = vpop.f32.mrb[64].mxu0  ;;  %v11894_v35 = vadd.f32 %v3837_v57, %v3680_v42  ;;  %v3007_v49 = vmax.f32 %v2982_v28, 0.0 }
 0x4b9   : > { %v8775_v5 = vpop.f32.mrb[65].mxu0 }
 0x4ba   : > { %v3856_v3 = vpop.f32.mrb[66].mxu0  ;;  %8942 = vmatmul.mubr.msk.bf16.gmra.mrb[156].mxu1 %vm982_vm4, %v4311_v56  ;;  %v11902_v60 = vadd.f32 %v3840_v15, %v3681_v0  ;;  %v3009_v1 = vsel %vm3008_vm9, %v3007_v49, 0.0 }
 0x4bb   : > { %v8776_v20 = vpop.f32.mrb[67].mxu0  ;;  %8945 = vmatprep.mubr.msk.bf16.mxu1 %vm9617_vm2, %v12969_v7 }
 0x4bd   : > { %v3604_v57 = vpop.f32.mrb[52].mxu1  ;;  %9002 = vmatmul.mubr.msk.bf16.gmra.mrb[172].mxu0 %vm982_vm4, %v11478_v12  ;;  %v4313_v12 = vsel %vm821_vm8, %v4310_v11, %v4312_v8 }
 0x4be   : > { %v3682_v22 = vadd.f32 %v3604_v57, %v11753_v40  ;;  %v8719_v4 = vpop.f32.mrb[53].mxu1  ;;  %9005 = vmatprep.mubr.msk.bf16.mxu0 %vm9617_vm2, %v12969_v7 }
 0x4bf   : > { %v3607_v15 = vpop.f32.mrb[54].mxu1 }
 0x4c0   : > { %v3683_v32 = vadd.f32 %v3607_v15, %v11757_v62  ;;  %v8720_v25 = vpop.f32.mrb[55].mxu1  ;;  %v3861_v45 = vpop.f32.mrb[68].mxu0  ;;  %v11913_v52 = vadd.f32 %v3845_v10, %v3682_v22  ;;  %v11923_v62 = vpack.c.bf16 %v12969_v7, %v3009_v1  ;;  %v4314_v10 = vrot.slane %v11445_v39, 7 }
 0x4c1   : > { %v8779_v30 = vpop.f32.mrb[69].mxu0 }
 0x4c2   : > { %v3864_v55 = vpop.f32.mrb[70].mxu0  ;;  %8946 = vmatmul.mubr.msk.bf16.gmra.mrb[160].mxu1 %vm982_vm4, %v4313_v12  ;;  %v11918_v40 = vadd.f32 %v3848_v47, %v3683_v32  ;;  %v4525_v21 = vshrl.u32 %v11923_v62, 16 }
 0x4c3   : > { %v8780_v16 = vpop.f32.mrb[71].mxu0  ;;  %8949 = vmatprep.mubr.msk.bf16.mxu1 %vm9617_vm2, %v12969_v7 }
 0x4c4   : > { %v4527_v20 = vrot.slane %v4525_v21, 7 }
 0x4c5   : > { %v3612_v26 = vpop.f32.mrb[56].mxu1  ;;  %9006 = vmatmul.mubr.msk.bf16.gmra.mrb[176].mxu0 %vm982_vm4, %v11509_v58  ;;  %v4315_v58 = vsel %vm821_vm8, %v4312_v8, %v4314_v10 }
 0x4c6   : > { %v3684_v11 = vadd.f32 %v3612_v26, %v11765_v31  ;;  %v8723_v42 = vpop.f32.mrb[57].mxu1  ;;  %9009 = vmatprep.mubr.msk.bf16.mxu0 %vm9617_vm2, %v12969_v7 }
 0x4c7   : > { %v3615_v47 = vpop.f32.mrb[58].mxu1 }
 0x4c8   : > { %v3685_v41 = vadd.f32 %v3615_v47, %v11769_v63  ;;  %v8724_v0 = vpop.f32.mrb[59].mxu1  ;;  %v3869_v37 = vpop.f32.mrb[72].mxu0  ;;  %v11933_v61 = vadd.f32 %v3853_v18, %v3684_v11  ;;  %v4316_v63 = vrot.slane %v11469_v6, 7  ;;  %v4528_v18 = vshll.u32 %v11923_v62, 16 }
 0x4c9   : > { %v8783_v28 = vpop.f32.mrb[73].mxu0 }
 0x4ca   : > { %v3872_v5 = vpop.f32.mrb[74].mxu0  ;;  %8950 = vmatmul.mubr.msk.bf16.gmra.mrb[164].mxu1 %vm982_vm4, %v4315_v58  ;;  %v11937_v31 = vadd.f32 %v3856_v3, %v3685_v41  ;;  %v4530_v22 = vor.u32 %v4528_v18, %v4527_v20  ;;  %v4320_v58 = vrot.slane %v11923_v62, 7 }
 0x4cb   : > { %v8784_v56 = vpop.f32.mrb[75].mxu0  ;;  %8953 = vmatprep.mubr.msk.bf16.mxu1 %vm9617_vm2, %v12969_v7 }
 0x4cc   : > { %v4531_v16 = vsel %vm1623_vm7, %v11633_v59, %v4530_v22 }
 0x4cd   : > { %v3620_v49 = vpop.f32.mrb[60].mxu1  ;;  %9010 = vmatmul.mubr.msk.bf16.gmra.mrb[180].mxu0 %vm982_vm4, %v11649_v46  ;;  %v4317_v46 = vsel %vm821_vm8, %v4314_v10, %v4316_v63 }
 0x4ce   : > { %v3686_v57 = vadd.f32 %v3620_v49, %v11777_v36  ;;  %v8727_v8 = vpop.f32.mrb[61].mxu1  ;;  %9013 = vmatprep.mubr.msk.bf16.mxu0 %vm9617_vm2, %v12969_v7 }
 0x4cf   : > { %v3623_v3 = vpop.f32.mrb[62].mxu1 }
 0x4d0   : > { %v3687_v4 = vadd.f32 %v3623_v3, %v11781_v14  ;;  %v8728_v15 = vpop.f32.mrb[63].mxu1  ;;  %v3877_v32 = vpop.f32.mrb[76].mxu0  ;;  %v11949_v25 = vadd.f32 %v3861_v45, %v3686_v57  ;;  %v4318_v14 = vrot.slane %v11496_v34, 7 }
 0x4d1   : > { %v8787_v1 = vpop.f32.mrb[77].mxu0 }
 0x4d2   : > { %v3880_v30 = vpop.f32.mrb[78].mxu0  ;;  %8954 = vmatmul.mubr.msk.bf16.gmra.mrb[168].mxu1 %vm982_vm4, %v4317_v46  ;;  %v11953_v12 = vadd.f32 %v3864_v55, %v3687_v4  ;;  %v4319_v59 = vsel %vm821_vm8, %v4316_v63, %v4318_v14 }
 0x4d3   : > { %v8788_v36 = vpop.f32.mrb[79].mxu0  ;;  %8957 = vmatprep.mubr.msk.bf16.mxu1 %vm9617_vm2, %v12969_v7 }
 0x4d5   : > { %v3628_v26 = vpop.f32.mrb[64].mxu1  ;;  %9014 = vmatmul.mubr.msk.bf16.gmra.mrb[184].mxu0 %vm982_vm4, %v4531_v16 }
 0x4d6   : > { %v3688_v45 = vadd.f32 %v3628_v26, %v11789_v9  ;;  %v8731_v10 = vpop.f32.mrb[65].mxu1  ;;  %9077 = vmatprep.mubr.msk.bf16.mxu0 %vm9617_vm2, %v12969_v7 }
 0x4d7   : > { %v3631_v55 = vpop.f32.mrb[66].mxu1 }
 0x4d8   : > { %v3689_v11 = vadd.f32 %v3631_v55, %v11793_v48  ;;  %v8732_v42 = vpop.f32.mrb[67].mxu1  ;;  %v3885_v47 = vpop.f32.mrb[80].mxu0  ;;  %v11965_v21 = vadd.f32 %v3869_v37, %v3688_v45 }
 0x4d9   : > { %v8791_v41 = vpop.f32.mrb[81].mxu0 }
 0x4da   : > { %v3888_v0 = vpop.f32.mrb[82].mxu0  ;;  %8958 = vmatmul.mubr.msk.bf16.gmra.mrb[172].mxu1 %vm982_vm4, %v4319_v59  ;;  %v11969_v28 = vadd.f32 %v3872_v5, %v3689_v11  ;;  %v4321_v5 = vsel %vm821_vm8, %v4318_v14, %v4320_v58 }
 0x4db   : > { %v8792_v9 = vpop.f32.mrb[83].mxu0  ;;  %8961 = vmatprep.mubr.msk.bf16.mxu1 %vm9617_vm2, %v12969_v7 }
 0x4dd   : > { %v3636_v56 = vpop.f32.mrb[68].mxu1 }
 0x4de   : > { %v3690_v48 = vadd.f32 %v3636_v56, %v11801_v43  ;;  %v8735_v20 = vpop.f32.mrb[69].mxu1 }
 0x4df   : > { %v3639_v37 = vpop.f32.mrb[70].mxu1 }
 0x4e0   : > { %v3691_v49 = vadd.f32 %v3639_v37, %v11805_v50  ;;  %v8736_v18 = vpop.f32.mrb[71].mxu1  ;;  %v3893_v63 = vpop.f32.mrb[84].mxu0  ;;  %v11976_v57 = vadd.f32 %v3877_v32, %v3690_v48 }
 0x4e1   : > { %v8795_v8 = vpop.f32.mrb[85].mxu0 }
 0x4e2   : > { %v3896_v3 = vpop.f32.mrb[86].mxu0  ;;  %8962 = vmatmul.mubr.msk.bf16.gmra.mrb[176].mxu1 %vm982_vm4, %v4321_v5  ;;  %v11980_v22 = vadd.f32 %v3880_v30, %v3691_v49 }
 0x4e3   : > { %v8796_v4 = vpop.f32.mrb[87].mxu0  ;;  %9025 = vmatprep.mubr.msk.bf16.mxu1 %vm9617_vm2, %v12969_v7 }
 0x4e5   : > { %v3644_v43 = vpop.f32.mrb[72].mxu1 }
 0x4e6   : > { %v3692_v15 = vadd.f32 %v3644_v43, %v11814_v53  ;;  %v8739_v50 = vpop.f32.mrb[73].mxu1 }
 0x4e7   : > { %v3647_v1 = vpop.f32.mrb[74].mxu1 }
 0x4e8   : > { %v3693_v32 = vadd.f32 %v3647_v1, %v11822_v24  ;;  %v8740_v46 = vpop.f32.mrb[75].mxu1  ;;  %v3901_v36 = vpop.f32.mrb[88].mxu0  ;;  %v11986_v16 = vadd.f32 %v3885_v47, %v3692_v15 }
 0x4e9   : > { %v8799_v14 = vpop.f32.mrb[89].mxu0 }
 0x4ea   : > { %v3904_v26 = vpop.f32.mrb[90].mxu0  ;;  %9026 = vmatmul.mubr.msk.bf16.vlgmr.msra.gmra.mrb[180].mxu1 %vm982_vm4, %v11264_v33  ;;  %v11990_v30 = vadd.f32 %v3888_v0, %v3693_v32 }
 0x4eb   : > { %v8800_v45 = vpop.f32.mrb[91].mxu0  ;;  %9029 = vmatprep.mubr.msk.bf16.mxu1 %vm9617_vm2, %v12969_v7 }
 0x4ed   : > { %v3652_v53 = vpop.f32.mrb[76].mxu1 }
 0x4ee   : > { %v3694_v10 = vadd.f32 %v3652_v53, %v11835_v17  ;;  %v8743_v55 = vpop.f32.mrb[77].mxu1 }
 0x4ef   : > { %v3655_v24 = vpop.f32.mrb[78].mxu1 }
 0x4f0   : > { %v3695_v11 = vadd.f32 %v3655_v24, %v11842_v13  ;;  %v8744_v42 = vpop.f32.mrb[79].mxu1  ;;  %v3909_v47 = vpop.f32.mrb[92].mxu0  ;;  %v11996_v41 = vadd.f32 %v3893_v63, %v3694_v10 }
 0x4f1   : > { %v8803_v59 = vpop.f32.mrb[93].mxu0 }
 0x4f2   : > { %v3912_v9 = vpop.f32.mrb[94].mxu0  ;;  %9030 = vmatmul.mubr.msk.bf16.gmra.mrb[184].mxu1 %vm982_vm4, %v11296_v27  ;;  %v12000_v33 = vadd.f32 %v3896_v3, %v3695_v11 }
 0x4f3   : > { %v8804_v0 = vpop.f32.mrb[95].mxu0  ;;  %9033 = vmatprep.mubr.msk.bf16.mxu1 %vm9617_vm2, %v12969_v7 }
 0x4f5   : > { %v3660_v17 = vpop.f32.mrb[80].mxu1 }
 0x4f6   : > { %v3696_v58 = vadd.f32 %v3660_v17, %v11856_v2  ;;  %v8747_v56 = vpop.f32.mrb[81].mxu1 }
 0x4f7   : > { %v3663_v13 = vpop.f32.mrb[82].mxu1 }
 0x4f8   : > { %v3697_v48 = vadd.f32 %v3663_v13, %v11860_v19  ;;  %v8748_v20 = vpop.f32.mrb[83].mxu1  ;;  %v3916_v37 = vpop.f32.mrb[96].mxu0  ;;  %v12006_v49 = vadd.f32 %v3901_v36, %v3696_v58 }
 0x4f9   : > { %v8807_v18 = vpop.f32.mrb[97].mxu0 }
 0x4fa   : > { %v3918_v63 = vpop.f32.mrb[98].mxu0  ;;  %9034 = vmatmul.mubr.msk.bf16.gmra.mrb[188].mxu1 %vm982_vm4, %v11325_v51  ;;  %v12010_v27 = vadd.f32 %v3904_v26, %v3697_v48 }
 0x4fb   : > { %v8808_v8 = vpop.f32.mrb[99].mxu0  ;;  %9037 = vmatprep.mubr.msk.bf16.mxu1 %vm9617_vm2, %v12969_v7 }
 0x4fd   : > { %v3668_v2 = vpop.f32.mrb[84].mxu1 }
 0x4fe   : > { %v3698_v5 = vadd.f32 %v3668_v2, %v11870_v38  ;;  %v8751_v3 = vpop.f32.mrb[85].mxu1 }
 0x4ff   : > { %v3671_v19 = vpop.f32.mrb[86].mxu1 }
 0x500   : > { %v8752_v4 = vpop.f32.mrb[87].mxu1  ;;  %v4186_v43 = vpop.f32.mrb[100].mxu0  ;;  %v12015_v15 = vadd.f32 %v3909_v47, %v3698_v5 }
 0x501   : > { %v8871_v50 = vpop.f32.mrb[101].mxu0 }
 0x502   : > { %v4189_v1 = vpop.f32.mrb[102].mxu0  ;;  %9038 = vmatmul.mubr.msk.bf16.gmra.mrb[192].mxu1 %vm982_vm4, %v11349_v44 }
 0x503   : > { %v8872_v51 = vpop.f32.mrb[103].mxu0  ;;  %9041 = vmatprep.mubr.msk.bf16.mxu1 %vm9617_vm2, %v12969_v7 }
 0x505   : > { %v3675_v32 = vpop.f32.mrb[88].mxu1 }
 0x506   : > { %v8755_v46 = vpop.f32.mrb[89].mxu1 }
 0x507   : > { %v3677_v36 = vpop.f32.mrb[90].mxu1 }
 0x508   : > { %v8756_v14 = vpop.f32.mrb[91].mxu1  ;;  %v4194_v38 = vpop.f32.mrb[104].mxu0 }
 0x509   : > { %v8875_v26 = vpop.f32.mrb[105].mxu0 }
 0x50a   : > { %v4197_v45 = vpop.f32.mrb[106].mxu0  ;;  %9042 = vmatmul.mubr.msk.bf16.gmra.mrb[196].mxu1 %vm982_vm4, %v11373_v29 }
 0x50b   : > { %v8876_v53 = vpop.f32.mrb[107].mxu0  ;;  %9045 = vmatprep.mubr.msk.bf16.mxu1 %vm9617_vm2, %v12969_v7 }
 0x50d   : > { %v4008_v10 = vpop.f32.mrb[92].mxu1 }
 0x50e   : > { %v4092_v44 = vadd.f32 %v4008_v10, %v11894_v35  ;;  %v8819_v55 = vpop.f32.mrb[93].mxu1 }
 0x50f   : > { %v4011_v24 = vpop.f32.mrb[94].mxu1 }
 0x510   : > { %v4093_v11 = vadd.f32 %v4011_v24, %v11902_v60  ;;  %v8820_v42 = vpop.f32.mrb[95].mxu1  ;;  %v4202_v47 = vpop.f32.mrb[108].mxu0  ;;  %v12027_v59 = vadd.f32 %v4186_v43, %v4092_v44 }
 0x511   : > { %v8879_v9 = vpop.f32.mrb[109].mxu0 }
 0x512   : > { %v4205_v0 = vpop.f32.mrb[110].mxu0  ;;  %9046 = vmatmul.mubr.msk.bf16.gmra.mrb[200].mxu1 %vm982_vm4, %v11397_v54  ;;  %v12031_v29 = vadd.f32 %v4189_v1, %v4093_v11 }
 0x513   : > { %v8880_v17 = vpop.f32.mrb[111].mxu0  ;;  %9049 = vmatprep.mubr.msk.bf16.mxu1 %vm9617_vm2, %v12969_v7 }
 0x515   : > { %v4016_v35 = vpop.f32.mrb[96].mxu1 }
 0x516   : > { %v4094_v58 = vadd.f32 %v4016_v35, %v11913_v52  ;;  %v8823_v56 = vpop.f32.mrb[97].mxu1 }
 0x517   : > { %v4019_v60 = vpop.f32.mrb[98].mxu1 }
 0x518   : > { %v4095_v13 = vadd.f32 %v4019_v60, %v11918_v40  ;;  %v8824_v48 = vpop.f32.mrb[99].mxu1  ;;  %v4210_v20 = vpop.f32.mrb[112].mxu0  ;;  %v12037_v37 = vadd.f32 %v4194_v38, %v4094_v58 }
 0x519   : > { %v8883_v18 = vpop.f32.mrb[113].mxu0 }
 0x51a   : > { %v4213_v63 = vpop.f32.mrb[114].mxu0  ;;  %9050 = vmatmul.mubr.msk.bf16.gmra.mrb[204].mxu1 %vm982_vm4, %v11421_v23  ;;  %v12041_v54 = vadd.f32 %v4197_v45, %v4095_v13 }
 0x51b   : > { %v8884_v8 = vpop.f32.mrb[115].mxu0  ;;  %9053 = vmatprep.mubr.msk.bf16.mxu1 %vm9617_vm2, %v12969_v7 }
 0x51d   : > { %v4024_v52 = vpop.f32.mrb[100].mxu1 }
 0x51e   : > { %v4096_v2 = vadd.f32 %v4024_v52, %v11933_v61  ;;  %v8827_v5 = vpop.f32.mrb[101].mxu1 }
 0x51f   : > { %v4027_v40 = vpop.f32.mrb[102].mxu1 }
 0x520   : > { %v4097_v3 = vadd.f32 %v4027_v40, %v11937_v31  ;;  %v8828_v19 = vpop.f32.mrb[103].mxu1  ;;  %v4218_v4 = vpop.f32.mrb[116].mxu0  ;;  %v12047_v43 = vadd.f32 %v4202_v47, %v4096_v2 }
 0x521   : > { %v8887_v50 = vpop.f32.mrb[117].mxu0 }
 0x522   : > { %v4221_v1 = vpop.f32.mrb[118].mxu0  ;;  %9054 = vmatmul.mubr.msk.bf16.gmra.mrb[208].mxu1 %vm982_vm4, %v11445_v39  ;;  %v12051_v23 = vadd.f32 %v4205_v0, %v4097_v3 }
 0x523   : > { %v8888_v51 = vpop.f32.mrb[119].mxu0  ;;  %9057 = vmatprep.mubr.msk.bf16.mxu1 %vm9617_vm2, %v12969_v7 }
 0x525   : > { %v4032_v61 = vpop.f32.mrb[104].mxu1 }
 0x526   : > { %v4098_v32 = vadd.f32 %v4032_v61, %v11949_v25  ;;  %v8831_v46 = vpop.f32.mrb[105].mxu1 }
 0x527   : > { %v4035_v31 = vpop.f32.mrb[106].mxu1 }
 0x528   : > { %v4099_v36 = vadd.f32 %v4035_v31, %v11953_v12  ;;  %v8832_v14 = vpop.f32.mrb[107].mxu1  ;;  %v4226_v38 = vpop.f32.mrb[120].mxu0  ;;  %v12057_v26 = vadd.f32 %v4210_v20, %v4098_v32 }
 0x529   : > { %v8891_v45 = vpop.f32.mrb[121].mxu0 }
 0x52a   : > { %v4229_v53 = vpop.f32.mrb[122].mxu0  ;;  %9058 = vmatmul.mubr.msk.bf16.gmra.mrb[212].mxu1 %vm982_vm4, %v11469_v6  ;;  %v12061_v39 = vadd.f32 %v4213_v63, %v4099_v36 }
 0x52b   : > { %v8892_v10 = vpop.f32.mrb[123].mxu0  ;;  %9061 = vmatprep.mubr.msk.bf16.mxu1 %vm9617_vm2, %v12969_v7 }
 0x52d   : > { %v4040_v25 = vpop.f32.mrb[108].mxu1 }
 0x52e   : > { %v4100_v44 = vadd.f32 %v4040_v25, %v11965_v21  ;;  %v8835_v55 = vpop.f32.mrb[109].mxu1 }
 0x52f   : > { %v4043_v12 = vpop.f32.mrb[110].mxu1 }
 0x530   : > { %v4101_v24 = vadd.f32 %v4043_v12, %v11969_v28  ;;  %v8836_v11 = vpop.f32.mrb[111].mxu1  ;;  %v4234_v42 = vpop.f32.mrb[124].mxu0  ;;  %v12067_v47 = vadd.f32 %v4218_v4, %v4100_v44 }
 0x531   : > { %v8895_v9 = vpop.f32.mrb[125].mxu0 }
 0x532   : > { %v4237_v0 = vpop.f32.mrb[126].mxu0  ;;  %9062 = vmatmul.mubr.msk.bf16.gmra.mrb[216].mxu1 %vm982_vm4, %v11496_v34  ;;  %v12071_v6 = vadd.f32 %v4221_v1, %v4101_v24  ;;  %v9487_v34 = vld [vmem:[%s12851_s7 + $0x20] sm:$0xff]  }
 0x533   : > { %v8896_v17 = vpop.f32.mrb[127].mxu0  ;;  %9065 = vmatprep.mubr.msk.bf16.mxu1 %vm9617_vm2, %v12969_v7  ;;  %9070 = vmatpush3.bf16.msra.mxu0 %v9487_v34 }
 0x534   : > { %9071 = vmatprep.subr.bf16.mxu0 %v12969_v7 }
 0x535   : > { %v4048_v21 = vpop.f32.mrb[112].mxu1 }
 0x536   : > { %v4102_v35 = vadd.f32 %v4048_v21, %v11976_v57  ;;  %v8839_v58 = vpop.f32.mrb[113].mxu1 }
 0x537   : > { %v4051_v28 = vpop.f32.mrb[114].mxu1 }
 0x538   : > { %v4103_v56 = vadd.f32 %v4051_v28, %v11980_v22  ;;  %v8840_v60 = vpop.f32.mrb[115].mxu1  ;;  %v4242_v13 = vpop.f32.mrb[128].mxu0  ;;  %v12077_v48 = vadd.f32 %v4226_v38, %v4102_v35 }
 0x539   : > { %v8899_v20 = vpop.f32.mrb[129].mxu0 }
 0x53a   : > { %v4245_v18 = vpop.f32.mrb[130].mxu0  ;;  %9066 = vmatmul.mubr.msk.bf16.gmra.mrb[220].mxu1 %vm982_vm4, %v11923_v62  ;;  %v12084_v63 = vadd.f32 %v4229_v53, %v4103_v56 }
 0x53b   : > { %v8900_v57 = vpop.f32.mrb[131].mxu0  ;;  %9149 = vmatprep.mubr.msk.bf16.mxu1 %vm9617_vm2, %v12969_v7 }
 0x53d   : > { %v4056_v22 = vpop.f32.mrb[116].mxu1 }
 0x53e   : > { %v4104_v8 = vadd.f32 %v4056_v22, %v11986_v16  ;;  %v8843_v52 = vpop.f32.mrb[117].mxu1 }
 0x53f   : > { %v4059_v2 = vpop.f32.mrb[118].mxu1 }
 0x540   : > { %v4105_v5 = vadd.f32 %v4059_v2, %v11990_v30  ;;  %v8844_v40 = vpop.f32.mrb[119].mxu1  ;;  %v4250_v3 = vpop.f32.mrb[132].mxu0  ;;  %v12091_v19 = vadd.f32 %v4234_v42, %v4104_v8  ;;  %v9488_v8 = vld [vmem:[%s12851_s7 + $0x28] sm:$0xff]  }
 0x541   : > { %v8903_v62 = vpop.f32.mrb[133].mxu0  ;;  %9072 = vmatpush3.bf16.msra.mxu0 %v9488_v8 }
 0x542   : > { %v4253_v4 = vpop.f32.mrb[134].mxu0  ;;  %v12093_v50 = vadd.f32 %v4237_v0, %v4105_v5  ;;  %9073 = vmatprep.subr.bf16.mxu0 %v12969_v7 }
 0x543   : > { %v8904_v1 = vpop.f32.mrb[135].mxu0 }
 0x545   : > { %v4064_v51 = vpop.f32.mrb[120].mxu1 }
 0x546   : > { %v4106_v61 = vadd.f32 %v4064_v51, %v11996_v41  ;;  %v8847_v32 = vpop.f32.mrb[121].mxu1 }
 0x547   : > { %v4067_v46 = vpop.f32.mrb[122].mxu1 }
 0x548   : > { %v4107_v16 = vadd.f32 %v4067_v46, %v12000_v33  ;;  %v8848_v31 = vpop.f32.mrb[123].mxu1  ;;  %v4258_v36 = vpop.f32.mrb[136].mxu0  ;;  %v12097_v14 = vadd.f32 %v4242_v13, %v4106_v61 }
 0x549   : > { %v8907_v30 = vpop.f32.mrb[137].mxu0 }
 0x54a   : > { %v4261_v38 = vpop.f32.mrb[138].mxu0  ;;  %v12099_v45 = vadd.f32 %v4245_v18, %v4107_v16 }
 0x54b   : > { %v8908_v53 = vpop.f32.mrb[139].mxu0 }
 0x54d   : > { %v4072_v10 = vpop.f32.mrb[124].mxu1 }
 0x54e   : > { %v4108_v25 = vadd.f32 %v4072_v10, %v12006_v49  ;;  %v8851_v44 = vpop.f32.mrb[125].mxu1 }
 0x54f   : > { %v4075_v55 = vpop.f32.mrb[126].mxu1 }
 0x550   : > { %v4109_v41 = vadd.f32 %v4075_v55, %v12010_v27  ;;  %v8852_v12 = vpop.f32.mrb[127].mxu1  ;;  %v4265_v24 = vpop.f32.mrb[140].mxu0  ;;  %v12103_v11 = vadd.f32 %v4250_v3, %v4108_v25 }
 0x551   : > { %v8911_v33 = vpop.f32.mrb[141].mxu0 }
 0x552   : > { %v4267_v42 = vpop.f32.mrb[142].mxu0  ;;  %v12105_v9 = vadd.f32 %v4253_v4, %v4109_v41 }
 0x553   : > { %v8912_v0 = vpop.f32.mrb[143].mxu0 }
 0x555   : > { %v4080_v17 = vpop.f32.mrb[128].mxu1 }
 0x556   : > { %v4110_v21 = vadd.f32 %v4080_v17, %v12015_v15  ;;  %v8855_v35 = vpop.f32.mrb[129].mxu1 }
 0x557   : > { %v4083_v58 = vpop.f32.mrb[130].mxu1 }
 0x558   : > { %v8856_v28 = vpop.f32.mrb[131].mxu1  ;;  %v4593_v49 = vpop.f32.mrb[144].mxu0  ;;  %v12108_v56 = vadd.f32 %v4258_v36, %v4110_v21 }
 0x559   : > { %v8975_v60 = vpop.f32.mrb[145].mxu0 }
 0x55a   : > { %v4596_v27 = vpop.f32.mrb[146].mxu0 }
 0x55b   : > { %v8976_v13 = vpop.f32.mrb[147].mxu0 }
 0x55d   : > { %v4087_v34 = vpop.f32.mrb[132].mxu1 }
 0x55e   : > { %v8859_v20 = vpop.f32.mrb[133].mxu1 }
 0x55f   : > { %v4089_v18 = vpop.f32.mrb[134].mxu1 }
 0x560   : > { %v8860_v57 = vpop.f32.mrb[135].mxu1  ;;  %v4601_v22 = vpop.f32.mrb[148].mxu0 }
 0x561   : > { %v8979_v52 = vpop.f32.mrb[149].mxu0 }
 0x562   : > { %v4604_v15 = vpop.f32.mrb[150].mxu0 }
 0x563   : > { %v8980_v2 = vpop.f32.mrb[151].mxu0 }
 0x565   : > { %v4413_v5 = vpop.f32.mrb[136].mxu1 }
 0x566   : > { %v4497_v40 = vadd.f32 %v4413_v5, %v12027_v59  ;;  %v8923_v3 = vpop.f32.mrb[137].mxu1 }
 0x567   : > { %v4416_v62 = vpop.f32.mrb[138].mxu1 }
 0x568   : > { %v4498_v4 = vadd.f32 %v4416_v62, %v12031_v29  ;;  %v8924_v1 = vpop.f32.mrb[139].mxu1  ;;  %v4609_v51 = vpop.f32.mrb[152].mxu0  ;;  %v12116_v61 = vadd.f32 %v4593_v49, %v4497_v40  ;;  %v9489_v49 = vld [vmem:[%s12851_s7 + $0x30] sm:$0xff]  }
 0x569   : > { %v8983_v32 = vpop.f32.mrb[153].mxu0  ;;  %9074 = vmatpush3.bf16.msra.mxu0 %v9489_v49  ;;  %v9496_v49 = vld [vmem:[%s12851_s7 + $0xd0] sm:$0xff]  }
 0x56a   : > { %v4612_v46 = vpop.f32.mrb[154].mxu0  ;;  %v12118_v16 = vadd.f32 %v4596_v27, %v4498_v4  ;;  %9075 = vmatprep.subr.bf16.mxu0 %v12969_v7 }
 0x56b   : > { %v8984_v31 = vpop.f32.mrb[155].mxu0 }
 0x56c   : > { %v9490_v31 = vld [vmem:[%s12851_s7 + $0x38] sm:$0xff]  }
 0x56d   : > { %v4421_v36 = vpop.f32.mrb[140].mxu1  ;;  %9076 = vmatpush3.bf16.msra.mxu0 %v9490_v31 }
 0x56e   : > { %v4499_v30 = vadd.f32 %v4421_v36, %v12037_v37  ;;  %v8927_v38 = vpop.f32.mrb[141].mxu1  ;;  %9081 = vmatprep.subr.bf16.mxu0 %v12969_v7 }
 0x56f   : > { %v4424_v53 = vpop.f32.mrb[142].mxu1 }
 0x570   : > { %v4500_v59 = vadd.f32 %v4424_v53, %v12041_v54  ;;  %v8928_v10 = vpop.f32.mrb[143].mxu1  ;;  %v4617_v25 = vpop.f32.mrb[156].mxu0  ;;  %v12122_v44 = vadd.f32 %v4601_v22, %v4499_v30 }
 0x571   : > { %v8987_v29 = vpop.f32.mrb[157].mxu0 }
 0x572   : > { %v4620_v55 = vpop.f32.mrb[158].mxu0  ;;  %v12124_v41 = vadd.f32 %v4604_v15, %v4500_v59  ;;  %v9491_v29 = vld [vmem:[%s12851_s7 + $0xc0] sm:$0xff]  }
 0x573   : > { %v8988_v12 = vpop.f32.mrb[159].mxu0  ;;  %9142 = vmatpush3.bf16.msra.mxu1 %v9491_v29 }
 0x574   : > { %9143 = vmatprep.subr.bf16.mxu1 %v12969_v7 }
 0x575   : > { %v4429_v24 = vpop.f32.mrb[144].mxu1 }
 0x576   : > { %v4501_v33 = vadd.f32 %v4429_v24, %v12047_v43  ;;  %v8931_v42 = vpop.f32.mrb[145].mxu1 }
 0x577   : > { %v4432_v0 = vpop.f32.mrb[146].mxu1 }
 0x578   : > { %v4502_v37 = vadd.f32 %v4432_v0, %v12051_v23  ;;  %v8932_v17 = vpop.f32.mrb[147].mxu1  ;;  %v4625_v21 = vpop.f32.mrb[160].mxu0  ;;  %v12128_v35 = vadd.f32 %v4609_v51, %v4501_v33 }
 0x579   : > { %v8991_v54 = vpop.f32.mrb[161].mxu0 }
 0x57a   : > { %v4628_v58 = vpop.f32.mrb[162].mxu0  ;;  %v12130_v28 = vadd.f32 %v4612_v46, %v4502_v37 }
 0x57b   : > { %v8992_v60 = vpop.f32.mrb[163].mxu0 }
 0x57d   : > { %v4437_v27 = vpop.f32.mrb[148].mxu1 }
 0x57e   : > { %v4503_v43 = vadd.f32 %v4437_v27, %v12057_v26  ;;  %v8935_v23 = vpop.f32.mrb[149].mxu1 }
 0x57f   : > { %v4440_v13 = vpop.f32.mrb[150].mxu1 }
 0x580   : > { %v4504_v34 = vadd.f32 %v4440_v13, %v12061_v39  ;;  %v8936_v20 = vpop.f32.mrb[151].mxu1  ;;  %v4633_v18 = vpop.f32.mrb[164].mxu0  ;;  %v12138_v57 = vadd.f32 %v4617_v25, %v4503_v43 }
 0x581   : > { %v8995_v22 = vpop.f32.mrb[165].mxu0 }
 0x582   : > { %v4636_v8 = vpop.f32.mrb[166].mxu0  ;;  %v12140_v52 = vadd.f32 %v4620_v55, %v4504_v34 }
 0x583   : > { %v8996_v15 = vpop.f32.mrb[167].mxu0 }
 0x585   : > { %v4445_v2 = vpop.f32.mrb[152].mxu1 }
 0x586   : > { %v4505_v5 = vadd.f32 %v4445_v2, %v12067_v47  ;;  %v8939_v40 = vpop.f32.mrb[153].mxu1 }
 0x587   : > { %v4448_v3 = vpop.f32.mrb[154].mxu1 }
 0x588   : > { %v4506_v26 = vadd.f32 %v4448_v3, %v12071_v6  ;;  %v8940_v62 = vpop.f32.mrb[155].mxu1  ;;  %v4641_v4 = vpop.f32.mrb[168].mxu0  ;;  %v12144_v1 = vadd.f32 %v4625_v21, %v4505_v5 }
 0x589   : > { %v8999_v39 = vpop.f32.mrb[169].mxu0 }
 0x58a   : > { %v4644_v51 = vpop.f32.mrb[170].mxu0  ;;  %v12146_v32 = vadd.f32 %v4628_v58, %v4506_v26 }
 0x58b   : > { %v9000_v46 = vpop.f32.mrb[171].mxu0 }
 0x58d   : > { %v4453_v36 = vpop.f32.mrb[156].mxu1 }
 0x58e   : > { %v4507_v47 = vadd.f32 %v4453_v36, %v12077_v48  ;;  %v8943_v30 = vpop.f32.mrb[157].mxu1 }
 0x58f   : > { %v4456_v6 = vpop.f32.mrb[158].mxu1 }
 0x590   : > { %v4508_v38 = vadd.f32 %v4456_v6, %v12084_v63  ;;  %v8944_v53 = vpop.f32.mrb[159].mxu1  ;;  %v4649_v59 = vpop.f32.mrb[172].mxu0  ;;  %v12154_v10 = vadd.f32 %v4633_v18, %v4507_v47  ;;  %v9494_v63 = vld [vmem:[%s12851_s7 + $0xc8] sm:$0xff]  }
 0x591   : > { %v9003_v25 = vpop.f32.mrb[173].mxu0  ;;  %9144 = vmatpush3.bf16.msra.mxu1 %v9494_v63 }
 0x592   : > { %v4652_v55 = vpop.f32.mrb[174].mxu0  ;;  %v12159_v12 = vadd.f32 %v4636_v8, %v4508_v38  ;;  %9145 = vmatprep.subr.bf16.mxu1 %v12969_v7 }
 0x593   : > { %v9004_v24 = vpop.f32.mrb[175].mxu0 }
 0x595   : > { %v4461_v48 = vpop.f32.mrb[160].mxu1  ;;  %9146 = vmatpush3.bf16.msra.mxu1 %v9496_v49 }
 0x596   : > { %v4509_v33 = vadd.f32 %v4461_v48, %v12091_v19  ;;  %v8947_v42 = vpop.f32.mrb[161].mxu1  ;;  %9147 = vmatprep.subr.bf16.mxu1 %v12969_v7  ;;  %v12198_v48 = vld [vmem:[%s12850_s6] ss:$0 sm:$0xff] }
 0x597   : > { %v4464_v0 = vpop.f32.mrb[162].mxu1 }
 0x598   : > { %v4510_v37 = vadd.f32 %v4464_v0, %v12093_v50  ;;  %v8948_v17 = vpop.f32.mrb[163].mxu1  ;;  %v4657_v21 = vpop.f32.mrb[176].mxu0  ;;  %v12167_v54 = vadd.f32 %v4641_v4, %v4509_v33  ;;  %v9498_v50 = vld [vmem:[%s12851_s7 + $0xd8] sm:$0xff]  }
 0x599   : > { %v9007_v58 = vpop.f32.mrb[177].mxu0  ;;  %9148 = vmatpush3.bf16.msra.mxu1 %v9498_v50 }
 0x59a   : > { %v4660_v60 = vpop.f32.mrb[178].mxu0  ;;  %v12173_v27 = vadd.f32 %v4644_v51, %v4510_v37  ;;  %9165 = vmatprep.subr.bf16.mxu1 %v12969_v7 }
 0x59b   : > { %v9008_v19 = vpop.f32.mrb[179].mxu0 }
 0x59d   : > { %v4469_v43 = vpop.f32.mrb[164].mxu1 }
 0x59e   : > { %v4511_v23 = vadd.f32 %v4469_v43, %v12097_v14  ;;  %v8951_v13 = vpop.f32.mrb[165].mxu1 }
 0x59f   : > { %v4472_v34 = vpop.f32.mrb[166].mxu1 }
 0x5a0   : > { %v4512_v20 = vadd.f32 %v4472_v34, %v12099_v45  ;;  %v8952_v18 = vpop.f32.mrb[167].mxu1  ;;  %v4665_v22 = vpop.f32.mrb[180].mxu0  ;;  %v12181_v8 = vadd.f32 %v4649_v59, %v4511_v23 }
 0x5a1   : > { %v9011_v15 = vpop.f32.mrb[181].mxu0 }
 0x5a2   : > { %v4668_v2 = vpop.f32.mrb[182].mxu0  ;;  %v12184_v5 = vadd.f32 %v4652_v55, %v4512_v20 }
 0x5a3   : > { %v9012_v40 = vpop.f32.mrb[183].mxu0 }
 0x5a5   : > { %v4477_v3 = vpop.f32.mrb[168].mxu1 }
 0x5a6   : > { %v4513_v26 = vadd.f32 %v4477_v3, %v12103_v11  ;;  %v8955_v14 = vpop.f32.mrb[169].mxu1 }
 0x5a7   : > { %v4480_v62 = vpop.f32.mrb[170].mxu1 }
 0x5a8   : > { %v4514_v4 = vadd.f32 %v4480_v62, %v12105_v9  ;;  %v8956_v39 = vpop.f32.mrb[171].mxu1  ;;  %v4672_v45 = vpop.f32.mrb[184].mxu0  ;;  %v12188_v51 = vadd.f32 %v4657_v21, %v4513_v26 }
 0x5a9   : > { %v9015_v46 = vpop.f32.mrb[185].mxu0 }
 0x5aa   : > { %v4674_v31 = vpop.f32.mrb[186].mxu0  ;;  %v12190_v36 = vadd.f32 %v4660_v60, %v4514_v4 }
 0x5ab   : > { %v9016_v47 = vpop.f32.mrb[187].mxu0 }
 0x5ad   : > { %v4485_v30 = vpop.f32.mrb[172].mxu1 }
 0x5ae   : > { %v4515_v6 = vadd.f32 %v4485_v30, %v12108_v56  ;;  %v8959_v38 = vpop.f32.mrb[173].mxu1 }
 0x5af   : > { %v4488_v53 = vpop.f32.mrb[174].mxu1 }
 0x5b0   : > { %v8960_v59 = vpop.f32.mrb[175].mxu1  ;;  %v12193_v11 = vadd.f32 %v4665_v22, %v4515_v6 }
 0x5b5   : > { %v4492_v25 = vpop.f32.mrb[176].mxu1 }
 0x5b6   : > { %v8963_v29 = vpop.f32.mrb[177].mxu1 }
 0x5b7   : > { %v4494_v9 = vpop.f32.mrb[178].mxu1 }
 0x5b8   : > { %v8964_v55 = vpop.f32.mrb[179].mxu1 }
 0x5bd   : > { %v4764_v24 = vpop.f32.mrb[180].mxu1 }
 0x5be   : > { %v4848_v63 = vadd.f32 %v4764_v24, %v12116_v61  ;;  %v9027_v33 = vpop.f32.mrb[181].mxu1 }
 0x5bf   : > { %v4767_v42 = vpop.f32.mrb[182].mxu1 }
 0x5c0   : > { %v4874_v56 = vadd.f32 %v12198_v48, %v4848_v63  ;;  %v4849_v0 = vadd.f32 %v4767_v42, %v12118_v16  ;;  %v9028_v37 = vpop.f32.mrb[183].mxu1 }
 0x5c2   : > { %v4893_v17 = vmax.f32 %v4874_v56, 0.0  ;;  %v4875_v21 = vadd.f32 %v12198_v48, %v4849_v0 }
 0x5c4   : > { %v4894_v58 = vmax.f32 %v4875_v21, 0.0  ;;  %v4927_v60 = vrot.slane %v4893_v17, 1 }
 0x5c5   : > { %v4772_v49 = vpop.f32.mrb[184].mxu1 }
 0x5c6   : > { %v4928_v19 = vrot.slane %v4894_v58, 1  ;;  %v4850_v43 = vadd.f32 %v4772_v49, %v12122_v44  ;;  %v9031_v50 = vpop.f32.mrb[185].mxu1 }
 0x5c7   : > { %v4775_v23 = vpop.f32.mrb[186].mxu1 }
 0x5c8   : > { %v4929_v61 = vsel %vm1365_vm5, %v4927_v60, %v4928_v19  ;;  %v4876_v13 = vadd.f32 %v12198_v48, %v4850_v43  ;;  %v4851_v34 = vadd.f32 %v4775_v23, %v12124_v41  ;;  %v9032_v20 = vpop.f32.mrb[187].mxu1 }
 0x5c9   : > { %v4960_v16 = vmax.f32 %v4893_v17, %v4929_v61 }
 0x5ca   : > { %v4895_v18 = vmax.f32 %v4876_v13, 0.0  ;;  %v4877_v22 = vadd.f32 %v12198_v48, %v4851_v34 }
 0x5cc   : > { %v4930_v15 = vrot.slane %v4895_v18, 1  ;;  %v4896_v2 = vmax.f32 %v4877_v22, 0.0 }
 0x5cd   : > { %v4780_v40 = vpop.f32.mrb[188].mxu1 }
 0x5ce   : > { %v4931_v3 = vsel %vm1365_vm5, %v4928_v19, %v4930_v15  ;;  %v4999_v26 = vmax.f32 %v4894_v58, %v4930_v15  ;;  %v4932_v44 = vrot.slane %v4896_v2, 1  ;;  %v4852_v14 = vadd.f32 %v4780_v40, %v12128_v35  ;;  %v9035_v62 = vpop.f32.mrb[189].mxu1 }
 0x5cf   : > { %v4961_v4 = vmax.f32 %v4894_v58, %v4931_v3  ;;  %v4783_v39 = vpop.f32.mrb[190].mxu1 }
 0x5d0   : > { %v4975_v45 = vsel %vm1365_vm5, %v4930_v15, %v4932_v44  ;;  %v4878_v41 = vadd.f32 %v12198_v48, %v4852_v14  ;;  %v4853_v46 = vadd.f32 %v4783_v39, %v12130_v28  ;;  %v9036_v31 = vpop.f32.mrb[191].mxu1  ;;  %v5023_v38 = vrot.slane %v4999_v26, 7 }
 0x5d1   : > { %v5000_v47 = vmax.f32 %v4895_v18, %v4975_v45 }
 0x5d2   : > { %v4897_v30 = vmax.f32 %v4878_v41, 0.0  ;;  %v4879_v6 = vadd.f32 %v12198_v48, %v4853_v46 }
 0x5d3   : > { %v5024_v53 = vrot.slane %v5000_v47, 7 }
 0x5d4   : > { %v4933_v59 = vrot.slane %v4897_v30, 1  ;;  %v4898_v25 = vmax.f32 %v4879_v6, 0.0 }
 0x5d5   : > { %v5025_v35 = vsel %vm821_vm8, %v5023_v38, %v5024_v53  ;;  %v4788_v29 = vpop.f32.mrb[192].mxu1 }
 0x5d6   : > { %v5056_v9 = vmax.f32 %v4960_v16, %v5025_v35  ;;  %v4934_v55 = vsel %vm1365_vm5, %v4932_v44, %v4933_v59  ;;  %v4935_v24 = vrot.slane %v4898_v25, 1  ;;  %v4854_v63 = vadd.f32 %v4788_v29, %v12138_v57  ;;  %v9039_v33 = vpop.f32.mrb[193].mxu1 }
 0x5d7   : > { %v4962_v28 = vmax.f32 %v4896_v2, %v4934_v55  ;;  %v4791_v42 = vpop.f32.mrb[194].mxu1 }
 0x5d8   : > { %v5067_v56 = vrot.slane %v5056_v9, 1  ;;  %v5069_v0 = vrot.slane %v5056_v9, 2  ;;  %v4936_v37 = vsel %vm1365_vm5, %v4933_v59, %v4935_v24  ;;  %v9040_v17 = vpop.f32.mrb[195].mxu1  ;;  %v4880_v49 = vadd.f32 %v12198_v48, %v4854_v63 }
 0x5d9   : > { %v5026_v21 = vrot.slane %v4962_v28, 7  ;;  %v4963_v58 = vmax.f32 %v4897_v30, %v4936_v37  ;;  %v4855_v60 = vadd.f32 %v4791_v42, %v12140_v52  ;;  %v5071_v13 = vrot.slane %v5056_v9, 3 }
 0x5da   : > { %v5103_v19 = vsel %vm821_vm8, %v5056_v9, %v5067_v56  ;;  %v4899_v57 = vmax.f32 %v4880_v49, 0.0 }
 0x5db   : > { %v5027_v43 = vsel %vm821_vm8, %v5024_v53, %v5026_v21  ;;  %v5105_v50 = vsel %vm5104_vm10, %v5103_v19, %v5069_v0  ;;  %v4881_v61 = vadd.f32 %v12198_v48, %v4855_v60  ;;  %v5028_v39 = vrot.slane %v4963_v58, 7 }
 0x5dc   : > { %v5057_v23 = vmax.f32 %v4961_v4, %v5027_v43  ;;  %v4976_v34 = vrot.slane %v4899_v57, 1  ;;  %v5106_v52 = vsel %vm3008_vm9, %v5105_v50, %v5071_v13 }
 0x5dd   : > { %v4796_v20 = vpop.f32.mrb[196].mxu1  ;;  %v4900_v18 = vmax.f32 %v4881_v61, 0.0 }
 0x5de   : > { %v5074_v16 = vrot.slane %v5057_v23, 4  ;;  %v4856_v22 = vadd.f32 %v4796_v20, %v12144_v1  ;;  %v9043_v15 = vpop.f32.mrb[197].mxu1  ;;  %v4977_v2 = vsel %vm1365_vm5, %v4935_v24, %v4976_v34 }
 0x5df   : > { %v4799_v40 = vpop.f32.mrb[198].mxu1  ;;  %v5001_v26 = vmax.f32 %v4898_v25, %v4977_v2  ;;  %v4937_v44 = vrot.slane %v4900_v18, 1 }
 0x5e0   : > { %v5108_v3 = vsel %vm5107_vm11, %v5106_v52, %v5074_v16  ;;  %v4882_v14 = vadd.f32 %v12198_v48, %v4856_v22  ;;  %v9044_v62 = vpop.f32.mrb[199].mxu1  ;;  %v4857_v4 = vadd.f32 %v4799_v40, %v12146_v32 }
 0x5e1   : > { %v5029_v45 = vrot.slane %v5001_v26, 7  ;;  %v4978_v41 = vsel %vm1365_vm5, %v4976_v34, %v4937_v44 }
 0x5e2   : > { %v4901_v1 = vmax.f32 %v4882_v14, 0.0  ;;  %v5002_v46 = vmax.f32 %v4899_v57, %v4978_v41  ;;  %v4883_v31 = vadd.f32 %v12198_v48, %v4857_v4 }
 0x5e3   : > { %v5030_v47 = vsel %vm821_vm8, %v5028_v39, %v5029_v45 }
 0x5e4   : > { %v4938_v30 = vrot.slane %v4901_v1, 1  ;;  %v5058_v6 = vmax.f32 %v4962_v28, %v5030_v47  ;;  %v5031_v38 = vrot.slane %v5002_v46, 7  ;;  %v4902_v53 = vmax.f32 %v4883_v31, 0.0 }
 0x5e5   : > { %v4804_v59 = vpop.f32.mrb[200].mxu1 }
 0x5e6   : > { %v4939_v25 = vsel %vm1365_vm5, %v4937_v44, %v4938_v30  ;;  %v4858_v35 = vadd.f32 %v4804_v59, %v12154_v10  ;;  %v9047_v32 = vpop.f32.mrb[201].mxu1  ;;  %v5077_v29 = vrot.slane %v5058_v6, 1  ;;  %v5032_v9 = vsel %vm821_vm8, %v5029_v45, %v5031_v38 }
 0x5e7   : > { %v4964_v55 = vmax.f32 %v4900_v18, %v4939_v25  ;;  %v4940_v24 = vrot.slane %v4902_v53, 1  ;;  %v4807_v63 = vpop.f32.mrb[202].mxu1  ;;  %v5059_v33 = vmax.f32 %v4963_v58, %v5032_v9 }
 0x5e8   : > { %v4884_v42 = vadd.f32 %v12198_v48, %v4858_v35  ;;  %v4859_v56 = vadd.f32 %v4807_v63, %v12159_v12  ;;  %v9048_v28 = vpop.f32.mrb[203].mxu1  ;;  %v5109_v0 = vsel %vm662_vm0, %v5108_v3, %v5077_v29 }
 0x5e9   : > { %v4941_v37 = vsel %vm1365_vm5, %v4938_v30, %v4940_v24  ;;  %v5080_v17 = vrot.slane %v5059_v33, 2  ;;  %v5082_v21 = vrot.slane %v5059_v33, 3  ;;  %v5086_v44 = vrot.slane %v5059_v33, 5 }
 0x5ea   : > { %v4965_v10 = vmax.f32 %v4901_v1, %v4941_v37  ;;  %v4903_v49 = vmax.f32 %v4884_v42, 0.0  ;;  %v4885_v60 = vadd.f32 %v12198_v48, %v4859_v56 }
 0x5eb   : > { %v5110_v19 = vsel %vm663_vm1, %v5109_v0, %v5080_v17 }
 0x5ec   : > { %v4979_v43 = vrot.slane %v4903_v49, 1  ;;  %v4904_v57 = vmax.f32 %v4885_v60, 0.0  ;;  %v12244_v50 = vsel %vm1365_vm5, %v5110_v19, %v5082_v21  ;;  %v5033_v15 = vrot.slane %v4965_v10, 7 }
 0x5ed   : > { %v4812_v58 = vpop.f32.mrb[204].mxu1 }
 0x5ee   : > { %v4860_v12 = vadd.f32 %v4812_v58, %v12167_v54  ;;  %v9051_v23 = vpop.f32.mrb[205].mxu1  ;;  %v4980_v61 = vsel %vm1365_vm5, %v4940_v24, %v4979_v43  ;;  %v4942_v13 = vrot.slane %v4904_v57, 1  ;;  %v5084_v54 = vrot.slane %v5059_v33, 4 }
 0x5ef   : > { %v4815_v34 = vpop.f32.mrb[206].mxu1  ;;  %v5003_v20 = vmax.f32 %v4902_v53, %v4980_v61 }
 0x5f0   : > { %v4886_v16 = vadd.f32 %v12198_v48, %v4860_v12  ;;  %v4861_v18 = vadd.f32 %v4815_v34, %v12173_v27  ;;  %v9052_v22 = vpop.f32.mrb[207].mxu1  ;;  %v4981_v52 = vsel %vm1365_vm5, %v4979_v43, %v4942_v13  ;;  %v5112_v25 = vsel %vm821_vm8, %v5084_v54, %v5086_v44 }
 0x5f1   : > { %v5034_v2 = vrot.slane %v5003_v20, 7  ;;  %v5004_v40 = vmax.f32 %v4903_v49, %v4981_v52 }
 0x5f2   : > { %v4905_v3 = vmax.f32 %v4886_v16, 0.0  ;;  %v4887_v26 = vadd.f32 %v12198_v48, %v4861_v18 }
 0x5f3   : > { %v5035_v14 = vsel %vm821_vm8, %v5033_v15, %v5034_v2  ;;  %v5036_v62 = vrot.slane %v5004_v40, 7 }
 0x5f4   : > { %v4943_v4 = vrot.slane %v4905_v3, 1  ;;  %v4906_v39 = vmax.f32 %v4887_v26, 0.0  ;;  %v5060_v45 = vmax.f32 %v4964_v55, %v5035_v14 }
 0x5f5   : > { %v4820_v41 = vpop.f32.mrb[208].mxu1  ;;  %v5037_v27 = vsel %vm821_vm8, %v5034_v2, %v5036_v62 }
 0x5f6   : > { %v4944_v1 = vsel %vm1365_vm5, %v4942_v13, %v4943_v4  ;;  %v4945_v46 = vrot.slane %v4906_v39, 1  ;;  %v4862_v31 = vadd.f32 %v4820_v41, %v12181_v8  ;;  %v9055_v47 = vpop.f32.mrb[209].mxu1  ;;  %v5089_v30 = vrot.slane %v5060_v45, 2 }
 0x5f7   : > { %v5091_v6 = vrot.slane %v5060_v45, 3  ;;  %v5061_v38 = vmax.f32 %v4965_v10, %v5037_v27  ;;  %v4966_v53 = vmax.f32 %v4904_v57, %v4944_v1  ;;  %v4823_v59 = vpop.f32.mrb[210].mxu1 }
 0x5f8   : > { %v4946_v35 = vsel %vm1365_vm5, %v4943_v4, %v4945_v46  ;;  %v4888_v32 = vadd.f32 %v12198_v48, %v4862_v31  ;;  %v4863_v29 = vadd.f32 %v4823_v59, %v12184_v5  ;;  %v9056_v9 = vpop.f32.mrb[211].mxu1  ;;  %v5113_v55 = vsel %vm5104_vm10, %v5112_v25, %v5089_v30 }
 0x5f9   : > { %v5094_v24 = vrot.slane %v5061_v38, 4  ;;  %v5096_v63 = vrot.slane %v5061_v38, 5  ;;  %v5114_v8 = vsel %vm3008_vm9, %v5113_v55, %v5091_v6  ;;  %v4967_v33 = vmax.f32 %v4905_v3, %v4946_v35 }
 0x5fa   : > { %v4907_v42 = vmax.f32 %v4888_v32, 0.0  ;;  %v4889_v56 = vadd.f32 %v12198_v48, %v4863_v29  ;;  %v5098_v28 = vrot.slane %v5061_v38, 6 }
 0x5fb   : > { %v5115_v0 = vsel %vm5107_vm11, %v5114_v8, %v5094_v24  ;;  %v5038_v34 = vrot.slane %v4967_v33, 7 }
 0x5fc   : > { %v5116_v37 = vsel %vm662_vm0, %v5115_v0, %v5096_v63  ;;  %v4982_v17 = vrot.slane %v4907_v42, 1  ;;  %v4908_v21 = vmax.f32 %v4889_v56, 0.0 }
 0x5fd   : > { %v5117_v5 = vsel %vm663_vm1, %v5116_v37, %v5098_v28  ;;  %v4828_v10 = vpop.f32.mrb[212].mxu1 }
 0x5fe   : > { %v4983_v49 = vsel %vm1365_vm5, %v4945_v46, %v4982_v17  ;;  %v4947_v60 = vrot.slane %v4908_v21, 1  ;;  %v4864_v19 = vadd.f32 %v4828_v10, %v12188_v51  ;;  %v9059_v43 = vpop.f32.mrb[213].mxu1 }
 0x5ff   : > { %v5005_v57 = vmax.f32 %v4906_v39, %v4983_v49  ;;  %v4831_v58 = vpop.f32.mrb[214].mxu1 }
 0x600   : > { %v4984_v12 = vsel %vm1365_vm5, %v4982_v17, %v4947_v60  ;;  %v4890_v23 = vadd.f32 %v12198_v48, %v4864_v19  ;;  %v4865_v61 = vadd.f32 %v4831_v58, %v12190_v36  ;;  %v9060_v13 = vpop.f32.mrb[215].mxu1  ;;  %v9493_v19 = vld [vmem:[%s12851_s7 + $0x8] sm:$0xff]  }
 0x601   : > { %v5039_v20 = vrot.slane %v5005_v57, 7  ;;  %v5006_v16 = vmax.f32 %v4907_v42, %v4984_v12  ;;  %v9495_v12 = vld [vmem:[%s12851_s7 + $0x10] sm:$0xff]  }
 0x602   : > { %v4909_v18 = vmax.f32 %v4890_v23, 0.0  ;;  %v4891_v22 = vadd.f32 %v12198_v48, %v4865_v61 }
 0x603   : > { %v5040_v15 = vsel %vm821_vm8, %v5038_v34, %v5039_v20  ;;  %v5041_v52 = vrot.slane %v5006_v16, 7 }
 0x604   : > { %v5062_v51 = vmax.f32 %v4966_v53, %v5040_v15  ;;  %v4948_v2 = vrot.slane %v4909_v18, 1  ;;  %v4910_v40 = vmax.f32 %v4891_v22, 0.0 }
 0x605   : > { %v5042_v3 = vsel %vm821_vm8, %v5039_v20, %v5041_v52  ;;  %v4836_v26 = vpop.f32.mrb[216].mxu1 }
 0x606   : > { %v5101_v54 = vrot.slane %v5062_v51, 3  ;;  %v5119_v44 = vrot.slane %v5062_v51, 4  ;;  %v5121_v14 = vrot.slane %v5062_v51, 5  ;;  %v5063_v36 = vmax.f32 %v4967_v33, %v5042_v3  ;;  %v9063_v62 = vpop.f32.mrb[217].mxu1 }
 0x607   : > { %v4949_v4 = vsel %vm1365_vm5, %v4947_v60, %v4948_v2  ;;  %v4985_v39 = vrot.slane %v4910_v40, 1  ;;  %v4866_v45 = vadd.f32 %v4836_v26, %v12193_v11  ;;  %v4839_v41 = vpop.f32.mrb[218].mxu1  ;;  %v4969_v10 = vmax.f32 %v4909_v18, %v4948_v2 }
 0x608   : > { %v5118_v27 = vsel %vm1365_vm5, %v5117_v5, %v5101_v54  ;;  %v5124_v1 = vrot.slane %v5063_v36, 6  ;;  %v5126_v46 = vrot.slane %v5063_v36, 7  ;;  %v5137_v31 = vsel %vm821_vm8, %v5119_v44, %v5121_v14  ;;  %v9064_v47 = vpop.f32.mrb[219].mxu1  ;;  %v9500_v14 = vld [vmem:[%s12851_s7 + $0x100] sm:$0xff]  }
 0x609   : > { %v12279_v30 = vpack.c.bf16 %v5118_v27, %v12244_v50  ;;  %v4968_v6 = vmax.f32 %v4908_v21, %v4949_v4  ;;  %v4986_v38 = vsel %vm1365_vm5, %v4948_v2, %v4985_v39  ;;  %v4892_v53 = vadd.f32 %v12198_v48, %v4866_v45  ;;  %v9492_v48 = vld [vmem:[%s12851_s7] sm:$0xff]  }
 0x60a   : > { %v5138_v59 = vsel %vm5104_vm10, %v5137_v31, %v5124_v1  ;;  %v5007_v25 = vmax.f32 %v4909_v18, %v4986_v38  ;;  %v9497_v18 = vld [vmem:[%s12851_s7 + $0x18] sm:$0xff]   ;;  %v9499_v2 = vld [vmem:[%s12851_s7 + $0x40] sm:$0xff]   ;;  %v9502_v38 = vld [vmem:[%s12851_s7 + $0x108] sm:$0xff]  }
 0x60b   : > { %v12285_v11 = vshrl.u32 %v12279_v30, 16  ;;  %v12288_v35 = vshll.u32 %v12279_v30, 16  ;;  %v5139_v32 = vsel %vm3008_vm9, %v5138_v59, %v5126_v46  ;;  %v4911_v29 = vmax.f32 %v4892_v53, 0.0 }
 0x60c   : > { %v5043_v49 = vrot.slane %v5007_v25, 7  ;;  %v5315_v3 = vrot.slane %v12279_v30, 1  ;;  %v5824_v26 = vrot.slane %v12279_v30, 6  ;;  %v5488_v41 = vrot.slane %v12279_v30, 3 }
 0x60d   : > { %v4987_v9 = vrot.slane %v4911_v29, 1  ;;  %v4843_v50 = vpop.f32.mrb[220].mxu1  ;;  %v5168_v55 = vrot.slane %v12288_v35, 1  ;;  %v5570_v63 = vrot.slane %v12285_v11, 3  ;;  %v5571_v8 = vrot.slane %v12288_v35, 4 }
 0x60e   : > { %v9067_v24 = vpop.f32.mrb[221].mxu1  ;;  %v5738_v33 = vrot.slane %v12285_v11, 5  ;;  %v5739_v0 = vrot.slane %v12288_v35, 6  ;;  %v5397_v54 = vrot.slane %v12285_v11, 2 }
 0x60f   : > { %v4988_v42 = vsel %vm1365_vm5, %v4985_v39, %v4987_v9  ;;  %v4845_v56 = vpop.f32.mrb[222].mxu1  ;;  %v5169_v28 = vor.u32 %v5168_v55, %v12285_v11  ;;  %v12301_v21 = vor.u32 %v5571_v8, %v5570_v63  ;;  %v5398_v39 = vrot.slane %v12288_v35, 3  ;;  %v9503_v55 = vld [vmem:[%s12851_s7 + $0x50] sm:$0xff]  }
 0x610   : > { %v5008_v37 = vmax.f32 %v4910_v40, %v4988_v42  ;;  %v9068_v17 = vpop.f32.mrb[223].mxu1  ;;  %v12304_v5 = vor.u32 %v5739_v0, %v5738_v33  ;;  %v5656_v40 = vrot.slane %v12279_v30, 5  ;;  %v9504_v63 = vld [vmem:[%s12851_s7 + $0x110] sm:$0xff]   ;;  %v9505_v33 = vld [vmem:[%s12851_s7 + $0x58] sm:$0xff]   ;;  %v9507_v56 = vld [vmem:[%s12851_s7 + $0x60] sm:$0xff]  }
 0x611   : > { %9078 = vmatmul.mubr.msk.bf16.vlgmr.msra.gmra.mrb[188].mxu0 %vm982_vm4, %v5169_v28  ;;  %v9506_v42 = vld [vmem:[%s12851_s7 + $0x118] sm:$0xff]   ;;  %v9508_v28 = vld [vmem:[%s12851_s7 + $0x68] sm:$0xff]   ;;  %v9509_v0 = vld [vmem:[%s12851_s7 + $0x70] sm:$0xff]  }
 0x612   : > { %v5044_v60 = vrot.slane %v5008_v37, 7  ;;  %9082 = vmatpush3.bf16.msra.mxu0 %v9492_v48  ;;  %9089 = vmatprep.mubr.msk.bf16.mxu0 %vm9617_vm2, %v12969_v7  ;;  %v9510_v37 = vld [vmem:[%s12851_s7 + $0x78] sm:$0xff]   ;;  %v9511_v17 = vld [vmem:[%s12851_s7 + $0x80] sm:$0xff]  }
 0x613   : > { %9083 = vmatprep.subr.bf16.mxu0 %v12969_v7 }
 0x614   : > { %v5045_v43 = vsel %vm821_vm8, %v5043_v49, %v5044_v60  ;;  %v5065_v57 = vmax.f32 %v4969_v10, %v5044_v60  ;;  %v9514_v10 = vld [vmem:[%s12851_s7 + $0x98] sm:$0xff]   ;;  %v9515_v49 = vld [vmem:[%s12851_s7 + $0xa0] sm:$0xff]   ;;  %v9516_v60 = vld [vmem:[%s12851_s7 + $0xa8] sm:$0xff]  }
 0x615   : > { %v5064_v58 = vmax.f32 %v4968_v6, %v5045_v43  ;;  %v9501_v6 = vld [vmem:[%s12851_s7 + $0x48] sm:$0xff]   ;;  %v9518_v43 = vld [vmem:[%s12851_s7 + $0xb8] sm:$0xff]  }
 0x616   : > { %9084 = vmatpush3.bf16.msra.mxu0 %v9493_v19  ;;  %v5144_v52 = vsel %vm821_vm8, %v5065_v57, 0.0  ;;  %v9517_v19 = vld [vmem:[%s12851_s7 + $0xb0] sm:$0xff]   ;;  %v9519_v57 = vld [vmem:[%s12851_s7 + $0xe0] sm:$0xff]  }
 0x617   : > { %v5129_v23 = vrot.slane %v5064_v58, 4  ;;  %v5131_v61 = vrot.slane %v5064_v58, 5  ;;  %9085 = vmatprep.subr.bf16.mxu0 %v12969_v7  ;;  %v5133_v13 = vrot.slane %v5064_v58, 6  ;;  %v5135_v20 = vrot.slane %v5064_v58, 7  ;;  %v9520_v58 = vld [vmem:[%s12851_s7 + $0xe8] sm:$0xff]  }
 0x619   : > { %v5140_v34 = vsel %vm5107_vm11, %v5139_v32, %v5129_v23  ;;  %v5399_v32 = vor.u32 %v5398_v39, %v5397_v54  ;;  %v9522_v23 = vld [vmem:[%s12851_s7 + $0xf8] sm:$0xff]  }
 0x61a   : > { %v5141_v16 = vsel %vm662_vm0, %v5140_v34, %v5131_v61  ;;  %9086 = vmatpush3.bf16.msra.mxu0 %v9495_v12  ;;  %v9521_v12 = vld [vmem:[%s12851_s7 + $0xf0] sm:$0xff]   ;;  %v9523_v61 = vld [vmem:[%s12853_s9] sm:$0xff]   ;;  %v9525_v34 = vld [vmem:[%s12853_s9 + $0x8] sm:$0xff]  }
 0x61b   : > { %v5142_v22 = vsel %vm663_vm1, %v5141_v16, %v5133_v13  ;;  %9087 = vmatprep.subr.bf16.mxu0 %v12969_v7  ;;  %v9524_v13 = vld [vmem:[%s12853_s9 + $0x40] sm:$0xff]   ;;  %v9527_v16 = vld [vmem:[%s12853_s9 + $0x10] sm:$0xff]   ;;  %v9537_v54 = vld [vmem:[%s12853_s9 + $0x38] sm:$0xff]   ;;  %vm6999_vm1 = vcmask 261120  }
 0x61c   : > { %v5143_v15 = vsel %vm1365_vm5, %v5142_v22, %v5135_v20  ;;  %v9526_v20 = vld [vmem:[%s12853_s9 + $0x48] sm:$0xff]   ;;  %v9529_v22 = vld [vmem:[%s12853_s9 + $0x18] sm:$0xff]  }
 0x61d   : > { %v5146_v51 = vpack.c.bf16 %v5144_v52, %v5143_v15  ;;  %v9530_v15 = vld [vmem:[%s12853_s9 + $0x58] sm:$0xff]   ;;  %v9531_v52 = vld [vmem:[%s12853_s9 + $0x20] sm:$0xff]  }
 0x61e   : > { %9088 = vmatpush3.bf16.msra.mxu0 %v9497_v18  ;;  %v9528_v18 = vld [vmem:[%s12853_s9 + $0x50] sm:$0xff]  }
 0x61f   : > { %9093 = vmatprep.subr.bf16.mxu0 %v12969_v7  ;;  %v5657_v44 = vrot.slane %v5146_v51, 5  ;;  %v5316_v36 = vrot.slane %v5146_v51, 1  ;;  %v5825_v62 = vrot.slane %v5146_v51, 6  ;;  %v5401_v4 = vshrl.u32 %v5146_v51, 16 }
 0x620   : > { %v5404_v45 = vshll.u32 %v5146_v51, 16  ;;  %v5489_v27 = vrot.slane %v5146_v51, 3  ;;  %v9532_v51 = vld [vmem:[%s12853_s9 + $0x60] sm:$0xff]  }
 0x621   : > { %9090 = vmatmul.mubr.msk.bf16.vlgmr.msra.gmra.mrb[192].mxu0 %vm982_vm4, %v12279_v30  ;;  %v5658_v1 = vsel %vm3008_vm9, %v5656_v40, %v5657_v44  ;;  %v5317_v46 = vsel %vm1365_vm5, %v5315_v3, %v5316_v36  ;;  %v5826_v31 = vsel %vm5104_vm10, %v5824_v26, %v5825_v62  ;;  %v5403_v47 = vrot.slane %v5401_v4, 2  ;;  %v9534_v40 = vld [vmem:[%s12853_s9 + $0x68] sm:$0xff]   ;;  %v9535_v3 = vld [vmem:[%s12853_s9 + $0x30] sm:$0xff]   ;;  %v9538_v44 = vld [vmem:[%s12853_s9 + $0x78] sm:$0xff]  }
 0x622   : > { %9094 = vmatpush3.bf16.msra.mxu0 %v9499_v2  ;;  %9150 = vmatmul.mubr.msk.bf16.vlgmr.msra.gmra.mrb[224].mxu1 %vm982_vm4, %v5658_v1  ;;  %v5406_v53 = vrot.slane %v5404_v45, 3  ;;  %v12352_v30 = vsel %vm662_vm0, %v5488_v41, %v5489_v27  ;;  %v5573_v59 = vrot.slane %v5401_v4, 3  ;;  %v5574_v25 = vrot.slane %v5404_v45, 4  ;;  %v9533_v2 = vld [vmem:[%s12853_s9 + $0x28] sm:$0xff]   ;;  %v9536_v26 = vld [vmem:[%s12853_s9 + $0x70] sm:$0xff]   ;;  %vm7482_vm0 = vmpackc.low %vm1365_vm5, %vm9618_vm15 }
 0x623   : > { %9166 = vmatpush3.bf16.msra.mxu1 %v9500_v14  ;;  %9095 = vmatprep.subr.bf16.mxu0 %v12969_v7  ;;  %v5741_v11 = vrot.slane %v5401_v4, 5  ;;  %v5742_v35 = vrot.slane %v5404_v45, 6 }
 0x624   : > { %9167 = vmatprep.subr.bf16.mxu1 %v12969_v7  ;;  %9101 = vmatprep.mubr.msk.bf16.mxu0 %vm9617_vm2, %v12969_v7  ;;  %v5407_v29 = vor.u32 %v5406_v53, %v5403_v47  ;;  %v5575_v9 = vor.u32 %v5574_v25, %v5573_v59 }
 0x625   : > { %9173 = vmatprep.mubr.msk.bf16.mxu1 %vm9617_vm2, %v12969_v7  ;;  %v5743_v50 = vor.u32 %v5742_v35, %v5741_v11 }
 0x626   : > { %9096 = vmatpush3.bf16.msra.mxu0 %v9501_v6  ;;  %v5408_v24 = vsel %vm5396_vm12, %v5399_v32, %v5407_v29  ;;  %v5576_v48 = vsel %vm5569_vm13, %v12301_v21, %v5575_v9  ;;  %v9512_v21 = vld [vmem:[%s12851_s7 + $0x88] sm:$0xff]  }
 0x627   : > { %9168 = vmatpush3.bf16.msra.mxu1 %v9502_v38  ;;  %9097 = vmatprep.subr.bf16.mxu0 %v12969_v7  ;;  %v12369_v8 = vsel %vm5737_vm14, %v12304_v5, %v5743_v50  ;;  %v9513_v5 = vld [vmem:[%s12851_s7 + $0x90] sm:$0xff]  }
 0x628   : > { %9169 = vmatprep.subr.bf16.mxu1 %v12969_v7 }
 0x62a   : > { %9098 = vmatpush3.bf16.msra.mxu0 %v9503_v55 }
 0x62b   : > { %9170 = vmatpush3.bf16.msra.mxu1 %v9504_v63  ;;  %9099 = vmatprep.subr.bf16.mxu0 %v12969_v7 }
 0x62c   : > { %9171 = vmatprep.subr.bf16.mxu1 %v12969_v7 }
 0x62e   : > { %9100 = vmatpush3.bf16.msra.mxu0 %v9505_v33 }
 0x62f   : > { %9172 = vmatpush3.bf16.msra.mxu1 %v9506_v42  ;;  %9105 = vmatprep.subr.bf16.mxu0 %v12969_v7 }
 0x630   : > { %9197 = vmatprep.subr.bf16.mxu1 %v12969_v7 }
 0x631   : > { %9102 = vmatmul.mubr.msk.bf16.vlgmr.msra.gmra.mrb[196].mxu0 %vm982_vm4, %v5317_v46 }
 0x632   : > { %9174 = vmatmul.mubr.msk.bf16.vlgmr.msra.gmra.mrb[228].mxu1 %vm982_vm4, %v5826_v31  ;;  %9106 = vmatpush3.bf16.msra.mxu0 %v9507_v56 }
 0x633   : > { %9107 = vmatprep.subr.bf16.mxu0 %v12969_v7  ;;  %9113 = vmatprep.mubr.msk.bf16.mxu0 %vm9617_vm2, %v12969_v7 }
 0x634   : > { %9213 = vmatprep.mubr.msk.bf16.mxu1 %vm9617_vm2, %v12969_v7  ;;  %9198 = vmatpush3.bf16.msra.mxu1 %v9523_v61  ;;  %v7465_v61 = vld [vmem:[%s12852_s8] ss:$0 sm:$0xff] }
 0x635   : > { %9199 = vmatprep.subr.bf16.mxu1 %v12969_v7 }
 0x636   : > { %9108 = vmatpush3.bf16.msra.mxu0 %v9508_v28 }
 0x637   : > { %9109 = vmatprep.subr.bf16.mxu0 %v12969_v7 }
 0x638   : > { %9200 = vmatpush3.bf16.msra.mxu1 %v9525_v34 }
 0x639   : > { %9201 = vmatprep.subr.bf16.mxu1 %v12969_v7 }
 0x63a   : > { %9110 = vmatpush3.bf16.msra.mxu0 %v9509_v0 }
 0x63b   : > { %9111 = vmatprep.subr.bf16.mxu0 %v12969_v7 }
 0x63c   : > { %9202 = vmatpush3.bf16.msra.mxu1 %v9527_v16 }
 0x63d   : > { %9203 = vmatprep.subr.bf16.mxu1 %v12969_v7 }
 0x63e   : > { %9112 = vmatpush3.bf16.msra.mxu0 %v9510_v37 }
 0x63f   : > { %9117 = vmatprep.subr.bf16.mxu0 %v12969_v7 }
 0x640   : > { %9204 = vmatpush3.bf16.msra.mxu1 %v9529_v22 }
 0x641   : > { %9114 = vmatmul.mubr.msk.bf16.vlgmr.msra.gmra.mrb[200].mxu0 %vm982_vm4, %v5408_v24  ;;  %9205 = vmatprep.subr.bf16.mxu1 %v12969_v7 }
 0x642   : > { %9118 = vmatpush3.bf16.msra.mxu0 %v9511_v17  ;;  %9125 = vmatprep.mubr.msk.bf16.mxu0 %vm9617_vm2, %v12969_v7 }
 0x643   : > { %9119 = vmatprep.subr.bf16.mxu0 %v12969_v7 }
 0x644   : > { %9206 = vmatpush3.bf16.msra.mxu1 %v9531_v52 }
 0x645   : > { %9207 = vmatprep.subr.bf16.mxu1 %v12969_v7 }
 0x646   : > { %9120 = vmatpush3.bf16.msra.mxu0 %v9512_v21 }
 0x647   : > { %9121 = vmatprep.subr.bf16.mxu0 %v12969_v7 }
 0x648   : > { %9208 = vmatpush3.bf16.msra.mxu1 %v9533_v2  ;;  %v9539_v2 = vld [vmem:[%s12853_s9 + $0xc0] sm:$0xff]  }
 0x649   : > { %9209 = vmatprep.subr.bf16.mxu1 %v12969_v7 }
 0x64a   : > { %9122 = vmatpush3.bf16.msra.mxu0 %v9513_v5 }
 0x64b   : > { %9123 = vmatprep.subr.bf16.mxu0 %v12969_v7 }
 0x64c   : > { %9210 = vmatpush3.bf16.msra.mxu1 %v9535_v3 }
 0x64d   : > { %9211 = vmatprep.subr.bf16.mxu1 %v12969_v7 }
 0x64e   : > { %9124 = vmatpush3.bf16.msra.mxu0 %v9514_v10 }
 0x64f   : > { %9129 = vmatprep.subr.bf16.mxu0 %v12969_v7 }
 0x650   : > { %9212 = vmatpush3.bf16.msra.mxu1 %v9537_v54  ;;  %v9540_v54 = vld [vmem:[%s12853_s9 + $0x80] sm:$0xff]  }
 0x651   : > { %9126 = vmatmul.mubr.msk.bf16.vlgmr.msra.gmra.mrb[204].mxu0 %vm982_vm4, %v12352_v30  ;;  %9237 = vmatprep.subr.bf16.mxu1 %v12969_v7 }
 0x652   : > { %9130 = vmatpush3.bf16.msra.mxu0 %v9515_v49  ;;  %9137 = vmatprep.mubr.msk.bf16.mxu0 %vm9617_vm2, %v12969_v7 }
 0x653   : > { %9131 = vmatprep.subr.bf16.mxu0 %v12969_v7 }
 0x656   : > { %9132 = vmatpush3.bf16.msra.mxu0 %v9516_v60 }
 0x657   : > { %9133 = vmatprep.subr.bf16.mxu0 %v12969_v7 }
 0x65a   : > { %9134 = vmatpush3.bf16.msra.mxu0 %v9517_v19 }
 0x65b   : > { %9135 = vmatprep.subr.bf16.mxu0 %v12969_v7 }
 0x65e   : > { %9136 = vmatpush3.bf16.msra.mxu0 %v9518_v43 }
 0x65f   : > { %9153 = vmatprep.subr.bf16.mxu0 %v12969_v7 }
 0x661   : > { %9138 = vmatmul.mubr.msk.bf16.vlgmr.msra.gmra.mrb[208].mxu0 %vm982_vm4, %v5576_v48 }
 0x662   : > { %9154 = vmatpush3.bf16.msra.mxu0 %v9519_v57  ;;  %9161 = vmatprep.mubr.msk.bf16.mxu0 %vm9617_vm2, %v12969_v7 }
 0x663   : > { %9155 = vmatprep.subr.bf16.mxu0 %v12969_v7 }
 0x666   : > { %9156 = vmatpush3.bf16.msra.mxu0 %v9520_v58 }
 0x667   : > { %9157 = vmatprep.subr.bf16.mxu0 %v12969_v7 }
 0x66a   : > { %9158 = vmatpush3.bf16.msra.mxu0 %v9521_v12 }
 0x66b   : > { %9159 = vmatprep.subr.bf16.mxu0 %v12969_v7 }
 0x66e   : > { %9160 = vmatpush3.bf16.msra.mxu0 %v9522_v23 }
 0x66f   : > { %9177 = vmatprep.subr.bf16.mxu0 %v12969_v7 }
 0x671   : > { %9162 = vmatmul.mubr.msk.bf16.vlgmr.msra.gmra.mrb[212].mxu0 %vm982_vm4, %v12369_v8 }
 0x672   : > { %9193 = vmatprep.mubr.msk.bf16.mxu0 %vm9617_vm2, %v12969_v7  ;;  %9178 = vmatpush3.bf16.msra.mxu0 %v9524_v13 }
 0x673   : > { %9179 = vmatprep.subr.bf16.mxu0 %v12969_v7 }
 0x676   : > { %9180 = vmatpush3.bf16.msra.mxu0 %v9526_v20 }
 0x677   : > { %9181 = vmatprep.subr.bf16.mxu0 %v12969_v7 }
 0x67a   : > { %9182 = vmatpush3.bf16.msra.mxu0 %v9528_v18 }
 0x67b   : > { %9183 = vmatprep.subr.bf16.mxu0 %v12969_v7 }
 0x67e   : > { %9184 = vmatpush3.bf16.msra.mxu0 %v9530_v15 }
 0x67f   : > { %9185 = vmatprep.subr.bf16.mxu0 %v12969_v7 }
 0x682   : > { %9186 = vmatpush3.bf16.msra.mxu0 %v9532_v51 }
 0x683   : > { %9187 = vmatprep.subr.bf16.mxu0 %v12969_v7 }
 0x686   : > { %9188 = vmatpush3.bf16.msra.mxu0 %v9534_v40 }
 0x687   : > { %9189 = vmatprep.subr.bf16.mxu0 %v12969_v7 }
 0x68a   : > { %9190 = vmatpush3.bf16.msra.mxu0 %v9536_v26 }
 0x68b   : > { %9191 = vmatprep.subr.bf16.mxu0 %v12969_v7 }
 0x68e   : > { %9192 = vmatpush3.bf16.msra.mxu0 %v9538_v44 }
 0x68f   : > { %9217 = vmatprep.subr.bf16.mxu0 %v12969_v7 }
 0x6e4   : > { %v5231_v14 = vpop.f32.mrb[188].mxu0 }
 0x6e5   : > { %v9079_v36 = vpop.f32.mrb[189].mxu0 }
 0x6e6   : > { %v5234_v62 = vpop.f32.mrb[190].mxu0  ;;  %v9542_v36 = vld [vmem:[%s12853_s9 + $0x88] sm:$0xff]  }
 0x6e7   : > { %v9080_v4 = vpop.f32.mrb[191].mxu0 }
 0x6e8   : > { %v9544_v4 = vld [vmem:[%s12853_s9 + $0x90] sm:$0xff]  }
 0x6f4   : > { %v5298_v39 = vpop.f32.mrb[192].mxu0 }
 0x6f5   : > { %v5299_v45 = vadd.f32 %v5298_v39, %v5231_v14  ;;  %v9091_v41 = vpop.f32.mrb[193].mxu0  ;;  %v5720_v27 = vpop.f32.mrb[224].mxu1  ;;  %v9541_v14 = vld [vmem:[%s12853_s9 + $0xc8] sm:$0xff]   ;;  %v9545_v39 = vld [vmem:[%s12853_s9 + $0xd8] sm:$0xff]  }
 0x6f6   : > { %v5301_v1 = vpop.f32.mrb[194].mxu0  ;;  %v9151_v46 = vpop.f32.mrb[225].mxu1  ;;  %v9547_v41 = vld [vmem:[%s12853_s9 + $0xe0] sm:$0xff]  }
 0x6f7   : > { %v5302_v31 = vadd.f32 %v5301_v1, %v5234_v62  ;;  %v9092_v47 = vpop.f32.mrb[195].mxu0  ;;  %v5723_v6 = vpop.f32.mrb[226].mxu1  ;;  %v9543_v62 = vld [vmem:[%s12853_s9 + $0xd0] sm:$0xff]   ;;  %v9549_v1 = vld [vmem:[%s12853_s9 + $0xe8] sm:$0xff]  }
 0x6f8   : > { %v9152_v38 = vpop.f32.mrb[227].mxu1  ;;  %v9550_v46 = vld [vmem:[%s12853_s9 + $0xa8] sm:$0xff]   ;;  %v9552_v47 = vld [vmem:[%s12853_s9 + $0xb0] sm:$0xff]  }
 0x6f9   : > { %v9554_v38 = vld [vmem:[%s12853_s9 + $0xb8] sm:$0xff]  }
 0x704   : > { %v5379_v53 = vpop.f32.mrb[196].mxu0 }
 0x705   : > { %v5386_v30 = vadd.f32 %v5379_v53, %v5299_v45  ;;  %v5888_v59 = vpop.f32.mrb[228].mxu1  ;;  %v9103_v25 = vpop.f32.mrb[197].mxu0  ;;  %v9546_v45 = vld [vmem:[%s12853_s9 + $0x98] sm:$0xff]   ;;  %v9555_v53 = vld [vmem:[%s12853_s9 + $0x140] sm:$0xff]  }
 0x706   : > { %v9175_v11 = vpop.f32.mrb[229].mxu1  ;;  %v5382_v35 = vpop.f32.mrb[198].mxu0 }
 0x707   : > { %v5387_v32 = vadd.f32 %v5382_v35, %v5302_v31  ;;  %v5891_v29 = vpop.f32.mrb[230].mxu1  ;;  %v9104_v9 = vpop.f32.mrb[199].mxu0  ;;  %v9551_v31 = vld [vmem:[%s12853_s9 + $0xf0] sm:$0xff]   ;;  %v9557_v11 = vld [vmem:[%s12853_s9 + $0x148] sm:$0xff]  }
 0x708   : > { %v9176_v50 = vpop.f32.mrb[231].mxu1  ;;  %v9558_v35 = vld [vmem:[%s12853_s9 + $0x108] sm:$0xff]   ;;  %v9561_v9 = vld [vmem:[%s12853_s9 + $0x158] sm:$0xff]  }
 0x709   : > { %v9562_v50 = vld [vmem:[%s12853_s9 + $0x118] sm:$0xff]  }
 0x714   : > { %v5470_v55 = vpop.f32.mrb[200].mxu0 }
 0x715   : > { %v5477_v24 = vadd.f32 %v5470_v55, %v5386_v30  ;;  %v9115_v48 = vpop.f32.mrb[201].mxu0  ;;  %v9563_v55 = vld [vmem:[%s12853_s9 + $0x160] sm:$0xff]  }
 0x716   : > { %v5473_v63 = vpop.f32.mrb[202].mxu0  ;;  %v9565_v48 = vld [vmem:[%s12853_s9 + $0x168] sm:$0xff]  }
 0x717   : > { %v5478_v8 = vadd.f32 %v5473_v63, %v5387_v32  ;;  %v9116_v33 = vpop.f32.mrb[203].mxu0  ;;  %v9559_v32 = vld [vmem:[%s12853_s9 + $0x150] sm:$0xff]   ;;  %v9566_v63 = vld [vmem:[%s12853_s9 + $0x128] sm:$0xff]  }
 0x718   : > { %v9568_v33 = vld [vmem:[%s12853_s9 + $0x130] sm:$0xff]  }
 0x724   : > { %v5552_v42 = vpop.f32.mrb[204].mxu0 }
 0x725   : > { %v5559_v56 = vadd.f32 %v5552_v42, %v5477_v24  ;;  %v9127_v28 = vpop.f32.mrb[205].mxu0  ;;  %v9564_v24 = vld [vmem:[%s12853_s9 + $0x120] sm:$0xff]   ;;  %v9569_v42 = vld [vmem:[%s12853_s9 + $0x178] sm:$0xff]  }
 0x726   : > { %v5555_v0 = vpop.f32.mrb[206].mxu0  ;;  %v9571_v28 = vld [vmem:[%s12853_s9 + $0x1c0] sm:$0xff]  }
 0x727   : > { %v5560_v37 = vadd.f32 %v5555_v0, %v5478_v8  ;;  %v9128_v17 = vpop.f32.mrb[207].mxu0  ;;  %v9567_v8 = vld [vmem:[%s12853_s9 + $0x170] sm:$0xff]  }
 0x734   : > { %v5638_v21 = vpop.f32.mrb[208].mxu0 }
 0x735   : > { %v5645_v5 = vadd.f32 %v5638_v21, %v5559_v56  ;;  %v9139_v10 = vpop.f32.mrb[209].mxu0  ;;  %v9570_v56 = vld [vmem:[%s12853_s9 + $0x138] sm:$0xff]   ;;  %v9573_v21 = vld [vmem:[%s12853_s9 + $0x1c8] sm:$0xff]  }
 0x736   : > { %v5641_v49 = vpop.f32.mrb[210].mxu0  ;;  %v9575_v10 = vld [vmem:[%s12853_s9 + $0x1d0] sm:$0xff]  }
 0x737   : > { %v5646_v60 = vadd.f32 %v5641_v49, %v5560_v37  ;;  %v9140_v19 = vpop.f32.mrb[211].mxu0  ;;  %v5727_v43 = vadd.f32 %v5720_v27, %v5645_v5  ;;  %v9548_v27 = vld [vmem:[%s12853_s9 + $0xa0] sm:$0xff]   ;;  %v9574_v5 = vld [vmem:[%s12853_s9 + $0x188] sm:$0xff]   ;;  %v9576_v49 = vld [vmem:[%s12853_s9 + $0x190] sm:$0xff]  }
 0x738   : > { %v9572_v37 = vld [vmem:[%s12853_s9 + $0x180] sm:$0xff]   ;;  %v9578_v19 = vld [vmem:[%s12853_s9 + $0x198] sm:$0xff]  }
 0x739   : > { %v5728_v57 = vadd.f32 %v5723_v6, %v5646_v60  ;;  %v9553_v6 = vld [vmem:[%s12853_s9 + $0xf8] sm:$0xff]  }
 0x73a   : > { %v9577_v60 = vld [vmem:[%s12853_s9 + $0x1d8] sm:$0xff]  }
 0x744   : > { %v5806_v58 = vpop.f32.mrb[212].mxu0 }
 0x745   : > { %v5813_v12 = vadd.f32 %v5806_v58, %v5727_v43  ;;  %v9163_v23 = vpop.f32.mrb[213].mxu0  ;;  %v9579_v43 = vld [vmem:[%s12853_s9 + $0x1e0] sm:$0xff]   ;;  %v9581_v58 = vld [vmem:[%s12853_s9 + $0x1e8] sm:$0xff]  }
 0x746   : > { %v5809_v13 = vpop.f32.mrb[214].mxu0  ;;  %v9583_v23 = vld [vmem:[%s12853_s9 + $0x1f0] sm:$0xff]  }
 0x747   : > { %v5895_v34 = vadd.f32 %v5888_v59, %v5813_v12  ;;  %v5814_v20 = vadd.f32 %v5809_v13, %v5728_v57  ;;  %v9164_v16 = vpop.f32.mrb[215].mxu0  ;;  %v9556_v59 = vld [vmem:[%s12853_s9 + $0x100] sm:$0xff]   ;;  %v9582_v12 = vld [vmem:[%s12853_s9 + $0x1a8] sm:$0xff]   ;;  %v9585_v13 = vld [vmem:[%s12853_s9 + $0x1f8] sm:$0xff]  }
 0x748   : > { %v9580_v57 = vld [vmem:[%s12853_s9 + $0x1a0] sm:$0xff]  }
 0x749   : > { %v5904_v18 = vadd.f32 %v7465_v61, %v5895_v34  ;;  %v5896_v22 = vadd.f32 %v5891_v29, %v5814_v20  ;;  %v9560_v29 = vld [vmem:[%s12853_s9 + $0x110] sm:$0xff]   ;;  %v9586_v34 = vld [vmem:[%s12853_s9 + $0x1b8] sm:$0xff]   ;;  %v9587_v16 = vld [vmem:[%s12853_s9 + $0x200] sm:$0xff]  }
 0x74b   : > { %v5905_v15 = vadd.f32 %v7465_v61, %v5896_v22  ;;  %v5906_v52 = vmax.f32 %v5904_v18, 0.0  ;;  %v9584_v61 = vld [vmem:[%s12853_s9 + $0x1b0] sm:$0xff]   ;;  %v9588_v22 = vld [vmem:[%s12853_s9 + $0x208] sm:$0xff]  }
 0x74d   : > { %v5907_v51 = vmax.f32 %v5905_v15, 0.0  ;;  %v9589_v15 = vld [vmem:[%s12853_s9 + $0x210] sm:$0xff]  }
 0x74f   : > { %v5908_v40 = vsel %vm1365_vm5, %v5907_v51, 0.0  ;;  %v7483_v3 = vpack.c.bf16 %v5907_v51, %v5906_v52  ;;  %v9591_v51 = vld [vmem:[%s12853_s9 + $0x220] sm:$0xff]  }
 0x750   : > { %v12538_v26 = vpack.c.bf16 %v5908_v40, %v5906_v52  ;;  %v9590_v52 = vld [vmem:[%s12853_s9 + $0x218] sm:$0xff]   ;;  %v9593_v40 = vld [vmem:[%s12853_s9 + $0x230] sm:$0xff]  }
 0x751   : > { %9214 = vmatmul.mubr.msk.bf16.vlgmr.msra.gmra.mrb[232].mxu1 %vm7482_vm0, %v7483_v3  ;;  %v9594_v3 = vld [vmem:[%s12853_s9 + $0x238] sm:$0xff]  }
 0x752   : > { %v12544_v44 = vshrl.u32 %v12538_v26, 16  ;;  %9238 = vmatpush3.bf16.msra.mxu1 %v9539_v2  ;;  %9253 = vmatprep.mubr.msk.bf16.mxu1 %vm9617_vm2, %v12969_v7  ;;  %v6139_v25 = vrot.slane %v12538_v26, 1  ;;  %v6353_v17 = vrot.slane %v12538_v26, 3  ;;  %v6567_v18 = vrot.slane %v12538_v26, 5  ;;  %v9592_v2 = vld [vmem:[%s12853_s9 + $0x228] sm:$0xff]  }
 0x753   : > { %9239 = vmatprep.subr.bf16.mxu1 %v12969_v7 }
 0x754   : > { %9194 = vmatmul.mubr.bf16.vlgmr.msra.gmra.mrb[216].mxu0 %v12544_v44  ;;  %v6246_v30 = vrot.slane %v12544_v44, 2  ;;  %v6460_v0 = vrot.slane %v12544_v44, 3  ;;  %v6674_v20 = vrot.slane %v12544_v44, 5  ;;  %v9595_v44 = vld [vmem:[%s12855_s11] sm:$0xff]  }
 0x755   : > { %9218 = vmatpush3.bf16.msra.mxu0 %v9540_v54  ;;  %9233 = vmatprep.mubr.msk.bf16.mxu0 %vm9617_vm2, %v12969_v7  ;;  %v6781_v54 = vrot.slane %v12538_v26, 6  ;;  %v9597_v26 = vld [vmem:[%s12855_s11 + $0x10] sm:$0xff]  }
 0x756   : > { %9240 = vmatpush3.bf16.msra.mxu1 %v9541_v14  ;;  %9219 = vmatprep.subr.bf16.mxu0 %v12969_v7  ;;  %v9596_v14 = vld [vmem:[%s12855_s11 + $0x8] sm:$0xff]  }
 0x757   : > { %9241 = vmatprep.subr.bf16.mxu1 %v12969_v7 }
 0x759   : > { %9220 = vmatpush3.bf16.msra.mxu0 %v9542_v36  ;;  %v9598_v36 = vld [vmem:[%s12855_s11 + $0x18] sm:$0xff]  }
 0x75a   : > { %9242 = vmatpush3.bf16.msra.mxu1 %v9543_v62  ;;  %9221 = vmatprep.subr.bf16.mxu0 %v12969_v7  ;;  %v9599_v62 = vld [vmem:[%s12855_s11 + $0x20] sm:$0xff]  }
 0x75b   : > { %9243 = vmatprep.subr.bf16.mxu1 %v12969_v7 }
 0x75d   : > { %9222 = vmatpush3.bf16.msra.mxu0 %v9544_v4  ;;  %v9600_v4 = vld [vmem:[%s12855_s11 + $0x28] sm:$0xff]  }
 0x75e   : > { %9244 = vmatpush3.bf16.msra.mxu1 %v9545_v39  ;;  %9223 = vmatprep.subr.bf16.mxu0 %v12969_v7 }
 0x75f   : > { %9245 = vmatprep.subr.bf16.mxu1 %v12969_v7 }
 0x761   : > { %9224 = vmatpush3.bf16.msra.mxu0 %v9546_v45 }
 0x762   : > { %9246 = vmatpush3.bf16.msra.mxu1 %v9547_v41  ;;  %9225 = vmatprep.subr.bf16.mxu0 %v12969_v7 }
 0x763   : > { %9247 = vmatprep.subr.bf16.mxu1 %v12969_v7 }
 0x765   : > { %9226 = vmatpush3.bf16.msra.mxu0 %v9548_v27 }
 0x766   : > { %9248 = vmatpush3.bf16.msra.mxu1 %v9549_v1  ;;  %9227 = vmatprep.subr.bf16.mxu0 %v12969_v7 }
 0x767   : > { %9249 = vmatprep.subr.bf16.mxu1 %v12969_v7 }
 0x769   : > { %9228 = vmatpush3.bf16.msra.mxu0 %v9550_v46 }
 0x76a   : > { %9250 = vmatpush3.bf16.msra.mxu1 %v9551_v31  ;;  %9229 = vmatprep.subr.bf16.mxu0 %v12969_v7 }
 0x76b   : > { %9251 = vmatprep.subr.bf16.mxu1 %v12969_v7 }
 0x76d   : > { %9230 = vmatpush3.bf16.msra.mxu0 %v9552_v47  ;;  %v9601_v47 = vld [vmem:[%s12855_s11 + $0x30] sm:$0xff]  }
 0x76e   : > { %9252 = vmatpush3.bf16.msra.mxu1 %v9553_v6  ;;  %9231 = vmatprep.subr.bf16.mxu0 %v12969_v7 }
 0x76f   : > { %9277 = vmatprep.subr.bf16.mxu1 %v12969_v7 }
 0x771   : > { %9232 = vmatpush3.bf16.msra.mxu0 %v9554_v38  ;;  %9254 = vmatmul.mubr.bf16.vlgmr.msra.gmra.mrb[236].mxu1 %v6246_v30  ;;  %v9603_v30 = vld [vmem:[%s12857_s13] sm:$0xff]  }
 0x772   : > { %9278 = vmatpush3.bf16.msra.mxu1 %v9555_v53  ;;  %9257 = vmatprep.subr.bf16.mxu0 %v12969_v7  ;;  %v9602_v53 = vld [vmem:[%s12855_s11 + $0x38] sm:$0xff]  }
 0x773   : > { %9279 = vmatprep.subr.bf16.mxu1 %v12969_v7  ;;  %9293 = vmatprep.mubr.msk.bf16.mxu1 %vm9617_vm2, %v12969_v7 }
 0x774   : > { %9234 = vmatmul.mubr.bf16.vlgmr.msra.gmra.mrb[220].mxu0 %v6139_v25 }
 0x775   : > { %9258 = vmatpush3.bf16.msra.mxu0 %v9556_v59  ;;  %9273 = vmatprep.mubr.msk.bf16.mxu0 %vm9617_vm2, %v12969_v7 }
 0x776   : > { %9280 = vmatpush3.bf16.msra.mxu1 %v9557_v11  ;;  %9259 = vmatprep.subr.bf16.mxu0 %v12969_v7 }
 0x777   : > { %9281 = vmatprep.subr.bf16.mxu1 %v12969_v7 }
 0x779   : > { %9260 = vmatpush3.bf16.msra.mxu0 %v9558_v35 }
 0x77a   : > { %9282 = vmatpush3.bf16.msra.mxu1 %v9559_v32  ;;  %9261 = vmatprep.subr.bf16.mxu0 %v12969_v7 }
 0x77b   : > { %9283 = vmatprep.subr.bf16.mxu1 %v12969_v7 }
 0x77d   : > { %9262 = vmatpush3.bf16.msra.mxu0 %v9560_v29 }
 0x77e   : > { %9284 = vmatpush3.bf16.msra.mxu1 %v9561_v9  ;;  %9263 = vmatprep.subr.bf16.mxu0 %v12969_v7 }
 0x77f   : > { %9285 = vmatprep.subr.bf16.mxu1 %v12969_v7 }
 0x781   : > { %9264 = vmatpush3.bf16.msra.mxu0 %v9562_v50 }
 0x782   : > { %9286 = vmatpush3.bf16.msra.mxu1 %v9563_v55  ;;  %9265 = vmatprep.subr.bf16.mxu0 %v12969_v7 }
 0x783   : > { %9287 = vmatprep.subr.bf16.mxu1 %v12969_v7 }
 0x785   : > { %9266 = vmatpush3.bf16.msra.mxu0 %v9564_v24 }
 0x786   : > { %9288 = vmatpush3.bf16.msra.mxu1 %v9565_v48  ;;  %9267 = vmatprep.subr.bf16.mxu0 %v12969_v7 }
 0x787   : > { %9289 = vmatprep.subr.bf16.mxu1 %v12969_v7 }
 0x789   : > { %9268 = vmatpush3.bf16.msra.mxu0 %v9566_v63 }
 0x78a   : > { %9290 = vmatpush3.bf16.msra.mxu1 %v9567_v8  ;;  %9269 = vmatprep.subr.bf16.mxu0 %v12969_v7 }
 0x78b   : > { %9291 = vmatprep.subr.bf16.mxu1 %v12969_v7 }
 0x78d   : > { %9270 = vmatpush3.bf16.msra.mxu0 %v9568_v33 }
 0x78e   : > { %9292 = vmatpush3.bf16.msra.mxu1 %v9569_v42  ;;  %9271 = vmatprep.subr.bf16.mxu0 %v12969_v7 }
 0x78f   : > { %9317 = vmatprep.subr.bf16.mxu1 %v12969_v7 }
 0x791   : > { %9272 = vmatpush3.bf16.msra.mxu0 %v9570_v56  ;;  %9294 = vmatmul.mubr.bf16.vlgmr.msra.gmra.mrb[240].mxu1 %v6460_v0 }
 0x792   : > { %9318 = vmatpush3.bf16.msra.mxu1 %v9571_v28  ;;  %9297 = vmatprep.subr.bf16.mxu0 %v12969_v7 }
 0x793   : > { %9319 = vmatprep.subr.bf16.mxu1 %v12969_v7  ;;  %9333 = vmatprep.mubr.msk.bf16.mxu1 %vm9617_vm2, %v12969_v7 }
 0x794   : > { %9274 = vmatmul.mubr.bf16.vlgmr.msra.gmra.mrb[224].mxu0 %v6353_v17 }
 0x795   : > { %9298 = vmatpush3.bf16.msra.mxu0 %v9572_v37  ;;  %9313 = vmatprep.mubr.msk.bf16.mxu0 %vm9617_vm2, %v12969_v7 }
 0x796   : > { %9320 = vmatpush3.bf16.msra.mxu1 %v9573_v21  ;;  %9299 = vmatprep.subr.bf16.mxu0 %v12969_v7 }
 0x797   : > { %9321 = vmatprep.subr.bf16.mxu1 %v12969_v7 }
 0x799   : > { %9300 = vmatpush3.bf16.msra.mxu0 %v9574_v5 }
 0x79a   : > { %9322 = vmatpush3.bf16.msra.mxu1 %v9575_v10  ;;  %9301 = vmatprep.subr.bf16.mxu0 %v12969_v7 }
 0x79b   : > { %9323 = vmatprep.subr.bf16.mxu1 %v12969_v7 }
 0x79d   : > { %9302 = vmatpush3.bf16.msra.mxu0 %v9576_v49 }
 0x79e   : > { %9324 = vmatpush3.bf16.msra.mxu1 %v9577_v60  ;;  %9303 = vmatprep.subr.bf16.mxu0 %v12969_v7 }
 0x79f   : > { %9325 = vmatprep.subr.bf16.mxu1 %v12969_v7 }
 0x7a1   : > { %9304 = vmatpush3.bf16.msra.mxu0 %v9578_v19 }
 0x7a2   : > { %9326 = vmatpush3.bf16.msra.mxu1 %v9579_v43  ;;  %9305 = vmatprep.subr.bf16.mxu0 %v12969_v7 }
 0x7a3   : > { %9327 = vmatprep.subr.bf16.mxu1 %v12969_v7 }
 0x7a5   : > { %9306 = vmatpush3.bf16.msra.mxu0 %v9580_v57 }
 0x7a6   : > { %9328 = vmatpush3.bf16.msra.mxu1 %v9581_v58  ;;  %9307 = vmatprep.subr.bf16.mxu0 %v12969_v7 }
 0x7a7   : > { %9329 = vmatprep.subr.bf16.mxu1 %v12969_v7 }
 0x7a9   : > { %9308 = vmatpush3.bf16.msra.mxu0 %v9582_v12 }
 0x7aa   : > { %9330 = vmatpush3.bf16.msra.mxu1 %v9583_v23  ;;  %9309 = vmatprep.subr.bf16.mxu0 %v12969_v7  ;;  %v6872_v23 = vld [vmem:[%s12854_s10] sm:$0x1] }
 0x7ab   : > { %9331 = vmatprep.subr.bf16.mxu1 %v12969_v7 }
 0x7ad   : > { %9310 = vmatpush3.bf16.msra.mxu0 %v9584_v61 }
 0x7ae   : > { %9332 = vmatpush3.bf16.msra.mxu1 %v9585_v13  ;;  %9311 = vmatprep.subr.bf16.mxu0 %v12969_v7 }
 0x7af   : > { %9357 = vmatprep.subr.bf16.mxu1 %v12969_v7 }
 0x7b1   : > { %9312 = vmatpush3.bf16.msra.mxu0 %v9586_v34  ;;  %9334 = vmatmul.mubr.bf16.vlgmr.msra.gmra.mrb[244].mxu1 %v6674_v20 }
 0x7b2   : > { %9337 = vmatprep.subr.bf16.mxu0 %v12969_v7  ;;  %9373 = vmatprep.mubr.msk.bf16.mxu1 %vm9617_vm2, %v12969_v7 }
 0x7b3   : > { %9358 = vmatpush3.bf16.msra.mxu1 %v9595_v44 }
 0x7b4   : > { %9314 = vmatmul.mubr.bf16.vlgmr.msra.gmra.mrb[228].mxu0 %v6567_v18  ;;  %9359 = vmatprep.subr.bf16.mxu1 %v12969_v7 }
 0x7b5   : > { %9338 = vmatpush3.bf16.msra.mxu0 %v9587_v16  ;;  %9353 = vmatprep.mubr.msk.bf16.mxu0 %vm9617_vm2, %v12969_v7 }
 0x7b6   : > { %9339 = vmatprep.subr.bf16.mxu0 %v12969_v7 }
 0x7b7   : > { %9360 = vmatpush3.bf16.msra.mxu1 %v9596_v14  ;;  %v6986_v14 = vld [vmem:[%s12858_s14] sm:$0x1] }
 0x7b8   : > { %9361 = vmatprep.subr.bf16.mxu1 %v12969_v7 }
 0x7b9   : > { %9340 = vmatpush3.bf16.msra.mxu0 %v9588_v22 }
 0x7ba   : > { %9341 = vmatprep.subr.bf16.mxu0 %v12969_v7 }
 0x7bb   : > { %9362 = vmatpush3.bf16.msra.mxu1 %v9597_v26 }
 0x7bc   : > { %9363 = vmatprep.subr.bf16.mxu1 %v12969_v7 }
 0x7bd   : > { %9342 = vmatpush3.bf16.msra.mxu0 %v9589_v15  ;;  %v9604_v15 = vld [vmem:[%s12857_s13 + $0x8] sm:$0xff]  }
 0x7be   : > { %9343 = vmatprep.subr.bf16.mxu0 %v12969_v7 }
 0x7bf   : > { %9364 = vmatpush3.bf16.msra.mxu1 %v9598_v36 }
 0x7c0   : > { %9365 = vmatprep.subr.bf16.mxu1 %v12969_v7 }
 0x7c1   : > { %9344 = vmatpush3.bf16.msra.mxu0 %v9590_v52  ;;  %v6892_v52 = vld [vmem:[%s12856_s12] sm:$0x1] }
 0x7c2   : > { %9345 = vmatprep.subr.bf16.mxu0 %v12969_v7 }
 0x7c3   : > { %9366 = vmatpush3.bf16.msra.mxu1 %v9599_v62 }
 0x7c4   : > { %9367 = vmatprep.subr.bf16.mxu1 %v12969_v7 }
 0x7c5   : > { %9346 = vmatpush3.bf16.msra.mxu0 %v9591_v51 }
 0x7c6   : > { %9347 = vmatprep.subr.bf16.mxu0 %v12969_v7 }
 0x7c7   : > { %9368 = vmatpush3.bf16.msra.mxu1 %v9600_v4 }
 0x7c8   : > { %9369 = vmatprep.subr.bf16.mxu1 %v12969_v7 }
 0x7c9   : > { %9348 = vmatpush3.bf16.msra.mxu0 %v9592_v2 }
 0x7ca   : > { %9349 = vmatprep.subr.bf16.mxu0 %v12969_v7 }
 0x7cb   : > { %9370 = vmatpush3.bf16.msra.mxu1 %v9601_v47 }
 0x7cc   : > { %9371 = vmatprep.subr.bf16.mxu1 %v12969_v7 }
 0x7cd   : > { %9350 = vmatpush3.bf16.msra.mxu0 %v9593_v40 }
 0x7ce   : > { %9351 = vmatprep.subr.bf16.mxu0 %v12969_v7 }
 0x7cf   : > { %9372 = vmatpush3.bf16.msra.mxu1 %v9602_v53 }
 0x7d1   : > { %9352 = vmatpush3.bf16.msra.mxu0 %v9594_v3 }
 0x7d2   : > { %9377 = vmatprep.subr.bf16.mxu0 %v12969_v7 }
 0x7d4   : > { %9354 = vmatmul.mubr.bf16.vlgmr.msra.gmra.mrb[232].mxu0 %v6781_v54 }
 0x7d5   : > { %9381 = vmatprep.mubr.msk.bf16.mxu0 %vm9617_vm2, %v12969_v7  ;;  %9378 = vmatpush3.bf16.msra.mxu0 %v9603_v30 }
 0x7d6   : > { %9379 = vmatprep.subr.bf16.mxu0 %v12969_v7 }
 0x7d9   : > { %9380 = vmatpush3.bf16.msra.mxu0 %v9604_v15 }
 0x824   : > { %v6116_v39 = vpop.f32.mrb[232].mxu1 }
 0x825   : > { %v9215_v45 = vpop.f32.mrb[233].mxu1 }
 0x826   : > { %v6119_v41 = vpop.f32.mrb[234].mxu1 }
 0x827   : > { %v6028_v27 = vpop.f32.mrb[216].mxu0  ;;  %v9216_v1 = vpop.f32.mrb[235].mxu1 }
 0x828   : > { %v6117_v46 = vadd.f32 %v6116_v39, %v6028_v27  ;;  %v9195_v31 = vpop.f32.mrb[217].mxu0 }
 0x829   : > { %v6031_v6 = vpop.f32.mrb[218].mxu0 }
 0x82a   : > { %v9196_v38 = vpop.f32.mrb[219].mxu0 }
 0x844   : > { %v6330_v59 = vpop.f32.mrb[236].mxu1 }
 0x845   : > { %v9255_v25 = vpop.f32.mrb[237].mxu1 }
 0x846   : > { %v6333_v11 = vpop.f32.mrb[238].mxu1 }
 0x847   : > { %v6223_v35 = vpop.f32.mrb[220].mxu0  ;;  %v9256_v32 = vpop.f32.mrb[239].mxu1 }
 0x848   : > { %v6229_v29 = vadd.f32 %v6223_v35, %v6117_v46  ;;  %v9235_v9 = vpop.f32.mrb[221].mxu0 }
 0x849   : > { %v6226_v50 = vpop.f32.mrb[222].mxu0 }
 0x84a   : > { %v9236_v55 = vpop.f32.mrb[223].mxu0  ;;  %v6336_v24 = vadd.f32 %v6330_v59, %v6229_v29 }
 0x864   : > { %v6544_v48 = vpop.f32.mrb[240].mxu1 }
 0x865   : > { %v9295_v63 = vpop.f32.mrb[241].mxu1 }
 0x866   : > { %v6547_v8 = vpop.f32.mrb[242].mxu1 }
 0x867   : > { %v6437_v33 = vpop.f32.mrb[224].mxu0  ;;  %v9296_v42 = vpop.f32.mrb[243].mxu1 }
 0x868   : > { %v6443_v56 = vadd.f32 %v6437_v33, %v6336_v24  ;;  %v9275_v28 = vpop.f32.mrb[225].mxu0 }
 0x869   : > { %v6440_v0 = vpop.f32.mrb[226].mxu0 }
 0x86a   : > { %v9276_v37 = vpop.f32.mrb[227].mxu0  ;;  %v6550_v7 = vadd.f32 %v6544_v48, %v6443_v56 }
 0x884   : > { %v6758_v17 = vpop.f32.mrb[244].mxu1 }
 0x885   : > { %v9335_v21 = vpop.f32.mrb[245].mxu1 }
 0x886   : > { %v6761_v5 = vpop.f32.mrb[246].mxu1 }
 0x887   : > { %v6651_v10 = vpop.f32.mrb[228].mxu0  ;;  %v9336_v49 = vpop.f32.mrb[247].mxu1 }
 0x888   : > { %v6657_v60 = vadd.f32 %v6651_v10, %v6550_v7  ;;  %v9315_v19 = vpop.f32.mrb[229].mxu0 }
 0x889   : > { %v6654_v43 = vpop.f32.mrb[230].mxu0 }
 0x88a   : > { %v9316_v57 = vpop.f32.mrb[231].mxu0  ;;  %v6764_v58 = vadd.f32 %v6758_v17, %v6657_v60 }
 0x8a7   : > { %v6865_v12 = vpop.f32.mrb[232].mxu0 }
 0x8a8   : > { %v6871_v61 = vadd.f32 %v6865_v12, %v6764_v58  ;;  %v9355_v13 = vpop.f32.mrb[233].mxu0 }
 0x8a9   : > { %v6868_v34 = vpop.f32.mrb[234].mxu0 }
 0x8aa   : > { %v6873_v20 = vadd.f32 %v6872_v23, %v6871_v61  ;;  %v9356_v16 = vpop.f32.mrb[235].mxu0 }
 0x8ac   : > { %v6874_v18 = vmax.f32 %v6873_v20, 0.0 }
 0x8ae   : > { %v6875_v22 = vpack.c.bf16 %v6874_v18, %v6874_v18 }
 0x8b0   : > { %9374 = vmatmul.mubr.bf16.vlgmr.msra.gmra.mrb[248].mxu1 %v6875_v22 }
 0x983   : > { %v6975_v51 = vpop.f32.mrb[248].mxu1 }
 0x984   : > { %v6976_v2 = vadd.f32 %v6975_v51, %v6892_v52  ;;  %v9375_v40 = vpop.f32.mrb[249].mxu1 }
 0x985   : > { %v6978_v3 = vpop.f32.mrb[250].mxu1 }
 0x986   : > { %v6981_v54 = vpack.c.bf16 %v6976_v2, %v6976_v2  ;;  %v9376_v44 = vpop.f32.mrb[251].mxu1 }
 0x988   : > { %9382 = vmatmul.mubr.msk.bf16.vlgmr.msra.gmra.mrb[236].mxu0 %vm6999_vm1, %v6981_v54 }
 0xa5b   : > { %v7037_v26 = vpop.f32.mrb[236].mxu0 }
 0xa5c   : > { %v7038_v36 = vadd.f32 %v7037_v26, %v6986_v14  ;;  %v9383_v62 = vpop.f32.mrb[237].mxu0 }
 0xa5d   : > { %v7040_v4 = vpop.f32.mrb[238].mxu0 }
 0xa5e   : > { %7043 = vst [vmem:[%s490_s25] sm:$0x1] %v7038_v36  ;;  %v9384_v39 = vpop.f32.mrb[239].mxu0 }
 0xa5f PF: > { %s25_s18 = sadd.s32 1, %s9613_s18  }
 0xa60   : > { %p22_p4 = scmp.ge.s32.totalorder %s25_s18, 10  }
 0xa62   :  { %24 = sbr.rel (!%p22_p4) target bundleno = 1 (0x1), region = 110 }

</bundles_post_ra>
